<compile_context>
chip_gen: v7x
topology: tpu7x:2x2x1
jax: 0.10.0
libtpu: 0.0.40
codegen_flags: <defaults>
</compile_context>

<pallas_src>
import functools

import jax
import jax.numpy as jnp
from jax import lax
from jax.experimental import pallas as pl
from jax.experimental.pallas import tpu as pltpu

EMBED_D = 128
C = 128          # channel width of both conv blocks / projection
K1 = 3           # conv block 1 kernel size (padding 1)
K1_TAPS = K1 * K1
K1_PAD = 16      # conv1 contraction padded 9 -> 16 (instead of 128: ~8x less HBM traffic)
K2 = 9           # conv block 2 kernel size (padding 4)
P2 = K2 // 2     # conv2 halo = 4
LPAD = 8         # left  W-halo of the conv2 input buffer, rounded up to 8 sublanes
RPAD = 8         # right W-halo, rounded up to 8 sublanes


# ----------------------------------------------------------------------------
# Fused kernel:  conv1+BN+ReLU+pool  ->  conv2+BN+ReLU+pool  ->  MLP projection
# ----------------------------------------------------------------------------
def _fused_forward_kernel(x1_ref, w1_ref, s1_ref, t1_ref,
                          w2_ref, s2_ref, t2_ref,
                          pw1_ref, pb1_ref, pw2_ref, pb2_ref,
                          o_ref, h1p_ref, *, B, H, W):
    """One block of B batch elements per grid step.

    x1_ref : (B, H*W, 16)          bf16  conv1 im2col patches (9 taps, zero-padded to 16)
    w1_ref : (16, 128)             bf16  conv1 weight, rows = (ky,kx) zero-padded
    s1/t1  : (1, 128)              f32   folded BN1 scale / shift (incl. conv bias)
    w2_ref : (81, 128, 128)        bf16  conv2 weight, tap-major [(ky,kx), cin, cout]
    s2/t2  : (1, 128)              f32   folded BN2 scale / shift
    pw1/pb1, pw2/pb2                     projection Linear weights (bf16) / biases (f32)
    o_ref  : (B, H*(W//4), 128)    f32   lane-dense flattened projection output
    h1p_ref: (B, H+8, 8+W//2+8, C) f32   zero-halo'd conv2 input (VMEM scratch)
    """
    W1 = W // 2            # width after first MaxPool1d(2)
    W2 = W1 // 2           # width after second MaxPool1d(2)
    M1 = B * H * W
    M2 = B * H * W1
    Wp = LPAD + W1 + RPAD

    # ---- conv block 1: one small bf16 matmul (K=16), f32 accumulation -------
    h1 = jnp.dot(x1_ref[...].reshape(M1, K1_PAD), w1_ref[...],
                 preferred_element_type=jnp.float32)
    h1 = jnp.maximum(h1 * s1_ref[0] + t1_ref[0], 0.0)           # folded BN + ReLU
    h1 = jnp.max(h1.reshape(M1 // 2, 2, C), axis=1)             # MaxPool1d(2) on W

    # ---- zero the conv2 halo only, then scatter the interior (aligned) ------
    # Re-zeroed every step (interior is fully overwritten below), so this stays
    # correct no matter how the "parallel" grid is split across TensorCores.
    zrow = jnp.zeros((B, P2, Wp, C), h1p_ref.dtype)
    h1p_ref[:, 0:P2, :, :] = zrow                                # top H-halo
    h1p_ref[:, P2 + H:2 * P2 + H, :, :] = zrow                   # bottom H-halo
    zcol = jnp.zeros((B, H, LPAD, C), h1p_ref.dtype)
    h1p_ref[:, P2:P2 + H, 0:LPAD, :] = zcol                      # left  W-halo (8-aligned)
    h1p_ref[:, P2:P2 + H, LPAD + W1:Wp, :] = jnp.zeros(
        (B, H, RPAD, C), h1p_ref.dtype)                          # right W-halo (8-aligned)
    h1p_ref[:, P2:P2 + H, LPAD:LPAD + W1, :] = h1.reshape(B, H, W1, C)

    # ---- conv block 2: 81 direct accumulating tap matmuls (no im2col) -------
    def dy_body(dy, acc):
        for dx in range(K2):                                     # 9 taps unrolled
            col0 = LPAD - P2 + dx                                # static column start
            tap = h1p_ref[:, pl.ds(dy, H), col0:col0 + W1, :]
            tap = tap.reshape(M2, C).astype(jnp.bfloat16)
            wt = w2_ref[dy * K2 + dx]                            # (C, C) bf16
            acc = acc + jnp.dot(tap, wt, preferred_element_type=jnp.float32)
        return acc

    h2 = lax.fori_loop(0, K2, dy_body, jnp.zeros((M2, C), jnp.float32))
    h2 = jnp.maximum(h2 * s2_ref[0] + t2_ref[0], 0.0)            # folded BN + ReLU
    h2 = jnp.max(h2.reshape(M2 // 2, 2, C), axis=1)              # MaxPool1d(2) on W

    # ---- projection: Linear(128,128) -> GELU -> Linear(128, EMBED_D) --------
    h = jnp.dot(h2.astype(pw1_ref.dtype), pw1_ref[...],
                preferred_element_type=jnp.float32) + pb1_ref[0]
    c0 = 0.7978845608028654   # sqrt(2/pi); tanh-GELU (runs on the EUP)
    h = 0.5 * h * (1.0 + jnp.tanh(c0 * (h + 0.044715 * (h * h * h))))
    out = jnp.dot(h.astype(pw2_ref.dtype), pw2_ref[...],
                  preferred_element_type=jnp.float32) + pb2_ref[0]
    o_ref[...] = out.reshape(B, H * W2, EMBED_D)


# ----------------------------------------------------------------------------
# Wrapper (plain JAX glue: layout, conv1 im2col, BN folding, dtype casts)
# ----------------------------------------------------------------------------
def _bn_fold(conv_bias, gamma, beta, mean, var, eps=1e-5):
    scale = gamma / jnp.sqrt(var + eps)
    shift = (conv_bias - mean) * scale + beta
    return (scale.reshape(1, -1).astype(jnp.float32),
            shift.reshape(1, -1).astype(jnp.float32))


def _im2col_k3(img):
    """3x3 same-padding im2col of a single-channel map: (N,H,W) -> (N,H*W,16) bf16."""
    N, H, W = img.shape
    p = K1 // 2
    xp = jnp.pad(img, ((0, 0), (p, p), (p, p)))
    cols = [xp[:, dy:dy + H, dx:dx + W] for dy in range(K1) for dx in range(K1)]
    col = jnp.stack(cols, axis=-1).reshape(N, H * W, K1_TAPS)
    col = jnp.pad(col, ((0, 0), (0, 0), (0, K1_PAD - K1_TAPS)))
    return col.astype(jnp.bfloat16)


def font_detection_forward(x_nchw, params):
    # TODO(synk): the pretrained TrOCR VisionEncoderDecoderModel has no clean
    # Pallas equivalent (and no checkpoint may be loaded here); it is treated
    # as identity and the single-channel map is fed straight to the conv stack.
    x = x_nchw.astype(jnp.float32)
    N, Cin, H, W = x.shape
    assert Cin == 1, "conv stack expects a single-channel map"
    # W % 4 needed by the two width-poolings; %16 / %8 keep every reshape and
    # store in this kernel tile-aligned.
    assert W % 16 == 0 and H % 8 == 0, "kernel assumes W % 16 == 0 and H % 8 == 0"
    W1, W2 = W // 2, W // 4
    L = H * W2                              # spatial positions after both pools
    Wp = LPAD + W1 + RPAD

    # 2 batch elements per grid step -> conv2 matmuls see M = 2*H*W1 (>=256) rows.
    B_blk = 2 if N % 2 == 0 else 1
    assert N % B_blk == 0

    # conv1 operands: wrapper-side 9-tap im2col, contraction padded only 9 -> 16.
    x1 = _im2col_k3(x[:, 0])                                    # (N, H*W, 16) bf16
    w1 = params["w1"].reshape(K1_TAPS, C)
    w1 = jnp.pad(w1, ((0, K1_PAD - K1_TAPS), (0, 0))).astype(jnp.bfloat16)
    s1, t1 = _bn_fold(params["b1"], params["bn1_gamma"], params["bn1_beta"],
                      params["bn1_mean"], params["bn1_var"])

    # conv2 operands: tap-major (81, C, C) bf16 weight for aligned per-tap loads.
    w2 = params["w2"].reshape(K2 * K2, C, C).astype(jnp.bfloat16)
    s2, t2 = _bn_fold(params["b2"], params["bn2_gamma"], params["bn2_beta"],
                      params["bn2_mean"], params["bn2_var"])

    # projection operands.
    pw1 = params["pw1"].astype(jnp.bfloat16)
    pb1 = params["pb1"].reshape(1, -1).astype(jnp.float32)
    pw2 = params["pw2"].astype(jnp.bfloat16)
    pb2 = params["pb2"].reshape(1, -1).astype(jnp.float32)

    # VMEM budget derived from the actual shapes (lane-padded), capped at
    # v7x's 64 MiB physical VMEM; never tighter than the 32 MiB default.
    vmem_est = (
        2 * B_blk * H * W * 128 * 2            # x1 double buffer (16 lanes pad to 128)
        + 2 * B_blk * L * EMBED_D * 4          # output double buffer
        + 2 * (K2 * K2 * C * C) * 2            # w2 double buffer (dominant weight)
        + 2 * (K1_PAD * C + 2 * C * C) * 2     # w1 / pw1 / pw2 double buffers
        + B_blk * (H + 2 * P2) * Wp * C * 4    # h1p scratch
        + 4 * B_blk * H * W1 * C * 4           # accumulator + relayout temporaries
    )
    vmem_limit = int(min(max(vmem_est, 32 * 1024 * 1024), 64 * 1024 * 1024))

    flops_per_elem = (2 * H * W * K1_PAD * C
                      + 2 * H * W1 * K2 * K2 * C * C
                      + 2 * H * W2 * (C * C + C * EMBED_D))
    cost = pl.CostEstimate(
        flops=int(N * flops_per_elem),
        transcendentals=int(N * H * W2 * C),
        bytes_accessed=int(x1.size * 2 + N * L * EMBED_D * 4
                           + w2.size * 2 + pw1.size * 2 + pw2.size * 2
                           + 6 * C * 4))

    kernel = functools.partial(_fused_forward_kernel, B=B_blk, H=H, W=W)
    out = pl.pallas_call(
        kernel,
        out_shape=jax.ShapeDtypeStruct((N, L, EMBED_D), jnp.float32),
        grid=(N // B_blk,),
        in_specs=[
            pl.BlockSpec((B_blk, H * W, K1_PAD), lambda n: (n, 0, 0)),  # conv1 patches
            pl.BlockSpec((K1_PAD, C), lambda n: (0, 0)),                # w1
            pl.BlockSpec((1, C), lambda n: (0, 0)),                     # bn1 scale
            pl.BlockSpec((1, C), lambda n: (0, 0)),                     # bn1 shift
            pl.BlockSpec((K2 * K2, C, C), lambda n: (0, 0, 0)),         # w2 (tap-major)
            pl.BlockSpec((1, C), lambda n: (0, 0)),                     # bn2 scale
            pl.BlockSpec((1, C), lambda n: (0, 0)),                     # bn2 shift
            pl.BlockSpec((C, C), lambda n: (0, 0)),                     # pw1
            pl.BlockSpec((1, C), lambda n: (0, 0)),                     # pb1
            pl.BlockSpec((C, EMBED_D), lambda n: (0, 0)),               # pw2
            pl.BlockSpec((1, EMBED_D), lambda n: (0, 0)),               # pb2
        ],
        out_specs=pl.BlockSpec((B_blk, L, EMBED_D), lambda n: (n, 0, 0)),
        scratch_shapes=[
            # zero-halo'd conv2 input; f32 for the robust relayout path (see header).
            pltpu.VMEM((B_blk, H + 2 * P2, Wp, C), jnp.float32),
        ],
        compiler_params=pltpu.CompilerParams(
            dimension_semantics=("parallel",),
            vmem_limit_bytes=vmem_limit),
        cost_estimate=cost,
    )(x1, w1, s1, t1, w2, s2, t2, pw1, pb1, pw2, pb2)
    return out.reshape(N, -1)     # x.view(x.shape[0], -1)


# ----------------------------------------------------------------------------
# Parameter init (deterministic, synthetic)
# ----------------------------------------------------------------------------
def init_params(key):
    ks = jax.random.split(key, 16)
    nrm = lambda k, shape, s: jax.random.normal(k, shape, jnp.float32) * s
    p = {}
    # conv block 1: Conv2d(1 -> 128, k=3, p=1) + BatchNorm2d(128)
    p["w1"] = nrm(ks[0], (3, 3, 1, 128), 0.05)
    p["b1"] = nrm(ks[1], (128,), 0.01)
    p["bn1_gamma"] = 1.0 + nrm(ks[2], (128,), 0.01)
    p["bn1_beta"] = nrm(ks[3], (128,), 0.01)
    p["bn1_mean"] = nrm(ks[4], (128,), 0.01)
    p["bn1_var"] = 1.0 + jnp.abs(nrm(ks[5], (128,), 0.01))
    # conv block 2: Conv2d(-> 128, k=9, p=4) + BatchNorm2d(128)
    # TODO(synk): the PyTorch module declares in_channels=32 but the incoming
    # tensor has 128 channels (shape mismatch); we use 128 so it is computable.
    p["w2"] = nrm(ks[6], (9, 9, 128, 128), 0.02)
    p["b2"] = nrm(ks[7], (128,), 0.01)
    p["bn2_gamma"] = 1.0 + nrm(ks[8], (128,), 0.01)
    p["bn2_beta"] = nrm(ks[9], (128,), 0.01)
    p["bn2_mean"] = nrm(ks[10], (128,), 0.01)
    p["bn2_var"] = 1.0 + jnp.abs(nrm(ks[11], (128,), 0.01))
    # projection: Linear(128,128) -> GELU -> Linear(128, EMBED_D)
    # TODO(synk): nn.Linear(128,128) on an NCHW 4-D tensor would act on the
    # width axis (shape-incompatible as written); the per-position channel
    # projection (channels-last) is implemented instead.
    p["pw1"] = nrm(ks[12], (128, 128), 0.05)
    p["pb1"] = nrm(ks[13], (128,), 0.01)
    p["pw2"] = nrm(ks[14], (128, EMBED_D), 0.05)
    p["pb2"] = nrm(ks[15], (EMBED_D,), 0.01)
    return p


if __name__ == "__main__":
    key = jax.random.PRNGKey(0)
    kx, kp = jax.random.split(key)

    # Small example: batch=4, single-channel 16x16 feature map (NCHW).
    x = jax.random.normal(kx, (4, 1, 16, 16), jnp.float32)
    params = init_params(kp)

    out = jax.jit(font_detection_forward)(x, params)
    out = jax.block_until_ready(out)

    assert out.shape == (4, 16 * 4 * EMBED_D), out.shape
    assert bool(jnp.all(jnp.isfinite(out)))
    print("KERNEL_OK")
</pallas_src>

<mosaic_0001>
module attributes {stable_mosaic.version = 11 : i64} {
  func.func @_fused_forward_kernel(%arg0: i32, %arg1: memref<2x256x16xbf16, #tpu.memory_space<vmem>>, %arg2: memref<16x128xbf16, #tpu.memory_space<vmem>>, %arg3: memref<1x128xf32, #tpu.memory_space<vmem>>, %arg4: memref<1x128xf32, #tpu.memory_space<vmem>>, %arg5: memref<81x128x128xbf16, #tpu.memory_space<vmem>>, %arg6: memref<1x128xf32, #tpu.memory_space<vmem>>, %arg7: memref<1x128xf32, #tpu.memory_space<vmem>>, %arg8: memref<128x128xbf16, #tpu.memory_space<vmem>>, %arg9: memref<1x128xf32, #tpu.memory_space<vmem>>, %arg10: memref<128x128xbf16, #tpu.memory_space<vmem>>, %arg11: memref<1x128xf32, #tpu.memory_space<vmem>>, %arg12: memref<2x64x128xf32, #tpu.memory_space<vmem>>, %arg13: memref<2x24x24x128xf32, #tpu.memory_space<vmem>>) attributes {dimension_semantics = [#tpu.dimension_semantics<parallel>], iteration_bounds = array<i64: 2>, scalar_prefetch = 0 : i64, scratch_operands = 1 : i64, tpu.core_type = #tpu.core_type<tc>, window_params = [{transform_indices = @transform_0, window_bounds = array<i64: 2, 256, 16>}, {pipeline_mode = #tpu.pipeline_mode<synchronous>, transform_indices = @transform_1, window_bounds = array<i64: 16, 128>}, {pipeline_mode = #tpu.pipeline_mode<synchronous>, transform_indices = @transform_2, window_bounds = array<i64: 1, 128>}, {pipeline_mode = #tpu.pipeline_mode<synchronous>, transform_indices = @transform_3, window_bounds = array<i64: 1, 128>}, {pipeline_mode = #tpu.pipeline_mode<synchronous>, transform_indices = @transform_4, window_bounds = array<i64: 81, 128, 128>}, {pipeline_mode = #tpu.pipeline_mode<synchronous>, transform_indices = @transform_5, window_bounds = array<i64: 1, 128>}, {pipeline_mode = #tpu.pipeline_mode<synchronous>, transform_indices = @transform_6, window_bounds = array<i64: 1, 128>}, {pipeline_mode = #tpu.pipeline_mode<synchronous>, transform_indices = @transform_7, window_bounds = array<i64: 128, 128>}, {pipeline_mode = #tpu.pipeline_mode<synchronous>, transform_indices = @transform_8, window_bounds = array<i64: 1, 128>}, {pipeline_mode = #tpu.pipeline_mode<synchronous>, transform_indices = @transform_9, window_bounds = array<i64: 128, 128>}, {pipeline_mode = #tpu.pipeline_mode<synchronous>, transform_indices = @transform_10, window_bounds = array<i64: 1, 128>}, {transform_indices = @transform_11, window_bounds = array<i64: 2, 64, 128>}]} {
    %c0 = arith.constant 0 : index
    %c0_0 = arith.constant 0 : index
    %c0_1 = arith.constant 0 : index
    %0 = vector.load %arg1[%c0, %c0_0, %c0_1] : memref<2x256x16xbf16, #tpu.memory_space<vmem>>, vector<2x256x16xbf16>
    %1 = vector.shape_cast %0 : vector<2x256x16xbf16> to vector<512x16xbf16>
    %c0_2 = arith.constant 0 : index
    %c0_3 = arith.constant 0 : index
    %2 = vector.load %arg2[%c0_2, %c0_3] : memref<16x128xbf16, #tpu.memory_space<vmem>>, vector<16x128xbf16>
    %cst = arith.constant dense<0.000000e+00> : vector<512x128xf32>
    %3 = tpu.matmul %1, %2, %cst {dimension_numbers = #tpu.dot_dimension_numbers<[1], [0], [0], [1], [0, 0, 1, 1], [], []>} : vector<512x16xbf16>, vector<16x128xbf16>, vector<512x128xf32> -> vector<512x128xf32>
    %c0_4 = arith.constant 0 : index
    %c0_5 = arith.constant 0 : index
    %4 = vector.load %arg3[%c0_4, %c0_5] : memref<1x128xf32, #tpu.memory_space<vmem>>, vector<1x128xf32>
    %5 = vector.shape_cast %4 : vector<1x128xf32> to vector<128xf32>
    %6 = vector.shape_cast %5 : vector<128xf32> to vector<1x128xf32>
    %7 = vector.broadcast %6 : vector<1x128xf32> to vector<512x128xf32>
    %8 = arith.mulf %3, %7 : vector<512x128xf32>
    %c0_6 = arith.constant 0 : index
    %c0_7 = arith.constant 0 : index
    %9 = vector.load %arg4[%c0_6, %c0_7] : memref<1x128xf32, #tpu.memory_space<vmem>>, vector<1x128xf32>
    %10 = vector.shape_cast %9 : vector<1x128xf32> to vector<128xf32>
    %11 = vector.shape_cast %10 : vector<128xf32> to vector<1x128xf32>
    %12 = vector.broadcast %11 : vector<1x128xf32> to vector<512x128xf32>
    %13 = arith.addf %8, %12 : vector<512x128xf32>
    %cst_8 = arith.constant 0.000000e+00 : f32
    %14 = vector.broadcast %cst_8 : f32 to vector<512x128xf32>
    %15 = arith.maximumf %13, %14 : vector<512x128xf32>
    %16 = vector.shape_cast %15 : vector<512x128xf32> to vector<256x2x128xf32>
    %cst_9 = arith.constant dense<0xFF800000> : vector<256x128xf32>
    %17 = vector.multi_reduction <maximumf>, %16, %cst_9 [1] : vector<256x2x128xf32> to vector<256x128xf32>
    %cst_10 = arith.constant 0.000000e+00 : f32
    %18 = vector.broadcast %cst_10 : f32 to vector<2x4x24x128xf32>
    %c0_11 = arith.constant 0 : index
    %c0_12 = arith.constant 0 : index
    %c0_13 = arith.constant 0 : index
    %c0_14 = arith.constant 0 : index
    %19 = vector.load %arg13[%c0_11, %c0_12, %c0_13, %c0_14] : memref<2x24x24x128xf32, #tpu.memory_space<vmem>>, vector<2x4x24x128xf32>
    tpu.vector_store %arg13[%c0_11, %c0_12, %c0_13, %c0_14], %18 {strides = array<i32>} : memref<2x24x24x128xf32, #tpu.memory_space<vmem>>, vector<2x4x24x128xf32>,
    %c0_15 = arith.constant 0 : index
    %c20 = arith.constant 20 : index
    %c0_16 = arith.constant 0 : index
    %c0_17 = arith.constant 0 : index
    %20 = vector.load %arg13[%c0_15, %c20, %c0_16, %c0_17] : memref<2x24x24x128xf32, #tpu.memory_space<vmem>>, vector<2x4x24x128xf32>
    tpu.vector_store %arg13[%c0_15, %c20, %c0_16, %c0_17], %18 {strides = array<i32>} : memref<2x24x24x128xf32, #tpu.memory_space<vmem>>, vector<2x4x24x128xf32>,
    %cst_18 = arith.constant 0.000000e+00 : f32
    %21 = vector.broadcast %cst_18 : f32 to vector<2x16x8x128xf32>
    %c0_19 = arith.constant 0 : index
    %c4 = arith.constant 4 : index
    %c0_20 = arith.constant 0 : index
    %c0_21 = arith.constant 0 : index
    %22 = vector.load %arg13[%c0_19, %c4, %c0_20, %c0_21] : memref<2x24x24x128xf32, #tpu.memory_space<vmem>>, vector<2x16x8x128xf32>
    tpu.vector_store %arg13[%c0_19, %c4, %c0_20, %c0_21], %21 {strides = array<i32>} : memref<2x24x24x128xf32, #tpu.memory_space<vmem>>, vector<2x16x8x128xf32>,
    %cst_22 = arith.constant 0.000000e+00 : f32
    %23 = vector.broadcast %cst_22 : f32 to vector<2x16x8x128xf32>
    %c0_23 = arith.constant 0 : index
    %c4_24 = arith.constant 4 : index
    %c16 = arith.constant 16 : index
    %c0_25 = arith.constant 0 : index
    %24 = vector.load %arg13[%c0_23, %c4_24, %c16, %c0_25] : memref<2x24x24x128xf32, #tpu.memory_space<vmem>>, vector<2x16x8x128xf32>
    tpu.vector_store %arg13[%c0_23, %c4_24, %c16, %c0_25], %23 {strides = array<i32>} : memref<2x24x24x128xf32, #tpu.memory_space<vmem>>, vector<2x16x8x128xf32>,
    %25 = vector.shape_cast %17 : vector<256x128xf32> to vector<2x16x8x128xf32>
    %c0_26 = arith.constant 0 : index
    %c4_27 = arith.constant 4 : index
    %c8 = arith.constant 8 : index
    %c0_28 = arith.constant 0 : index
    %26 = vector.load %arg13[%c0_26, %c4_27, %c8, %c0_28] : memref<2x24x24x128xf32, #tpu.memory_space<vmem>>, vector<2x16x8x128xf32>
    tpu.vector_store %arg13[%c0_26, %c4_27, %c8, %c0_28], %25 {strides = array<i32>} : memref<2x24x24x128xf32, #tpu.memory_space<vmem>>, vector<2x16x8x128xf32>,
    %cst_29 = arith.constant 0.000000e+00 : f32
    %27 = vector.broadcast %cst_29 : f32 to vector<256x128xf32>
    %c0_i32 = arith.constant 0 : i32
    %c9_i32 = arith.constant 9 : i32
    %28 = arith.addi %c0_i32, %c9_i32 : i32
    %c1_i32 = arith.constant 1 : i32
    %29 = scf.for %arg14 = %c0_i32 to %28 step %c1_i32 iter_args(%arg15 = %27) -> (vector<256x128xf32>)  : i32 {
      %c0_54 = arith.constant 0 : index
      %75 = arith.index_cast %arg14 : i32 to index
      %c4_55 = arith.constant 4 : index
      %c0_56 = arith.constant 0 : index
      %76 = vector.load %arg13[%c0_54, %75, %c4_55, %c0_56] : memref<2x24x24x128xf32, #tpu.memory_space<vmem>>, vector<2x16x8x128xf32>
      %77 = vector.shape_cast %76 : vector<2x16x8x128xf32> to vector<256x128xf32>
      %78 = arith.truncf %77 : vector<256x128xf32> to vector<256x128xbf16>
      %c9_i32_57 = arith.constant 9 : i32
      %79 = arith.muli %arg14, %c9_i32_57 : i32
      %c0_i32_58 = arith.constant 0 : i32
      %80 = arith.addi %79, %c0_i32_58 : i32
      %81 = arith.index_cast %80 : i32 to index
      %c0_59 = arith.constant 0 : index
      %c0_60 = arith.constant 0 : index
      %82 = vector.load %arg5[%81, %c0_59, %c0_60] : memref<81x128x128xbf16, #tpu.memory_space<vmem>>, vector<1x128x128xbf16>
      %83 = vector.shape_cast %82 : vector<1x128x128xbf16> to vector<128x128xbf16>
      %cst_61 = arith.constant dense<0.000000e+00> : vector<256x128xf32>
      %84 = tpu.matmul %78, %83, %cst_61 {dimension_numbers = #tpu.dot_dimension_numbers<[1], [0], [0], [1], [0, 0, 1, 1], [], []>} : vector<256x128xbf16>, vector<128x128xbf16>, vector<256x128xf32> -> vector<256x128xf32>
      %85 = arith.addf %arg15, %84 : vector<256x128xf32>
      %c0_62 = arith.constant 0 : index
      %86 = arith.index_cast %arg14 : i32 to index
      %c5 = arith.constant 5 : index
      %c0_63 = arith.constant 0 : index
      %87 = vector.load %arg13[%c0_62, %86, %c5, %c0_63] : memref<2x24x24x128xf32, #tpu.memory_space<vmem>>, vector<2x16x8x128xf32>
      %88 = vector.shape_cast %87 : vector<2x16x8x128xf32> to vector<256x128xf32>
      %89 = arith.truncf %88 : vector<256x128xf32> to vector<256x128xbf16>
      %c9_i32_64 = arith.constant 9 : i32
      %90 = arith.muli %arg14, %c9_i32_64 : i32
      %c1_i32_65 = arith.constant 1 : i32
      %91 = arith.addi %90, %c1_i32_65 : i32
      %92 = arith.index_cast %91 : i32 to index
      %c0_66 = arith.constant 0 : index
      %c0_67 = arith.constant 0 : index
      %93 = vector.load %arg5[%92, %c0_66, %c0_67] : memref<81x128x128xbf16, #tpu.memory_space<vmem>>, vector<1x128x128xbf16>
      %94 = vector.shape_cast %93 : vector<1x128x128xbf16> to vector<128x128xbf16>
      %cst_68 = arith.constant dense<0.000000e+00> : vector<256x128xf32>
      %95 = tpu.matmul %89, %94, %cst_68 {dimension_numbers = #tpu.dot_dimension_numbers<[1], [0], [0], [1], [0, 0, 1, 1], [], []>} : vector<256x128xbf16>, vector<128x128xbf16>, vector<256x128xf32> -> vector<256x128xf32>
      %96 = arith.addf %85, %95 : vector<256x128xf32>
      %c0_69 = arith.constant 0 : index
      %97 = arith.index_cast %arg14 : i32 to index
      %c6 = arith.constant 6 : index
      %c0_70 = arith.constant 0 : index
      %98 = vector.load %arg13[%c0_69, %97, %c6, %c0_70] : memref<2x24x24x128xf32, #tpu.memory_space<vmem>>, vector<2x16x8x128xf32>
      %99 = vector.shape_cast %98 : vector<2x16x8x128xf32> to vector<256x128xf32>
      %100 = arith.truncf %99 : vector<256x128xf32> to vector<256x128xbf16>
      %c9_i32_71 = arith.constant 9 : i32
      %101 = arith.muli %arg14, %c9_i32_71 : i32
      %c2_i32 = arith.constant 2 : i32
      %102 = arith.addi %101, %c2_i32 : i32
      %103 = arith.index_cast %102 : i32 to index
      %c0_72 = arith.constant 0 : index
      %c0_73 = arith.constant 0 : index
      %104 = vector.load %arg5[%103, %c0_72, %c0_73] : memref<81x128x128xbf16, #tpu.memory_space<vmem>>, vector<1x128x128xbf16>
      %105 = vector.shape_cast %104 : vector<1x128x128xbf16> to vector<128x128xbf16>
      %cst_74 = arith.constant dense<0.000000e+00> : vector<256x128xf32>
      %106 = tpu.matmul %100, %105, %cst_74 {dimension_numbers = #tpu.dot_dimension_numbers<[1], [0], [0], [1], [0, 0, 1, 1], [], []>} : vector<256x128xbf16>, vector<128x128xbf16>, vector<256x128xf32> -> vector<256x128xf32>
      %107 = arith.addf %96, %106 : vector<256x128xf32>
      %c0_75 = arith.constant 0 : index
      %108 = arith.index_cast %arg14 : i32 to index
      %c7 = arith.constant 7 : index
      %c0_76 = arith.constant 0 : index
      %109 = vector.load %arg13[%c0_75, %108, %c7, %c0_76] : memref<2x24x24x128xf32, #tpu.memory_space<vmem>>, vector<2x16x8x128xf32>
      %110 = vector.shape_cast %109 : vector<2x16x8x128xf32> to vector<256x128xf32>
      %111 = arith.truncf %110 : vector<256x128xf32> to vector<256x128xbf16>
      %c9_i32_77 = arith.constant 9 : i32
      %112 = arith.muli %arg14, %c9_i32_77 : i32
      %c3_i32 = arith.constant 3 : i32
      %113 = arith.addi %112, %c3_i32 : i32
      %114 = arith.index_cast %113 : i32 to index
      %c0_78 = arith.constant 0 : index
      %c0_79 = arith.constant 0 : index
      %115 = vector.load %arg5[%114, %c0_78, %c0_79] : memref<81x128x128xbf16, #tpu.memory_space<vmem>>, vector<1x128x128xbf16>
      %116 = vector.shape_cast %115 : vector<1x128x128xbf16> to vector<128x128xbf16>
      %cst_80 = arith.constant dense<0.000000e+00> : vector<256x128xf32>
      %117 = tpu.matmul %111, %116, %cst_80 {dimension_numbers = #tpu.dot_dimension_numbers<[1], [0], [0], [1], [0, 0, 1, 1], [], []>} : vector<256x128xbf16>, vector<128x128xbf16>, vector<256x128xf32> -> vector<256x128xf32>
      %118 = arith.addf %107, %117 : vector<256x128xf32>
      %c0_81 = arith.constant 0 : index
      %119 = arith.index_cast %arg14 : i32 to index
      %c8_82 = arith.constant 8 : index
      %c0_83 = arith.constant 0 : index
      %120 = vector.load %arg13[%c0_81, %119, %c8_82, %c0_83] : memref<2x24x24x128xf32, #tpu.memory_space<vmem>>, vector<2x16x8x128xf32>
      %121 = vector.shape_cast %120 : vector<2x16x8x128xf32> to vector<256x128xf32>
      %122 = arith.truncf %121 : vector<256x128xf32> to vector<256x128xbf16>
      %c9_i32_84 = arith.constant 9 : i32
      %123 = arith.muli %arg14, %c9_i32_84 : i32
      %c4_i32 = arith.constant 4 : i32
      %124 = arith.addi %123, %c4_i32 : i32
      %125 = arith.index_cast %124 : i32 to index
      %c0_85 = arith.constant 0 : index
      %c0_86 = arith.constant 0 : index
      %126 = vector.load %arg5[%125, %c0_85, %c0_86] : memref<81x128x128xbf16, #tpu.memory_space<vmem>>, vector<1x128x128xbf16>
      %127 = vector.shape_cast %126 : vector<1x128x128xbf16> to vector<128x128xbf16>
      %cst_87 = arith.constant dense<0.000000e+00> : vector<256x128xf32>
      %128 = tpu.matmul %122, %127, %cst_87 {dimension_numbers = #tpu.dot_dimension_numbers<[1], [0], [0], [1], [0, 0, 1, 1], [], []>} : vector<256x128xbf16>, vector<128x128xbf16>, vector<256x128xf32> -> vector<256x128xf32>
      %129 = arith.addf %118, %128 : vector<256x128xf32>
      %c0_88 = arith.constant 0 : index
      %130 = arith.index_cast %arg14 : i32 to index
      %c9 = arith.constant 9 : index
      %c0_89 = arith.constant 0 : index
      %131 = vector.load %arg13[%c0_88, %130, %c9, %c0_89] : memref<2x24x24x128xf32, #tpu.memory_space<vmem>>, vector<2x16x8x128xf32>
      %132 = vector.shape_cast %131 : vector<2x16x8x128xf32> to vector<256x128xf32>
      %133 = arith.truncf %132 : vector<256x128xf32> to vector<256x128xbf16>
      %c9_i32_90 = arith.constant 9 : i32
      %134 = arith.muli %arg14, %c9_i32_90 : i32
      %c5_i32 = arith.constant 5 : i32
      %135 = arith.addi %134, %c5_i32 : i32
      %136 = arith.index_cast %135 : i32 to index
      %c0_91 = arith.constant 0 : index
      %c0_92 = arith.constant 0 : index
      %137 = vector.load %arg5[%136, %c0_91, %c0_92] : memref<81x128x128xbf16, #tpu.memory_space<vmem>>, vector<1x128x128xbf16>
      %138 = vector.shape_cast %137 : vector<1x128x128xbf16> to vector<128x128xbf16>
      %cst_93 = arith.constant dense<0.000000e+00> : vector<256x128xf32>
      %139 = tpu.matmul %133, %138, %cst_93 {dimension_numbers = #tpu.dot_dimension_numbers<[1], [0], [0], [1], [0, 0, 1, 1], [], []>} : vector<256x128xbf16>, vector<128x128xbf16>, vector<256x128xf32> -> vector<256x128xf32>
      %140 = arith.addf %129, %139 : vector<256x128xf32>
      %c0_94 = arith.constant 0 : index
      %141 = arith.index_cast %arg14 : i32 to index
      %c10 = arith.constant 10 : index
      %c0_95 = arith.constant 0 : index
      %142 = vector.load %arg13[%c0_94, %141, %c10, %c0_95] : memref<2x24x24x128xf32, #tpu.memory_space<vmem>>, vector<2x16x8x128xf32>
      %143 = vector.shape_cast %142 : vector<2x16x8x128xf32> to vector<256x128xf32>
      %144 = arith.truncf %143 : vector<256x128xf32> to vector<256x128xbf16>
      %c9_i32_96 = arith.constant 9 : i32
      %145 = arith.muli %arg14, %c9_i32_96 : i32
      %c6_i32 = arith.constant 6 : i32
      %146 = arith.addi %145, %c6_i32 : i32
      %147 = arith.index_cast %146 : i32 to index
      %c0_97 = arith.constant 0 : index
      %c0_98 = arith.constant 0 : index
      %148 = vector.load %arg5[%147, %c0_97, %c0_98] : memref<81x128x128xbf16, #tpu.memory_space<vmem>>, vector<1x128x128xbf16>
      %149 = vector.shape_cast %148 : vector<1x128x128xbf16> to vector<128x128xbf16>
      %cst_99 = arith.constant dense<0.000000e+00> : vector<256x128xf32>
      %150 = tpu.matmul %144, %149, %cst_99 {dimension_numbers = #tpu.dot_dimension_numbers<[1], [0], [0], [1], [0, 0, 1, 1], [], []>} : vector<256x128xbf16>, vector<128x128xbf16>, vector<256x128xf32> -> vector<256x128xf32>
      %151 = arith.addf %140, %150 : vector<256x128xf32>
      %c0_100 = arith.constant 0 : index
      %152 = arith.index_cast %arg14 : i32 to index
      %c11 = arith.constant 11 : index
      %c0_101 = arith.constant 0 : index
      %153 = vector.load %arg13[%c0_100, %152, %c11, %c0_101] : memref<2x24x24x128xf32, #tpu.memory_space<vmem>>, vector<2x16x8x128xf32>
      %154 = vector.shape_cast %153 : vector<2x16x8x128xf32> to vector<256x128xf32>
      %155 = arith.truncf %154 : vector<256x128xf32> to vector<256x128xbf16>
      %c9_i32_102 = arith.constant 9 : i32
      %156 = arith.muli %arg14, %c9_i32_102 : i32
      %c7_i32 = arith.constant 7 : i32
      %157 = arith.addi %156, %c7_i32 : i32
      %158 = arith.index_cast %157 : i32 to index
      %c0_103 = arith.constant 0 : index
      %c0_104 = arith.constant 0 : index
      %159 = vector.load %arg5[%158, %c0_103, %c0_104] : memref<81x128x128xbf16, #tpu.memory_space<vmem>>, vector<1x128x128xbf16>
      %160 = vector.shape_cast %159 : vector<1x128x128xbf16> to vector<128x128xbf16>
      %cst_105 = arith.constant dense<0.000000e+00> : vector<256x128xf32>
      %161 = tpu.matmul %155, %160, %cst_105 {dimension_numbers = #tpu.dot_dimension_numbers<[1], [0], [0], [1], [0, 0, 1, 1], [], []>} : vector<256x128xbf16>, vector<128x128xbf16>, vector<256x128xf32> -> vector<256x128xf32>
      %162 = arith.addf %151, %161 : vector<256x128xf32>
      %c0_106 = arith.constant 0 : index
      %163 = arith.index_cast %arg14 : i32 to index
      %c12 = arith.constant 12 : index
      %c0_107 = arith.constant 0 : index
      %164 = vector.load %arg13[%c0_106, %163, %c12, %c0_107] : memref<2x24x24x128xf32, #tpu.memory_space<vmem>>, vector<2x16x8x128xf32>
      %165 = vector.shape_cast %164 : vector<2x16x8x128xf32> to vector<256x128xf32>
      %166 = arith.truncf %165 : vector<256x128xf32> to vector<256x128xbf16>
      %c9_i32_108 = arith.constant 9 : i32
      %167 = arith.muli %arg14, %c9_i32_108 : i32
      %c8_i32 = arith.constant 8 : i32
      %168 = arith.addi %167, %c8_i32 : i32
      %169 = arith.index_cast %168 : i32 to index
      %c0_109 = arith.constant 0 : index
      %c0_110 = arith.constant 0 : index
      %170 = vector.load %arg5[%169, %c0_109, %c0_110] : memref<81x128x128xbf16, #tpu.memory_space<vmem>>, vector<1x128x128xbf16>
      %171 = vector.shape_cast %170 : vector<1x128x128xbf16> to vector<128x128xbf16>
      %cst_111 = arith.constant dense<0.000000e+00> : vector<256x128xf32>
      %172 = tpu.matmul %166, %171, %cst_111 {dimension_numbers = #tpu.dot_dimension_numbers<[1], [0], [0], [1], [0, 0, 1, 1], [], []>} : vector<256x128xbf16>, vector<128x128xbf16>, vector<256x128xf32> -> vector<256x128xf32>
      %173 = arith.addf %162, %172 : vector<256x128xf32>
      scf.yield %173 : vector<256x128xf32>
    }
    %c9_i32_30 = arith.constant 9 : i32
    %c0_31 = arith.constant 0 : index
    %c0_32 = arith.constant 0 : index
    %30 = vector.load %arg6[%c0_31, %c0_32] : memref<1x128xf32, #tpu.memory_space<vmem>>, vector<1x128xf32>
    %31 = vector.shape_cast %30 : vector<1x128xf32> to vector<128xf32>
    %32 = vector.shape_cast %31 : vector<128xf32> to vector<1x128xf32>
    %33 = vector.broadcast %32 : vector<1x128xf32> to vector<256x128xf32>
    %34 = arith.mulf %29, %33 : vector<256x128xf32>
    %c0_33 = arith.constant 0 : index
    %c0_34 = arith.constant 0 : index
    %35 = vector.load %arg7[%c0_33, %c0_34] : memref<1x128xf32, #tpu.memory_space<vmem>>, vector<1x128xf32>
    %36 = vector.shape_cast %35 : vector<1x128xf32> to vector<128xf32>
    %37 = vector.shape_cast %36 : vector<128xf32> to vector<1x128xf32>
    %38 = vector.broadcast %37 : vector<1x128xf32> to vector<256x128xf32>
    %39 = arith.addf %34, %38 : vector<256x128xf32>
    %cst_35 = arith.constant 0.000000e+00 : f32
    %40 = vector.broadcast %cst_35 : f32 to vector<256x128xf32>
    %41 = arith.maximumf %39, %40 : vector<256x128xf32>
    %42 = vector.shape_cast %41 : vector<256x128xf32> to vector<128x2x128xf32>
    %cst_36 = arith.constant dense<0xFF800000> : vector<128x128xf32>
    %43 = vector.multi_reduction <maximumf>, %42, %cst_36 [1] : vector<128x2x128xf32> to vector<128x128xf32>
    %44 = arith.truncf %43 : vector<128x128xf32> to vector<128x128xbf16>
    %c0_37 = arith.constant 0 : index
    %c0_38 = arith.constant 0 : index
    %45 = vector.load %arg8[%c0_37, %c0_38] : memref<128x128xbf16, #tpu.memory_space<vmem>>, vector<128x128xbf16>
    %cst_39 = arith.constant dense<0.000000e+00> : vector<128x128xf32>
    %46 = tpu.matmul %44, %45, %cst_39 {dimension_numbers = #tpu.dot_dimension_numbers<[1], [0], [0], [1], [0, 0, 1, 1], [], []>} : vector<128x128xbf16>, vector<128x128xbf16>, vector<128x128xf32> -> vector<128x128xf32>
    %c0_40 = arith.constant 0 : index
    %c0_41 = arith.constant 0 : index
    %47 = vector.load %arg9[%c0_40, %c0_41] : memref<1x128xf32, #tpu.memory_space<vmem>>, vector<1x128xf32>
    %48 = vector.shape_cast %47 : vector<1x128xf32> to vector<128xf32>
    %49 = vector.shape_cast %48 : vector<128xf32> to vector<1x128xf32>
    %50 = vector.broadcast %49 : vector<1x128xf32> to vector<128x128xf32>
    %51 = arith.addf %46, %50 : vector<128x128xf32>
    %cst_42 = arith.constant 5.000000e-01 : f32
    %52 = vector.broadcast %cst_42 : f32 to vector<128x128xf32>
    %53 = arith.mulf %52, %51 : vector<128x128xf32>
    %54 = arith.mulf %51, %51 : vector<128x128xf32>
    %55 = arith.mulf %54, %51 : vector<128x128xf32>
    %cst_43 = arith.constant 4.471500e-02 : f32
    %56 = vector.broadcast %cst_43 : f32 to vector<128x128xf32>
    %57 = arith.mulf %56, %55 : vector<128x128xf32>
    %58 = arith.addf %51, %57 : vector<128x128xf32>
    %cst_44 = arith.constant 0.797884583 : f32
    %59 = vector.broadcast %cst_44 : f32 to vector<128x128xf32>
    %60 = arith.mulf %59, %58 : vector<128x128xf32>
    %61 = math.tanh %60 : vector<128x128xf32>
    %cst_45 = arith.constant 1.000000e+00 : f32
    %62 = vector.broadcast %cst_45 : f32 to vector<128x128xf32>
    %63 = arith.addf %62, %61 : vector<128x128xf32>
    %64 = arith.mulf %53, %63 : vector<128x128xf32>
    %65 = arith.truncf %64 : vector<128x128xf32> to vector<128x128xbf16>
    %c0_46 = arith.constant 0 : index
    %c0_47 = arith.constant 0 : index
    %66 = vector.load %arg10[%c0_46, %c0_47] : memref<128x128xbf16, #tpu.memory_space<vmem>>, vector<128x128xbf16>
    %cst_48 = arith.constant dense<0.000000e+00> : vector<128x128xf32>
    %67 = tpu.matmul %65, %66, %cst_48 {dimension_numbers = #tpu.dot_dimension_numbers<[1], [0], [0], [1], [0, 0, 1, 1], [], []>} : vector<128x128xbf16>, vector<128x128xbf16>, vector<128x128xf32> -> vector<128x128xf32>
    %c0_49 = arith.constant 0 : index
    %c0_50 = arith.constant 0 : index
    %68 = vector.load %arg11[%c0_49, %c0_50] : memref<1x128xf32, #tpu.memory_space<vmem>>, vector<1x128xf32>
    %69 = vector.shape_cast %68 : vector<1x128xf32> to vector<128xf32>
    %70 = vector.shape_cast %69 : vector<128xf32> to vector<1x128xf32>
    %71 = vector.broadcast %70 : vector<1x128xf32> to vector<128x128xf32>
    %72 = arith.addf %67, %71 : vector<128x128xf32>
    %73 = vector.shape_cast %72 : vector<128x128xf32> to vector<2x64x128xf32>
    %c0_51 = arith.constant 0 : index
    %c0_52 = arith.constant 0 : index
    %c0_53 = arith.constant 0 : index
    %74 = vector.load %arg12[%c0_51, %c0_52, %c0_53] : memref<2x64x128xf32, #tpu.memory_space<vmem>>, vector<2x64x128xf32>
    tpu.vector_store %arg12[%c0_51, %c0_52, %c0_53], %73 {strides = array<i32>} : memref<2x64x128xf32, #tpu.memory_space<vmem>>, vector<2x64x128xf32>,
    return
  }
  func.func @transform_0(%arg0: i32) -> (i32, i32, i32) {
    %c0_i32 = arith.constant 0 : i32
    %c0_i32_0 = arith.constant 0 : i32
    %c0_i32_1 = arith.constant 0 : i32
    return %arg0, %c0_i32, %c0_i32_0 : i32, i32, i32
  }
  func.func @transform_1(%arg0: i32) -> (i32, i32) {
    %c0_i32 = arith.constant 0 : i32
    %c0_i32_0 = arith.constant 0 : i32
    %c0_i32_1 = arith.constant 0 : i32
    return %c0_i32, %c0_i32_0 : i32, i32
  }
  func.func @transform_2(%arg0: i32) -> (i32, i32) {
    %c0_i32 = arith.constant 0 : i32
    %c0_i32_0 = arith.constant 0 : i32
    %c0_i32_1 = arith.constant 0 : i32
    return %c0_i32, %c0_i32_0 : i32, i32
  }
  func.func @transform_3(%arg0: i32) -> (i32, i32) {
    %c0_i32 = arith.constant 0 : i32
    %c0_i32_0 = arith.constant 0 : i32
    %c0_i32_1 = arith.constant 0 : i32
    return %c0_i32, %c0_i32_0 : i32, i32
  }
  func.func @transform_4(%arg0: i32) -> (i32, i32, i32) {
    %c0_i32 = arith.constant 0 : i32
    %c0_i32_0 = arith.constant 0 : i32
    %c0_i32_1 = arith.constant 0 : i32
    %c0_i32_2 = arith.constant 0 : i32
    return %c0_i32, %c0_i32_0, %c0_i32_1 : i32, i32, i32
  }
  func.func @transform_5(%arg0: i32) -> (i32, i32) {
    %c0_i32 = arith.constant 0 : i32
    %c0_i32_0 = arith.constant 0 : i32
    %c0_i32_1 = arith.constant 0 : i32
    return %c0_i32, %c0_i32_0 : i32, i32
  }
  func.func @transform_6(%arg0: i32) -> (i32, i32) {
    %c0_i32 = arith.constant 0 : i32
    %c0_i32_0 = arith.constant 0 : i32
    %c0_i32_1 = arith.constant 0 : i32
    return %c0_i32, %c0_i32_0 : i32, i32
  }
  func.func @transform_7(%arg0: i32) -> (i32, i32) {
    %c0_i32 = arith.constant 0 : i32
    %c0_i32_0 = arith.constant 0 : i32
    %c0_i32_1 = arith.constant 0 : i32
    return %c0_i32, %c0_i32_0 : i32, i32
  }
  func.func @transform_8(%arg0: i32) -> (i32, i32) {
    %c0_i32 = arith.constant 0 : i32
    %c0_i32_0 = arith.constant 0 : i32
    %c0_i32_1 = arith.constant 0 : i32
    return %c0_i32, %c0_i32_0 : i32, i32
  }
  func.func @transform_9(%arg0: i32) -> (i32, i32) {
    %c0_i32 = arith.constant 0 : i32
    %c0_i32_0 = arith.constant 0 : i32
    %c0_i32_1 = arith.constant 0 : i32
    return %c0_i32, %c0_i32_0 : i32, i32
  }
  func.func @transform_10(%arg0: i32) -> (i32, i32) {
    %c0_i32 = arith.constant 0 : i32
    %c0_i32_0 = arith.constant 0 : i32
    %c0_i32_1 = arith.constant 0 : i32
    return %c0_i32, %c0_i32_0 : i32, i32
  }
  func.func @transform_11(%arg0: i32) -> (i32, i32, i32) {
    %c0_i32 = arith.constant 0 : i32
    %c0_i32_0 = arith.constant 0 : i32
    %c0_i32_1 = arith.constant 0 : i32
    return %arg0, %c0_i32, %c0_i32_0 : i32, i32, i32
  }
}

</mosaic_0001>

<bundles_post_ra>
// kernel: font_detection_forward.1
= control target key start
LH: loop header
LB: loop body
LE: loop exit
PB: predicated region body
PF: predicated region fallthrough
CT: control target
= control target key end

     0   :  { %s13071_s17 = smov 0   ;;  %s16360_s0 = inlined_call_operand.vmem [shape: bf16[4,256,16], index: 0, kind: input, shape index: {}]   ;;  %s16361_s1 = inlined_call_operand.vmem [shape: bf16[16,128], index: 1, kind: input, shape index: {}]   ;;  %s16362_s2 = inlined_call_operand.vmem [shape: f32[1,128], index: 2, kind: input, shape index: {}]   ;;  %s16363_s3 = inlined_call_operand.vmem [shape: f32[1,128], index: 3, kind: input, shape index: {}]   ;;  %s16364_s4 = inlined_call_operand.vmem [shape: bf16[81,128,128], index: 4, kind: input, shape index: {}]   ;;  %s16365_s5 = inlined_call_operand.vmem [shape: f32[1,128], index: 5, kind: input, shape index: {}]   ;;  %s16366_s6 = inlined_call_operand.vmem [shape: f32[1,128], index: 6, kind: input, shape index: {}]   ;;  %s16367_s7 = inlined_call_operand.vmem [shape: bf16[128,128], index: 7, kind: input, shape index: {}]   ;;  %s16368_s8 = inlined_call_operand.vmem [shape: f32[1,128], index: 8, kind: input, shape index: {}]   ;;  %s16369_s9 = inlined_call_operand.vmem [shape: bf16[128,128], index: 9, kind: input, shape index: {}]   ;;  %s16370_s10 = inlined_call_operand.vmem [shape: f32[1,128], index: 10, kind: input, shape index: {}]   ;;  %s16371_s11 = inlined_call_operand.vmem [shape: f32[4,64,128], index: 11, kind: output, shape index: {}]  }
   0x1 LB: > { %s10828_s18 = sadd.s32 4294967295, %s12875_s17   ;;  %p10832_p0 = scmp.ge.s32.totalorder %s12875_s17, 1  ;;  %s12875_s17 = sphi %s13071_s17, %s21_s17  }
   0x2   : > { %p339_p1 = scmp.lt.s32.totalorder %s12875_s17, 3 }
   0x4   : > { %p340_p2 = pnand %p10832_p0, %p339_p1 }
   0x6   : > { %343 = sbr.rel (%p340_p2) target bundleno = 2295 (0x8f7), region = 64 }
   0xd   : > { %v12564_v0 = vld [vmem:[%s16361_s1] sm:$0xff]   ;;  %s10833_s21 = sshll.u32 %s10828_s18, 1  ;;  %vm628_vm0 = vcmask 130048   ;;  %v13009_v33 = vmov 1983009808   ;;  %v1288_v35 = vlaneseq  ;;  %vm2628_vm1 = vcmask 1041408  }
   0xe   : > { %p382_p3 = scmp.lt.s32.totalorder %s10833_s21, 3  ;;  %11422 = vmatprep.subr.bf16.mxu0 %v12564_v0  ;;  %11984 = vmatprep.subr.bf16.mxu1 %v12564_v0  ;;  %v1286_v34 = vunpack.c.l.s4 %v13009_v33  ;;  %v13159_v36 = vld [vmem:[%s16362_s2] ss:$0 sm:$0xff]  ;;  %vm4791_vm2 = vcmask 1041409   ;;  %vm4793_vm3 = vcmask 1042434   ;;  %vm4795_vm4 = vcmask 1043459  }
   0xf   : > { %11423 = vmatpush3.bf16.msra.mxu0 %v12564_v0  ;;  %11985 = vmatpush3.bf16.msra.mxu1 %v12564_v0  ;;  %v1289_v38 = vshrl.u32 %v1288_v35, 7  ;;  %v13164_v40 = vld [vmem:[%s16363_s3] ss:$0 sm:$0xff]  ;;  %vm4797_vm5 = vcmask 1044484   ;;  %vm4799_vm6 = vcmask 1045509   ;;  %vm4801_vm7 = vcmask 1046534  }
  0x10   : > { %s16476_s21 = smov (!%p382_p3, %s10833_s21), 3  ;;  %v1287_v37 = vunpack.c.0.s8 %v1286_v34  ;;  %vm4803_vm8 = vcmask 1047559   ;;  %s14595_s14 = smov 0  }
  0x11   : > { %s11138_s22 = sshll.u32 %s16476_s21, 7  ;;  %s11139_s23 = sshll.u32 %s16476_s21, 6 }
  0x12   : > { %s13085_s26 = scalar_lea.vmem %s16360_s0, %s11138_s22  ;;  %s13090_s29 = scalar_lea.vmem %s16371_s11, %s11139_s23  ;;  %v13167_v44 = vsub.s32 %v1287_v37, %v1289_v38 }
  0x13   : > { %v12565_v1 = vld [vmem:[%s13085_s26] sm:$0xff]   ;;  %v12567_v3 = vld [vmem:[%s13085_s26 + $0x8] sm:$0xff]   ;;  %v12569_v5 = vld [vmem:[%s13085_s26 + $0x10] sm:$0xff]  }
  0x14   : > { %v12566_v2 = vld [vmem:[%s13085_s26 + $0x80] sm:$0xff]   ;;  %11424 = vmatprep.mubr.msk.bf16.mxu0 %vm628_vm0, %v12565_v1  ;;  %v12568_v4 = vld [vmem:[%s13085_s26 + $0x88] sm:$0xff]   ;;  %v12570_v6 = vld [vmem:[%s13085_s26 + $0x90] sm:$0xff]   ;;  %16383 = vst [vmem:[#allocation3_spill] sm:$0xff] %v13167_v44 }
  0x15   : > { %11456 = vmatprep.mubr.msk.bf16.mxu1 %vm628_vm0, %v12566_v2  ;;  %11425 = vmatmul.mubr.msk.bf16.vlgmr.msra.gmra.mrb[0].mxu0 %vm628_vm0, %v12567_v3  ;;  %v12571_v7 = vld [vmem:[%s13085_s26 + $0x18] sm:$0xff]   ;;  %v12573_v9 = vld [vmem:[%s13085_s26 + $0x20] sm:$0xff]   ;;  %v12575_v11 = vld [vmem:[%s13085_s26 + $0x28] sm:$0xff]  }
  0x16   : > { %11457 = vmatmul.mubr.msk.bf16.vlgmr.msra.gmra.mrb[0].mxu1 %vm628_vm0, %v12568_v4  ;;  %11428 = vmatprep.mubr.msk.bf16.mxu0 %vm628_vm0, %v12569_v5  ;;  %v12572_v8 = vld [vmem:[%s13085_s26 + $0x98] sm:$0xff]   ;;  %v12574_v10 = vld [vmem:[%s13085_s26 + $0xa0] sm:$0xff]   ;;  %v12576_v12 = vld [vmem:[%s13085_s26 + $0xa8] sm:$0xff]  }
  0x17   : > { %11460 = vmatprep.mubr.msk.bf16.mxu1 %vm628_vm0, %v12570_v6  ;;  %v12577_v13 = vld [vmem:[%s13085_s26 + $0x30] sm:$0xff]   ;;  %v12579_v15 = vld [vmem:[%s13085_s26 + $0x38] sm:$0xff]   ;;  %v12581_v17 = vld [vmem:[%s13085_s26 + $0x40] sm:$0xff]  }
  0x18   : > { %v12578_v14 = vld [vmem:[%s13085_s26 + $0xb0] sm:$0xff]   ;;  %v12580_v16 = vld [vmem:[%s13085_s26 + $0xb8] sm:$0xff]   ;;  %v12582_v18 = vld [vmem:[%s13085_s26 + $0xc0] sm:$0xff]  }
  0x19   : > { %v12583_v19 = vld [vmem:[%s13085_s26 + $0x48] sm:$0xff]   ;;  %v12585_v21 = vld [vmem:[%s13085_s26 + $0x50] sm:$0xff]   ;;  %v12587_v23 = vld [vmem:[%s13085_s26 + $0x58] sm:$0xff]  }
  0x1a   : > { %v12584_v20 = vld [vmem:[%s13085_s26 + $0xc8] sm:$0xff]   ;;  %v12586_v22 = vld [vmem:[%s13085_s26 + $0xd0] sm:$0xff]   ;;  %v12588_v24 = vld [vmem:[%s13085_s26 + $0xd8] sm:$0xff]  }
  0x1b   : > { %v12589_v25 = vld [vmem:[%s13085_s26 + $0x60] sm:$0xff]   ;;  %v12591_v27 = vld [vmem:[%s13085_s26 + $0x68] sm:$0xff]   ;;  %v12593_v29 = vld [vmem:[%s13085_s26 + $0x70] sm:$0xff]  }
  0x1c   : > { %v12590_v26 = vld [vmem:[%s13085_s26 + $0xe0] sm:$0xff]   ;;  %v12592_v28 = vld [vmem:[%s13085_s26 + $0xe8] sm:$0xff]   ;;  %v12594_v30 = vld [vmem:[%s13085_s26 + $0xf0] sm:$0xff]  }
  0x1d   : > { %11429 = vmatmul.mubr.msk.bf16.gmra.mrb[4].mxu0 %vm628_vm0, %v12571_v7  ;;  %v12595_v31 = vld [vmem:[%s13085_s26 + $0x78] sm:$0xff]  }
  0x1e   : > { %11461 = vmatmul.mubr.msk.bf16.gmra.mrb[4].mxu1 %vm628_vm0, %v12572_v8  ;;  %11432 = vmatprep.mubr.msk.bf16.mxu0 %vm628_vm0, %v12573_v9  ;;  %v12596_v32 = vld [vmem:[%s13085_s26 + $0xf8] sm:$0xff]  }
  0x1f   : > { %11464 = vmatprep.mubr.msk.bf16.mxu1 %vm628_vm0, %v12574_v10 }
  0x25   : > { %11433 = vmatmul.mubr.msk.bf16.gmra.mrb[8].mxu0 %vm628_vm0, %v12575_v11 }
  0x26   : > { %11465 = vmatmul.mubr.msk.bf16.gmra.mrb[8].mxu1 %vm628_vm0, %v12576_v12  ;;  %11436 = vmatprep.mubr.msk.bf16.mxu0 %vm628_vm0, %v12577_v13 }
  0x27   : > { %11468 = vmatprep.mubr.msk.bf16.mxu1 %vm628_vm0, %v12578_v14 }
  0x2d   : > { %11437 = vmatmul.mubr.msk.bf16.gmra.mrb[12].mxu0 %vm628_vm0, %v12579_v15 }
  0x2e   : > { %11469 = vmatmul.mubr.msk.bf16.gmra.mrb[12].mxu1 %vm628_vm0, %v12580_v16  ;;  %11440 = vmatprep.mubr.msk.bf16.mxu0 %vm628_vm0, %v12581_v17 }
  0x2f   : > { %11472 = vmatprep.mubr.msk.bf16.mxu1 %vm628_vm0, %v12582_v18 }
  0x35   : > { %11441 = vmatmul.mubr.msk.bf16.gmra.mrb[16].mxu0 %vm628_vm0, %v12583_v19 }
  0x36   : > { %11473 = vmatmul.mubr.msk.bf16.gmra.mrb[16].mxu1 %vm628_vm0, %v12584_v20  ;;  %11444 = vmatprep.mubr.msk.bf16.mxu0 %vm628_vm0, %v12585_v21 }
  0x37   : > { %11476 = vmatprep.mubr.msk.bf16.mxu1 %vm628_vm0, %v12586_v22 }
  0x3d   : > { %11445 = vmatmul.mubr.msk.bf16.gmra.mrb[20].mxu0 %vm628_vm0, %v12587_v23 }
  0x3e   : > { %11477 = vmatmul.mubr.msk.bf16.gmra.mrb[20].mxu1 %vm628_vm0, %v12588_v24  ;;  %11448 = vmatprep.mubr.msk.bf16.mxu0 %vm628_vm0, %v12589_v25 }
  0x3f   : > { %11480 = vmatprep.mubr.msk.bf16.mxu1 %vm628_vm0, %v12590_v26 }
  0x45   : > { %11449 = vmatmul.mubr.msk.bf16.gmra.mrb[24].mxu0 %vm628_vm0, %v12591_v27 }
  0x46   : > { %11481 = vmatmul.mubr.msk.bf16.gmra.mrb[24].mxu1 %vm628_vm0, %v12592_v28  ;;  %11452 = vmatprep.mubr.msk.bf16.mxu0 %vm628_vm0, %v12593_v29 }
  0x47   : > { %11484 = vmatprep.mubr.msk.bf16.mxu1 %vm628_vm0, %v12594_v30 }
  0x4d   : > { %11453 = vmatmul.mubr.msk.bf16.gmra.mrb[28].mxu0 %vm628_vm0, %v12595_v31 }
  0x4e   : > { %11485 = vmatmul.mubr.msk.bf16.gmra.mrb[28].mxu1 %vm628_vm0, %v12596_v32 }
  0xe8   : > { %v11426_v39 = vpop.f32.mrb[0].mxu0 }
  0xe9   : > { %v1023_v41 = vmul.f32 %v11426_v39, %v13159_v36  ;;  %v11458_v42 = vpop.f32.mrb[0].mxu1  ;;  %v759_v43 = vpop.f32.mrb[1].mxu0 }
  0xea   : > { %v1055_v45 = vmul.f32 %v11458_v42, %v13159_v36  ;;  %v1021_v46 = vmul.f32 %v13159_v36, %v759_v43  ;;  %v887_v47 = vpop.f32.mrb[1].mxu1  ;;  %v11427_v48 = vpop.f32.mrb[2].mxu0 }
  0xeb   : > { %v1094_v49 = vadd.f32 %v13164_v40, %v1023_v41  ;;  %v1053_v50 = vmul.f32 %v13159_v36, %v887_v47  ;;  %v1024_v51 = vmul.f32 %v11427_v48, %v13159_v36  ;;  %v11459_v52 = vpop.f32.mrb[2].mxu1  ;;  %v762_v53 = vpop.f32.mrb[3].mxu0 }
  0xec   : > { %v1126_v54 = vadd.f32 %v13164_v40, %v1055_v45  ;;  %v1092_v55 = vadd.f32 %v13164_v40, %v1021_v46  ;;  %v1056_v56 = vmul.f32 %v11459_v52, %v13159_v36  ;;  %v1022_v57 = vmul.f32 %v13159_v36, %v762_v53  ;;  %v890_v58 = vpop.f32.mrb[3].mxu1 }
  0xed   : > { %v1158_v59 = vmax.f32 %v1094_v49, 0.0  ;;  %v1124_v60 = vadd.f32 %v13164_v40, %v1053_v50  ;;  %v1095_v61 = vadd.f32 %v13164_v40, %v1024_v51  ;;  %v13181_v62 = vmul.f32 %v13159_v36, %v890_v58 }
  0xee   : > { %v1190_v63 = vmax.f32 %v1126_v54, 0.0  ;;  %v13183_v0 = vmax.f32 %v1092_v55, 0.0  ;;  %v13186_v1 = vadd.f32 %v13164_v40, %v1056_v56  ;;  %v13189_v2 = vadd.f32 %v13164_v40, %v1022_v57 }
  0xef   : > { %v1318_v3 = vcombine.high %v1158_v59, %v1158_v59  ;;  %v1325_v4 = vrot.slane %v1158_v59, %v13167_v44  ;;  %v13192_v5 = vmax.f32 %v1124_v60, 0.0  ;;  %v13194_v6 = vmax.f32 %v1095_v61, 0.0 }
  0xf0   : > { %v1862_v7 = vcombine.high %v1190_v63, %v1190_v63  ;;  %v1869_v8 = vrot.slane %v1190_v63, %v13167_v44  ;;  %v1284_v9 = vcombine.high %v13183_v0, %v13183_v0  ;;  %v13201_v10 = vrot.slane %v13183_v0, %v13167_v44  ;;  %v13203_v11 = vpop.f32.mrb[4].mxu0 }
  0xf1   : > { %v1332_v12 = vrot.slane %v1318_v3, %v13167_v44  ;;  %v1333_v13 = vcombine.high %v1325_v4, %v1325_v4  ;;  %v2685_v14 = vsel %vm2628_vm1, %v1325_v4, -inf  ;;  %v1828_v15 = vcombine.high %v13192_v5, %v13192_v5  ;;  %v13209_v16 = vpop.f32.mrb[4].mxu1  ;;  %v13211_v17 = vpop.f32.mrb[5].mxu0 }
  0xf2   : > { %v2686_v18 = vrot.slane %v2685_v14, 4  ;;  %v1876_v19 = vrot.slane %v1862_v7, %v13167_v44  ;;  %v1877_v20 = vcombine.high %v1869_v8, %v1869_v8  ;;  %v3581_v21 = vsel %vm2628_vm1, %v1869_v8, -inf  ;;  %v13215_v22 = vpop.f32.mrb[5].mxu1  ;;  %v13217_v23 = vpop.f32.mrb[6].mxu0 }
  0xf3   : > { %v1334_v24 = vcombine.high %v1332_v12, %v1332_v12  ;;  %v2692_v25 = vsel %vm2628_vm1, %v1333_v13, -inf  ;;  %v2699_v26 = vsel %vm2628_vm1, %v1332_v12, -inf  ;;  %v3582_v27 = vrot.slane %v3581_v21, 4  ;;  %v13221_v28 = vpop.f32.mrb[6].mxu1  ;;  %v13223_v29 = vpop.f32.mrb[7].mxu0 }
  0xf4   : > { %v2687_v30 = vmax.f32 %v2685_v14, %v2686_v18  ;;  %v2693_v31 = vrot.slane %v2692_v25, 4  ;;  %v2700_v32 = vrot.slane %v2699_v26, 4  ;;  %v1878_v33 = vcombine.high %v1876_v19, %v1876_v19  ;;  %v13225_v34 = vpop.f32.mrb[7].mxu1 }
  0xf5   : > { %v2706_v35 = vsel %vm2628_vm1, %v1334_v24, -inf  ;;  %v3583_v37 = vmax.f32 %v3581_v21, %v3582_v27  ;;  %v3588_v38 = vsel %vm2628_vm1, %v1877_v20, -inf  ;;  %v3595_v39 = vsel %vm2628_vm1, %v1876_v19, -inf }
  0xf6   : > { %v2688_v41 = vrot.slane %v2687_v30, 2  ;;  %v2694_v42 = vmax.f32 %v2692_v25, %v2693_v31  ;;  %v2701_v43 = vmax.f32 %v2699_v26, %v2700_v32  ;;  %v2707_v45 = vrot.slane %v2706_v35, 4 }
  0xf7   : > { %v3584_v46 = vrot.slane %v3583_v37, 2  ;;  %v3589_v47 = vrot.slane %v3588_v38, 4  ;;  %v3596_v48 = vrot.slane %v3595_v39, 4  ;;  %v3602_v49 = vsel %vm2628_vm1, %v1878_v33, -inf }
  0xf8   : > { %v2689_v50 = vmax.f32 %v2687_v30, %v2688_v41  ;;  %v2695_v51 = vrot.slane %v2694_v42, 2  ;;  %v2702_v52 = vrot.slane %v2701_v43, 2  ;;  %v2708_v53 = vmax.f32 %v2706_v35, %v2707_v45  ;;  %v13231_v63 = vpop.f32.mrb[8].mxu0 }
  0xf9   : > { %v3585_v54 = vmax.f32 %v3583_v37, %v3584_v46  ;;  %v3590_v55 = vmax.f32 %v3588_v38, %v3589_v47  ;;  %v3597_v56 = vmax.f32 %v3595_v39, %v3596_v48  ;;  %v3603_v57 = vrot.slane %v3602_v49, 4  ;;  %v13239_v37 = vpop.f32.mrb[8].mxu1 }
  0xfa   : > { %v2690_v58 = vrot.slane %v2689_v50, 1  ;;  %v2696_v59 = vmax.f32 %v2694_v42, %v2695_v51  ;;  %v2703_v60 = vmax.f32 %v2701_v43, %v2702_v52  ;;  %v2709_v61 = vrot.slane %v2708_v53, 2 }
  0xfb   : > { %v3586_v3 = vrot.slane %v3585_v54, 1  ;;  %v3591_v4 = vrot.slane %v3590_v55, 2  ;;  %v3598_v7 = vrot.slane %v3597_v56, 2  ;;  %v3604_v8 = vmax.f32 %v3602_v49, %v3603_v57 }
  0xfc   : > { %v2691_v12 = vmax.f32 %v2689_v50, %v2690_v58  ;;  %v2697_v13 = vrot.slane %v2696_v59, 1  ;;  %v2704_v14 = vrot.slane %v2703_v60, 1  ;;  %v2710_v18 = vmax.f32 %v2708_v53, %v2709_v61 }
  0xfd   : > { %v3587_v19 = vmax.f32 %v3585_v54, %v3586_v3  ;;  %v3592_v20 = vmax.f32 %v3590_v55, %v3591_v4  ;;  %v3599_v21 = vmax.f32 %v3597_v56, %v3598_v7  ;;  %v3605_v24 = vrot.slane %v3604_v8, 2 }
  0xfe   : > { %v2698_v25 = vmax.f32 %v2696_v59, %v2697_v13  ;;  %v2705_v26 = vmax.f32 %v2703_v60, %v2704_v14  ;;  %v2711_v27 = vrot.slane %v2710_v18, 1  ;;  %v1298_v30 = vrot.slane %v1284_v9, %v13167_v44 }
  0xff   : > { %v3593_v31 = vrot.slane %v3592_v20, 1  ;;  %v3600_v32 = vrot.slane %v3599_v21, 1  ;;  %v3606_v33 = vmax.f32 %v3604_v8, %v3605_v24  ;;  %v1299_v35 = vcombine.high %v13201_v10, %v13201_v10 }
 0x100   : > { %v13241_v38 = vmax.f32 %v2710_v18, %v2711_v27  ;;  %v4805_v39 = vsel %vm4791_vm2, %v2698_v25, %v2691_v12  ;;  %v1300_v41 = vcombine.high %v1298_v30, %v1298_v30  ;;  %v2629_v42 = vsel %vm2628_vm1, %v13201_v10, -inf }
 0x101   : > { %v13247_v43 = vsel %vm4793_vm3, %v2705_v26, %v4805_v39  ;;  %v3594_v0 = vmax.f32 %v3592_v20, %v3593_v31  ;;  %v3601_v9 = vmax.f32 %v3599_v21, %v3600_v32  ;;  %v3607_v45 = vrot.slane %v3606_v33, 1  ;;  %v13270_v32 = vpop.f32.mrb[9].mxu0 }
 0x102   : > { %v2630_v46 = vrot.slane %v2629_v42, 4  ;;  %v2636_v47 = vsel %vm2628_vm1, %v1299_v35, -inf  ;;  %v2643_v48 = vsel %vm2628_vm1, %v1298_v30, -inf  ;;  %v2650_v49 = vsel %vm2628_vm1, %v1300_v41, -inf }
 0x103   : > { %v13252_v50 = vmax.f32 %v3606_v33, %v3607_v45  ;;  %v4917_v51 = vsel %vm4791_vm2, %v3594_v0, %v3587_v19  ;;  %v2637_v52 = vrot.slane %v2636_v47, 4  ;;  %v2644_v53 = vrot.slane %v2643_v48, 4 }
 0x104   : > { %v13256_v10 = vsel %vm4793_vm3, %v3601_v9, %v4917_v51  ;;  %v2631_v54 = vmax.f32 %v2629_v42, %v2630_v46  ;;  %v2651_v55 = vrot.slane %v2650_v49, 4  ;;  %v1835_v56 = vrot.slane %v13192_v5, %v13167_v44 }
 0x105   : > { %v2638_v57 = vmax.f32 %v2636_v47, %v2637_v52  ;;  %v2645_v58 = vmax.f32 %v2643_v48, %v2644_v53  ;;  %v1842_v59 = vrot.slane %v1828_v15, %v13167_v44  ;;  %v1335_v60 = vcombine.high %v13194_v6, %v13194_v6 }
 0x106   : > { %v2632_v61 = vrot.slane %v2631_v54, 2  ;;  %v2652_v3 = vmax.f32 %v2650_v49, %v2651_v55  ;;  %v1843_v4 = vcombine.high %v1835_v56, %v1835_v56  ;;  %v3525_v7 = vsel %vm2628_vm1, %v1835_v56, -inf }
 0x107   : > { %v2639_v8 = vrot.slane %v2638_v57, 2  ;;  %v2646_v12 = vrot.slane %v2645_v58, 2  ;;  %v1844_v13 = vcombine.high %v1842_v59, %v1842_v59  ;;  %v3526_v14 = vrot.slane %v3525_v7, 4 }
 0x108   : > { %v2633_v18 = vmax.f32 %v2631_v54, %v2632_v61  ;;  %v2653_v19 = vrot.slane %v2652_v3, 2  ;;  %v3532_v20 = vsel %vm2628_vm1, %v1843_v4, -inf  ;;  %v3539_v21 = vsel %vm2628_vm1, %v1842_v59, -inf }
 0x109   : > { %v2640_v5 = vmax.f32 %v2638_v57, %v2639_v8  ;;  %v2647_v15 = vmax.f32 %v2645_v58, %v2646_v12  ;;  %v3527_v24 = vmax.f32 %v3525_v7, %v3526_v14  ;;  %v3533_v25 = vrot.slane %v3532_v20, 4 }
 0x10a   : > { %v2634_v26 = vrot.slane %v2633_v18, 1  ;;  %v2654_v27 = vmax.f32 %v2652_v3, %v2653_v19  ;;  %v3540_v30 = vrot.slane %v3539_v21, 4  ;;  %v3546_v31 = vsel %vm2628_vm1, %v1844_v13, -inf }
 0x10b   : > { %v2641_v33 = vrot.slane %v2640_v5, 1  ;;  %v2648_v35 = vrot.slane %v2647_v15, 1  ;;  %v3528_v39 = vrot.slane %v3527_v24, 2  ;;  %v3534_v41 = vmax.f32 %v3532_v20, %v3533_v25  ;;  %v13279_v20 = vpop.f32.mrb[9].mxu1 }
 0x10c   : > { %v2635_v42 = vmax.f32 %v2633_v18, %v2634_v26  ;;  %v2655_v0 = vrot.slane %v2654_v27, 1  ;;  %v3541_v9 = vmax.f32 %v3539_v21, %v3540_v30  ;;  %v3547_v45 = vrot.slane %v3546_v31, 4 }
 0x10d   : > { %v2642_v46 = vmax.f32 %v2640_v5, %v2641_v33  ;;  %v2649_v47 = vmax.f32 %v2647_v15, %v2648_v35  ;;  %v3529_v48 = vmax.f32 %v3527_v24, %v3528_v39  ;;  %v3535_v49 = vrot.slane %v3534_v41, 2 }
 0x10e   : > { %v2656_v51 = vmax.f32 %v2654_v27, %v2655_v0  ;;  %v3542_v52 = vrot.slane %v3541_v9, 2  ;;  %v3548_v53 = vmax.f32 %v3546_v31, %v3547_v45  ;;  %v1342_v54 = vrot.slane %v13194_v6, %v13167_v44 }
 0x10f   : > { %v4792_v55 = vsel %vm4791_vm2, %v2642_v46, %v2635_v42  ;;  %v3530_v56 = vrot.slane %v3529_v48, 1  ;;  %v3536_v57 = vmax.f32 %v3534_v41, %v3535_v49  ;;  %v1349_v58 = vrot.slane %v1335_v60, %v13167_v44 }
 0x110   : > { %v4794_v59 = vsel %vm4793_vm3, %v2649_v47, %v4792_v55  ;;  %v3543_v61 = vmax.f32 %v3541_v9, %v3542_v52  ;;  %v3549_v3 = vrot.slane %v3548_v53, 2  ;;  %v1350_v4 = vcombine.high %v1342_v54, %v1342_v54 }
 0x111   : > { %v3531_v7 = vmax.f32 %v3529_v48, %v3530_v56  ;;  %v3537_v8 = vrot.slane %v3536_v57, 1  ;;  %v1351_v12 = vcombine.high %v1349_v58, %v1349_v58  ;;  %v2713_v13 = vsel %vm2628_vm1, %v1342_v54, -inf }
 0x112   : > { %v3544_v14 = vrot.slane %v3543_v61, 1  ;;  %v3550_v18 = vmax.f32 %v3548_v53, %v3549_v3  ;;  %v2714_v19 = vrot.slane %v2713_v13, 4  ;;  %v2720_v6 = vsel %vm2628_vm1, %v1350_v4, -inf }
 0x113   : > { %v3538_v21 = vmax.f32 %v3536_v57, %v3537_v8  ;;  %v2721_v5 = vrot.slane %v2720_v6, 4  ;;  %v2727_v60 = vsel %vm2628_vm1, %v1349_v58, -inf  ;;  %v2734_v15 = vsel %vm2628_vm1, %v1351_v12, -inf }
 0x114   : > { %v3545_v24 = vmax.f32 %v3543_v61, %v3544_v14  ;;  %v3551_v25 = vrot.slane %v3550_v18, 1  ;;  %v2715_v26 = vmax.f32 %v2713_v13, %v2714_v19  ;;  %v2728_v27 = vrot.slane %v2727_v60, 4 }
 0x115   : > { %v4910_v30 = vsel %vm4791_vm2, %v3538_v21, %v3531_v7  ;;  %v2722_v31 = vmax.f32 %v2720_v6, %v2721_v5  ;;  %v2735_v33 = vrot.slane %v2734_v15, 4  ;;  %v4807_v35 = vsel %vm4795_vm4, %v13241_v38, %v13247_v43  ;;  %v13310_v21 = vpop.f32.mrb[10].mxu0 }
 0x116   : > { %v13287_v39 = vmax.f32 %v3550_v18, %v3551_v25  ;;  %v13290_v41 = vsel %vm4793_vm3, %v3545_v24, %v4910_v30  ;;  %v2716_v42 = vrot.slane %v2715_v26, 2  ;;  %v2729_v0 = vmax.f32 %v2727_v60, %v2728_v27 }
 0x117   : > { %v2723_v9 = vrot.slane %v2722_v31, 2  ;;  %v2736_v45 = vmax.f32 %v2734_v15, %v2735_v33  ;;  %v1191_v46 = vmax.f32 %v13186_v1, 0.0  ;;  %v13296_v47 = vsel %vm4795_vm4, %v13252_v50, %v13256_v10 }
 0x118   : > { %v2717_v48 = vmax.f32 %v2715_v26, %v2716_v42  ;;  %v2730_v49 = vrot.slane %v2729_v0, 2  ;;  %v1157_v38 = vmax.f32 %v13189_v2, 0.0  ;;  %v13300_v43 = vsel %vm4795_vm4, %v2656_v51, %v4794_v59 }
 0x119   : > { %v2724_v52 = vmax.f32 %v2722_v31, %v2723_v9  ;;  %v2737_v53 = vrot.slane %v2736_v45, 2  ;;  %v1879_v54 = vcombine.high %v1191_v46, %v1191_v46  ;;  %v1886_v55 = vrot.slane %v1191_v46, %v13167_v44 }
 0x11a   : > { %v2718_v56 = vrot.slane %v2717_v48, 1  ;;  %v2731_v57 = vmax.f32 %v2729_v0, %v2730_v49  ;;  %v1301_v1 = vcombine.high %v1157_v38, %v1157_v38  ;;  %v1308_v58 = vrot.slane %v1157_v38, %v13167_v44 }
 0x11b   : > { %v2725_v61 = vrot.slane %v2724_v52, 1  ;;  %v2738_v50 = vmax.f32 %v2736_v45, %v2737_v53  ;;  %v1893_v10 = vrot.slane %v1879_v54, %v13167_v44  ;;  %v1894_v3 = vcombine.high %v1886_v55, %v1886_v55 }
 0x11c   : > { %v2719_v4 = vmax.f32 %v2717_v48, %v2718_v56  ;;  %v2732_v2 = vrot.slane %v2731_v57, 1  ;;  %v3609_v51 = vsel %vm2628_vm1, %v1886_v55, -inf  ;;  %v1315_v59 = vrot.slane %v1301_v1, %v13167_v44 }
 0x11d   : > { %v2726_v7 = vmax.f32 %v2724_v52, %v2725_v61  ;;  %v2739_v8 = vrot.slane %v2738_v50, 1  ;;  %v1895_v12 = vcombine.high %v1893_v10, %v1893_v10  ;;  %v3610_v13 = vrot.slane %v3609_v51, 4 }
 0x11e   : > { %v2733_v14 = vmax.f32 %v2731_v57, %v2732_v2  ;;  %v4808_v18 = vsel %vm4797_vm5, %v2719_v4, %v4807_v35  ;;  %v3616_v19 = vsel %vm2628_vm1, %v1894_v3, -inf  ;;  %v3623_v6 = vsel %vm2628_vm1, %v1893_v10, -inf  ;;  %v13320_v57 = vpop.f32.mrb[10].mxu1 }
 0x11f   : > { %v2740_v5 = vmax.f32 %v2738_v50, %v2739_v8  ;;  %v4809_v60 = vsel %vm4799_vm6, %v2726_v7, %v4808_v18  ;;  %v3611_v15 = vmax.f32 %v3609_v51, %v3610_v13  ;;  %v3617_v24 = vrot.slane %v3616_v19, 4 }
 0x120   : > { %v4810_v25 = vsel %vm4801_vm7, %v2733_v14, %v4809_v60  ;;  %v3624_v26 = vrot.slane %v3623_v6, 4  ;;  %v3630_v27 = vsel %vm2628_vm1, %v1895_v12, -inf  ;;  %v1316_v30 = vcombine.high %v1308_v58, %v1308_v58 }
 0x121   : > { %v4811_v31 = vsel %vm4803_vm8, %v2740_v5, %v4810_v25  ;;  %v3612_v33 = vrot.slane %v3611_v15, 2  ;;  %v3618_v35 = vmax.f32 %v3616_v19, %v3617_v24  ;;  %v3631_v42 = vrot.slane %v3630_v27, 4 }
 0x122   : > { %5055 = vst [vmem:[#allocation2 + $0x80] sm:$0xff] %v4811_v31  ;;  %v3625_v0 = vmax.f32 %v3623_v6, %v3624_v26  ;;  %v1317_v9 = vcombine.high %v1315_v59, %v1315_v59  ;;  %v2657_v45 = vsel %vm2628_vm1, %v1308_v58, -inf  ;;  %v2664_v46 = vsel %vm2628_vm1, %v1316_v30, -inf }
 0x123   : > { %v3613_v48 = vmax.f32 %v3611_v15, %v3612_v33  ;;  %v3619_v49 = vrot.slane %v3618_v35, 2  ;;  %v3632_v38 = vmax.f32 %v3630_v27, %v3631_v42  ;;  %v2658_v52 = vrot.slane %v2657_v45, 4 }
 0x124   : > { %v3626_v53 = vrot.slane %v3625_v0, 2  ;;  %v2665_v54 = vrot.slane %v2664_v46, 4  ;;  %v2671_v55 = vsel %vm2628_vm1, %v1315_v59, -inf  ;;  %v2678_v56 = vsel %vm2628_vm1, %v1317_v9, -inf }
 0x125   : > { %v3614_v1 = vrot.slane %v3613_v48, 1  ;;  %v3620_v61 = vmax.f32 %v3618_v35, %v3619_v49  ;;  %v3633_v50 = vrot.slane %v3632_v38, 2  ;;  %v2659_v10 = vmax.f32 %v2657_v45, %v2658_v52 }
 0x126   : > { %v3627_v3 = vmax.f32 %v3625_v0, %v3626_v53  ;;  %v2666_v58 = vmax.f32 %v2664_v46, %v2665_v54  ;;  %v2672_v4 = vrot.slane %v2671_v55, 4  ;;  %v2679_v2 = vrot.slane %v2678_v56, 4 }
 0x127   : > { %v3615_v51 = vmax.f32 %v3613_v48, %v3614_v1  ;;  %v3621_v7 = vrot.slane %v3620_v61, 1  ;;  %v3634_v8 = vmax.f32 %v3632_v38, %v3633_v50  ;;  %v2660_v12 = vrot.slane %v2659_v10, 2 }
 0x128   : > { %v3628_v13 = vrot.slane %v3627_v3, 1  ;;  %v2667_v14 = vrot.slane %v2666_v58, 2  ;;  %v2673_v18 = vmax.f32 %v2671_v55, %v2672_v4  ;;  %v2680_v59 = vmax.f32 %v2678_v56, %v2679_v2  ;;  %v13349_v2 = vpop.f32.mrb[11].mxu0 }
 0x129   : > { %v3622_v19 = vmax.f32 %v3620_v61, %v3621_v7  ;;  %v3635_v6 = vrot.slane %v3634_v8, 1  ;;  %v4920_v5 = vsel %vm4797_vm5, %v3615_v51, %v13296_v47  ;;  %v2661_v60 = vmax.f32 %v2659_v10, %v2660_v12 }
 0x12a   : > { %v3629_v15 = vmax.f32 %v3627_v3, %v3628_v13  ;;  %v2668_v24 = vmax.f32 %v2666_v58, %v2667_v14  ;;  %v2674_v25 = vrot.slane %v2673_v18, 2  ;;  %v2681_v26 = vrot.slane %v2680_v59, 2 }
 0x12b   : > { %v3636_v27 = vmax.f32 %v3634_v8, %v3635_v6  ;;  %v4921_v30 = vsel %vm4799_vm6, %v3622_v19, %v4920_v5  ;;  %v2662_v31 = vrot.slane %v2661_v60, 1  ;;  %v1125_v33 = vadd.f32 %v13164_v40, %v13181_v62 }
 0x12c   : > { %v4922_v35 = vsel %vm4801_vm7, %v3629_v15, %v4921_v30  ;;  %v2669_v42 = vrot.slane %v2668_v24, 1  ;;  %v2675_v0 = vmax.f32 %v2673_v18, %v2674_v25  ;;  %v2682_v9 = vmax.f32 %v2680_v59, %v2681_v26 }
 0x12d   : > { %v4923_v45 = vsel %vm4803_vm8, %v3636_v27, %v4922_v35  ;;  %v2663_v47 = vmax.f32 %v2661_v60, %v2662_v31  ;;  %v1189_v46 = vmax.f32 %v1125_v33, 0.0  ;;  %v13332_v48 = vsel %vm4795_vm4, %v13287_v39, %v13290_v41  ;;  %v13361_v33 = vpop.f32.mrb[11].mxu1 }
 0x12e   : > { %5071 = vst [vmem:[#allocation2 + $0x2c0] sm:$0xff] %v4923_v45  ;;  %v2670_v49 = vmax.f32 %v2668_v24, %v2669_v42  ;;  %v2676_v38 = vrot.slane %v2675_v0, 1  ;;  %v2683_v52 = vrot.slane %v2682_v9, 1  ;;  %v1027_v62 = vmul.f32 %v13203_v11, %v13159_v36 }
 0x12f   : > { %v4798_v53 = vsel %vm4797_vm5, %v2663_v47, %v13300_v43  ;;  %v1845_v54 = vcombine.high %v1189_v46, %v1189_v46  ;;  %v1852_v55 = vrot.slane %v1189_v46, %v13167_v44  ;;  %v1059_v56 = vmul.f32 %v13209_v16, %v13159_v36 }
 0x130   : > { %v2677_v1 = vmax.f32 %v2675_v0, %v2676_v38  ;;  %v2684_v61 = vmax.f32 %v2682_v9, %v2683_v52  ;;  %v4800_v39 = vsel %vm4799_vm6, %v2670_v49, %v4798_v53  ;;  %v1098_v41 = vadd.f32 %v13164_v40, %v1027_v62 }
 0x131   : > { %v1859_v50 = vrot.slane %v1845_v54, %v13167_v44  ;;  %v1860_v10 = vcombine.high %v1852_v55, %v1852_v55  ;;  %v3553_v11 = vsel %vm2628_vm1, %v1852_v55, -inf  ;;  %v1130_v3 = vadd.f32 %v13164_v40, %v1059_v56 }
 0x132   : > { %v4802_v43 = vsel %vm4801_vm7, %v2677_v1, %v4800_v39  ;;  %v3554_v58 = vrot.slane %v3553_v11, 4  ;;  %v1162_v4 = vmax.f32 %v1098_v41, 0.0  ;;  %v1025_v16 = vmul.f32 %v13159_v36, %v13211_v17 }
 0x133   : > { %v4804_v51 = vsel %vm4803_vm8, %v2684_v61, %v4802_v43  ;;  %v1861_v7 = vcombine.high %v1859_v50, %v1859_v50  ;;  %v3560_v8 = vsel %vm2628_vm1, %v1860_v10, -inf  ;;  %v3567_v12 = vsel %vm2628_vm1, %v1859_v50, -inf }
 0x134   : > { %5054 = vst [vmem:[#allocation2 + $0x68] sm:$0xff] %v4804_v51  ;;  %v3555_v13 = vmax.f32 %v3553_v11, %v3554_v58  ;;  %v3561_v14 = vrot.slane %v3560_v8, 4  ;;  %v3568_v18 = vrot.slane %v3567_v12, 4  ;;  %v1386_v59 = vcombine.high %v1162_v4, %v1162_v4 }
 0x135   : > { %v3574_v19 = vsel %vm2628_vm1, %v1861_v7, -inf  ;;  %v1393_v6 = vrot.slane %v1162_v4, %v13167_v44  ;;  %v1194_v5 = vmax.f32 %v1130_v3, 0.0  ;;  %v13357_v17 = vadd.f32 %v13164_v40, %v1025_v16 }
 0x136   : > { %v3556_v60 = vrot.slane %v3555_v13, 2  ;;  %v3562_v15 = vmax.f32 %v3560_v8, %v3561_v14  ;;  %v3569_v24 = vmax.f32 %v3567_v12, %v3568_v18  ;;  %v3575_v25 = vrot.slane %v3574_v19, 4 }
 0x137   : > { %v1400_v26 = vrot.slane %v1386_v59, %v13167_v44  ;;  %v1401_v27 = vcombine.high %v1393_v6, %v1393_v6  ;;  %v2797_v30 = vsel %vm2628_vm1, %v1393_v6, -inf  ;;  %v1930_v31 = vcombine.high %v1194_v5, %v1194_v5 }
 0x138   : > { %v3557_v35 = vmax.f32 %v3555_v13, %v3556_v60  ;;  %v3563_v42 = vrot.slane %v3562_v15, 2  ;;  %v3570_v0 = vrot.slane %v3569_v24, 2  ;;  %v3576_v9 = vmax.f32 %v3574_v19, %v3575_v25 }
 0x139   : > { %v1402_v45 = vcombine.high %v1400_v26, %v1400_v26  ;;  %v2798_v47 = vrot.slane %v2797_v30, 4  ;;  %v2804_v46 = vsel %vm2628_vm1, %v1401_v27, -inf  ;;  %v2811_v49 = vsel %vm2628_vm1, %v1400_v26, -inf }
 0x13a   : > { %v3558_v38 = vrot.slane %v3557_v35, 1  ;;  %v3564_v52 = vmax.f32 %v3562_v15, %v3563_v42  ;;  %v3571_v62 = vmax.f32 %v3569_v24, %v3570_v0  ;;  %v3577_v53 = vrot.slane %v3576_v9, 2 }
 0x13b   : > { %v2799_v54 = vmax.f32 %v2797_v30, %v2798_v47  ;;  %v2805_v55 = vrot.slane %v2804_v46, 4  ;;  %v2812_v56 = vrot.slane %v2811_v49, 4  ;;  %v2818_v1 = vsel %vm2628_vm1, %v1402_v45, -inf }
 0x13c   : > { %v3559_v61 = vmax.f32 %v3557_v35, %v3558_v38  ;;  %v3565_v39 = vrot.slane %v3564_v52, 1  ;;  %v3572_v41 = vrot.slane %v3571_v62, 1  ;;  %v3578_v50 = vmax.f32 %v3576_v9, %v3577_v53 }
 0x13d   : > { %v2800_v10 = vrot.slane %v2799_v54, 2  ;;  %v2806_v11 = vmax.f32 %v2804_v46, %v2805_v55  ;;  %v2813_v3 = vmax.f32 %v2811_v49, %v2812_v56  ;;  %v2819_v43 = vrot.slane %v2818_v1, 4 }
 0x13e   : > { %v3566_v58 = vmax.f32 %v3564_v52, %v3565_v39  ;;  %v3573_v4 = vmax.f32 %v3571_v62, %v3572_v41  ;;  %v3579_v16 = vrot.slane %v3578_v50, 1  ;;  %v4913_v51 = vsel %vm4797_vm5, %v3559_v61, %v13332_v48 }
 0x13f   : > { %v2801_v7 = vmax.f32 %v2799_v54, %v2800_v10  ;;  %v2807_v8 = vrot.slane %v2806_v11, 2  ;;  %v2814_v12 = vrot.slane %v2813_v3, 2  ;;  %v2820_v13 = vmax.f32 %v2818_v1, %v2819_v43 }
 0x140   : > { %v3580_v14 = vmax.f32 %v3578_v50, %v3579_v16  ;;  %v4914_v18 = vsel %vm4799_vm6, %v3566_v58, %v4913_v51  ;;  %v1937_v59 = vrot.slane %v1194_v5, %v13167_v44  ;;  %v1944_v19 = vrot.slane %v1930_v31, %v13167_v44 }
 0x141   : > { %v4915_v6 = vsel %vm4801_vm7, %v3573_v4, %v4914_v18  ;;  %v2802_v60 = vrot.slane %v2801_v7, 1  ;;  %v2808_v15 = vmax.f32 %v2806_v11, %v2807_v8  ;;  %v2815_v24 = vmax.f32 %v2813_v3, %v2814_v12 }
 0x142   : > { %v4916_v25 = vsel %vm4803_vm8, %v3580_v14, %v4915_v6  ;;  %v2821_v26 = vrot.slane %v2820_v13, 2  ;;  %v1945_v48 = vcombine.high %v1937_v59, %v1937_v59  ;;  %v1946_v27 = vcombine.high %v1944_v19, %v1944_v19 }
 0x143   : > { %5070 = vst [vmem:[#allocation2 + $0x2a8] sm:$0xff] %v4916_v25  ;;  %v2803_v30 = vmax.f32 %v2801_v7, %v2802_v60  ;;  %v2809_v35 = vrot.slane %v2808_v15, 1  ;;  %v2816_v42 = vrot.slane %v2815_v24, 1  ;;  %v3693_v0 = vsel %vm2628_vm1, %v1937_v59, -inf }
 0x144   : > { %v2822_v9 = vmax.f32 %v2820_v13, %v2821_v26  ;;  %v3694_v5 = vrot.slane %v3693_v0, 4  ;;  %v3700_v31 = vsel %vm2628_vm1, %v1945_v48, -inf  ;;  %v3707_v45 = vsel %vm2628_vm1, %v1944_v19, -inf  ;;  %v13390_v48 = vpop.f32.mrb[12].mxu0 }
 0x145   : > { %v2810_v47 = vmax.f32 %v2808_v15, %v2809_v35  ;;  %v2817_v46 = vmax.f32 %v2815_v24, %v2816_v42  ;;  %v3701_v49 = vrot.slane %v3700_v31, 4  ;;  %v3708_v38 = vrot.slane %v3707_v45, 4 }
 0x146   : > { %v2823_v52 = vrot.slane %v2822_v9, 1  ;;  %v3695_v62 = vmax.f32 %v3693_v0, %v3694_v5  ;;  %v3714_v53 = vsel %vm2628_vm1, %v1946_v27, -inf  ;;  %v1160_v54 = vmax.f32 %v13357_v17, 0.0  ;;  %v13392_v27 = vpop.f32.mrb[12].mxu1 }
 0x147   : > { %v4819_v55 = vsel %vm4791_vm2, %v2810_v47, %v2803_v30  ;;  %v3702_v56 = vmax.f32 %v3700_v31, %v3701_v49  ;;  %v3709_v1 = vmax.f32 %v3707_v45, %v3708_v38  ;;  %v3715_v61 = vrot.slane %v3714_v53, 4 }
 0x148   : > { %v2824_v39 = vmax.f32 %v2822_v9, %v2823_v52  ;;  %v4820_v41 = vsel %vm4793_vm3, %v2817_v46, %v4819_v55  ;;  %v3696_v50 = vrot.slane %v3695_v62, 2  ;;  %v1352_v10 = vcombine.high %v1160_v54, %v1160_v54 }
 0x149   : > { %v3703_v11 = vrot.slane %v3702_v56, 2  ;;  %v3710_v3 = vrot.slane %v3709_v1, 2  ;;  %v3716_v43 = vmax.f32 %v3714_v53, %v3715_v61  ;;  %v1359_v58 = vrot.slane %v1160_v54, %v13167_v44 }
 0x14a   : > { %v3697_v4 = vmax.f32 %v3695_v62, %v3696_v50  ;;  %v1366_v16 = vrot.slane %v1352_v10, %v13167_v44  ;;  %v1057_v17 = vmul.f32 %v13159_v36, %v13215_v22  ;;  %v1028_v51 = vmul.f32 %v13217_v23, %v13159_v36 }
 0x14b   : > { %v3704_v7 = vmax.f32 %v3702_v56, %v3703_v11  ;;  %v3711_v8 = vmax.f32 %v3709_v1, %v3710_v3  ;;  %v3717_v12 = vrot.slane %v3716_v43, 2  ;;  %v1367_v13 = vcombine.high %v1359_v58, %v1359_v58 }
 0x14c   : > { %v3698_v14 = vrot.slane %v3697_v4, 1  ;;  %v1368_v18 = vcombine.high %v1366_v16, %v1366_v16  ;;  %v2741_v59 = vsel %vm2628_vm1, %v1359_v58, -inf  ;;  %v2755_v19 = vsel %vm2628_vm1, %v1366_v16, -inf }
 0x14d   : > { %v3705_v6 = vrot.slane %v3704_v7, 1  ;;  %v3712_v60 = vrot.slane %v3711_v8, 1  ;;  %v3718_v15 = vmax.f32 %v3716_v43, %v3717_v12  ;;  %v2742_v24 = vrot.slane %v2741_v59, 4 }
 0x14e   : > { %v3699_v25 = vmax.f32 %v3697_v4, %v3698_v14  ;;  %v2748_v22 = vsel %vm2628_vm1, %v1367_v13, -inf  ;;  %v2756_v26 = vrot.slane %v2755_v19, 4  ;;  %v2762_v23 = vsel %vm2628_vm1, %v1368_v18, -inf }
 0x14f   : > { %v3706_v30 = vmax.f32 %v3704_v7, %v3705_v6  ;;  %v3713_v35 = vmax.f32 %v3711_v8, %v3712_v60  ;;  %v3719_v42 = vrot.slane %v3718_v15, 1  ;;  %v2743_v0 = vmax.f32 %v2741_v59, %v2742_v24 }
 0x150   : > { %v2749_v9 = vrot.slane %v2748_v22, 4  ;;  %v2757_v5 = vmax.f32 %v2755_v19, %v2756_v26  ;;  %v2763_v31 = vrot.slane %v2762_v23, 4  ;;  %v1128_v45 = vadd.f32 %v13164_v40, %v1057_v17 }
 0x151   : > { %v13395_v47 = vmax.f32 %v3718_v15, %v3719_v42  ;;  %v4931_v46 = vsel %vm4791_vm2, %v3706_v30, %v3699_v25  ;;  %v2744_v49 = vrot.slane %v2743_v0, 2  ;;  %v1099_v38 = vadd.f32 %v13164_v40, %v1028_v51 }
 0x152   : > { %v13400_v52 = vsel %vm4793_vm3, %v3713_v35, %v4931_v46  ;;  %v2750_v62 = vmax.f32 %v2748_v22, %v2749_v9  ;;  %v2758_v53 = vrot.slane %v2757_v5, 2  ;;  %v2764_v54 = vmax.f32 %v2762_v23, %v2763_v31  ;;  %v13419_v35 = vpop.f32.mrb[13].mxu0 }
 0x153   : > { %v2745_v55 = vmax.f32 %v2743_v0, %v2744_v49  ;;  %v1192_v56 = vmax.f32 %v1128_v45, 0.0  ;;  %v1163_v1 = vmax.f32 %v1099_v38, 0.0  ;;  %v13403_v61 = vsel %vm4795_vm4, %v2824_v39, %v4820_v41 }
 0x154   : > { %v2751_v50 = vrot.slane %v2750_v62, 2  ;;  %v2759_v10 = vmax.f32 %v2757_v5, %v2758_v53  ;;  %v2765_v11 = vrot.slane %v2764_v54, 2  ;;  %v13407_v3 = vmul.f32 %v13221_v28, %v13159_v36 }
 0x155   : > { %v2746_v40 = vrot.slane %v2745_v55, 1  ;;  %v1896_v43 = vcombine.high %v1192_v56, %v1192_v56  ;;  %v1903_v58 = vrot.slane %v1192_v56, %v13167_v44  ;;  %v1403_v4 = vcombine.high %v1163_v1, %v1163_v1 }
 0x156   : > { %v2752_v16 = vmax.f32 %v2750_v62, %v2751_v50  ;;  %v2760_v17 = vrot.slane %v2759_v10, 1  ;;  %v2766_v51 = vmax.f32 %v2764_v54, %v2765_v11  ;;  %v1410_v7 = vrot.slane %v1163_v1, %v13167_v44 }
 0x157   : > { %v2747_v8 = vmax.f32 %v2745_v55, %v2746_v40  ;;  %v1910_v39 = vrot.slane %v1896_v43, %v13167_v44  ;;  %v1911_v41 = vcombine.high %v1903_v58, %v1903_v58  ;;  %v3637_v12 = vsel %vm2628_vm1, %v1903_v58, -inf }
 0x158   : > { %v2753_v13 = vrot.slane %v2752_v16, 1  ;;  %v2761_v14 = vmax.f32 %v2759_v10, %v2760_v17  ;;  %v2767_v36 = vrot.slane %v2766_v51, 1  ;;  %v3638_v28 = vrot.slane %v3637_v12, 4 }
 0x159   : > { %v1912_v18 = vcombine.high %v1910_v39, %v1910_v39  ;;  %v3644_v59 = vsel %vm2628_vm1, %v1911_v41, -inf  ;;  %v3651_v19 = vsel %vm2628_vm1, %v1910_v39, -inf  ;;  %v1417_v6 = vrot.slane %v1403_v4, %v13167_v44 }
 0x15a   : > { %v2754_v60 = vmax.f32 %v2752_v16, %v2753_v13  ;;  %v13416_v15 = vmax.f32 %v2766_v51, %v2767_v36  ;;  %v3639_v24 = vmax.f32 %v3637_v12, %v3638_v28  ;;  %v3645_v25 = vrot.slane %v3644_v59, 4  ;;  %v13429_v51 = vpop.f32.mrb[13].mxu1 }
 0x15b   : > { %v3652_v22 = vrot.slane %v3651_v19, 4  ;;  %v3658_v26 = vsel %vm2628_vm1, %v1912_v18, -inf  ;;  %v1418_v23 = vcombine.high %v1410_v7, %v1410_v7  ;;  %v1419_v30 = vcombine.high %v1417_v6, %v1417_v6 }
 0x15c   : > { %v4812_v42 = vsel %vm4791_vm2, %v2754_v60, %v2747_v8  ;;  %v3640_v0 = vrot.slane %v3639_v24, 2  ;;  %v3646_v9 = vmax.f32 %v3644_v59, %v3645_v25  ;;  %v3659_v5 = vrot.slane %v3658_v26, 4 }
 0x15d   : > { %v13423_v31 = vsel %vm4793_vm3, %v2761_v14, %v4812_v42  ;;  %v3653_v45 = vmax.f32 %v3651_v19, %v3652_v22  ;;  %v2825_v46 = vsel %vm2628_vm1, %v1410_v7, -inf  ;;  %v2832_v49 = vsel %vm2628_vm1, %v1418_v23, -inf  ;;  %v13434_v19 = vld [vmem:[%s16363_s3] ss:$0 sm:$0xff] }
 0x15e   : > { %v3641_v38 = vmax.f32 %v3639_v24, %v3640_v0  ;;  %v3647_v62 = vrot.slane %v3646_v9, 2  ;;  %v3660_v53 = vmax.f32 %v3658_v26, %v3659_v5  ;;  %v2826_v54 = vrot.slane %v2825_v46, 4 }
 0x15f   : > { %v3654_v55 = vrot.slane %v3653_v45, 2  ;;  %v2833_v56 = vrot.slane %v2832_v49, 4  ;;  %v2839_v1 = vsel %vm2628_vm1, %v1417_v6, -inf  ;;  %v2846_v50 = vsel %vm2628_vm1, %v1419_v30, -inf }
 0x160   : > { %v3642_v10 = vrot.slane %v3641_v38, 1  ;;  %v3648_v11 = vmax.f32 %v3646_v9, %v3647_v62  ;;  %v3661_v40 = vrot.slane %v3660_v53, 2  ;;  %v2827_v43 = vmax.f32 %v2825_v46, %v2826_v54 }
 0x161   : > { %v3655_v58 = vmax.f32 %v3653_v45, %v3654_v55  ;;  %v2834_v4 = vmax.f32 %v2832_v49, %v2833_v56  ;;  %v2840_v16 = vrot.slane %v2839_v1, 4  ;;  %v2847_v17 = vrot.slane %v2846_v50, 4  ;;  %v13449_v55 = vld [vmem:[%s16362_s2] ss:$0 sm:$0xff] }
 0x162   : > { %v3643_v7 = vmax.f32 %v3641_v38, %v3642_v10  ;;  %v3649_v8 = vrot.slane %v3648_v11, 1  ;;  %v3662_v39 = vmax.f32 %v3660_v53, %v3661_v40  ;;  %v2828_v41 = vrot.slane %v2827_v43, 2 }
 0x163   : > { %v3656_v12 = vrot.slane %v3655_v58, 1  ;;  %v2835_v13 = vrot.slane %v2834_v4, 2  ;;  %v2841_v14 = vmax.f32 %v2839_v1, %v2840_v16  ;;  %v2848_v36 = vmax.f32 %v2846_v50, %v2847_v17 }
 0x164   : > { %v3650_v28 = vmax.f32 %v3648_v11, %v3649_v8  ;;  %v3663_v18 = vrot.slane %v3662_v39, 1  ;;  %v2829_v59 = vmax.f32 %v2827_v43, %v2828_v41  ;;  %v1131_v6 = vadd.f32 %v13434_v19, %v13407_v3 }
 0x165   : > { %v3657_v60 = vmax.f32 %v3655_v58, %v3656_v12  ;;  %v2836_v24 = vmax.f32 %v2834_v4, %v2835_v13  ;;  %v2842_v25 = vrot.slane %v2841_v14, 2  ;;  %v2849_v22 = vrot.slane %v2848_v36, 2 }
 0x166   : > { %v3664_v26 = vmax.f32 %v3662_v39, %v3663_v18  ;;  %v4924_v23 = vsel %vm4791_vm2, %v3650_v28, %v3643_v7  ;;  %v2830_v30 = vrot.slane %v2829_v59, 1  ;;  %v1195_v42 = vmax.f32 %v1131_v6, 0.0  ;;  %v13462_v39 = vpop.f32.mrb[14].mxu0 }
 0x167   : > { %v4925_v0 = vsel %vm4793_vm3, %v3657_v60, %v4924_v23  ;;  %v2837_v9 = vrot.slane %v2836_v24, 1  ;;  %v2843_v5 = vmax.f32 %v2841_v14, %v2842_v25  ;;  %v2850_v45 = vmax.f32 %v2848_v36, %v2849_v22 }
 0x168   : > { %v2831_v46 = vmax.f32 %v2829_v59, %v2830_v30  ;;  %v1947_v49 = vcombine.high %v1195_v42, %v1195_v42  ;;  %v1954_v38 = vrot.slane %v1195_v42, %v13167_v44  ;;  %v13444_v3 = vsel %vm4795_vm4, %v13395_v47, %v13400_v52 }
 0x169   : > { %v2838_v62 = vmax.f32 %v2836_v24, %v2837_v9  ;;  %v2844_v53 = vrot.slane %v2843_v5, 1  ;;  %v2851_v54 = vrot.slane %v2850_v45, 1  ;;  %v1026_v56 = vmul.f32 %v13449_v55, %v13223_v29 }
 0x16a   : > { %v4822_v1 = vsel %vm4797_vm5, %v2831_v46, %v13403_v61  ;;  %v1961_v50 = vrot.slane %v1947_v49, %v13167_v44  ;;  %v1962_v10 = vcombine.high %v1954_v38, %v1954_v38  ;;  %v3721_v47 = vsel %vm2628_vm1, %v1954_v38, -inf }
 0x16b   : > { %v2845_v52 = vmax.f32 %v2843_v5, %v2844_v53  ;;  %v2852_v11 = vmax.f32 %v2850_v45, %v2851_v54  ;;  %v4823_v40 = vsel %vm4799_vm6, %v2838_v62, %v4822_v1  ;;  %v3722_v43 = vrot.slane %v3721_v47, 4  ;;  %v13480_v45 = vpop.f32.mrb[14].mxu1 }
 0x16c   : > { %v1963_v58 = vcombine.high %v1961_v50, %v1961_v50  ;;  %v3728_v4 = vsel %vm2628_vm1, %v1962_v10, -inf  ;;  %v3735_v16 = vsel %vm2628_vm1, %v1961_v50, -inf  ;;  %v1097_v29 = vadd.f32 %v13434_v19, %v1026_v56 }
 0x16d   : > { %v4824_v17 = vsel %vm4801_vm7, %v2845_v52, %v4823_v40  ;;  %v3723_v61 = vmax.f32 %v3721_v47, %v3722_v43  ;;  %v3729_v7 = vrot.slane %v3728_v4, 4  ;;  %v3736_v8 = vrot.slane %v3735_v16, 4 }
 0x16e   : > { %v4825_v41 = vsel %vm4803_vm8, %v2852_v11, %v4824_v17  ;;  %v3742_v12 = vsel %vm2628_vm1, %v1963_v58, -inf  ;;  %v1161_v13 = vmax.f32 %v1097_v29, 0.0  ;;  %v13469_v14 = vsel %vm4795_vm4, %v13416_v15, %v13423_v31 }
 0x16f   : > { %5057 = vst [vmem:[#allocation2 + $0xb0] sm:$0xff] %v4825_v41  ;;  %v3724_v36 = vrot.slane %v3723_v61, 2  ;;  %v3730_v28 = vmax.f32 %v3728_v4, %v3729_v7  ;;  %v3737_v18 = vmax.f32 %v3735_v16, %v3736_v8  ;;  %v3743_v59 = vrot.slane %v3742_v12, 4 }
 0x170   : > { %v1369_v6 = vcombine.high %v1161_v13, %v1161_v13  ;;  %v1376_v60 = vrot.slane %v1161_v13, %v13167_v44  ;;  %v1058_v24 = vmul.f32 %v13449_v55, %v13225_v34  ;;  %v13475_v25 = vsel %vm4795_vm4, %v3664_v26, %v4925_v0 }
 0x171   : > { %v3725_v22 = vmax.f32 %v3723_v61, %v3724_v36  ;;  %v3731_v23 = vrot.slane %v3730_v28, 2  ;;  %v3738_v30 = vrot.slane %v3737_v18, 2  ;;  %v3744_v42 = vmax.f32 %v3742_v12, %v3743_v59 }
 0x172   : > { %v1383_v15 = vrot.slane %v1369_v6, %v13167_v44  ;;  %v1384_v31 = vcombine.high %v1376_v60, %v1376_v60  ;;  %v2769_v9 = vsel %vm2628_vm1, %v1376_v60, -inf  ;;  %v1129_v5 = vadd.f32 %v13434_v19, %v1058_v24 }
 0x173   : > { %v3726_v46 = vrot.slane %v3725_v22, 1  ;;  %v3732_v49 = vmax.f32 %v3730_v28, %v3731_v23  ;;  %v3739_v38 = vmax.f32 %v3737_v18, %v3738_v30  ;;  %v3745_v34 = vrot.slane %v3744_v42, 2 }
 0x174   : > { %v1385_v62 = vcombine.high %v1383_v15, %v1383_v15  ;;  %v2770_v26 = vrot.slane %v2769_v9, 4  ;;  %v2776_v0 = vsel %vm2628_vm1, %v1384_v31, -inf  ;;  %v2783_v53 = vsel %vm2628_vm1, %v1383_v15, -inf }
 0x175   : > { %v3727_v54 = vmax.f32 %v3725_v22, %v3726_v46  ;;  %v3733_v56 = vrot.slane %v3732_v49, 1  ;;  %v3740_v1 = vrot.slane %v3739_v38, 1  ;;  %v3746_v50 = vmax.f32 %v3744_v42, %v3745_v34 }
 0x176   : > { %v2771_v10 = vmax.f32 %v2769_v9, %v2770_v26  ;;  %v2777_v47 = vrot.slane %v2776_v0, 4  ;;  %v2784_v52 = vrot.slane %v2783_v53, 4  ;;  %v2790_v11 = vsel %vm2628_vm1, %v1385_v62, -inf }
 0x177   : > { %v3734_v40 = vmax.f32 %v3732_v49, %v3733_v56  ;;  %v3741_v43 = vmax.f32 %v3739_v38, %v3740_v1  ;;  %v3747_v58 = vrot.slane %v3746_v50, 1  ;;  %v4934_v4 = vsel %vm4797_vm5, %v3727_v54, %v13444_v3 }
 0x178   : > { %v2772_v16 = vrot.slane %v2771_v10, 2  ;;  %v2778_v29 = vmax.f32 %v2776_v0, %v2777_v47  ;;  %v2785_v17 = vmax.f32 %v2783_v53, %v2784_v52  ;;  %v2791_v61 = vrot.slane %v2790_v11, 4 }
 0x179   : > { %v3748_v7 = vmax.f32 %v3746_v50, %v3747_v58  ;;  %v4935_v8 = vsel %vm4799_vm6, %v3734_v40, %v4934_v4  ;;  %v1193_v41 = vmax.f32 %v1129_v5, 0.0  ;;  %v1031_v12 = vmul.f32 %v13449_v55, %v13231_v63 }
 0x17a   : > { %v4936_v13 = vsel %vm4801_vm7, %v3741_v43, %v4935_v8  ;;  %v2773_v36 = vmax.f32 %v2771_v10, %v2772_v16  ;;  %v2779_v28 = vrot.slane %v2778_v29, 2  ;;  %v2786_v18 = vrot.slane %v2785_v17, 2 }
 0x17b   : > { %v4937_v59 = vsel %vm4803_vm8, %v3748_v7, %v4936_v13  ;;  %v2792_v6 = vmax.f32 %v2790_v11, %v2791_v61  ;;  %v1913_v3 = vcombine.high %v1193_v41, %v1193_v41  ;;  %v1920_v60 = vrot.slane %v1193_v41, %v13167_v44 }
 0x17c   : > { %5073 = vst [vmem:[#allocation2 + $0x2f0] sm:$0xff] %v4937_v59  ;;  %v2774_v24 = vrot.slane %v2773_v36, 1  ;;  %v2780_v22 = vmax.f32 %v2778_v29, %v2779_v28  ;;  %v2787_v23 = vmax.f32 %v2785_v17, %v2786_v18  ;;  %v1102_v30 = vadd.f32 %v13434_v19, %v1031_v12  ;;  %v13503_v17 = vpop.f32.mrb[15].mxu0 }
 0x17d   : > { %v2793_v42 = vrot.slane %v2792_v6, 2  ;;  %v1927_v63 = vrot.slane %v1913_v3, %v13167_v44  ;;  %v1928_v15 = vcombine.high %v1920_v60, %v1920_v60  ;;  %v3665_v31 = vsel %vm2628_vm1, %v1920_v60, -inf }
 0x17e   : > { %v2775_v9 = vmax.f32 %v2773_v36, %v2774_v24  ;;  %v2781_v5 = vrot.slane %v2780_v22, 1  ;;  %v2788_v46 = vrot.slane %v2787_v23, 1  ;;  %v3666_v49 = vrot.slane %v3665_v31, 4 }
 0x17f   : > { %v2794_v38 = vmax.f32 %v2792_v6, %v2793_v42  ;;  %v1929_v34 = vcombine.high %v1927_v63, %v1927_v63  ;;  %v3672_v62 = vsel %vm2628_vm1, %v1928_v15, -inf  ;;  %v3679_v26 = vsel %vm2628_vm1, %v1927_v63, -inf }
 0x180   : > { %v2782_v0 = vmax.f32 %v2780_v22, %v2781_v5  ;;  %v2789_v53 = vmax.f32 %v2787_v23, %v2788_v46  ;;  %v4815_v54 = vsel %vm4797_vm5, %v2775_v9, %v13469_v14  ;;  %v3667_v56 = vmax.f32 %v3665_v31, %v3666_v49  ;;  %v13512_v23 = vpop.f32.mrb[15].mxu1 }
 0x181   : > { %v2795_v1 = vrot.slane %v2794_v38, 1  ;;  %v3673_v50 = vrot.slane %v3672_v62, 4  ;;  %v3680_v10 = vrot.slane %v3679_v26, 4  ;;  %v3686_v47 = vsel %vm2628_vm1, %v1929_v34, -inf }
 0x182   : > { %v4816_v52 = vsel %vm4799_vm6, %v2782_v0, %v4815_v54  ;;  %v3668_v11 = vrot.slane %v3667_v56, 2  ;;  %v3687_v40 = vrot.slane %v3686_v47, 4  ;;  %v1166_v43 = vmax.f32 %v1102_v30, 0.0 }
 0x183   : > { %v2796_v58 = vmax.f32 %v2794_v38, %v2795_v1  ;;  %v4817_v4 = vsel %vm4801_vm7, %v2789_v53, %v4816_v52  ;;  %v3674_v16 = vmax.f32 %v3672_v62, %v3673_v50  ;;  %v3681_v29 = vmax.f32 %v3679_v26, %v3680_v10 }
 0x184   : > { %v3669_v61 = vmax.f32 %v3667_v56, %v3668_v11  ;;  %v3688_v14 = vmax.f32 %v3686_v47, %v3687_v40  ;;  %v1454_v7 = vcombine.high %v1166_v43, %v1166_v43  ;;  %v1461_v8 = vrot.slane %v1166_v43, %v13167_v44 }
 0x185   : > { %v4818_v41 = vsel %vm4803_vm8, %v2796_v58, %v4817_v4  ;;  %v3675_v12 = vrot.slane %v3674_v16, 2  ;;  %v3682_v13 = vrot.slane %v3681_v29, 2  ;;  %v1063_v36 = vmul.f32 %v13449_v55, %v13239_v37 }
 0x186   : > { %5056 = vst [vmem:[#allocation2 + $0x98] sm:$0xff] %v4818_v41  ;;  %v3670_v28 = vrot.slane %v3669_v61, 1  ;;  %v3689_v18 = vrot.slane %v3688_v14, 2  ;;  %v1468_v59 = vrot.slane %v1454_v7, %v13167_v44  ;;  %v1469_v6 = vcombine.high %v1461_v8, %v1461_v8 }
 0x187   : > { %v3676_v3 = vmax.f32 %v3674_v16, %v3675_v12  ;;  %v3683_v60 = vmax.f32 %v3681_v29, %v3682_v13  ;;  %v2909_v24 = vsel %vm2628_vm1, %v1461_v8, -inf  ;;  %v1134_v22 = vadd.f32 %v13434_v19, %v1063_v36 }
 0x188   : > { %v3671_v30 = vmax.f32 %v3669_v61, %v3670_v28  ;;  %v3690_v42 = vmax.f32 %v3688_v14, %v3689_v18  ;;  %v1470_v63 = vcombine.high %v1468_v59, %v1468_v59  ;;  %v2910_v15 = vrot.slane %v2909_v24, 4 }
 0x189   : > { %v3677_v31 = vrot.slane %v3676_v3, 1  ;;  %v3684_v37 = vrot.slane %v3683_v60, 1  ;;  %v2916_v9 = vsel %vm2628_vm1, %v1469_v6, -inf  ;;  %v2923_v5 = vsel %vm2628_vm1, %v1468_v59, -inf }
 0x18a   : > { %v3691_v46 = vrot.slane %v3690_v42, 1  ;;  %v4927_v49 = vsel %vm4797_vm5, %v3671_v30, %v13475_v25  ;;  %v2911_v38 = vmax.f32 %v2909_v24, %v2910_v15  ;;  %v2917_v34 = vrot.slane %v2916_v9, 4 }
 0x18b   : > { %v3678_v62 = vmax.f32 %v3676_v3, %v3677_v31  ;;  %v3685_v26 = vmax.f32 %v3683_v60, %v3684_v37  ;;  %v2924_v0 = vrot.slane %v2923_v5, 4  ;;  %v2930_v53 = vsel %vm2628_vm1, %v1470_v63, -inf }
 0x18c   : > { %v3692_v54 = vmax.f32 %v3690_v42, %v3691_v46  ;;  %v2912_v56 = vrot.slane %v2911_v38, 2  ;;  %v2918_v1 = vmax.f32 %v2916_v9, %v2917_v34  ;;  %v2931_v50 = vrot.slane %v2930_v53, 4 }
 0x18d   : > { %v4928_v10 = vsel %vm4799_vm6, %v3678_v62, %v4927_v49  ;;  %v2925_v47 = vmax.f32 %v2923_v5, %v2924_v0  ;;  %v1198_v52 = vmax.f32 %v1134_v22, 0.0  ;;  %v1029_v11 = vmul.f32 %v13449_v55, %v13270_v32 }
 0x18e   : > { %v4929_v25 = vsel %vm4801_vm7, %v3685_v26, %v4928_v10  ;;  %v2913_v40 = vmax.f32 %v2911_v38, %v2912_v56  ;;  %v2919_v43 = vrot.slane %v2918_v1, 2  ;;  %v2932_v58 = vmax.f32 %v2930_v53, %v2931_v50 }
 0x18f   : > { %v4930_v4 = vsel %vm4803_vm8, %v3692_v54, %v4929_v25  ;;  %v2926_v16 = vrot.slane %v2925_v47, 2  ;;  %v1998_v29 = vcombine.high %v1198_v52, %v1198_v52  ;;  %v2005_v61 = vrot.slane %v1198_v52, %v13167_v44  ;;  %v13539_v25 = vpop.f32.mrb[16].mxu0 }
 0x190   : > { %5072 = vst [vmem:[#allocation2 + $0x2d8] sm:$0xff] %v4930_v4  ;;  %v2914_v14 = vrot.slane %v2913_v40, 1  ;;  %v2920_v7 = vmax.f32 %v2918_v1, %v2919_v43  ;;  %v2933_v8 = vrot.slane %v2932_v58, 2  ;;  %v1100_v41 = vadd.f32 %v13434_v19, %v1029_v11 }
 0x191   : > { %v2927_v12 = vmax.f32 %v2925_v47, %v2926_v16  ;;  %v2012_v32 = vrot.slane %v1998_v29, %v13167_v44  ;;  %v2013_v13 = vcombine.high %v2005_v61, %v2005_v61  ;;  %v3805_v36 = vsel %vm2628_vm1, %v2005_v61, -inf }
 0x192   : > { %v2915_v28 = vmax.f32 %v2913_v40, %v2914_v14  ;;  %v2921_v18 = vrot.slane %v2920_v7, 1  ;;  %v2934_v59 = vmax.f32 %v2932_v58, %v2933_v8  ;;  %v3806_v6 = vrot.slane %v3805_v36, 4 }
 0x193   : > { %v2928_v3 = vrot.slane %v2927_v12, 1  ;;  %v2014_v60 = vcombine.high %v2012_v32, %v2012_v32  ;;  %v3812_v24 = vsel %vm2628_vm1, %v2013_v13, -inf  ;;  %v3819_v22 = vsel %vm2628_vm1, %v2012_v32, -inf }
 0x194   : > { %v2922_v30 = vmax.f32 %v2920_v7, %v2921_v18  ;;  %v2935_v42 = vrot.slane %v2934_v59, 1  ;;  %v3807_v63 = vmax.f32 %v3805_v36, %v3806_v6  ;;  %v3813_v15 = vrot.slane %v3812_v24, 4 }
 0x195   : > { %v2929_v31 = vmax.f32 %v2927_v12, %v2928_v3  ;;  %v3820_v37 = vrot.slane %v3819_v22, 4  ;;  %v3826_v9 = vsel %vm2628_vm1, %v2014_v60, -inf  ;;  %v1164_v5 = vmax.f32 %v1100_v41, 0.0  ;;  %v13544_v12 = vpop.f32.mrb[16].mxu1 }
 0x196   : > { %v2936_v46 = vmax.f32 %v2934_v59, %v2935_v42  ;;  %v4833_v49 = vsel %vm4791_vm2, %v2922_v30, %v2915_v28  ;;  %v3808_v38 = vrot.slane %v3807_v63, 2  ;;  %v3814_v34 = vmax.f32 %v3812_v24, %v3813_v15 }
 0x197   : > { %v4834_v62 = vsel %vm4793_vm3, %v2929_v31, %v4833_v49  ;;  %v3821_v26 = vmax.f32 %v3819_v22, %v3820_v37  ;;  %v3827_v0 = vrot.slane %v3826_v9, 4  ;;  %v1420_v53 = vcombine.high %v1164_v5, %v1164_v5 }
 0x198   : > { %v3809_v54 = vmax.f32 %v3807_v63, %v3808_v38  ;;  %v3815_v56 = vrot.slane %v3814_v34, 2  ;;  %v1427_v1 = vrot.slane %v1164_v5, %v13167_v44  ;;  %v1061_v50 = vmul.f32 %v13449_v55, %v13279_v20 }
 0x199   : > { %v3822_v10 = vrot.slane %v3821_v26, 2  ;;  %v3828_v47 = vmax.f32 %v3826_v9, %v3827_v0  ;;  %v1434_v52 = vrot.slane %v1420_v53, %v13167_v44  ;;  %v1032_v11 = vmul.f32 %v13449_v55, %v13310_v21 }
 0x19a   : > { %v3810_v40 = vrot.slane %v3809_v54, 1  ;;  %v3816_v43 = vmax.f32 %v3814_v34, %v3815_v56  ;;  %v1435_v58 = vcombine.high %v1427_v1, %v1427_v1  ;;  %v2853_v4 = vsel %vm2628_vm1, %v1427_v1, -inf }
 0x19b   : > { %v3823_v16 = vmax.f32 %v3821_v26, %v3822_v10  ;;  %v3829_v29 = vrot.slane %v3828_v47, 2  ;;  %v1436_v61 = vcombine.high %v1434_v52, %v1434_v52  ;;  %v2854_v14 = vrot.slane %v2853_v4, 4 }
 0x19c   : > { %v3811_v7 = vmax.f32 %v3809_v54, %v3810_v40  ;;  %v3817_v20 = vrot.slane %v3816_v43, 1  ;;  %v2860_v8 = vsel %vm2628_vm1, %v1435_v58, -inf  ;;  %v2867_v41 = vsel %vm2628_vm1, %v1434_v52, -inf }
 0x19d   : > { %v3824_v21 = vrot.slane %v3823_v16, 1  ;;  %v3830_v32 = vmax.f32 %v3828_v47, %v3829_v29  ;;  %v2855_v13 = vmax.f32 %v2853_v4, %v2854_v14  ;;  %v2861_v36 = vrot.slane %v2860_v8, 4 }
 0x19e   : > { %v3818_v28 = vmax.f32 %v3816_v43, %v3817_v20  ;;  %v2868_v18 = vrot.slane %v2867_v41, 4  ;;  %v2874_v59 = vsel %vm2628_vm1, %v1436_v61, -inf  ;;  %v1132_v6 = vadd.f32 %v13434_v19, %v1061_v50 }
 0x19f   : > { %v3825_v3 = vmax.f32 %v3823_v16, %v3824_v21  ;;  %v3831_v60 = vrot.slane %v3830_v32, 1  ;;  %v2856_v24 = vrot.slane %v2855_v13, 2  ;;  %v2862_v22 = vmax.f32 %v2860_v8, %v2861_v36 }
 0x1a0   : > { %v4945_v30 = vsel %vm4791_vm2, %v3818_v28, %v3811_v7  ;;  %v2869_v42 = vmax.f32 %v2867_v41, %v2868_v18  ;;  %v2875_v63 = vrot.slane %v2874_v59, 4  ;;  %v1196_v15 = vmax.f32 %v1132_v6, 0.0 }
 0x1a1   : > { %v13549_v31 = vmax.f32 %v3830_v32, %v3831_v60  ;;  %v13552_v37 = vsel %vm4793_vm3, %v3825_v3, %v4945_v30  ;;  %v2857_v9 = vmax.f32 %v2855_v13, %v2856_v24  ;;  %v2863_v5 = vrot.slane %v2862_v22, 2  ;;  %v13572_v30 = vpop.f32.mrb[17].mxu0 }
 0x1a2   : > { %v2870_v49 = vrot.slane %v2869_v42, 2  ;;  %v2876_v38 = vmax.f32 %v2874_v59, %v2875_v63  ;;  %v1964_v34 = vcombine.high %v1196_v15, %v1196_v15  ;;  %v1971_v26 = vrot.slane %v1196_v15, %v13167_v44 }
 0x1a3   : > { %v2858_v0 = vrot.slane %v2857_v9, 1  ;;  %v2864_v53 = vmax.f32 %v2862_v22, %v2863_v5  ;;  %v1103_v54 = vadd.f32 %v13434_v19, %v1032_v11  ;;  %v13557_v56 = vsel %vm4795_vm4, %v2936_v46, %v4834_v62 }
 0x1a4   : > { %v2871_v1 = vmax.f32 %v2869_v42, %v2870_v49  ;;  %v2877_v50 = vrot.slane %v2876_v38, 2  ;;  %v1978_v10 = vrot.slane %v1964_v34, %v13167_v44  ;;  %v1979_v47 = vcombine.high %v1971_v26, %v1971_v26 }
 0x1a5   : > { %v2859_v52 = vmax.f32 %v2857_v9, %v2858_v0  ;;  %v2865_v40 = vrot.slane %v2864_v53, 1  ;;  %v3749_v43 = vsel %vm2628_vm1, %v1971_v26, -inf  ;;  %v1167_v58 = vmax.f32 %v1103_v54, 0.0  ;;  %v13577_v26 = vpop.f32.mrb[17].mxu1 }
 0x1a6   : > { %v2872_v4 = vrot.slane %v2871_v1, 1  ;;  %v2878_v16 = vmax.f32 %v2876_v38, %v2877_v50  ;;  %v1980_v29 = vcombine.high %v1978_v10, %v1978_v10  ;;  %v3750_v61 = vrot.slane %v3749_v43, 4 }
 0x1a7   : > { %v2866_v14 = vmax.f32 %v2864_v53, %v2865_v40  ;;  %v3756_v11 = vsel %vm2628_vm1, %v1979_v47, -inf  ;;  %v3763_v46 = vsel %vm2628_vm1, %v1978_v10, -inf  ;;  %v1471_v62 = vcombine.high %v1167_v58, %v1167_v58 }
 0x1a8   : > { %v2873_v7 = vmax.f32 %v2871_v1, %v2872_v4  ;;  %v2879_v20 = vrot.slane %v2878_v16, 1  ;;  %v3751_v8 = vmax.f32 %v3749_v43, %v3750_v61  ;;  %v3757_v41 = vrot.slane %v3756_v11, 4 }
 0x1a9   : > { %v4826_v21 = vsel %vm4791_vm2, %v2866_v14, %v2859_v52  ;;  %v3764_v32 = vrot.slane %v3763_v46, 4  ;;  %v3770_v13 = vsel %vm2628_vm1, %v1980_v29, -inf  ;;  %v1478_v36 = vrot.slane %v1167_v58, %v13167_v44 }
 0x1aa   : > { %v13566_v28 = vmax.f32 %v2878_v16, %v2879_v20  ;;  %v13569_v18 = vsel %vm4793_vm3, %v2873_v7, %v4826_v21  ;;  %v3752_v59 = vrot.slane %v3751_v8, 2  ;;  %v3758_v6 = vmax.f32 %v3756_v11, %v3757_v41 }
 0x1ab   : > { %v3765_v3 = vmax.f32 %v3763_v46, %v3764_v32  ;;  %v3771_v60 = vrot.slane %v3770_v13, 4  ;;  %v1485_v24 = vrot.slane %v1471_v62, %v13167_v44  ;;  %v1486_v22 = vcombine.high %v1478_v36, %v1478_v36 }
 0x1ac   : > { %v3753_v42 = vmax.f32 %v3751_v8, %v3752_v59  ;;  %v3759_v63 = vrot.slane %v3758_v6, 2  ;;  %v2937_v15 = vsel %vm2628_vm1, %v1478_v36, -inf  ;;  %v1064_v9 = vmul.f32 %v13449_v55, %v13320_v57 }
 0x1ad   : > { %v3766_v5 = vrot.slane %v3765_v3, 2  ;;  %v3772_v49 = vmax.f32 %v3770_v13, %v3771_v60  ;;  %v1487_v38 = vcombine.high %v1485_v24, %v1485_v24  ;;  %v2938_v34 = vrot.slane %v2937_v15, 4 }
 0x1ae   : > { %v3754_v0 = vrot.slane %v3753_v42, 1  ;;  %v3760_v53 = vmax.f32 %v3758_v6, %v3759_v63  ;;  %v2944_v54 = vsel %vm2628_vm1, %v1486_v22, -inf  ;;  %v2951_v1 = vsel %vm2628_vm1, %v1485_v24, -inf }
 0x1af   : > { %v3767_v50 = vmax.f32 %v3765_v3, %v3766_v5  ;;  %v3773_v10 = vrot.slane %v3772_v49, 2  ;;  %v2939_v47 = vmax.f32 %v2937_v15, %v2938_v34  ;;  %v2945_v52 = vrot.slane %v2944_v54, 4 }
 0x1b0   : > { %v3755_v40 = vmax.f32 %v3753_v42, %v3754_v0  ;;  %v3761_v43 = vrot.slane %v3760_v53, 1  ;;  %v2952_v58 = vrot.slane %v2951_v1, 4  ;;  %v2958_v57 = vsel %vm2628_vm1, %v1487_v38, -inf }
 0x1b1   : > { %v3768_v4 = vrot.slane %v3767_v50, 1  ;;  %v3774_v16 = vmax.f32 %v3772_v49, %v3773_v10  ;;  %v2940_v29 = vrot.slane %v2939_v47, 2  ;;  %v2946_v61 = vmax.f32 %v2944_v54, %v2945_v52 }
 0x1b2   : > { %v3762_v14 = vmax.f32 %v3760_v53, %v3761_v43  ;;  %v2953_v11 = vmax.f32 %v2951_v1, %v2952_v58  ;;  %v2959_v46 = vrot.slane %v2958_v57, 4  ;;  %v1135_v62 = vadd.f32 %v13434_v19, %v1064_v9 }
 0x1b3   : > { %v3769_v7 = vmax.f32 %v3767_v50, %v3768_v4  ;;  %v3775_v20 = vrot.slane %v3774_v16, 1  ;;  %v2941_v8 = vmax.f32 %v2939_v47, %v2940_v29  ;;  %v2947_v41 = vrot.slane %v2946_v61, 2  ;;  %v13606_v29 = vpop.f32.mrb[18].mxu0 }
 0x1b4   : > { %v4938_v21 = vsel %vm4791_vm2, %v3762_v14, %v3755_v40  ;;  %v2954_v32 = vrot.slane %v2953_v11, 2  ;;  %v2960_v13 = vmax.f32 %v2958_v57, %v2959_v46  ;;  %v1199_v36 = vmax.f32 %v1135_v62, 0.0 }
 0x1b5   : > { %v13584_v59 = vmax.f32 %v3774_v16, %v3775_v20  ;;  %v13587_v6 = vsel %vm4793_vm3, %v3769_v7, %v4938_v21  ;;  %v2942_v3 = vrot.slane %v2941_v8, 1  ;;  %v2948_v60 = vmax.f32 %v2946_v61, %v2947_v41 }
 0x1b6   : > { %v2955_v24 = vmax.f32 %v2953_v11, %v2954_v32  ;;  %v2961_v22 = vrot.slane %v2960_v13, 2  ;;  %v2015_v42 = vcombine.high %v1199_v36, %v1199_v36  ;;  %v2022_v63 = vrot.slane %v1199_v36, %v13167_v44 }
 0x1b7   : > { %v2943_v15 = vmax.f32 %v2941_v8, %v2942_v3  ;;  %v2949_v9 = vrot.slane %v2948_v60, 1  ;;  %v13593_v5 = vsel %vm4795_vm4, %v13549_v31, %v13552_v37  ;;  %v1030_v49 = vmul.f32 %v13449_v55, %v13349_v2 }
 0x1b8   : > { %v2956_v38 = vrot.slane %v2955_v24, 1  ;;  %v2962_v34 = vmax.f32 %v2960_v13, %v2961_v22  ;;  %v2029_v0 = vrot.slane %v2015_v42, %v13167_v44  ;;  %v2030_v53 = vcombine.high %v2022_v63, %v2022_v63 }
 0x1b9   : > { %v2950_v54 = vmax.f32 %v2948_v60, %v2949_v9  ;;  %v4836_v1 = vsel %vm4797_vm5, %v2943_v15, %v13557_v56  ;;  %v3833_v50 = vsel %vm2628_vm1, %v2022_v63, -inf  ;;  %v1101_v10 = vadd.f32 %v13434_v19, %v1030_v49 }
 0x1ba   : > { %v2957_v47 = vmax.f32 %v2955_v24, %v2956_v38  ;;  %v2963_v52 = vrot.slane %v2962_v34, 1  ;;  %v2031_v31 = vcombine.high %v2029_v0, %v2029_v0  ;;  %v3834_v37 = vrot.slane %v3833_v50, 4 }
 0x1bb   : > { %v4837_v40 = vsel %vm4799_vm6, %v2950_v54, %v4836_v1  ;;  %v3840_v2 = vsel %vm2628_vm1, %v2030_v53, -inf  ;;  %v3847_v43 = vsel %vm2628_vm1, %v2029_v0, -inf  ;;  %v1165_v58 = vmax.f32 %v1101_v10, 0.0 }
 0x1bc   : > { %v2964_v57 = vmax.f32 %v2962_v34, %v2963_v52  ;;  %v4838_v4 = vsel %vm4801_vm7, %v2957_v47, %v4837_v40  ;;  %v3835_v16 = vmax.f32 %v3833_v50, %v3834_v37  ;;  %v3841_v56 = vrot.slane %v3840_v2, 4  ;;  %v13616_v50 = vpop.f32.mrb[18].mxu1 }
 0x1bd   : > { %v3848_v61 = vrot.slane %v3847_v43, 4  ;;  %v3854_v14 = vsel %vm2628_vm1, %v2031_v31, -inf  ;;  %v1437_v11 = vcombine.high %v1165_v58, %v1165_v58  ;;  %v1444_v46 = vrot.slane %v1165_v58, %v13167_v44 }
 0x1be   : > { %v4839_v62 = vsel %vm4803_vm8, %v2964_v57, %v4838_v4  ;;  %v3836_v7 = vrot.slane %v3835_v16, 2  ;;  %v3842_v20 = vmax.f32 %v3840_v2, %v3841_v56  ;;  %v3855_v8 = vrot.slane %v3854_v14, 4 }
 0x1bf   : > { %5059 = vst [vmem:[#allocation2 + $0xe0] sm:$0xff] %v4839_v62  ;;  %v3849_v41 = vmax.f32 %v3847_v43, %v3848_v61  ;;  %v1451_v21 = vrot.slane %v1437_v11, %v13167_v44  ;;  %v1452_v32 = vcombine.high %v1444_v46, %v1444_v46  ;;  %v2881_v13 = vsel %vm2628_vm1, %v1444_v46, -inf }
 0x1c0   : > { %v3837_v36 = vmax.f32 %v3835_v16, %v3836_v7  ;;  %v3843_v3 = vrot.slane %v3842_v20, 2  ;;  %v3856_v60 = vmax.f32 %v3854_v14, %v3855_v8  ;;  %v2882_v24 = vrot.slane %v2881_v13, 4 }
 0x1c1   : > { %v3850_v22 = vrot.slane %v3849_v41, 2  ;;  %v1453_v42 = vcombine.high %v1451_v21, %v1451_v21  ;;  %v2888_v63 = vsel %vm2628_vm1, %v1452_v32, -inf  ;;  %v2895_v15 = vsel %vm2628_vm1, %v1451_v21, -inf }
 0x1c2   : > { %v3838_v9 = vrot.slane %v3837_v36, 1  ;;  %v3844_v49 = vmax.f32 %v3842_v20, %v3843_v3  ;;  %v3857_v38 = vrot.slane %v3856_v60, 2  ;;  %v2883_v34 = vmax.f32 %v2881_v13, %v2882_v24 }
 0x1c3   : > { %v3851_v0 = vmax.f32 %v3849_v41, %v3850_v22  ;;  %v2889_v53 = vrot.slane %v2888_v63, 4  ;;  %v2896_v54 = vrot.slane %v2895_v15, 4  ;;  %v2902_v1 = vsel %vm2628_vm1, %v1453_v42, -inf }
 0x1c4   : > { %v3839_v10 = vmax.f32 %v3837_v36, %v3838_v9  ;;  %v3845_v47 = vrot.slane %v3844_v49, 1  ;;  %v3858_v52 = vmax.f32 %v3856_v60, %v3857_v38  ;;  %v2884_v31 = vrot.slane %v2883_v34, 2 }
 0x1c5   : > { %v3852_v37 = vrot.slane %v3851_v0, 1  ;;  %v2890_v40 = vmax.f32 %v2888_v63, %v2889_v53  ;;  %v2897_v2 = vmax.f32 %v2895_v15, %v2896_v54  ;;  %v2903_v43 = vrot.slane %v2902_v1, 4 }
 0x1c6   : > { %v3846_v58 = vmax.f32 %v3844_v49, %v3845_v47  ;;  %v3859_v57 = vrot.slane %v3858_v52, 1  ;;  %v4948_v4 = vsel %vm4797_vm5, %v3839_v10, %v13593_v5  ;;  %v2885_v16 = vmax.f32 %v2883_v34, %v2884_v31 }
 0x1c7   : > { %v3853_v56 = vmax.f32 %v3851_v0, %v3852_v37  ;;  %v2891_v61 = vrot.slane %v2890_v40, 2  ;;  %v2898_v14 = vrot.slane %v2897_v2, 2  ;;  %v2904_v11 = vmax.f32 %v2902_v1, %v2903_v43  ;;  %v13648_v0 = vpop.f32.mrb[19].mxu0 }
 0x1c8   : > { %v3860_v46 = vmax.f32 %v3858_v52, %v3859_v57  ;;  %v4949_v62 = vsel %vm4799_vm6, %v3846_v58, %v4948_v4  ;;  %v2886_v7 = vrot.slane %v2885_v16, 1  ;;  %v4828_v20 = vsel %vm4795_vm4, %v13566_v28, %v13569_v18 }
 0x1c9   : > { %v4950_v8 = vsel %vm4801_vm7, %v3853_v56, %v4949_v62  ;;  %v2892_v41 = vmax.f32 %v2890_v40, %v2891_v61  ;;  %v2899_v21 = vmax.f32 %v2897_v2, %v2898_v14  ;;  %v2905_v32 = vrot.slane %v2904_v11, 2 }
 0x1ca   : > { %v4951_v5 = vsel %vm4803_vm8, %v3860_v46, %v4950_v8  ;;  %v2887_v13 = vmax.f32 %v2885_v16, %v2886_v7  ;;  %v1062_v36 = vmul.f32 %v13449_v55, %v13361_v33  ;;  %v13631_v3 = vsel %vm4795_vm4, %v13584_v59, %v13587_v6 }
 0x1cb   : > { %5075 = vst [vmem:[#allocation2 + $0x320] sm:$0xff] %v4951_v5  ;;  %v2893_v60 = vrot.slane %v2892_v41, 1  ;;  %v2900_v24 = vrot.slane %v2899_v21, 1  ;;  %v2906_v28 = vmax.f32 %v2904_v11, %v2905_v32  ;;  %v1035_v18 = vmul.f32 %v13449_v55, %v13390_v48 }
 0x1cc   : > { %v4829_v22 = vsel %vm4797_vm5, %v2887_v13, %v4828_v20  ;;  %v1133_v42 = vadd.f32 %v13434_v19, %v1062_v36  ;;  %v1067_v63 = vmul.f32 %v13449_v55, %v13392_v27  ;;  %v1033_v33 = vmul.f32 %v13449_v55, %v13419_v35 }
 0x1cd   : > { %v2894_v15 = vmax.f32 %v2892_v41, %v2893_v60  ;;  %v2901_v59 = vmax.f32 %v2899_v21, %v2900_v24  ;;  %v2907_v6 = vrot.slane %v2906_v28, 1  ;;  %v1106_v9 = vadd.f32 %v13434_v19, %v1035_v18 }
 0x1ce   : > { %v1197_v49 = vmax.f32 %v1133_v42, 0.0  ;;  %v1138_v38 = vadd.f32 %v13434_v19, %v1067_v63  ;;  %v1104_v48 = vadd.f32 %v13434_v19, %v1033_v33  ;;  %v13646_v34 = vmul.f32 %v13449_v55, %v13429_v51 }
 0x1cf   : > { %v2908_v27 = vmax.f32 %v2906_v28, %v2907_v6  ;;  %v4830_v53 = vsel %vm4799_vm6, %v2894_v15, %v4829_v22  ;;  %v1170_v35 = vmax.f32 %v1106_v9, 0.0  ;;  %v13653_v54 = vmul.f32 %v13449_v55, %v13462_v39 }
 0x1d0   : > { %v4831_v1 = vsel %vm4801_vm7, %v2901_v59, %v4830_v53  ;;  %v1981_v10 = vcombine.high %v1197_v49, %v1197_v49  ;;  %v1988_v47 = vrot.slane %v1197_v49, %v13167_v44  ;;  %v13657_v19 = vmax.f32 %v1138_v38, 0.0  ;;  %v13675_v49 = vpop.f32.mrb[19].mxu1 }
 0x1d1   : > { %v4832_v51 = vsel %vm4803_vm8, %v2908_v27, %v4831_v1  ;;  %v1522_v52 = vcombine.high %v1170_v35, %v1170_v35  ;;  %v1529_v31 = vrot.slane %v1170_v35, %v13167_v44  ;;  %v13661_v37 = vmax.f32 %v1104_v48, 0.0 }
 0x1d2   : > { %5058 = vst [vmem:[#allocation2 + $0xc8] sm:$0xff] %v4832_v51  ;;  %v1995_v40 = vrot.slane %v1981_v10, %v13167_v44  ;;  %v1996_v2 = vcombine.high %v1988_v47, %v1988_v47  ;;  %v3777_v55 = vsel %vm2628_vm1, %v1988_v47, -inf  ;;  %v2066_v39 = vcombine.high %v13657_v19, %v13657_v19 }
 0x1d3   : > { %v3778_v43 = vrot.slane %v3777_v55, 4  ;;  %v1536_v58 = vrot.slane %v1522_v52, %v13167_v44  ;;  %v1537_v57 = vcombine.high %v1529_v31, %v1529_v31  ;;  %v3021_v4 = vsel %vm2628_vm1, %v1529_v31, -inf }
 0x1d4   : > { %v1997_v16 = vcombine.high %v1995_v40, %v1995_v40  ;;  %v3784_v56 = vsel %vm2628_vm1, %v1996_v2, -inf  ;;  %v3791_v61 = vsel %vm2628_vm1, %v1995_v40, -inf  ;;  %v3022_v14 = vrot.slane %v3021_v4, 4 }
 0x1d5   : > { %v3779_v11 = vmax.f32 %v3777_v55, %v3778_v43  ;;  %v3785_v46 = vrot.slane %v3784_v56, 4  ;;  %v3792_v62 = vrot.slane %v3791_v61, 4  ;;  %v1538_v7 = vcombine.high %v1536_v58, %v1536_v58 }
 0x1d6   : > { %v3798_v20 = vsel %vm2628_vm1, %v1997_v16, -inf  ;;  %v3023_v8 = vmax.f32 %v3021_v4, %v3022_v14  ;;  %v3028_v41 = vsel %vm2628_vm1, %v1537_v57, -inf  ;;  %v3035_v21 = vsel %vm2628_vm1, %v1536_v58, -inf }
 0x1d7   : > { %v3780_v32 = vrot.slane %v3779_v11, 2  ;;  %v3786_v5 = vmax.f32 %v3784_v56, %v3785_v46  ;;  %v3793_v13 = vmax.f32 %v3791_v61, %v3792_v62  ;;  %v3799_v36 = vrot.slane %v3798_v20, 4 }
 0x1d8   : > { %v3024_v60 = vrot.slane %v3023_v8, 2  ;;  %v3029_v24 = vrot.slane %v3028_v41, 4  ;;  %v3036_v28 = vrot.slane %v3035_v21, 4  ;;  %v3042_v18 = vsel %vm2628_vm1, %v1538_v7, -inf }
 0x1d9   : > { %v3781_v22 = vmax.f32 %v3779_v11, %v3780_v32  ;;  %v3787_v42 = vrot.slane %v3786_v5, 2  ;;  %v3794_v63 = vrot.slane %v3793_v13, 2  ;;  %v3800_v33 = vmax.f32 %v3798_v20, %v3799_v36 }
 0x1da   : > { %v3025_v15 = vmax.f32 %v3023_v8, %v3024_v60  ;;  %v3030_v59 = vmax.f32 %v3028_v41, %v3029_v24  ;;  %v3037_v6 = vmax.f32 %v3035_v21, %v3036_v28  ;;  %v3043_v9 = vrot.slane %v3042_v18, 4 }
 0x1db   : > { %v3782_v38 = vrot.slane %v3781_v22, 1  ;;  %v3788_v48 = vmax.f32 %v3786_v5, %v3787_v42  ;;  %v3795_v27 = vmax.f32 %v3793_v13, %v3794_v63  ;;  %v3801_v53 = vrot.slane %v3800_v33, 2 }
 0x1dc   : > { %v3026_v35 = vrot.slane %v3025_v15, 1  ;;  %v3031_v1 = vrot.slane %v3030_v59, 2  ;;  %v3038_v10 = vrot.slane %v3037_v6, 2  ;;  %v3044_v47 = vmax.f32 %v3042_v18, %v3043_v9 }
 0x1dd   : > { %v3783_v51 = vmax.f32 %v3781_v22, %v3782_v38  ;;  %v3789_v52 = vrot.slane %v3788_v48, 1  ;;  %v3796_v31 = vrot.slane %v3795_v27, 1  ;;  %v3802_v40 = vmax.f32 %v3800_v33, %v3801_v53  ;;  %v13697_v33 = vpop.f32.mrb[20].mxu0 }
 0x1de   : > { %v3027_v2 = vmax.f32 %v3025_v15, %v3026_v35  ;;  %v3032_v55 = vmax.f32 %v3030_v59, %v3031_v1  ;;  %v3039_v43 = vmax.f32 %v3037_v6, %v3038_v10  ;;  %v3045_v58 = vrot.slane %v3044_v47, 2 }
 0x1df   : > { %v3790_v57 = vmax.f32 %v3788_v48, %v3789_v52  ;;  %v3797_v4 = vmax.f32 %v3795_v27, %v3796_v31  ;;  %v3803_v16 = vrot.slane %v3802_v40, 1  ;;  %v4941_v56 = vsel %vm4797_vm5, %v3783_v51, %v13631_v3  ;;  %v13705_v27 = vld [vmem:[%s16363_s3] ss:$0 sm:$0xff] }
 0x1e0   : > { %v3033_v61 = vrot.slane %v3032_v55, 1  ;;  %v3040_v14 = vrot.slane %v3039_v43, 1  ;;  %v3046_v11 = vmax.f32 %v3044_v47, %v3045_v58  ;;  %v2073_v46 = vrot.slane %v13657_v19, %v13167_v44 }
 0x1e1   : > { %v3804_v62 = vmax.f32 %v3802_v40, %v3803_v16  ;;  %v4942_v7 = vsel %vm4799_vm6, %v3790_v57, %v4941_v56  ;;  %v2080_v20 = vrot.slane %v2066_v39, %v13167_v44  ;;  %v1488_v8 = vcombine.high %v13661_v37, %v13661_v37 }
 0x1e2   : > { %v4943_v41 = vsel %vm4801_vm7, %v3797_v4, %v4942_v7  ;;  %v3034_v21 = vmax.f32 %v3032_v55, %v3033_v61  ;;  %v3041_v32 = vmax.f32 %v3039_v43, %v3040_v14  ;;  %v3047_v5 = vrot.slane %v3046_v11, 1 }
 0x1e3   : > { %v4944_v3 = vsel %vm4803_vm8, %v3804_v62, %v4943_v41  ;;  %v2081_v13 = vcombine.high %v2073_v46, %v2073_v46  ;;  %v2082_v36 = vcombine.high %v2080_v20, %v2080_v20  ;;  %v3917_v60 = vsel %vm2628_vm1, %v2073_v46, -inf }
 0x1e4   : > { %5074 = vst [vmem:[#allocation2 + $0x308] sm:$0xff] %v4944_v3  ;;  %v13688_v19 = vmax.f32 %v3046_v11, %v3047_v5  ;;  %v4847_v24 = vsel %vm4791_vm2, %v3034_v21, %v3027_v2  ;;  %v3918_v39 = vrot.slane %v3917_v60, 4  ;;  %v3931_v28 = vsel %vm2628_vm1, %v2080_v20, -inf }
 0x1e5   : > { %v13693_v18 = vsel %vm4793_vm3, %v3041_v32, %v4847_v24  ;;  %v3924_v22 = vsel %vm2628_vm1, %v2081_v13, -inf  ;;  %v3932_v42 = vrot.slane %v3931_v28, 4  ;;  %v3938_v63 = vsel %vm2628_vm1, %v2082_v36, -inf  ;;  %v13715_v32 = vpop.f32.mrb[20].mxu1 }
 0x1e6   : > { %v3919_v15 = vmax.f32 %v3917_v60, %v3918_v39  ;;  %v3925_v59 = vrot.slane %v3924_v22, 4  ;;  %v3939_v6 = vrot.slane %v3938_v63, 4  ;;  %v1495_v9 = vrot.slane %v13661_v37, %v13167_v44 }
 0x1e7   : > { %v3933_v38 = vmax.f32 %v3931_v28, %v3932_v42  ;;  %v1502_v48 = vrot.slane %v1488_v8, %v13167_v44  ;;  %v1136_v53 = vadd.f32 %v13705_v27, %v13646_v34  ;;  %v1107_v35 = vadd.f32 %v13705_v27, %v13653_v54 }
 0x1e8   : > { %v3920_v1 = vrot.slane %v3919_v15, 2  ;;  %v3926_v10 = vmax.f32 %v3924_v22, %v3925_v59  ;;  %v3940_v47 = vmax.f32 %v3938_v63, %v3939_v6  ;;  %v1503_v51 = vcombine.high %v1495_v9, %v1495_v9 }
 0x1e9   : > { %v3934_v52 = vrot.slane %v3933_v38, 2  ;;  %v1504_v37 = vcombine.high %v1502_v48, %v1502_v48  ;;  %v2965_v31 = vsel %vm2628_vm1, %v1495_v9, -inf  ;;  %v2979_v40 = vsel %vm2628_vm1, %v1502_v48, -inf }
 0x1ea   : > { %v3921_v2 = vmax.f32 %v3919_v15, %v3920_v1  ;;  %v3927_v55 = vrot.slane %v3926_v10, 2  ;;  %v3941_v43 = vrot.slane %v3940_v47, 2  ;;  %v2966_v58 = vrot.slane %v2965_v31, 4 }
 0x1eb   : > { %v3935_v57 = vmax.f32 %v3933_v38, %v3934_v52  ;;  %v2972_v34 = vsel %vm2628_vm1, %v1503_v51, -inf  ;;  %v2980_v4 = vrot.slane %v2979_v40, 4  ;;  %v2986_v54 = vsel %vm2628_vm1, %v1504_v37, -inf }
 0x1ec   : > { %v3922_v16 = vrot.slane %v3921_v2, 1  ;;  %v3928_v56 = vmax.f32 %v3926_v10, %v3927_v55  ;;  %v3942_v61 = vmax.f32 %v3940_v47, %v3941_v43  ;;  %v2967_v14 = vmax.f32 %v2965_v31, %v2966_v58  ;;  %v13726_v55 = vpop.f32.mrb[21].mxu0 }
 0x1ed   : > { %v3936_v11 = vrot.slane %v3935_v57, 1  ;;  %v2973_v46 = vrot.slane %v2972_v34, 4  ;;  %v2981_v62 = vmax.f32 %v2979_v40, %v2980_v4  ;;  %v2987_v7 = vrot.slane %v2986_v54, 4 }
 0x1ee   : > { %v3923_v20 = vmax.f32 %v3921_v2, %v3922_v16  ;;  %v3929_v8 = vrot.slane %v3928_v56, 1  ;;  %v3943_v41 = vrot.slane %v3942_v61, 1  ;;  %v2968_v21 = vrot.slane %v2967_v14, 2 }
 0x1ef   : > { %v3937_v5 = vmax.f32 %v3935_v57, %v3936_v11  ;;  %v2974_v3 = vmax.f32 %v2972_v34, %v2973_v46  ;;  %v2982_v13 = vrot.slane %v2981_v62, 2  ;;  %v2988_v36 = vmax.f32 %v2986_v54, %v2987_v7 }
 0x1f0   : > { %v3930_v60 = vmax.f32 %v3928_v56, %v3929_v8  ;;  %v13717_v24 = vmax.f32 %v3942_v61, %v3943_v41  ;;  %v2969_v39 = vmax.f32 %v2967_v14, %v2968_v21  ;;  %v1200_v28 = vmax.f32 %v1136_v53, 0.0 }
 0x1f1   : > { %v2975_v22 = vrot.slane %v2974_v3, 2  ;;  %v2983_v42 = vmax.f32 %v2981_v62, %v2982_v13  ;;  %v2989_v63 = vrot.slane %v2988_v36, 2  ;;  %v1171_v15 = vmax.f32 %v1107_v35, 0.0 }
 0x1f2   : > { %v4959_v59 = vsel %vm4791_vm2, %v3930_v60, %v3923_v20  ;;  %v2970_v6 = vrot.slane %v2969_v39, 1  ;;  %v2032_v9 = vcombine.high %v1200_v28, %v1200_v28  ;;  %v2039_v38 = vrot.slane %v1200_v28, %v13167_v44 }
 0x1f3   : > { %v13722_v48 = vsel %vm4793_vm3, %v3937_v5, %v4959_v59  ;;  %v2976_v1 = vmax.f32 %v2974_v3, %v2975_v22  ;;  %v2984_v10 = vrot.slane %v2983_v42, 1  ;;  %v2990_v47 = vmax.f32 %v2988_v36, %v2989_v63 }
 0x1f4   : > { %v2971_v51 = vmax.f32 %v2969_v39, %v2970_v6  ;;  %v2046_v52 = vrot.slane %v2032_v9, %v13167_v44  ;;  %v2047_v53 = vcombine.high %v2039_v38, %v2039_v38  ;;  %v3861_v37 = vsel %vm2628_vm1, %v2039_v38, -inf }
 0x1f5   : > { %v2977_v31 = vrot.slane %v2976_v1, 1  ;;  %v2985_v35 = vmax.f32 %v2983_v42, %v2984_v10  ;;  %v2991_v40 = vrot.slane %v2990_v47, 1  ;;  %v3862_v2 = vrot.slane %v3861_v37, 4 }
 0x1f6   : > { %v2048_v43 = vcombine.high %v2046_v52, %v2046_v52  ;;  %v3868_v58 = vsel %vm2628_vm1, %v2047_v53, -inf  ;;  %v3875_v57 = vsel %vm2628_vm1, %v2046_v52, -inf  ;;  %v1539_v34 = vcombine.high %v1171_v15, %v1171_v15 }
 0x1f7   : > { %v2978_v4 = vmax.f32 %v2976_v1, %v2977_v31  ;;  %v13730_v54 = vmax.f32 %v2990_v47, %v2991_v40  ;;  %v3863_v16 = vmax.f32 %v3861_v37, %v3862_v2  ;;  %v3869_v56 = vrot.slane %v3868_v58, 4  ;;  %v13741_v31 = vpop.f32.mrb[21].mxu1 }
 0x1f8   : > { %v3876_v61 = vrot.slane %v3875_v57, 4  ;;  %v3882_v14 = vsel %vm2628_vm1, %v2048_v43, -inf  ;;  %v1546_v11 = vrot.slane %v1171_v15, %v13167_v44  ;;  %v1553_v46 = vrot.slane %v1539_v34, %v13167_v44 }
 0x1f9   : > { %v4840_v62 = vsel %vm4791_vm2, %v2978_v4, %v2971_v51  ;;  %v3864_v7 = vrot.slane %v3863_v16, 2  ;;  %v3870_v20 = vmax.f32 %v3868_v58, %v3869_v56  ;;  %v3883_v8 = vrot.slane %v3882_v14, 4 }
 0x1fa   : > { %v4841_v41 = vsel %vm4793_vm3, %v2985_v35, %v4840_v62  ;;  %v3877_v21 = vmax.f32 %v3875_v57, %v3876_v61  ;;  %v1554_v5 = vcombine.high %v1546_v11, %v1546_v11  ;;  %v1555_v3 = vcombine.high %v1553_v46, %v1553_v46 }
 0x1fb   : > { %v3865_v13 = vmax.f32 %v3863_v16, %v3864_v7  ;;  %v3871_v36 = vrot.slane %v3870_v20, 2  ;;  %v3884_v60 = vmax.f32 %v3882_v14, %v3883_v8  ;;  %v3049_v39 = vsel %vm2628_vm1, %v1546_v11, -inf  ;;  %v13750_v7 = vld [vmem:[%s16362_s2] ss:$0 sm:$0xff] }
 0x1fc   : > { %v3878_v28 = vrot.slane %v3877_v21, 2  ;;  %v3050_v22 = vrot.slane %v3049_v39, 4  ;;  %v3056_v42 = vsel %vm2628_vm1, %v1554_v5, -inf  ;;  %v3063_v63 = vsel %vm2628_vm1, %v1553_v46, -inf }
 0x1fd   : > { %v3866_v15 = vrot.slane %v3865_v13, 1  ;;  %v3872_v59 = vmax.f32 %v3870_v20, %v3871_v36  ;;  %v3885_v6 = vrot.slane %v3884_v60, 2  ;;  %v3057_v9 = vrot.slane %v3056_v42, 4 }
 0x1fe   : > { %v3879_v38 = vmax.f32 %v3877_v21, %v3878_v28  ;;  %v3051_v1 = vmax.f32 %v3049_v39, %v3050_v22  ;;  %v3064_v10 = vrot.slane %v3063_v63, 4  ;;  %v3070_v47 = vsel %vm2628_vm1, %v1555_v3, -inf }
 0x1ff   : > { %v3867_v51 = vmax.f32 %v3865_v13, %v3866_v15  ;;  %v3873_v52 = vrot.slane %v3872_v59, 1  ;;  %v3886_v53 = vmax.f32 %v3884_v60, %v3885_v6  ;;  %v3058_v37 = vmax.f32 %v3056_v42, %v3057_v9 }
 0x200   : > { %v3880_v35 = vrot.slane %v3879_v38, 1  ;;  %v3052_v40 = vrot.slane %v3051_v1, 2  ;;  %v3065_v2 = vmax.f32 %v3063_v63, %v3064_v10  ;;  %v3071_v43 = vrot.slane %v3070_v47, 4 }
 0x201   : > { %v3874_v58 = vmax.f32 %v3872_v59, %v3873_v52  ;;  %v3887_v57 = vrot.slane %v3886_v53, 1  ;;  %v3059_v34 = vrot.slane %v3058_v37, 2  ;;  %v4849_v4 = vsel %vm4795_vm4, %v13688_v19, %v13693_v18 }
 0x202   : > { %v3881_v16 = vmax.f32 %v3879_v38, %v3880_v35  ;;  %v3053_v56 = vmax.f32 %v3051_v1, %v3052_v40  ;;  %v3066_v61 = vrot.slane %v3065_v2, 2  ;;  %v3072_v14 = vmax.f32 %v3070_v47, %v3071_v43 }
 0x203   : > { %v3888_v11 = vmax.f32 %v3886_v53, %v3887_v57  ;;  %v4952_v46 = vsel %vm4791_vm2, %v3874_v58, %v3867_v51  ;;  %v3060_v62 = vmax.f32 %v3058_v37, %v3059_v34  ;;  %v1068_v20 = vmul.f32 %v13750_v7, %v13480_v45  ;;  %v13784_v37 = vpop.f32.mrb[22].mxu0 }
 0x204   : > { %v4953_v8 = vsel %vm4793_vm3, %v3881_v16, %v4952_v46  ;;  %v3054_v21 = vrot.slane %v3053_v56, 1  ;;  %v3067_v19 = vmax.f32 %v3065_v2, %v3066_v61  ;;  %v3073_v18 = vrot.slane %v3072_v14, 2 }
 0x205   : > { %v3061_v5 = vrot.slane %v3060_v62, 1  ;;  %v1139_v3 = vadd.f32 %v13705_v27, %v1068_v20  ;;  %v13759_v13 = vsel %vm4795_vm4, %v13717_v24, %v13722_v48  ;;  %v1034_v36 = vmul.f32 %v13750_v7, %v13503_v17 }
 0x206   : > { %v3055_v60 = vmax.f32 %v3053_v56, %v3054_v21  ;;  %v3068_v39 = vrot.slane %v3067_v19, 1  ;;  %v3074_v28 = vmax.f32 %v3072_v14, %v3073_v18  ;;  %v13765_v45 = vsel %vm4795_vm4, %v13730_v54, %v4841_v41 }
 0x207   : > { %v3062_v22 = vmax.f32 %v3060_v62, %v3061_v5  ;;  %v1203_v42 = vmax.f32 %v1139_v3, 0.0  ;;  %v1105_v63 = vadd.f32 %v13705_v27, %v1034_v36  ;;  %v1066_v15 = vmul.f32 %v13750_v7, %v13512_v23 }
 0x208   : > { %v3069_v59 = vmax.f32 %v3067_v19, %v3068_v39  ;;  %v3075_v24 = vrot.slane %v3074_v28, 1  ;;  %v4850_v48 = vsel %vm4797_vm5, %v3055_v60, %v4849_v4  ;;  %v13772_v17 = vsel %vm4795_vm4, %v3888_v11, %v4953_v8 }
 0x209   : > { %v4851_v6 = vsel %vm4799_vm6, %v3062_v22, %v4850_v48  ;;  %v2083_v9 = vcombine.high %v1203_v42, %v1203_v42  ;;  %v2090_v54 = vrot.slane %v1203_v42, %v13167_v44  ;;  %v1169_v41 = vmax.f32 %v1105_v63, 0.0  ;;  %v13798_v42 = vpop.f32.mrb[22].mxu1 }
 0x20a   : > { %v3076_v38 = vmax.f32 %v3074_v28, %v3075_v24  ;;  %v4852_v1 = vsel %vm4801_vm7, %v3069_v59, %v4851_v6  ;;  %v1137_v10 = vadd.f32 %v13705_v27, %v1066_v15  ;;  %v13780_v23 = vmul.f32 %v13750_v7, %v13539_v25 }
 0x20b   : > { %v2097_v47 = vrot.slane %v2083_v9, %v13167_v44  ;;  %v2098_v51 = vcombine.high %v2090_v54, %v2090_v54  ;;  %v3945_v52 = vsel %vm2628_vm1, %v2090_v54, -inf  ;;  %v1505_v53 = vcombine.high %v1169_v41, %v1169_v41 }
 0x20c   : > { %v4853_v35 = vsel %vm4803_vm8, %v3076_v38, %v4852_v1  ;;  %v3946_v40 = vrot.slane %v3945_v52, 4  ;;  %v1512_v2 = vrot.slane %v1169_v41, %v13167_v44  ;;  %v13788_v43 = vmax.f32 %v1137_v10, 0.0 }
 0x20d   : > { %5061 = vst [vmem:[#allocation2 + $0x110] sm:$0xff] %v4853_v35  ;;  %v2099_v58 = vcombine.high %v2097_v47, %v2097_v47  ;;  %v3952_v25 = vsel %vm2628_vm1, %v2098_v51, -inf  ;;  %v3959_v57 = vsel %vm2628_vm1, %v2097_v47, -inf  ;;  %v1519_v34 = vrot.slane %v1505_v53, %v13167_v44 }
 0x20e   : > { %v3947_v4 = vmax.f32 %v3945_v52, %v3946_v40  ;;  %v3953_v16 = vrot.slane %v3952_v25, 4  ;;  %v3960_v56 = vrot.slane %v3959_v57, 4  ;;  %v1520_v61 = vcombine.high %v1512_v2, %v1512_v2 }
 0x20f   : > { %v3966_v14 = vsel %vm2628_vm1, %v2099_v58, -inf  ;;  %v1521_v11 = vcombine.high %v1519_v34, %v1519_v34  ;;  %v2993_v46 = vsel %vm2628_vm1, %v1512_v2, -inf  ;;  %v3007_v62 = vsel %vm2628_vm1, %v1519_v34, -inf }
 0x210   : > { %v3948_v20 = vrot.slane %v3947_v4, 2  ;;  %v3954_v8 = vmax.f32 %v3952_v25, %v3953_v16  ;;  %v3961_v21 = vmax.f32 %v3959_v57, %v3960_v56  ;;  %v3967_v19 = vrot.slane %v3966_v14, 4 }
 0x211   : > { %v2994_v18 = vrot.slane %v2993_v46, 4  ;;  %v3000_v5 = vsel %vm2628_vm1, %v1520_v61, -inf  ;;  %v3008_v3 = vrot.slane %v3007_v62, 4  ;;  %v3014_v36 = vsel %vm2628_vm1, %v1521_v11, -inf }
 0x212   : > { %v3949_v60 = vmax.f32 %v3947_v4, %v3948_v20  ;;  %v3955_v39 = vrot.slane %v3954_v8, 2  ;;  %v3962_v28 = vrot.slane %v3961_v21, 2  ;;  %v3968_v22 = vmax.f32 %v3966_v14, %v3967_v19 }
 0x213   : > { %v2995_v63 = vmax.f32 %v2993_v46, %v2994_v18  ;;  %v3001_v15 = vrot.slane %v3000_v5, 4  ;;  %v3009_v59 = vmax.f32 %v3007_v62, %v3008_v3  ;;  %v3015_v24 = vrot.slane %v3014_v36, 4 }
 0x214   : > { %v3950_v48 = vrot.slane %v3949_v60, 1  ;;  %v3956_v6 = vmax.f32 %v3954_v8, %v3955_v39  ;;  %v3963_v9 = vmax.f32 %v3961_v21, %v3962_v28  ;;  %v3969_v54 = vrot.slane %v3968_v22, 2 }
 0x215   : > { %v2996_v41 = vrot.slane %v2995_v63, 2  ;;  %v3002_v38 = vmax.f32 %v3000_v5, %v3001_v15  ;;  %v3010_v1 = vrot.slane %v3009_v59, 2  ;;  %v3016_v10 = vmax.f32 %v3014_v36, %v3015_v24 }
 0x216   : > { %v3951_v47 = vmax.f32 %v3949_v60, %v3950_v48  ;;  %v3957_v51 = vrot.slane %v3956_v6, 1  ;;  %v3964_v52 = vrot.slane %v3963_v9, 1  ;;  %v3970_v53 = vmax.f32 %v3968_v22, %v3969_v54  ;;  %v13815_v22 = vpop.f32.mrb[23].mxu0 }
 0x217   : > { %v2997_v35 = vmax.f32 %v2995_v63, %v2996_v41  ;;  %v3003_v40 = vrot.slane %v3002_v38, 2  ;;  %v3011_v2 = vmax.f32 %v3009_v59, %v3010_v1  ;;  %v3017_v58 = vrot.slane %v3016_v10, 2 }
 0x218   : > { %v3958_v25 = vmax.f32 %v3956_v6, %v3957_v51  ;;  %v3965_v57 = vmax.f32 %v3963_v9, %v3964_v52  ;;  %v3971_v34 = vrot.slane %v3970_v53, 1  ;;  %v4962_v4 = vsel %vm4797_vm5, %v3951_v47, %v13759_v13 }
 0x219   : > { %v2998_v16 = vrot.slane %v2997_v35, 1  ;;  %v3004_v56 = vmax.f32 %v3002_v38, %v3003_v40  ;;  %v3012_v61 = vrot.slane %v3011_v2, 1  ;;  %v3018_v14 = vmax.f32 %v3016_v10, %v3017_v58 }
 0x21a   : > { %v3972_v11 = vmax.f32 %v3970_v53, %v3971_v34  ;;  %v4963_v46 = vsel %vm4799_vm6, %v3958_v25, %v4962_v4  ;;  %v2049_v62 = vcombine.high %v13788_v43, %v13788_v43  ;;  %v2056_v20 = vrot.slane %v13788_v43, %v13167_v44 }
 0x21b   : > { %v4964_v8 = vsel %vm4801_vm7, %v3965_v57, %v4963_v46  ;;  %v2999_v21 = vmax.f32 %v2997_v35, %v2998_v16  ;;  %v3005_v19 = vrot.slane %v3004_v56, 1  ;;  %v3013_v18 = vmax.f32 %v3011_v2, %v3012_v61 }
 0x21c   : > { %v4965_v13 = vsel %vm4803_vm8, %v3972_v11, %v4964_v8  ;;  %v3019_v5 = vrot.slane %v3018_v14, 1  ;;  %v2063_v3 = vrot.slane %v2049_v62, %v13167_v44  ;;  %v2064_v36 = vcombine.high %v2056_v20, %v2056_v20 }
 0x21d   : > { %5077 = vst [vmem:[#allocation2 + $0x350] sm:$0xff] %v4965_v13  ;;  %v3006_v60 = vmax.f32 %v3004_v56, %v3005_v19  ;;  %v4843_v39 = vsel %vm4797_vm5, %v2999_v21, %v13765_v45  ;;  %v3889_v28 = vsel %vm2628_vm1, %v2056_v20, -inf  ;;  %v1110_v43 = vadd.f32 %v13705_v27, %v13780_v23 }
 0x21e   : > { %v3020_v63 = vmax.f32 %v3018_v14, %v3019_v5  ;;  %v2065_v15 = vcombine.high %v2063_v3, %v2063_v3  ;;  %v3890_v59 = vrot.slane %v3889_v28, 4  ;;  %v3896_v24 = vsel %vm2628_vm1, %v2064_v36, -inf }
 0x21f   : > { %v4844_v48 = vsel %vm4799_vm6, %v3006_v60, %v4843_v39  ;;  %v3897_v6 = vrot.slane %v3896_v24, 4  ;;  %v3903_v9 = vsel %vm2628_vm1, %v2063_v3, -inf  ;;  %v1174_v54 = vmax.f32 %v1110_v43, 0.0 }
 0x220   : > { %v4845_v45 = vsel %vm4801_vm7, %v3013_v18, %v4844_v48  ;;  %v3891_v41 = vmax.f32 %v3889_v28, %v3890_v59  ;;  %v3904_v38 = vrot.slane %v3903_v9, 4  ;;  %v3910_v1 = vsel %vm2628_vm1, %v2065_v15, -inf }
 0x221   : > { %v4846_v23 = vsel %vm4803_vm8, %v3020_v63, %v4845_v45  ;;  %v3898_v10 = vmax.f32 %v3896_v24, %v3897_v6  ;;  %v3911_v47 = vrot.slane %v3910_v1, 4  ;;  %v1590_v51 = vcombine.high %v1174_v54, %v1174_v54  ;;  %v13833_v63 = vpop.f32.mrb[23].mxu1 }
 0x222   : > { %5060 = vst [vmem:[#allocation2 + $0xf8] sm:$0xff] %v4846_v23  ;;  %v3892_v52 = vrot.slane %v3891_v41, 2  ;;  %v3905_v53 = vmax.f32 %v3903_v9, %v3904_v38  ;;  %v1597_v35 = vrot.slane %v1174_v54, %v13167_v44  ;;  %v1071_v40 = vmul.f32 %v13750_v7, %v13544_v12 }
 0x223   : > { %v3899_v2 = vrot.slane %v3898_v10, 2  ;;  %v3912_v58 = vmax.f32 %v3910_v1, %v3911_v47  ;;  %v1604_v25 = vrot.slane %v1590_v51, %v13167_v44  ;;  %v1037_v57 = vmul.f32 %v13750_v7, %v13572_v30 }
 0x224   : > { %v3893_v34 = vmax.f32 %v3891_v41, %v3892_v52  ;;  %v3906_v4 = vrot.slane %v3905_v53, 2  ;;  %v1605_v16 = vcombine.high %v1597_v35, %v1597_v35  ;;  %v3133_v56 = vsel %vm2628_vm1, %v1597_v35, -inf }
 0x225   : > { %v3900_v61 = vmax.f32 %v3898_v10, %v3899_v2  ;;  %v3913_v14 = vrot.slane %v3912_v58, 2  ;;  %v1606_v11 = vcombine.high %v1604_v25, %v1604_v25  ;;  %v3134_v46 = vrot.slane %v3133_v56, 4 }
 0x226   : > { %v3894_v62 = vrot.slane %v3893_v34, 1  ;;  %v3907_v20 = vmax.f32 %v3905_v53, %v3906_v4  ;;  %v3140_v12 = vsel %vm2628_vm1, %v1605_v16, -inf  ;;  %v3147_v8 = vsel %vm2628_vm1, %v1604_v25, -inf }
 0x227   : > { %v3901_v21 = vrot.slane %v3900_v61, 1  ;;  %v3914_v19 = vmax.f32 %v3912_v58, %v3913_v14  ;;  %v3135_v18 = vmax.f32 %v3133_v56, %v3134_v46  ;;  %v3141_v13 = vrot.slane %v3140_v12, 4 }
 0x228   : > { %v3895_v30 = vmax.f32 %v3893_v34, %v3894_v62  ;;  %v3908_v5 = vrot.slane %v3907_v20, 1  ;;  %v3148_v3 = vrot.slane %v3147_v8, 4  ;;  %v3154_v36 = vsel %vm2628_vm1, %v1606_v11, -inf }
 0x229   : > { %v3902_v60 = vmax.f32 %v3900_v61, %v3901_v21  ;;  %v3915_v39 = vrot.slane %v3914_v19, 1  ;;  %v3136_v28 = vrot.slane %v3135_v18, 2  ;;  %v3142_v43 = vmax.f32 %v3140_v12, %v3141_v13 }
 0x22a   : > { %v3909_v15 = vmax.f32 %v3907_v20, %v3908_v5  ;;  %v4955_v59 = vsel %vm4797_vm5, %v3895_v30, %v13772_v17  ;;  %v3149_v24 = vmax.f32 %v3147_v8, %v3148_v3  ;;  %v3155_v48 = vrot.slane %v3154_v36, 4 }
 0x22b   : > { %v3916_v6 = vmax.f32 %v3914_v19, %v3915_v39  ;;  %v4956_v9 = vsel %vm4799_vm6, %v3902_v60, %v4955_v59  ;;  %v3137_v54 = vmax.f32 %v3135_v18, %v3136_v28  ;;  %v3143_v45 = vrot.slane %v3142_v43, 2  ;;  %v13863_v28 = vpop.f32.mrb[24].mxu0 }
 0x22c   : > { %v4957_v41 = vsel %vm4801_vm7, %v3909_v15, %v4956_v9  ;;  %v3150_v38 = vrot.slane %v3149_v24, 2  ;;  %v3156_v1 = vmax.f32 %v3154_v36, %v3155_v48  ;;  %v1142_v23 = vadd.f32 %v13705_v27, %v1071_v40 }
 0x22d   : > { %v4958_v10 = vsel %vm4803_vm8, %v3916_v6, %v4957_v41  ;;  %v3138_v47 = vrot.slane %v3137_v54, 1  ;;  %v3144_v51 = vmax.f32 %v3142_v43, %v3143_v45  ;;  %v1108_v52 = vadd.f32 %v13705_v27, %v1037_v57 }
 0x22e   : > { %5076 = vst [vmem:[#allocation2 + $0x338] sm:$0xff] %v4958_v10  ;;  %v3151_v17 = vmax.f32 %v3149_v24, %v3150_v38  ;;  %v3157_v53 = vrot.slane %v3156_v1, 2  ;;  %v1206_v35 = vmax.f32 %v1142_v23, 0.0  ;;  %v1069_v2 = vmul.f32 %v13750_v7, %v13577_v26 }
 0x22f   : > { %v3139_v58 = vmax.f32 %v3137_v54, %v3138_v47  ;;  %v3145_v25 = vrot.slane %v3144_v51, 1  ;;  %v1172_v34 = vmax.f32 %v1108_v52, 0.0  ;;  %v13846_v4 = vmul.f32 %v13750_v7, %v13606_v29 }
 0x230   : > { %v3152_v40 = vrot.slane %v3151_v17, 1  ;;  %v3158_v16 = vmax.f32 %v3156_v1, %v3157_v53  ;;  %v2134_v56 = vcombine.high %v1206_v35, %v1206_v35  ;;  %v2141_v61 = vrot.slane %v1206_v35, %v13167_v44 }
 0x231   : > { %v3146_v57 = vmax.f32 %v3144_v51, %v3145_v25  ;;  %v1556_v14 = vcombine.high %v1172_v34, %v1172_v34  ;;  %v1563_v11 = vrot.slane %v1172_v34, %v13167_v44  ;;  %v1140_v46 = vadd.f32 %v13705_v27, %v1069_v2 }
 0x232   : > { %v3153_v62 = vmax.f32 %v3151_v17, %v3152_v40  ;;  %v3159_v26 = vrot.slane %v3158_v16, 1  ;;  %v2148_v20 = vrot.slane %v2134_v56, %v13167_v44  ;;  %v2149_v12 = vcombine.high %v2141_v61, %v2141_v61  ;;  %v13869_v40 = vpop.f32.mrb[24].mxu1 }
 0x233   : > { %v4861_v8 = vsel %vm4791_vm2, %v3146_v57, %v3139_v58  ;;  %v4029_v29 = vsel %vm2628_vm1, %v2141_v61, -inf  ;;  %v1570_v21 = vrot.slane %v1556_v14, %v13167_v44  ;;  %v1571_v19 = vcombine.high %v1563_v11, %v1563_v11 }
 0x234   : > { %v13855_v18 = vmax.f32 %v3158_v16, %v3159_v26  ;;  %v13858_v13 = vsel %vm4793_vm3, %v3153_v62, %v4861_v8  ;;  %v2150_v30 = vcombine.high %v2148_v20, %v2148_v20  ;;  %v4030_v5 = vrot.slane %v4029_v29, 4 }
 0x235   : > { %v4036_v3 = vsel %vm2628_vm1, %v2149_v12, -inf  ;;  %v4043_v36 = vsel %vm2628_vm1, %v2148_v20, -inf  ;;  %v1572_v60 = vcombine.high %v1570_v21, %v1570_v21  ;;  %v3077_v39 = vsel %vm2628_vm1, %v1563_v11, -inf }
 0x236   : > { %v4031_v43 = vmax.f32 %v4029_v29, %v4030_v5  ;;  %v4037_v15 = vrot.slane %v4036_v3, 4  ;;  %v4044_v59 = vrot.slane %v4043_v36, 4  ;;  %v4050_v24 = vsel %vm2628_vm1, %v2150_v30, -inf }
 0x237   : > { %v4051_v48 = vrot.slane %v4050_v24, 4  ;;  %v3078_v6 = vrot.slane %v3077_v39, 4  ;;  %v3084_v9 = vsel %vm2628_vm1, %v1571_v19, -inf  ;;  %v3091_v54 = vsel %vm2628_vm1, %v1570_v21, -inf }
 0x238   : > { %v4032_v45 = vrot.slane %v4031_v43, 2  ;;  %v4038_v41 = vmax.f32 %v4036_v3, %v4037_v15  ;;  %v4045_v38 = vmax.f32 %v4043_v36, %v4044_v59  ;;  %v3085_v1 = vrot.slane %v3084_v9, 4 }
 0x239   : > { %v4052_v23 = vmax.f32 %v4050_v24, %v4051_v48  ;;  %v3079_v10 = vmax.f32 %v3077_v39, %v3078_v6  ;;  %v3092_v47 = vrot.slane %v3091_v54, 4  ;;  %v3098_v51 = vsel %vm2628_vm1, %v1572_v60, -inf }
 0x23a   : > { %v4033_v52 = vmax.f32 %v4031_v43, %v4032_v45  ;;  %v4039_v17 = vrot.slane %v4038_v41, 2  ;;  %v4046_v53 = vrot.slane %v4045_v38, 2  ;;  %v3086_v35 = vmax.f32 %v3084_v9, %v3085_v1 }
 0x23b   : > { %v4053_v2 = vrot.slane %v4052_v23, 2  ;;  %v3080_v58 = vrot.slane %v3079_v10, 2  ;;  %v3093_v25 = vmax.f32 %v3091_v54, %v3092_v47  ;;  %v3099_v34 = vrot.slane %v3098_v51, 4 }
 0x23c   : > { %v4034_v16 = vrot.slane %v4033_v52, 1  ;;  %v4040_v56 = vmax.f32 %v4038_v41, %v4039_v17  ;;  %v4047_v61 = vmax.f32 %v4045_v38, %v4046_v53  ;;  %v3087_v57 = vrot.slane %v3086_v35, 2 }
 0x23d   : > { %v4054_v14 = vmax.f32 %v4052_v23, %v4053_v2  ;;  %v3081_v11 = vmax.f32 %v3079_v10, %v3080_v58  ;;  %v3094_v62 = vrot.slane %v3093_v25, 2  ;;  %v3100_v26 = vmax.f32 %v3098_v51, %v3099_v34 }
 0x23e   : > { %v4035_v20 = vmax.f32 %v4033_v52, %v4034_v16  ;;  %v4041_v12 = vrot.slane %v4040_v56, 1  ;;  %v4048_v8 = vrot.slane %v4047_v61, 1  ;;  %v3088_v29 = vmax.f32 %v3086_v35, %v3087_v57 }
 0x23f   : > { %v4055_v21 = vrot.slane %v4054_v14, 1  ;;  %v3082_v19 = vrot.slane %v3081_v11, 1  ;;  %v3095_v30 = vmax.f32 %v3093_v25, %v3094_v62  ;;  %v3101_v5 = vrot.slane %v3100_v26, 2  ;;  %v13898_v62 = vpop.f32.mrb[25].mxu0 }
 0x240   : > { %v4042_v3 = vmax.f32 %v4040_v56, %v4041_v12  ;;  %v4049_v36 = vmax.f32 %v4047_v61, %v4048_v8  ;;  %v3089_v60 = vrot.slane %v3088_v29, 1  ;;  %v1204_v39 = vmax.f32 %v1140_v46, 0.0 }
 0x241   : > { %v4056_v43 = vmax.f32 %v4054_v14, %v4055_v21  ;;  %v3083_v15 = vmax.f32 %v3081_v11, %v3082_v19  ;;  %v3096_v59 = vrot.slane %v3095_v30, 1  ;;  %v3102_v24 = vmax.f32 %v3100_v26, %v3101_v5 }
 0x242   : > { %v4973_v48 = vsel %vm4791_vm2, %v4042_v3, %v4035_v20  ;;  %v3090_v6 = vmax.f32 %v3088_v29, %v3089_v60  ;;  %v2100_v9 = vcombine.high %v1204_v39, %v1204_v39  ;;  %v2107_v54 = vrot.slane %v1204_v39, %v13167_v44 }
 0x243   : > { %v4974_v45 = vsel %vm4793_vm3, %v4049_v36, %v4973_v48  ;;  %v3097_v41 = vmax.f32 %v3095_v30, %v3096_v59  ;;  %v3103_v38 = vrot.slane %v3102_v24, 1  ;;  %v1111_v1 = vadd.f32 %v13705_v27, %v13846_v4  ;;  %v13905_v48 = vpop.f32.mrb[25].mxu1 }
 0x244   : > { %v4854_v23 = vsel %vm4791_vm2, %v3090_v6, %v3083_v15  ;;  %v2114_v46 = vrot.slane %v2100_v9, %v13167_v44  ;;  %v2115_v10 = vcombine.high %v2107_v54, %v2107_v54  ;;  %v3973_v47 = vsel %vm2628_vm1, %v2107_v54, -inf }
 0x245   : > { %v13879_v51 = vmax.f32 %v3102_v24, %v3103_v38  ;;  %v13882_v52 = vsel %vm4793_vm3, %v3097_v41, %v4854_v23  ;;  %v3974_v17 = vrot.slane %v3973_v47, 4  ;;  %v1175_v53 = vmax.f32 %v1111_v1, 0.0 }
 0x246   : > { %v2116_v35 = vcombine.high %v2114_v46, %v2114_v46  ;;  %v3980_v2 = vsel %vm2628_vm1, %v2115_v10, -inf  ;;  %v3987_v58 = vsel %vm2628_vm1, %v2114_v46, -inf  ;;  %v13889_v4 = vsel %vm4795_vm4, %v13855_v18, %v13858_v13 }
 0x247   : > { %v3975_v25 = vmax.f32 %v3973_v47, %v3974_v17  ;;  %v3981_v34 = vrot.slane %v3980_v2, 4  ;;  %v3988_v16 = vrot.slane %v3987_v58, 4  ;;  %v1607_v56 = vcombine.high %v1175_v53, %v1175_v53 }
 0x248   : > { %v3994_v61 = vsel %vm2628_vm1, %v2116_v35, -inf  ;;  %v1614_v57 = vrot.slane %v1175_v53, %v13167_v44  ;;  %v1072_v14 = vmul.f32 %v13750_v7, %v13616_v50  ;;  %v13896_v11 = vsel %vm4795_vm4, %v4056_v43, %v4974_v45 }
 0x249   : > { %v3976_v26 = vrot.slane %v3975_v25, 2  ;;  %v3982_v20 = vmax.f32 %v3980_v2, %v3981_v34  ;;  %v3989_v18 = vmax.f32 %v3987_v58, %v3988_v16  ;;  %v3995_v13 = vrot.slane %v3994_v61, 4 }
 0x24a   : > { %v1621_v12 = vrot.slane %v1607_v56, %v13167_v44  ;;  %v1622_v8 = vcombine.high %v1614_v57, %v1614_v57  ;;  %v3161_v29 = vsel %vm2628_vm1, %v1614_v57, -inf  ;;  %v1143_v21 = vadd.f32 %v13705_v27, %v1072_v14 }
 0x24b   : > { %v3977_v19 = vmax.f32 %v3975_v25, %v3976_v26  ;;  %v3983_v30 = vrot.slane %v3982_v20, 2  ;;  %v3990_v5 = vrot.slane %v3989_v18, 2  ;;  %v3996_v50 = vmax.f32 %v3994_v61, %v3995_v13 }
 0x24c   : > { %v1623_v3 = vcombine.high %v1621_v12, %v1621_v12  ;;  %v3162_v36 = vrot.slane %v3161_v29, 4  ;;  %v3168_v60 = vsel %vm2628_vm1, %v1622_v8, -inf  ;;  %v3175_v39 = vsel %vm2628_vm1, %v1621_v12, -inf }
 0x24d   : > { %v3978_v43 = vrot.slane %v3977_v19, 1  ;;  %v3984_v15 = vmax.f32 %v3982_v20, %v3983_v30  ;;  %v3991_v59 = vmax.f32 %v3989_v18, %v3990_v5  ;;  %v3997_v24 = vrot.slane %v3996_v50, 2 }
 0x24e   : > { %v3163_v6 = vmax.f32 %v3161_v29, %v3162_v36  ;;  %v3169_v9 = vrot.slane %v3168_v60, 4  ;;  %v3176_v54 = vrot.slane %v3175_v39, 4  ;;  %v3182_v45 = vsel %vm2628_vm1, %v1623_v3, -inf }
 0x24f   : > { %v3979_v41 = vmax.f32 %v3977_v19, %v3978_v43  ;;  %v3985_v38 = vrot.slane %v3984_v15, 1  ;;  %v3992_v1 = vrot.slane %v3991_v59, 1  ;;  %v3998_v23 = vmax.f32 %v3996_v50, %v3997_v24 }
 0x250   : > { %v3164_v46 = vrot.slane %v3163_v6, 2  ;;  %v3170_v10 = vmax.f32 %v3168_v60, %v3169_v9  ;;  %v3177_v47 = vmax.f32 %v3175_v39, %v3176_v54  ;;  %v3183_v17 = vrot.slane %v3182_v45, 4 }
 0x251   : > { %v3986_v53 = vmax.f32 %v3984_v15, %v3985_v38  ;;  %v3993_v35 = vmax.f32 %v3991_v59, %v3992_v1  ;;  %v3999_v2 = vrot.slane %v3998_v23, 1  ;;  %v1207_v58 = vmax.f32 %v1143_v21, 0.0 }
 0x252   : > { %v3165_v25 = vmax.f32 %v3163_v6, %v3164_v46  ;;  %v3171_v34 = vrot.slane %v3170_v10, 2  ;;  %v3178_v16 = vrot.slane %v3177_v47, 2  ;;  %v3184_v56 = vmax.f32 %v3182_v45, %v3183_v17 }
 0x253   : > { %v4000_v61 = vmax.f32 %v3998_v23, %v3999_v2  ;;  %v4966_v57 = vsel %vm4791_vm2, %v3986_v53, %v3979_v41  ;;  %v2151_v14 = vcombine.high %v1207_v58, %v1207_v58  ;;  %v2158_v26 = vrot.slane %v1207_v58, %v13167_v44 }
 0x254   : > { %v4967_v20 = vsel %vm4793_vm3, %v3993_v35, %v4966_v57  ;;  %v3166_v18 = vrot.slane %v3165_v25, 1  ;;  %v3172_v13 = vmax.f32 %v3170_v10, %v3171_v34  ;;  %v3179_v12 = vmax.f32 %v3177_v47, %v3178_v16  ;;  %v13921_v10 = vpop.f32.mrb[26].mxu0 }
 0x255   : > { %v3185_v8 = vrot.slane %v3184_v56, 2  ;;  %v2165_v29 = vrot.slane %v2151_v14, %v13167_v44  ;;  %v2166_v19 = vcombine.high %v2158_v26, %v2158_v26  ;;  %v4057_v21 = vsel %vm2628_vm1, %v2158_v26, -inf }
 0x256   : > { %v3167_v30 = vmax.f32 %v3165_v25, %v3166_v18  ;;  %v3173_v5 = vrot.slane %v3172_v13, 1  ;;  %v3180_v50 = vrot.slane %v3179_v12, 1  ;;  %v4058_v3 = vrot.slane %v4057_v21, 4 }
 0x257   : > { %v3186_v36 = vmax.f32 %v3184_v56, %v3185_v8  ;;  %v2167_v60 = vcombine.high %v2165_v29, %v2165_v29  ;;  %v4064_v39 = vsel %vm2628_vm1, %v2166_v19, -inf  ;;  %v4071_v43 = vsel %vm2628_vm1, %v2165_v29, -inf }
 0x258   : > { %v3174_v15 = vmax.f32 %v3172_v13, %v3173_v5  ;;  %v3181_v59 = vmax.f32 %v3179_v12, %v3180_v50  ;;  %v4864_v24 = vsel %vm4797_vm5, %v3167_v30, %v13889_v4  ;;  %v4059_v6 = vmax.f32 %v4057_v21, %v4058_v3 }
 0x259   : > { %v3187_v9 = vrot.slane %v3186_v36, 1  ;;  %v4065_v54 = vrot.slane %v4064_v39, 4  ;;  %v4072_v45 = vrot.slane %v4071_v43, 4  ;;  %v4078_v41 = vsel %vm2628_vm1, %v2167_v60, -inf  ;;  %v13946_v60 = vpop.f32.mrb[26].mxu1 }
 0x25a   : > { %v4865_v38 = vsel %vm4799_vm6, %v3174_v15, %v4864_v24  ;;  %v4060_v1 = vrot.slane %v4059_v6, 2  ;;  %v4079_v23 = vrot.slane %v4078_v41, 4  ;;  %v1038_v46 = vmul.f32 %v13750_v7, %v13648_v0 }
 0x25b   : > { %v3188_v47 = vmax.f32 %v3186_v36, %v3187_v9  ;;  %v4866_v17 = vsel %vm4801_vm7, %v3181_v59, %v4865_v38  ;;  %v4066_v53 = vmax.f32 %v4064_v39, %v4065_v54  ;;  %v4073_v4 = vmax.f32 %v4071_v43, %v4072_v45 }
 0x25c   : > { %v4061_v35 = vmax.f32 %v4059_v6, %v4060_v1  ;;  %v4080_v2 = vmax.f32 %v4078_v41, %v4079_v23  ;;  %v1109_v58 = vadd.f32 %v13705_v27, %v1038_v46  ;;  %v13928_v25 = vsel %vm4795_vm4, %v13879_v51, %v13882_v52 }
 0x25d   : > { %v4867_v34 = vsel %vm4803_vm8, %v3188_v47, %v4866_v17  ;;  %v4067_v16 = vrot.slane %v4066_v53, 2  ;;  %v4074_v0 = vrot.slane %v4073_v4, 2  ;;  %v1070_v56 = vmul.f32 %v13750_v7, %v13675_v49 }
 0x25e   : > { %5063 = vst [vmem:[#allocation2 + $0x140] sm:$0xff] %v4867_v34  ;;  %v4062_v57 = vrot.slane %v4061_v35, 1  ;;  %v4081_v14 = vrot.slane %v4080_v2, 2  ;;  %v1173_v26 = vmax.f32 %v1109_v58, 0.0  ;;  %v13934_v18 = vsel %vm4795_vm4, %v4000_v61, %v4967_v20 }
 0x25f   : > { %v4068_v13 = vmax.f32 %v4066_v53, %v4067_v16  ;;  %v4075_v12 = vmax.f32 %v4073_v4, %v4074_v0  ;;  %v1141_v8 = vadd.f32 %v13705_v27, %v1070_v56  ;;  %v1043_v51 = vmul.f32 %v13750_v7, %v13697_v33 }
 0x260   : > { %v4063_v52 = vmax.f32 %v4061_v35, %v4062_v57  ;;  %v4082_v29 = vmax.f32 %v4080_v2, %v4081_v14  ;;  %v1573_v19 = vcombine.high %v1173_v26, %v1173_v26  ;;  %v1580_v21 = vrot.slane %v1173_v26, %v13167_v44 }
 0x261   : > { %v4069_v49 = vrot.slane %v4068_v13, 1  ;;  %v4076_v30 = vrot.slane %v4075_v12, 1  ;;  %v1205_v5 = vmax.f32 %v1141_v8, 0.0  ;;  %v13941_v50 = vadd.f32 %v13705_v27, %v1043_v51 }
 0x262   : > { %v4083_v61 = vrot.slane %v4082_v29, 1  ;;  %v4976_v20 = vsel %vm4797_vm5, %v4063_v52, %v13896_v11  ;;  %v1587_v3 = vrot.slane %v1573_v19, %v13167_v44  ;;  %v1588_v36 = vcombine.high %v1580_v21, %v1580_v21 }
 0x263   : > { %v4070_v33 = vmax.f32 %v4068_v13, %v4069_v49  ;;  %v4077_v39 = vmax.f32 %v4075_v12, %v4076_v30  ;;  %v3105_v43 = vsel %vm2628_vm1, %v1580_v21, -inf  ;;  %v2117_v15 = vcombine.high %v1205_v5, %v1205_v5  ;;  %v13961_v30 = vpop.f32.mrb[27].mxu0 }
 0x264   : > { %v4084_v59 = vmax.f32 %v4082_v29, %v4083_v61  ;;  %v1589_v24 = vcombine.high %v1587_v3, %v1587_v3  ;;  %v3106_v6 = vrot.slane %v3105_v43, 4  ;;  %v3112_v27 = vsel %vm2628_vm1, %v1588_v36, -inf }
 0x265   : > { %v4977_v9 = vsel %vm4799_vm6, %v4070_v33, %v4976_v20  ;;  %v3113_v54 = vrot.slane %v3112_v27, 4  ;;  %v3119_v11 = vsel %vm2628_vm1, %v1587_v3, -inf  ;;  %v2124_v45 = vrot.slane %v1205_v5, %v13167_v44 }
 0x266   : > { %v4978_v41 = vsel %vm4801_vm7, %v4077_v39, %v4977_v9  ;;  %v3107_v38 = vmax.f32 %v3105_v43, %v3106_v6  ;;  %v3120_v1 = vrot.slane %v3119_v11, 4  ;;  %v3126_v23 = vsel %vm2628_vm1, %v1589_v24, -inf }
 0x267   : > { %v4979_v46 = vsel %vm4803_vm8, %v4084_v59, %v4978_v41  ;;  %v3114_v47 = vmax.f32 %v3112_v27, %v3113_v54  ;;  %v3127_v17 = vrot.slane %v3126_v23, 4  ;;  %v2131_v53 = vrot.slane %v2117_v15, %v13167_v44 }
 0x268   : > { %5079 = vst [vmem:[#allocation2 + $0x380] sm:$0xff] %v4979_v46  ;;  %v3108_v4 = vrot.slane %v3107_v38, 2  ;;  %v3121_v35 = vmax.f32 %v3119_v11, %v3120_v1  ;;  %v2132_v2 = vcombine.high %v2124_v45, %v2124_v45  ;;  %v4001_v58 = vsel %vm2628_vm1, %v2124_v45, -inf }
 0x269   : > { %v3115_v34 = vrot.slane %v3114_v47, 2  ;;  %v3128_v16 = vmax.f32 %v3126_v23, %v3127_v17  ;;  %v2133_v0 = vcombine.high %v2131_v53, %v2131_v53  ;;  %v4002_v56 = vrot.slane %v4001_v58, 4 }
 0x26a   : > { %v3109_v57 = vmax.f32 %v3107_v38, %v3108_v4  ;;  %v3122_v14 = vrot.slane %v3121_v35, 2  ;;  %v4008_v26 = vsel %vm2628_vm1, %v2132_v2, -inf  ;;  %v4015_v13 = vsel %vm2628_vm1, %v2131_v53, -inf }
 0x26b   : > { %v3116_v12 = vmax.f32 %v3114_v47, %v3115_v34  ;;  %v3129_v8 = vrot.slane %v3128_v16, 2  ;;  %v4003_v51 = vmax.f32 %v4001_v58, %v4002_v56  ;;  %v4009_v52 = vrot.slane %v4008_v26, 4 }
 0x26c   : > { %v3110_v29 = vrot.slane %v3109_v57, 1  ;;  %v3123_v19 = vmax.f32 %v3121_v35, %v3122_v14  ;;  %v4016_v21 = vrot.slane %v4015_v13, 4  ;;  %v4022_v49 = vsel %vm2628_vm1, %v2133_v0, -inf }
 0x26d   : > { %v3117_v5 = vrot.slane %v3116_v12, 1  ;;  %v3130_v61 = vmax.f32 %v3128_v16, %v3129_v8  ;;  %v4004_v20 = vrot.slane %v4003_v51, 2  ;;  %v4010_v3 = vmax.f32 %v4008_v26, %v4009_v52 }
 0x26e   : > { %v3111_v36 = vmax.f32 %v3109_v57, %v3110_v29  ;;  %v3124_v33 = vrot.slane %v3123_v19, 1  ;;  %v4017_v39 = vmax.f32 %v4015_v13, %v4016_v21  ;;  %v4023_v43 = vrot.slane %v4022_v49, 4 }
 0x26f   : > { %v3118_v15 = vmax.f32 %v3116_v12, %v3117_v5  ;;  %v3131_v59 = vrot.slane %v3130_v61, 1  ;;  %v4005_v24 = vmax.f32 %v4003_v51, %v4004_v20  ;;  %v4011_v6 = vrot.slane %v4010_v3, 2  ;;  %v13987_v5 = vpop.f32.mrb[27].mxu1 }
 0x270   : > { %v3125_v27 = vmax.f32 %v3123_v19, %v3124_v33  ;;  %v4857_v9 = vsel %vm4797_vm5, %v3111_v36, %v13928_v25  ;;  %v4018_v54 = vrot.slane %v4017_v39, 2  ;;  %v4024_v11 = vmax.f32 %v4022_v49, %v4023_v43 }
 0x271   : > { %v3132_v45 = vmax.f32 %v3130_v61, %v3131_v59  ;;  %v4858_v41 = vsel %vm4799_vm6, %v3118_v15, %v4857_v9  ;;  %v4006_v38 = vrot.slane %v4005_v24, 1  ;;  %v4012_v1 = vmax.f32 %v4010_v3, %v4011_v6 }
 0x272   : > { %v4859_v23 = vsel %vm4801_vm7, %v3125_v27, %v4858_v41  ;;  %v4019_v46 = vmax.f32 %v4017_v39, %v4018_v54  ;;  %v4025_v47 = vrot.slane %v4024_v11, 2  ;;  %v1178_v17 = vmax.f32 %v13941_v50, 0.0  ;;  %v13977_v50 = vld [vmem:[%s16363_s3] ss:$0 sm:$0xff] }
 0x273   : > { %v4860_v53 = vsel %vm4803_vm8, %v3132_v45, %v4859_v23  ;;  %v4007_v4 = vmax.f32 %v4005_v24, %v4006_v38  ;;  %v4013_v35 = vrot.slane %v4012_v1, 1  ;;  %v1075_v25 = vmul.f32 %v13750_v7, %v13715_v32 }
 0x274   : > { %5062 = vst [vmem:[#allocation2 + $0x128] sm:$0xff] %v4860_v53  ;;  %v4020_v2 = vrot.slane %v4019_v46, 1  ;;  %v4026_v58 = vmax.f32 %v4024_v11, %v4025_v47  ;;  %v1658_v34 = vcombine.high %v1178_v17, %v1178_v17  ;;  %v1665_v16 = vrot.slane %v1178_v17, %v13167_v44 }
 0x275   : > { %v4014_v0 = vmax.f32 %v4012_v1, %v4013_v35  ;;  %v4969_v56 = vsel %vm4797_vm5, %v4007_v4, %v13934_v18  ;;  %v1146_v57 = vadd.f32 %v13977_v50, %v1075_v25  ;;  %v1041_v32 = vmul.f32 %v13750_v7, %v13726_v55 }
 0x276   : > { %v4021_v14 = vmax.f32 %v4019_v46, %v4020_v2  ;;  %v4027_v26 = vrot.slane %v4026_v58, 1  ;;  %v1672_v13 = vrot.slane %v1658_v34, %v13167_v44  ;;  %v1673_v12 = vcombine.high %v1665_v16, %v1665_v16 }
 0x277   : > { %v4970_v8 = vsel %vm4799_vm6, %v4014_v0, %v4969_v56  ;;  %v3245_v51 = vsel %vm2628_vm1, %v1665_v16, -inf  ;;  %v1210_v18 = vmax.f32 %v1146_v57, 0.0  ;;  %v1112_v52 = vadd.f32 %v13977_v50, %v1041_v32 }
 0x278   : > { %v4028_v29 = vmax.f32 %v4026_v58, %v4027_v26  ;;  %v4971_v19 = vsel %vm4801_vm7, %v4021_v14, %v4970_v8  ;;  %v1674_v21 = vcombine.high %v1672_v13, %v1672_v13  ;;  %v3246_v49 = vrot.slane %v3245_v51, 4 }
 0x279   : > { %v3252_v55 = vsel %vm2628_vm1, %v1673_v12, -inf  ;;  %v3259_v7 = vsel %vm2628_vm1, %v1672_v13, -inf  ;;  %v2202_v61 = vcombine.high %v1210_v18, %v1210_v18  ;;  %v2209_v20 = vrot.slane %v1210_v18, %v13167_v44 }
 0x27a   : > { %v4972_v3 = vsel %vm4803_vm8, %v4028_v29, %v4971_v19  ;;  %v3247_v36 = vmax.f32 %v3245_v51, %v3246_v49  ;;  %v3253_v33 = vrot.slane %v3252_v55, 4  ;;  %v3260_v39 = vrot.slane %v3259_v7, 4  ;;  %v13999_v29 = vpop.f32.mrb[28].mxu0 }
 0x27b   : > { %5078 = vst [vmem:[#allocation2 + $0x368] sm:$0xff] %v4972_v3  ;;  %v3266_v43 = vsel %vm2628_vm1, %v1674_v21, -inf  ;;  %v2216_v15 = vrot.slane %v2202_v61, %v13167_v44  ;;  %v2217_v59 = vcombine.high %v2209_v20, %v2209_v20  ;;  %v4141_v24 = vsel %vm2628_vm1, %v2209_v20, -inf }
 0x27c   : > { %v3248_v6 = vrot.slane %v3247_v36, 2  ;;  %v3254_v27 = vmax.f32 %v3252_v55, %v3253_v33  ;;  %v3261_v9 = vmax.f32 %v3259_v7, %v3260_v39  ;;  %v3267_v54 = vrot.slane %v3266_v43, 4 }
 0x27d   : > { %v2218_v11 = vcombine.high %v2216_v15, %v2216_v15  ;;  %v4142_v45 = vrot.slane %v4141_v24, 4  ;;  %v4148_v41 = vsel %vm2628_vm1, %v2217_v59, -inf  ;;  %v4155_v38 = vsel %vm2628_vm1, %v2216_v15, -inf }
 0x27e   : > { %v3249_v1 = vmax.f32 %v3247_v36, %v3248_v6  ;;  %v3255_v23 = vrot.slane %v3254_v27, 2  ;;  %v3262_v46 = vrot.slane %v3261_v9, 2  ;;  %v3268_v47 = vmax.f32 %v3266_v43, %v3267_v54 }
 0x27f   : > { %v4143_v17 = vmax.f32 %v4141_v24, %v4142_v45  ;;  %v4149_v53 = vrot.slane %v4148_v41, 4  ;;  %v4156_v4 = vrot.slane %v4155_v38, 4  ;;  %v4162_v35 = vsel %vm2628_vm1, %v2218_v11, -inf }
 0x280   : > { %v3250_v25 = vrot.slane %v3249_v1, 1  ;;  %v3256_v2 = vmax.f32 %v3254_v27, %v3255_v23  ;;  %v3263_v58 = vmax.f32 %v3261_v9, %v3262_v46  ;;  %v3269_v34 = vrot.slane %v3268_v47, 2 }
 0x281   : > { %v4144_v16 = vrot.slane %v4143_v17, 2  ;;  %v4150_v0 = vmax.f32 %v4148_v41, %v4149_v53  ;;  %v4157_v56 = vmax.f32 %v4155_v38, %v4156_v4  ;;  %v4163_v57 = vrot.slane %v4162_v35, 4  ;;  %v14009_v38 = vld [vmem:[%s16362_s2] ss:$0 sm:$0xff] }
 0x282   : > { %v3251_v32 = vmax.f32 %v3249_v1, %v3250_v25  ;;  %v3257_v14 = vrot.slane %v3256_v2, 1  ;;  %v3264_v26 = vrot.slane %v3263_v58, 1  ;;  %v3270_v13 = vmax.f32 %v3268_v47, %v3269_v34 }
 0x283   : > { %v4145_v12 = vmax.f32 %v4143_v17, %v4144_v16  ;;  %v4151_v8 = vrot.slane %v4150_v0, 2  ;;  %v4158_v51 = vrot.slane %v4157_v56, 2  ;;  %v4164_v18 = vmax.f32 %v4162_v35, %v4163_v57  ;;  %v14023_v16 = vpop.f32.mrb[28].mxu1 }
 0x284   : > { %v3258_v19 = vmax.f32 %v3256_v2, %v3257_v14  ;;  %v3265_v21 = vmax.f32 %v3263_v58, %v3264_v26  ;;  %v3271_v49 = vrot.slane %v3270_v13, 1  ;;  %v1176_v55 = vmax.f32 %v1112_v52, 0.0 }
 0x285   : > { %v4146_v7 = vrot.slane %v4145_v12, 1  ;;  %v4152_v61 = vmax.f32 %v4150_v0, %v4151_v8  ;;  %v4159_v20 = vmax.f32 %v4157_v56, %v4158_v51  ;;  %v4165_v3 = vrot.slane %v4164_v18, 2 }
 0x286   : > { %v3272_v36 = vmax.f32 %v3270_v13, %v3271_v49  ;;  %v4875_v33 = vsel %vm4791_vm2, %v3258_v19, %v3251_v32  ;;  %v1624_v39 = vcombine.high %v1176_v55, %v1176_v55  ;;  %v1631_v43 = vrot.slane %v1176_v55, %v13167_v44 }
 0x287   : > { %v4876_v15 = vsel %vm4793_vm3, %v3265_v21, %v4875_v33  ;;  %v4147_v59 = vmax.f32 %v4145_v12, %v4146_v7  ;;  %v4153_v24 = vrot.slane %v4152_v61, 1  ;;  %v4160_v6 = vrot.slane %v4159_v20, 1 }
 0x288   : > { %v4166_v27 = vmax.f32 %v4164_v18, %v4165_v3  ;;  %v1638_v9 = vrot.slane %v1624_v39, %v13167_v44  ;;  %v1639_v54 = vcombine.high %v1631_v43, %v1631_v43  ;;  %v3189_v52 = vsel %vm2628_vm1, %v1631_v43, -inf }
 0x289   : > { %v4154_v11 = vmax.f32 %v4152_v61, %v4153_v24  ;;  %v4161_v45 = vmax.f32 %v4159_v20, %v4160_v6  ;;  %v3190_v41 = vrot.slane %v3189_v52, 4  ;;  %v1073_v1 = vmul.f32 %v14009_v38, %v13741_v31  ;;  %v14037_v6 = vpop.f32.mrb[29].mxu0 }
 0x28a   : > { %v4167_v23 = vrot.slane %v4166_v27, 1  ;;  %v1640_v46 = vcombine.high %v1638_v9, %v1638_v9  ;;  %v3196_v47 = vsel %vm2628_vm1, %v1639_v54, -inf  ;;  %v3203_v17 = vsel %vm2628_vm1, %v1638_v9, -inf }
 0x28b   : > { %v4987_v53 = vsel %vm4791_vm2, %v4154_v11, %v4147_v59  ;;  %v3191_v4 = vmax.f32 %v3189_v52, %v3190_v41  ;;  %v3197_v35 = vrot.slane %v3196_v47, 4  ;;  %v3204_v25 = vrot.slane %v3203_v17, 4 }
 0x28c   : > { %v14016_v2 = vmax.f32 %v4166_v27, %v4167_v23  ;;  %v14019_v58 = vsel %vm4793_vm3, %v4161_v45, %v4987_v53  ;;  %v3210_v34 = vsel %vm2628_vm1, %v1640_v46, -inf  ;;  %v1144_v31 = vadd.f32 %v13977_v50, %v1073_v1 }
 0x28d   : > { %v3192_v0 = vrot.slane %v3191_v4, 2  ;;  %v3198_v56 = vmax.f32 %v3196_v47, %v3197_v35  ;;  %v3205_v57 = vmax.f32 %v3203_v17, %v3204_v25  ;;  %v3211_v32 = vrot.slane %v3210_v34, 4 }
 0x28e   : > { %v1208_v14 = vmax.f32 %v1144_v31, 0.0  ;;  %v1044_v26 = vmul.f32 %v14009_v38, %v13784_v37  ;;  %v14028_v13 = vsel %vm4795_vm4, %v3272_v36, %v4876_v15  ;;  %v1076_v12 = vmul.f32 %v14009_v38, %v13798_v42 }
 0x28f   : > { %v3193_v8 = vmax.f32 %v3191_v4, %v3192_v0  ;;  %v3199_v51 = vrot.slane %v3198_v56, 2  ;;  %v3206_v18 = vrot.slane %v3205_v57, 2  ;;  %v3212_v19 = vmax.f32 %v3210_v34, %v3211_v32 }
 0x290   : > { %v2168_v21 = vcombine.high %v1208_v14, %v1208_v14  ;;  %v2175_v49 = vrot.slane %v1208_v14, %v13167_v44  ;;  %v1115_v55 = vadd.f32 %v13977_v50, %v1044_v26  ;;  %v1147_v7 = vadd.f32 %v13977_v50, %v1076_v12 }
 0x291   : > { %v3194_v61 = vrot.slane %v3193_v8, 1  ;;  %v3200_v20 = vmax.f32 %v3198_v56, %v3199_v51  ;;  %v3207_v37 = vmax.f32 %v3205_v57, %v3206_v18  ;;  %v3213_v3 = vrot.slane %v3212_v19, 2 }
 0x292   : > { %v2182_v36 = vrot.slane %v2168_v21, %v13167_v44  ;;  %v2183_v33 = vcombine.high %v2175_v49, %v2175_v49  ;;  %v4085_v42 = vsel %vm2628_vm1, %v2175_v49, -inf  ;;  %v1179_v39 = vmax.f32 %v1115_v55, 0.0 }
 0x293   : > { %v3195_v43 = vmax.f32 %v3193_v8, %v3194_v61  ;;  %v3201_v15 = vrot.slane %v3200_v20, 1  ;;  %v3208_v59 = vrot.slane %v3207_v37, 1  ;;  %v3214_v24 = vmax.f32 %v3212_v19, %v3213_v3 }
 0x294   : > { %v2184_v27 = vcombine.high %v2182_v36, %v2182_v36  ;;  %v4086_v9 = vrot.slane %v4085_v42, 4  ;;  %v4092_v54 = vsel %vm2628_vm1, %v2183_v33, -inf  ;;  %v4099_v52 = vsel %vm2628_vm1, %v2182_v36, -inf }
 0x295   : > { %v3202_v11 = vmax.f32 %v3200_v20, %v3201_v15  ;;  %v3209_v45 = vmax.f32 %v3207_v37, %v3208_v59  ;;  %v3215_v41 = vrot.slane %v3214_v24, 1  ;;  %v4093_v1 = vrot.slane %v4092_v54, 4 }
 0x296   : > { %v4087_v23 = vmax.f32 %v4085_v42, %v4086_v9  ;;  %v4100_v46 = vrot.slane %v4099_v52, 4  ;;  %v4106_v47 = vsel %vm2628_vm1, %v2184_v27, -inf  ;;  %v1675_v17 = vcombine.high %v1179_v39, %v1179_v39 }
 0x297   : > { %v14042_v53 = vmax.f32 %v3214_v24, %v3215_v41  ;;  %v4868_v4 = vsel %vm4791_vm2, %v3202_v11, %v3195_v43  ;;  %v4094_v35 = vmax.f32 %v4092_v54, %v4093_v1  ;;  %v4107_v25 = vrot.slane %v4106_v47, 4 }
 0x298   : > { %v14046_v34 = vsel %vm4793_vm3, %v3209_v45, %v4868_v4  ;;  %v4088_v31 = vrot.slane %v4087_v23, 2  ;;  %v4101_v0 = vmax.f32 %v4099_v52, %v4100_v46  ;;  %v1682_v56 = vrot.slane %v1179_v39, %v13167_v44 }
 0x299   : > { %v4095_v57 = vrot.slane %v4094_v35, 2  ;;  %v4108_v32 = vmax.f32 %v4106_v47, %v4107_v25  ;;  %v1689_v14 = vrot.slane %v1675_v17, %v13167_v44  ;;  %v1211_v26 = vmax.f32 %v1147_v7, 0.0  ;;  %v14053_v7 = vpop.f32.mrb[29].mxu1 }
 0x29a   : > { %v4089_v12 = vmax.f32 %v4087_v23, %v4088_v31  ;;  %v4102_v8 = vrot.slane %v4101_v0, 2  ;;  %v1690_v51 = vcombine.high %v1682_v56, %v1682_v56  ;;  %v3273_v18 = vsel %vm2628_vm1, %v1682_v56, -inf }
 0x29b   : > { %v4096_v19 = vmax.f32 %v4094_v35, %v4095_v57  ;;  %v4109_v21 = vrot.slane %v4108_v32, 2  ;;  %v1691_v49 = vcombine.high %v1689_v14, %v1689_v14  ;;  %v3274_v55 = vrot.slane %v3273_v18, 4 }
 0x29c   : > { %v4090_v61 = vrot.slane %v4089_v12, 1  ;;  %v4103_v20 = vmax.f32 %v4101_v0, %v4102_v8  ;;  %v3280_v37 = vsel %vm2628_vm1, %v1690_v51, -inf  ;;  %v3287_v3 = vsel %vm2628_vm1, %v1689_v14, -inf }
 0x29d   : > { %v4097_v36 = vrot.slane %v4096_v19, 1  ;;  %v4110_v33 = vmax.f32 %v4108_v32, %v4109_v21  ;;  %v3275_v42 = vmax.f32 %v3273_v18, %v3274_v55  ;;  %v3281_v39 = vrot.slane %v3280_v37, 4 }
 0x29e   : > { %v4091_v43 = vmax.f32 %v4089_v12, %v4090_v61  ;;  %v4104_v15 = vrot.slane %v4103_v20, 1  ;;  %v3288_v59 = vrot.slane %v3287_v3, 4  ;;  %v3294_v24 = vsel %vm2628_vm1, %v1691_v49, -inf }
 0x29f   : > { %v4098_v27 = vmax.f32 %v4096_v19, %v4097_v36  ;;  %v4111_v9 = vrot.slane %v4110_v33, 1  ;;  %v3276_v54 = vrot.slane %v3275_v42, 2  ;;  %v3282_v52 = vmax.f32 %v3280_v37, %v3281_v39 }
 0x2a0   : > { %v4105_v11 = vmax.f32 %v4103_v20, %v4104_v15  ;;  %v3289_v45 = vmax.f32 %v3287_v3, %v3288_v59  ;;  %v3295_v41 = vrot.slane %v3294_v24, 4  ;;  %v2219_v1 = vcombine.high %v1211_v26, %v1211_v26 }
 0x2a1   : > { %v4112_v23 = vmax.f32 %v4110_v33, %v4111_v9  ;;  %v4980_v46 = vsel %vm4791_vm2, %v4098_v27, %v4091_v43  ;;  %v3277_v47 = vmax.f32 %v3275_v42, %v3276_v54  ;;  %v3283_v17 = vrot.slane %v3282_v52, 2  ;;  %v14070_v27 = vpop.f32.mrb[30].mxu0 }
 0x2a2   : > { %v4981_v4 = vsel %vm4793_vm3, %v4105_v11, %v4980_v46  ;;  %v3290_v35 = vrot.slane %v3289_v45, 2  ;;  %v3296_v25 = vmax.f32 %v3294_v24, %v3295_v41  ;;  %v2226_v31 = vrot.slane %v1211_v26, %v13167_v44 }
 0x2a3   : > { %v3278_v0 = vrot.slane %v3277_v47, 1  ;;  %v3284_v56 = vmax.f32 %v3282_v52, %v3283_v17  ;;  %v2233_v57 = vrot.slane %v2219_v1, %v13167_v44  ;;  %v4989_v32 = vsel %vm4795_vm4, %v14016_v2, %v14019_v58 }
 0x2a4   : > { %v3291_v14 = vmax.f32 %v3289_v45, %v3290_v35  ;;  %v3297_v12 = vrot.slane %v3296_v25, 2  ;;  %v2234_v8 = vcombine.high %v2226_v31, %v2226_v31  ;;  %v4169_v51 = vsel %vm2628_vm1, %v2226_v31, -inf }
 0x2a5   : > { %v3279_v18 = vmax.f32 %v3277_v47, %v3278_v0  ;;  %v3285_v19 = vrot.slane %v3284_v56, 1  ;;  %v2235_v21 = vcombine.high %v2233_v57, %v2233_v57  ;;  %v4170_v49 = vrot.slane %v4169_v51, 4 }
 0x2a6   : > { %v3292_v55 = vrot.slane %v3291_v14, 1  ;;  %v3298_v61 = vmax.f32 %v3296_v25, %v3297_v12  ;;  %v4176_v26 = vsel %vm2628_vm1, %v2234_v8, -inf  ;;  %v4183_v20 = vsel %vm2628_vm1, %v2233_v57, -inf }
 0x2a7   : > { %v3286_v37 = vmax.f32 %v3284_v56, %v3285_v19  ;;  %v4878_v3 = vsel %vm4797_vm5, %v3279_v18, %v14028_v13  ;;  %v4171_v2 = vmax.f32 %v4169_v51, %v4170_v49  ;;  %v4177_v58 = vrot.slane %v4176_v26, 4 }
 0x2a8   : > { %v3293_v36 = vmax.f32 %v3291_v14, %v3292_v55  ;;  %v3299_v33 = vrot.slane %v3298_v61, 1  ;;  %v4184_v42 = vrot.slane %v4183_v20, 4  ;;  %v4190_v39 = vsel %vm2628_vm1, %v2235_v21, -inf }
 0x2a9   : > { %v4879_v43 = vsel %vm4799_vm6, %v3286_v37, %v4878_v3  ;;  %v4172_v15 = vrot.slane %v4171_v2, 2  ;;  %v4178_v59 = vmax.f32 %v4176_v26, %v4177_v58  ;;  %v4191_v24 = vrot.slane %v4190_v39, 4 }
 0x2aa   : > { %v3300_v9 = vmax.f32 %v3298_v61, %v3299_v33  ;;  %v4880_v54 = vsel %vm4801_vm7, %v3293_v36, %v4879_v43  ;;  %v4185_v52 = vmax.f32 %v4183_v20, %v4184_v42  ;;  %v1042_v13 = vmul.f32 %v14009_v38, %v13815_v22 }
 0x2ab   : > { %v4173_v11 = vmax.f32 %v4171_v2, %v4172_v15  ;;  %v4179_v45 = vrot.slane %v4178_v59, 2  ;;  %v4192_v41 = vmax.f32 %v4190_v39, %v4191_v24  ;;  %v14078_v1 = vsel %vm4795_vm4, %v14042_v53, %v14046_v34 }
 0x2ac   : > { %v4881_v46 = vsel %vm4803_vm8, %v3300_v9, %v4880_v54  ;;  %v4186_v47 = vrot.slane %v4185_v52, 2  ;;  %v1113_v17 = vadd.f32 %v13977_v50, %v1042_v13  ;;  %v1074_v35 = vmul.f32 %v14009_v38, %v13833_v63 }
 0x2ad   : > { %5065 = vst [vmem:[#allocation2 + $0x170] sm:$0xff] %v4881_v46  ;;  %v4174_v25 = vrot.slane %v4173_v11, 1  ;;  %v4180_v31 = vmax.f32 %v4178_v59, %v4179_v45  ;;  %v4193_v22 = vrot.slane %v4192_v41, 2  ;;  %v14085_v0 = vsel %vm4795_vm4, %v4112_v23, %v4981_v4  ;;  %v14095_v4 = vpop.f32.mrb[30].mxu1 }
 0x2ae   : > { %v4187_v56 = vmax.f32 %v4185_v52, %v4186_v47  ;;  %v1177_v57 = vmax.f32 %v1113_v17, 0.0  ;;  %v1145_v53 = vadd.f32 %v13977_v50, %v1074_v35  ;;  %v1047_v34 = vmul.f32 %v14009_v38, %v13863_v28 }
 0x2af   : > { %v4175_v14 = vmax.f32 %v4173_v11, %v4174_v25  ;;  %v4181_v12 = vrot.slane %v4180_v31, 1  ;;  %v4194_v8 = vmax.f32 %v4192_v41, %v4193_v22  ;;  %v14092_v63 = vmul.f32 %v14009_v38, %v13869_v40 }
 0x2b0   : > { %v4188_v51 = vrot.slane %v4187_v56, 1  ;;  %v1641_v18 = vcombine.high %v1177_v57, %v1177_v57  ;;  %v1648_v19 = vrot.slane %v1177_v57, %v13167_v44  ;;  %v1209_v23 = vmax.f32 %v1145_v53, 0.0 }
 0x2b1   : > { %v4182_v21 = vmax.f32 %v4180_v31, %v4181_v12  ;;  %v4195_v49 = vrot.slane %v4194_v8, 1  ;;  %v4990_v55 = vsel %vm4797_vm5, %v4175_v14, %v4989_v32  ;;  %v1118_v28 = vadd.f32 %v13977_v50, %v1047_v34 }
 0x2b2   : > { %v4189_v61 = vmax.f32 %v4187_v56, %v4188_v51  ;;  %v1655_v26 = vrot.slane %v1641_v18, %v13167_v44  ;;  %v1656_v20 = vcombine.high %v1648_v19, %v1648_v19  ;;  %v3217_v40 = vsel %vm2628_vm1, %v1648_v19, -inf  ;;  %v14113_v19 = vpop.f32.mrb[31].mxu0 }
 0x2b3   : > { %v4196_v37 = vmax.f32 %v4194_v8, %v4195_v49  ;;  %v4991_v3 = vsel %vm4799_vm6, %v4182_v21, %v4990_v55  ;;  %v3218_v2 = vrot.slane %v3217_v40, 4  ;;  %v2185_v58 = vcombine.high %v1209_v23, %v1209_v23 }
 0x2b4   : > { %v4992_v36 = vsel %vm4801_vm7, %v4189_v61, %v4991_v3  ;;  %v1657_v33 = vcombine.high %v1655_v26, %v1655_v26  ;;  %v3224_v42 = vsel %vm2628_vm1, %v1656_v20, -inf  ;;  %v3231_v32 = vsel %vm2628_vm1, %v1655_v26, -inf }
 0x2b5   : > { %v4993_v39 = vsel %vm4803_vm8, %v4196_v37, %v4992_v36  ;;  %v3219_v43 = vmax.f32 %v3217_v40, %v3218_v2  ;;  %v3225_v15 = vrot.slane %v3224_v42, 4  ;;  %v3232_v59 = vrot.slane %v3231_v32, 4 }
 0x2b6   : > { %5081 = vst [vmem:[#allocation2 + $0x3b0] sm:$0xff] %v4993_v39  ;;  %v3238_v24 = vsel %vm2628_vm1, %v1657_v33, -inf  ;;  %v2192_v9 = vrot.slane %v1209_v23, %v13167_v44  ;;  %v2199_v54 = vrot.slane %v2185_v58, %v13167_v44  ;;  %v1182_v52 = vmax.f32 %v1118_v28, 0.0 }
 0x2b7   : > { %v3220_v13 = vrot.slane %v3219_v43, 2  ;;  %v3226_v11 = vmax.f32 %v3224_v42, %v3225_v15  ;;  %v3233_v45 = vmax.f32 %v3231_v32, %v3232_v59  ;;  %v3239_v41 = vrot.slane %v3238_v24, 4 }
 0x2b8   : > { %v2200_v46 = vcombine.high %v2192_v9, %v2192_v9  ;;  %v2201_v47 = vcombine.high %v2199_v54, %v2199_v54  ;;  %v4113_v17 = vsel %vm2628_vm1, %v2192_v9, -inf  ;;  %v4127_v35 = vsel %vm2628_vm1, %v2199_v54, -inf }
 0x2b9   : > { %v3221_v25 = vmax.f32 %v3219_v43, %v3220_v13  ;;  %v3227_v31 = vrot.slane %v3226_v11, 2  ;;  %v3234_v22 = vrot.slane %v3233_v45, 2  ;;  %v3240_v56 = vmax.f32 %v3238_v24, %v3239_v41 }
 0x2ba   : > { %v4114_v57 = vrot.slane %v4113_v17, 4  ;;  %v4120_v53 = vsel %vm2628_vm1, %v2200_v46, -inf  ;;  %v4128_v34 = vrot.slane %v4127_v35, 4  ;;  %v4134_v14 = vsel %vm2628_vm1, %v2201_v47, -inf }
 0x2bb   : > { %v3222_v12 = vrot.slane %v3221_v25, 1  ;;  %v3228_v8 = vmax.f32 %v3226_v11, %v3227_v31  ;;  %v3235_v51 = vmax.f32 %v3233_v45, %v3234_v22  ;;  %v3241_v18 = vrot.slane %v3240_v56, 2 }
 0x2bc   : > { %v4115_v23 = vmax.f32 %v4113_v17, %v4114_v57  ;;  %v4121_v21 = vrot.slane %v4120_v53, 4  ;;  %v4129_v49 = vmax.f32 %v4127_v35, %v4128_v34  ;;  %v4135_v55 = vrot.slane %v4134_v14, 4 }
 0x2bd   : > { %v3223_v28 = vmax.f32 %v3221_v25, %v3222_v12  ;;  %v3229_v61 = vrot.slane %v3228_v8, 1  ;;  %v3236_v26 = vrot.slane %v3235_v51, 1  ;;  %v3242_v20 = vmax.f32 %v3240_v56, %v3241_v18 }
 0x2be   : > { %v4116_v40 = vrot.slane %v4115_v23, 2  ;;  %v4122_v37 = vmax.f32 %v4120_v53, %v4121_v21  ;;  %v4130_v3 = vrot.slane %v4129_v49, 2  ;;  %v4136_v2 = vmax.f32 %v4134_v14, %v4135_v55 }
 0x2bf   : > { %v3230_v58 = vmax.f32 %v3228_v8, %v3229_v61  ;;  %v3237_v36 = vmax.f32 %v3235_v51, %v3236_v26  ;;  %v3243_v33 = vrot.slane %v3242_v20, 1  ;;  %v4871_v42 = vsel %vm4797_vm5, %v3223_v28, %v14078_v1 }
 0x2c0   : > { %v4117_v32 = vmax.f32 %v4115_v23, %v4116_v40  ;;  %v4123_v39 = vrot.slane %v4122_v37, 2  ;;  %v4131_v43 = vmax.f32 %v4129_v49, %v4130_v3  ;;  %v4137_v15 = vrot.slane %v4136_v2, 2  ;;  %v14128_v49 = vpop.f32.mrb[31].mxu1 }
 0x2c1   : > { %v3244_v59 = vmax.f32 %v3242_v20, %v3243_v33  ;;  %v4872_v24 = vsel %vm4799_vm6, %v3230_v58, %v4871_v42  ;;  %v1726_v9 = vcombine.high %v1182_v52, %v1182_v52  ;;  %v1733_v54 = vrot.slane %v1182_v52, %v13167_v44 }
 0x2c2   : > { %v4873_v13 = vsel %vm4801_vm7, %v3237_v36, %v4872_v24  ;;  %v4118_v11 = vrot.slane %v4117_v32, 1  ;;  %v4124_v45 = vmax.f32 %v4122_v37, %v4123_v39  ;;  %v4132_v41 = vrot.slane %v4131_v43, 1 }
 0x2c3   : > { %v4874_v46 = vsel %vm4803_vm8, %v3244_v59, %v4873_v13  ;;  %v4138_v47 = vmax.f32 %v4136_v2, %v4137_v15  ;;  %v1740_v1 = vrot.slane %v1726_v9, %v13167_v44  ;;  %v1741_v17 = vcombine.high %v1733_v54, %v1733_v54 }
 0x2c4   : > { %5064 = vst [vmem:[#allocation2 + $0x158] sm:$0xff] %v4874_v46  ;;  %v4119_v35 = vmax.f32 %v4117_v32, %v4118_v11  ;;  %v4125_v25 = vrot.slane %v4124_v45, 1  ;;  %v4133_v31 = vmax.f32 %v4131_v43, %v4132_v41  ;;  %v3357_v22 = vsel %vm2628_vm1, %v1733_v54, -inf }
 0x2c5   : > { %v4139_v56 = vrot.slane %v4138_v47, 1  ;;  %v1742_v57 = vcombine.high %v1740_v1, %v1740_v1  ;;  %v3358_v52 = vrot.slane %v3357_v22, 4  ;;  %v3364_v53 = vsel %vm2628_vm1, %v1741_v17, -inf }
 0x2c6   : > { %v4126_v34 = vmax.f32 %v4124_v45, %v4125_v25  ;;  %v4983_v14 = vsel %vm4797_vm5, %v4119_v35, %v14085_v0  ;;  %v3365_v12 = vrot.slane %v3364_v53, 4  ;;  %v3371_v8 = vsel %vm2628_vm1, %v1740_v1, -inf }
 0x2c7   : > { %v4140_v51 = vmax.f32 %v4138_v47, %v4139_v56  ;;  %v3359_v18 = vmax.f32 %v3357_v22, %v3358_v52  ;;  %v3372_v23 = vrot.slane %v3371_v8, 4  ;;  %v3378_v21 = vsel %vm2628_vm1, %v1742_v57, -inf }
 0x2c8   : > { %v4984_v55 = vsel %vm4799_vm6, %v4126_v34, %v4983_v14  ;;  %v3366_v28 = vmax.f32 %v3364_v53, %v3365_v12  ;;  %v3379_v61 = vrot.slane %v3378_v21, 4  ;;  %v1150_v26 = vadd.f32 %v13977_v50, %v14092_v63 }
 0x2c9   : > { %v4985_v20 = vsel %vm4801_vm7, %v4133_v31, %v4984_v55  ;;  %v3360_v0 = vrot.slane %v3359_v18, 2  ;;  %v3373_v40 = vmax.f32 %v3371_v8, %v3372_v23  ;;  %v1045_v37 = vmul.f32 %v14009_v38, %v13898_v62 }
 0x2ca   : > { %v4986_v3 = vsel %vm4803_vm8, %v4140_v51, %v4985_v20  ;;  %v3367_v2 = vrot.slane %v3366_v28, 2  ;;  %v3380_v58 = vmax.f32 %v3378_v21, %v3379_v61  ;;  %v1214_v36 = vmax.f32 %v1150_v26, 0.0 }
 0x2cb   : > { %5080 = vst [vmem:[#allocation2 + $0x398] sm:$0xff] %v4986_v3  ;;  %v3361_v33 = vmax.f32 %v3359_v18, %v3360_v0  ;;  %v3374_v42 = vrot.slane %v3373_v40, 2  ;;  %v1116_v32 = vadd.f32 %v13977_v50, %v1045_v37  ;;  %v1077_v63 = vmul.f32 %v14009_v38, %v13905_v48 }
 0x2cc   : > { %v3368_v39 = vmax.f32 %v3366_v28, %v3367_v2  ;;  %v3381_v43 = vrot.slane %v3380_v58, 2  ;;  %v2270_v15 = vcombine.high %v1214_v36, %v1214_v36  ;;  %v2277_v59 = vrot.slane %v1214_v36, %v13167_v44 }
 0x2cd   : > { %v3362_v24 = vrot.slane %v3361_v33, 1  ;;  %v3375_v62 = vmax.f32 %v3373_v40, %v3374_v42  ;;  %v1180_v9 = vmax.f32 %v1116_v32, 0.0  ;;  %v1148_v54 = vadd.f32 %v13977_v50, %v1077_v63 }
 0x2ce   : > { %v3369_v13 = vrot.slane %v3368_v39, 1  ;;  %v3382_v11 = vmax.f32 %v3380_v58, %v3381_v43  ;;  %v2284_v45 = vrot.slane %v2270_v15, %v13167_v44  ;;  %v2285_v41 = vcombine.high %v2277_v59, %v2277_v59 }
 0x2cf   : > { %v3363_v46 = vmax.f32 %v3361_v33, %v3362_v24  ;;  %v3376_v47 = vrot.slane %v3375_v62, 1  ;;  %v4253_v1 = vsel %vm2628_vm1, %v2277_v59, -inf  ;;  %v1692_v48 = vcombine.high %v1180_v9, %v1180_v9 }
 0x2d0   : > { %v3370_v17 = vmax.f32 %v3368_v39, %v3369_v13  ;;  %v3383_v35 = vrot.slane %v3382_v11, 1  ;;  %v2286_v25 = vcombine.high %v2284_v45, %v2284_v45  ;;  %v4254_v31 = vrot.slane %v4253_v1, 4 }
 0x2d1   : > { %v3377_v22 = vmax.f32 %v3375_v62, %v3376_v47  ;;  %v4260_v56 = vsel %vm2628_vm1, %v2285_v41, -inf  ;;  %v4267_v57 = vsel %vm2628_vm1, %v2284_v45, -inf  ;;  %v1699_v52 = vrot.slane %v1180_v9, %v13167_v44 }
 0x2d2   : > { %v14147_v53 = vmax.f32 %v3382_v11, %v3383_v35  ;;  %v4889_v34 = vsel %vm4791_vm2, %v3370_v17, %v3363_v46  ;;  %v4255_v14 = vmax.f32 %v4253_v1, %v4254_v31  ;;  %v4261_v12 = vrot.slane %v4260_v56, 4 }
 0x2d3   : > { %v4890_v8 = vsel %vm4793_vm3, %v3377_v22, %v4889_v34  ;;  %v4268_v51 = vrot.slane %v4267_v57, 4  ;;  %v4274_v18 = vsel %vm2628_vm1, %v2286_v25, -inf  ;;  %v1706_v23 = vrot.slane %v1692_v48, %v13167_v44 }
 0x2d4   : > { %v4256_v21 = vrot.slane %v4255_v14, 2  ;;  %v4262_v55 = vmax.f32 %v4260_v56, %v4261_v12  ;;  %v4275_v28 = vrot.slane %v4274_v18, 4  ;;  %v1707_v61 = vcombine.high %v1699_v52, %v1699_v52 }
 0x2d5   : > { %v4269_v26 = vmax.f32 %v4267_v57, %v4268_v51  ;;  %v1708_v20 = vcombine.high %v1706_v23, %v1706_v23  ;;  %v3301_v0 = vsel %vm2628_vm1, %v1699_v52, -inf  ;;  %v3315_v40 = vsel %vm2628_vm1, %v1706_v23, -inf }
 0x2d6   : > { %v4257_v37 = vmax.f32 %v4255_v14, %v4256_v21  ;;  %v4263_v3 = vrot.slane %v4262_v55, 2  ;;  %v4276_v2 = vmax.f32 %v4274_v18, %v4275_v28  ;;  %v3302_v58 = vrot.slane %v3301_v0, 4 }
 0x2d7   : > { %v4270_v36 = vrot.slane %v4269_v26, 2  ;;  %v3308_v33 = vsel %vm2628_vm1, %v1707_v61, -inf  ;;  %v3316_v42 = vrot.slane %v3315_v40, 4  ;;  %v3322_v32 = vsel %vm2628_vm1, %v1708_v20, -inf }
 0x2d8   : > { %v4258_v63 = vrot.slane %v4257_v37, 1  ;;  %v4264_v39 = vmax.f32 %v4262_v55, %v4263_v3  ;;  %v4277_v43 = vrot.slane %v4276_v2, 2  ;;  %v3303_v15 = vmax.f32 %v3301_v0, %v3302_v58 }
 0x2d9   : > { %v4271_v59 = vmax.f32 %v4269_v26, %v4270_v36  ;;  %v3309_v24 = vrot.slane %v3308_v33, 4  ;;  %v3317_v62 = vmax.f32 %v3315_v40, %v3316_v42  ;;  %v3323_v9 = vrot.slane %v3322_v32, 4 }
 0x2da   : > { %v4259_v13 = vmax.f32 %v4257_v37, %v4258_v63  ;;  %v4265_v11 = vrot.slane %v4264_v39, 1  ;;  %v4278_v45 = vmax.f32 %v4276_v2, %v4277_v43  ;;  %v3304_v41 = vrot.slane %v3303_v15, 2 }
 0x2db   : > { %v4272_v46 = vrot.slane %v4271_v59, 1  ;;  %v3310_v47 = vmax.f32 %v3308_v33, %v3309_v24  ;;  %v3318_v1 = vrot.slane %v3317_v62, 2  ;;  %v3324_v48 = vmax.f32 %v3322_v32, %v3323_v9 }
 0x2dc   : > { %v4266_v17 = vmax.f32 %v4264_v39, %v4265_v11  ;;  %v4279_v35 = vrot.slane %v4278_v45, 1  ;;  %v3305_v25 = vmax.f32 %v3303_v15, %v3304_v41  ;;  %v1212_v31 = vmax.f32 %v1148_v54, 0.0 }
 0x2dd   : > { %v4273_v22 = vmax.f32 %v4271_v59, %v4272_v46  ;;  %v3311_v56 = vrot.slane %v3310_v47, 2  ;;  %v3319_v57 = vmax.f32 %v3317_v62, %v3318_v1  ;;  %v3325_v52 = vrot.slane %v3324_v48, 2 }
 0x2de   : > { %v4280_v34 = vmax.f32 %v4278_v45, %v4279_v35  ;;  %v5001_v14 = vsel %vm4791_vm2, %v4266_v17, %v4259_v13  ;;  %v3306_v12 = vrot.slane %v3305_v25, 1  ;;  %v2236_v51 = vcombine.high %v1212_v31, %v1212_v31 }
 0x2df   : > { %v5002_v18 = vsel %vm4793_vm3, %v4273_v22, %v5001_v14  ;;  %v3312_v23 = vmax.f32 %v3310_v47, %v3311_v56  ;;  %v3320_v21 = vrot.slane %v3319_v57, 1  ;;  %v3326_v55 = vmax.f32 %v3324_v48, %v3325_v52 }
 0x2e0   : > { %v3307_v28 = vmax.f32 %v3305_v25, %v3306_v12  ;;  %v2243_v61 = vrot.slane %v1212_v31, %v13167_v44  ;;  %v2250_v26 = vrot.slane %v2236_v51, %v13167_v44  ;;  %v1048_v54 = vmul.f32 %v14009_v38, %v13921_v10 }
 0x2e1   : > { %v3313_v20 = vrot.slane %v3312_v23, 1  ;;  %v3321_v0 = vmax.f32 %v3319_v57, %v3320_v21  ;;  %v3327_v40 = vrot.slane %v3326_v55, 1  ;;  %v14165_v37 = vsel %vm4795_vm4, %v14147_v53, %v4890_v8 }
 0x2e2   : > { %v2251_v3 = vcombine.high %v2243_v61, %v2243_v61  ;;  %v2252_v2 = vcombine.high %v2250_v26, %v2250_v26  ;;  %v4197_v58 = vsel %vm2628_vm1, %v2243_v61, -inf  ;;  %v4211_v36 = vsel %vm2628_vm1, %v2250_v26, -inf }
 0x2e3   : > { %v3314_v33 = vmax.f32 %v3312_v23, %v3313_v20  ;;  %v14169_v42 = vmax.f32 %v3326_v55, %v3327_v40  ;;  %v4198_v32 = vrot.slane %v4197_v58, 4  ;;  %v4212_v63 = vrot.slane %v4211_v36, 4 }
 0x2e4   : > { %v4204_v10 = vsel %vm2628_vm1, %v2251_v3, -inf  ;;  %v4218_v39 = vsel %vm2628_vm1, %v2252_v2, -inf  ;;  %v1119_v43 = vadd.f32 %v13977_v50, %v1048_v54  ;;  %v1080_v53 = vmul.f32 %v14009_v38, %v13946_v60 }
 0x2e5   : > { %v4882_v8 = vsel %vm4791_vm2, %v3314_v33, %v3307_v28  ;;  %v4199_v15 = vmax.f32 %v4197_v58, %v4198_v32  ;;  %v4205_v59 = vrot.slane %v4204_v10, 4  ;;  %v4213_v24 = vmax.f32 %v4211_v36, %v4212_v63 }
 0x2e6   : > { %v14178_v62 = vsel %vm4793_vm3, %v3321_v0, %v4882_v8  ;;  %v4219_v9 = vrot.slane %v4218_v39, 4  ;;  %v1183_v13 = vmax.f32 %v1119_v43, 0.0  ;;  %v1151_v11 = vadd.f32 %v13977_v50, %v1080_v53 }
 0x2e7   : > { %v4200_v45 = vrot.slane %v4199_v15, 2  ;;  %v4206_v41 = vmax.f32 %v4204_v10, %v4205_v59  ;;  %v4214_v46 = vrot.slane %v4213_v24, 2  ;;  %v14182_v47 = vsel %vm4795_vm4, %v4280_v34, %v5002_v18 }
 0x2e8   : > { %v4220_v1 = vmax.f32 %v4218_v39, %v4219_v9  ;;  %v1743_v60 = vcombine.high %v1183_v13, %v1183_v13  ;;  %v1750_v48 = vrot.slane %v1183_v13, %v13167_v44  ;;  %v1215_v17 = vmax.f32 %v1151_v11, 0.0 }
 0x2e9   : > { %v4201_v35 = vmax.f32 %v4199_v15, %v4200_v45  ;;  %v4207_v25 = vrot.slane %v4206_v41, 2  ;;  %v4215_v31 = vmax.f32 %v4213_v24, %v4214_v46  ;;  %v14187_v22 = vmul.f32 %v14009_v38, %v13961_v30 }
 0x2ea   : > { %v4221_v56 = vrot.slane %v4220_v1, 2  ;;  %v1757_v50 = vrot.slane %v1743_v60, %v13167_v44  ;;  %v1758_v57 = vcombine.high %v1750_v48, %v1750_v48  ;;  %v3385_v52 = vsel %vm2628_vm1, %v1750_v48, -inf }
 0x2eb   : > { %v4202_v34 = vrot.slane %v4201_v35, 1  ;;  %v4208_v14 = vmax.f32 %v4206_v41, %v4207_v25  ;;  %v4216_v12 = vrot.slane %v4215_v31, 1  ;;  %v3386_v51 = vrot.slane %v3385_v52, 4 }
 0x2ec   : > { %v4222_v18 = vmax.f32 %v4220_v1, %v4221_v56  ;;  %v1759_v23 = vcombine.high %v1757_v50, %v1757_v50  ;;  %v3392_v21 = vsel %vm2628_vm1, %v1758_v57, -inf  ;;  %v3399_v55 = vsel %vm2628_vm1, %v1757_v50, -inf }
 0x2ed   : > { %v4203_v28 = vmax.f32 %v4201_v35, %v4202_v34  ;;  %v4209_v61 = vrot.slane %v4208_v14, 1  ;;  %v4217_v30 = vmax.f32 %v4215_v31, %v4216_v12  ;;  %v3387_v26 = vmax.f32 %v3385_v52, %v3386_v51 }
 0x2ee   : > { %v4223_v54 = vrot.slane %v4222_v18, 1  ;;  %v3393_v20 = vrot.slane %v3392_v21, 4  ;;  %v3400_v0 = vrot.slane %v3399_v55, 4  ;;  %v3406_v40 = vsel %vm2628_vm1, %v1759_v23, -inf }
 0x2ef   : > { %v4210_v3 = vmax.f32 %v4208_v14, %v4209_v61  ;;  %v3388_v2 = vrot.slane %v3387_v26, 2  ;;  %v3407_v58 = vrot.slane %v3406_v40, 4  ;;  %v2287_v36 = vcombine.high %v1215_v17, %v1215_v17 }
 0x2f0   : > { %v4224_v33 = vmax.f32 %v4222_v18, %v4223_v54  ;;  %v3394_v32 = vmax.f32 %v3392_v21, %v3393_v20  ;;  %v3401_v63 = vmax.f32 %v3399_v55, %v3400_v0  ;;  %v2294_v10 = vrot.slane %v1215_v17, %v13167_v44 }
 0x2f1   : > { %v4994_v39 = vsel %vm4791_vm2, %v4210_v3, %v4203_v28  ;;  %v3389_v43 = vmax.f32 %v3387_v26, %v3388_v2  ;;  %v3408_v53 = vmax.f32 %v3406_v40, %v3407_v58  ;;  %v2301_v8 = vrot.slane %v2287_v36, %v13167_v44  ;;  %v14207_v26 = vld [vmem:[%s16363_s3] ss:$0 sm:$0xff] }
 0x2f2   : > { %v4995_v15 = vsel %vm4793_vm3, %v4217_v30, %v4994_v39  ;;  %v3395_v59 = vrot.slane %v3394_v32, 2  ;;  %v3402_v24 = vrot.slane %v3401_v63, 2  ;;  %v2302_v9 = vcombine.high %v2294_v10, %v2294_v10 }
 0x2f3   : > { %v3390_v13 = vrot.slane %v3389_v43, 1  ;;  %v3409_v11 = vrot.slane %v3408_v53, 2  ;;  %v2303_v45 = vcombine.high %v2301_v8, %v2301_v8  ;;  %v4281_v41 = vsel %vm2628_vm1, %v2294_v10, -inf }
 0x2f4   : > { %v3396_v46 = vmax.f32 %v3394_v32, %v3395_v59  ;;  %v3403_v1 = vmax.f32 %v3401_v63, %v3402_v24  ;;  %v4282_v60 = vrot.slane %v4281_v41, 4  ;;  %v4288_v48 = vsel %vm2628_vm1, %v2302_v9, -inf }
 0x2f5   : > { %v3391_v17 = vmax.f32 %v3389_v43, %v3390_v13  ;;  %v3410_v35 = vmax.f32 %v3408_v53, %v3409_v11  ;;  %v4289_v25 = vrot.slane %v4288_v48, 4  ;;  %v4295_v31 = vsel %vm2628_vm1, %v2301_v8, -inf }
 0x2f6   : > { %v3397_v56 = vrot.slane %v3396_v46, 1  ;;  %v3404_v50 = vrot.slane %v3403_v1, 1  ;;  %v4283_v57 = vmax.f32 %v4281_v41, %v4282_v60  ;;  %v4296_v52 = vrot.slane %v4295_v31, 4 }
 0x2f7   : > { %v3411_v34 = vrot.slane %v3410_v35, 1  ;;  %v4892_v14 = vsel %vm4797_vm5, %v3391_v17, %v14165_v37  ;;  %v4290_v12 = vmax.f32 %v4288_v48, %v4289_v25  ;;  %v4302_v51 = vsel %vm2628_vm1, %v2303_v45, -inf }
 0x2f8   : > { %v3398_v18 = vmax.f32 %v3396_v46, %v3397_v56  ;;  %v3405_v23 = vmax.f32 %v3403_v1, %v3404_v50  ;;  %v4284_v21 = vrot.slane %v4283_v57, 2  ;;  %v4297_v55 = vmax.f32 %v4295_v31, %v4296_v52 }
 0x2f9   : > { %v3412_v28 = vmax.f32 %v3410_v35, %v3411_v34  ;;  %v4291_v61 = vrot.slane %v4290_v12, 2  ;;  %v4303_v30 = vrot.slane %v4302_v51, 4  ;;  %v1117_v54 = vadd.f32 %v14207_v26, %v14187_v22 }
 0x2fa   : > { %v4893_v37 = vsel %vm4799_vm6, %v3398_v18, %v4892_v14  ;;  %v4285_v20 = vmax.f32 %v4283_v57, %v4284_v21  ;;  %v4298_v0 = vrot.slane %v4297_v55, 2  ;;  %v14215_v40 = vsel %vm4795_vm4, %v14169_v42, %v14178_v62 }
 0x2fb   : > { %v4894_v3 = vsel %vm4801_vm7, %v3405_v23, %v4893_v37  ;;  %v4292_v2 = vmax.f32 %v4290_v12, %v4291_v61  ;;  %v4304_v58 = vmax.f32 %v4302_v51, %v4303_v30  ;;  %v1181_v36 = vmax.f32 %v1117_v54, 0.0 }
 0x2fc   : > { %v4895_v32 = vsel %vm4803_vm8, %v3412_v28, %v4894_v3  ;;  %v4286_v63 = vrot.slane %v4285_v20, 1  ;;  %v4299_v10 = vmax.f32 %v4297_v55, %v4298_v0  ;;  %v1078_v22 = vmul.f32 %v14009_v38, %v13987_v5 }
 0x2fd   : > { %5067 = vst [vmem:[#allocation2 + $0x1a0] sm:$0xff] %v4895_v32  ;;  %v4293_v39 = vrot.slane %v4292_v2, 1  ;;  %v4305_v43 = vrot.slane %v4304_v58, 2  ;;  %v1709_v53 = vcombine.high %v1181_v36, %v1181_v36  ;;  %v1716_v8 = vrot.slane %v1181_v36, %v13167_v44 }
 0x2fe   : > { %v4287_v42 = vmax.f32 %v4285_v20, %v4286_v63  ;;  %v4300_v62 = vrot.slane %v4299_v10, 1  ;;  %v1149_v59 = vadd.f32 %v14207_v26, %v1078_v22  ;;  %v14224_v24 = vsel %vm4795_vm4, %v4224_v33, %v4995_v15 }
 0x2ff   : > { %v4294_v9 = vmax.f32 %v4292_v2, %v4293_v39  ;;  %v4306_v13 = vmax.f32 %v4304_v58, %v4305_v43  ;;  %v1723_v11 = vrot.slane %v1709_v53, %v13167_v44  ;;  %v1724_v45 = vcombine.high %v1716_v8, %v1716_v8 }
 0x300   : > { %v4301_v41 = vmax.f32 %v4299_v10, %v4300_v62  ;;  %v5004_v5 = vsel %vm4797_vm5, %v4287_v42, %v14182_v47  ;;  %v3329_v46 = vsel %vm2628_vm1, %v1716_v8, -inf  ;;  %v1213_v1 = vmax.f32 %v1149_v59, 0.0 }
 0x301   : > { %v4307_v60 = vrot.slane %v4306_v13, 1  ;;  %v5005_v48 = vsel %vm4799_vm6, %v4294_v9, %v5004_v5  ;;  %v1725_v17 = vcombine.high %v1723_v11, %v1723_v11  ;;  %v3330_v35 = vrot.slane %v3329_v46, 4 }
 0x302   : > { %v5006_v33 = vsel %vm4801_vm7, %v4301_v41, %v5005_v48  ;;  %v3336_v15 = vsel %vm2628_vm1, %v1724_v45, -inf  ;;  %v3343_v25 = vsel %vm2628_vm1, %v1723_v11, -inf  ;;  %v2253_v31 = vcombine.high %v1213_v1, %v1213_v1 }
 0x303   : > { %v4308_v56 = vmax.f32 %v4306_v13, %v4307_v60  ;;  %v3331_v50 = vmax.f32 %v3329_v46, %v3330_v35  ;;  %v3337_v57 = vrot.slane %v3336_v15, 4  ;;  %v3344_v52 = vrot.slane %v3343_v25, 4 }
 0x304   : > { %v3350_v47 = vsel %vm2628_vm1, %v1725_v17, -inf  ;;  %v2260_v34 = vrot.slane %v1213_v1, %v13167_v44  ;;  %v2267_v14 = vrot.slane %v2253_v31, %v13167_v44  ;;  %v1051_v12 = vmul.f32 %v14009_v38, %v13999_v29 }
 0x305   : > { %v5007_v51 = vsel %vm4803_vm8, %v4308_v56, %v5006_v33  ;;  %v3332_v18 = vrot.slane %v3331_v50, 2  ;;  %v3338_v23 = vmax.f32 %v3336_v15, %v3337_v57  ;;  %v3345_v21 = vmax.f32 %v3343_v25, %v3344_v52  ;;  %v14251_v25 = vld [vmem:[%s16362_s2] ss:$0 sm:$0xff] }
 0x306   : > { %5083 = vst [vmem:[#allocation2 + $0x3e0] sm:$0xff] %v5007_v51  ;;  %v3351_v55 = vrot.slane %v3350_v47, 4  ;;  %v2268_v28 = vcombine.high %v2260_v34, %v2260_v34  ;;  %v2269_v61 = vcombine.high %v2267_v14, %v2267_v14  ;;  %v4225_v30 = vsel %vm2628_vm1, %v2260_v34, -inf }
 0x307   : > { %v3333_v54 = vmax.f32 %v3331_v50, %v3332_v18  ;;  %v3339_v37 = vrot.slane %v3338_v23, 2  ;;  %v3346_v20 = vrot.slane %v3345_v21, 2  ;;  %v4226_v0 = vrot.slane %v4225_v30, 4 }
 0x308   : > { %v3352_v3 = vmax.f32 %v3350_v47, %v3351_v55  ;;  %v4232_v2 = vsel %vm2628_vm1, %v2268_v28, -inf  ;;  %v4239_v29 = vsel %vm2628_vm1, %v2267_v14, -inf  ;;  %v4246_v38 = vsel %vm2628_vm1, %v2269_v61, -inf }
 0x309   : > { %v3334_v58 = vrot.slane %v3333_v54, 1  ;;  %v3340_v36 = vmax.f32 %v3338_v23, %v3339_v37  ;;  %v3347_v32 = vmax.f32 %v3345_v21, %v3346_v20  ;;  %v4227_v63 = vmax.f32 %v4225_v30, %v4226_v0 }
 0x30a   : > { %v3353_v10 = vrot.slane %v3352_v3, 2  ;;  %v4233_v22 = vrot.slane %v4232_v2, 4  ;;  %v4240_v39 = vrot.slane %v4239_v29, 4  ;;  %v4247_v43 = vrot.slane %v4246_v38, 4 }
 0x30b   : > { %v3335_v53 = vmax.f32 %v3333_v54, %v3334_v58  ;;  %v3341_v8 = vrot.slane %v3340_v36, 1  ;;  %v3348_v42 = vrot.slane %v3347_v32, 1  ;;  %v4228_v62 = vrot.slane %v4227_v63, 2 }
 0x30c   : > { %v3354_v59 = vmax.f32 %v3352_v3, %v3353_v10  ;;  %v4234_v9 = vmax.f32 %v4232_v2, %v4233_v22  ;;  %v4241_v13 = vmax.f32 %v4239_v29, %v4240_v39  ;;  %v4248_v11 = vmax.f32 %v4246_v38, %v4247_v43 }
 0x30d   : > { %v3342_v45 = vmax.f32 %v3340_v36, %v3341_v8  ;;  %v3349_v41 = vmax.f32 %v3347_v32, %v3348_v42  ;;  %v4885_v5 = vsel %vm4797_vm5, %v3335_v53, %v14215_v40  ;;  %v4229_v46 = vmax.f32 %v4227_v63, %v4228_v62 }
 0x30e   : > { %v3355_v1 = vrot.slane %v3354_v59, 1  ;;  %v4235_v60 = vrot.slane %v4234_v9, 2  ;;  %v4242_v48 = vrot.slane %v4241_v13, 2  ;;  %v4249_v17 = vrot.slane %v4248_v11, 2 }
 0x30f   : > { %v4886_v35 = vsel %vm4799_vm6, %v3342_v45, %v4885_v5  ;;  %v4230_v33 = vrot.slane %v4229_v46, 1  ;;  %v1122_v15 = vadd.f32 %v14207_v26, %v1051_v12  ;;  %v1083_v31 = vmul.f32 %v14251_v25, %v14023_v16 }
 0x310   : > { %v3356_v56 = vmax.f32 %v3354_v59, %v3355_v1  ;;  %v4887_v40 = vsel %vm4801_vm7, %v3349_v41, %v4886_v35  ;;  %v4236_v50 = vmax.f32 %v4234_v9, %v4235_v60  ;;  %v4243_v57 = vmax.f32 %v4241_v13, %v4242_v48 }
 0x311   : > { %v4231_v52 = vmax.f32 %v4229_v46, %v4230_v33  ;;  %v4250_v47 = vmax.f32 %v4248_v11, %v4249_v17  ;;  %v1186_v34 = vmax.f32 %v1122_v15, 0.0  ;;  %v1154_v14 = vadd.f32 %v14207_v26, %v1083_v31 }
 0x312   : > { %v4888_v12 = vsel %vm4803_vm8, %v3356_v56, %v4887_v40  ;;  %v4237_v51 = vrot.slane %v4236_v50, 1  ;;  %v4244_v18 = vrot.slane %v4243_v57, 1  ;;  %v1049_v23 = vmul.f32 %v14251_v25, %v14037_v6 }
 0x313   : > { %5066 = vst [vmem:[#allocation2 + $0x188] sm:$0xff] %v4888_v12  ;;  %v4251_v21 = vrot.slane %v4250_v47, 1  ;;  %v4997_v16 = vsel %vm4797_vm5, %v4231_v52, %v14224_v24  ;;  %v1794_v55 = vcombine.high %v1186_v34, %v1186_v34  ;;  %v1801_v28 = vrot.slane %v1186_v34, %v13167_v44 }
 0x314   : > { %v4238_v61 = vmax.f32 %v4236_v50, %v4237_v51  ;;  %v4245_v30 = vmax.f32 %v4243_v57, %v4244_v18  ;;  %v1218_v54 = vmax.f32 %v1154_v14, 0.0  ;;  %v1120_v37 = vadd.f32 %v14207_v26, %v1049_v23 }
 0x315   : > { %v4252_v20 = vmax.f32 %v4250_v47, %v4251_v21  ;;  %v1808_v0 = vrot.slane %v1794_v55, %v13167_v44  ;;  %v1809_v3 = vcombine.high %v1801_v28, %v1801_v28  ;;  %v3469_v2 = vsel %vm2628_vm1, %v1801_v28, -inf }
 0x316   : > { %v4998_v6 = vsel %vm4799_vm6, %v4238_v61, %v4997_v16  ;;  %v3470_v29 = vrot.slane %v3469_v2, 4  ;;  %v2338_v38 = vcombine.high %v1218_v54, %v1218_v54  ;;  %v2345_v24 = vrot.slane %v1218_v54, %v13167_v44 }
 0x317   : > { %v4999_v58 = vsel %vm4801_vm7, %v4245_v30, %v4998_v6  ;;  %v1810_v36 = vcombine.high %v1808_v0, %v1808_v0  ;;  %v3476_v32 = vsel %vm2628_vm1, %v1809_v3, -inf  ;;  %v3483_v63 = vsel %vm2628_vm1, %v1808_v0, -inf }
 0x318   : > { %v5000_v10 = vsel %vm4803_vm8, %v4252_v20, %v4999_v58  ;;  %v3471_v22 = vmax.f32 %v3469_v2, %v3470_v29  ;;  %v3477_v39 = vrot.slane %v3476_v32, 4  ;;  %v3484_v43 = vrot.slane %v3483_v63, 4 }
 0x319   : > { %5082 = vst [vmem:[#allocation2 + $0x3c8] sm:$0xff] %v5000_v10  ;;  %v3490_v53 = vsel %vm2628_vm1, %v1810_v36, -inf  ;;  %v2352_v8 = vrot.slane %v2338_v38, %v13167_v44  ;;  %v2353_v42 = vcombine.high %v2345_v24, %v2345_v24  ;;  %v4365_v62 = vsel %vm2628_vm1, %v2345_v24, -inf }
 0x31a   : > { %v3472_v59 = vrot.slane %v3471_v22, 2  ;;  %v3478_v9 = vmax.f32 %v3476_v32, %v3477_v39  ;;  %v3485_v13 = vmax.f32 %v3483_v63, %v3484_v43  ;;  %v3491_v11 = vrot.slane %v3490_v53, 4 }
 0x31b   : > { %v2354_v45 = vcombine.high %v2352_v8, %v2352_v8  ;;  %v4366_v41 = vrot.slane %v4365_v62, 4  ;;  %v4372_v5 = vsel %vm2628_vm1, %v2353_v42, -inf  ;;  %v4379_v46 = vsel %vm2628_vm1, %v2352_v8, -inf }
 0x31c   : > { %v3473_v1 = vmax.f32 %v3471_v22, %v3472_v59  ;;  %v3479_v60 = vrot.slane %v3478_v9, 2  ;;  %v3486_v48 = vrot.slane %v3485_v13, 2  ;;  %v3492_v17 = vmax.f32 %v3490_v53, %v3491_v11 }
 0x31d   : > { %v4367_v35 = vmax.f32 %v4365_v62, %v4366_v41  ;;  %v4373_v33 = vrot.slane %v4372_v5, 4  ;;  %v4380_v15 = vrot.slane %v4379_v46, 4  ;;  %v4386_v31 = vsel %vm2628_vm1, %v2354_v45, -inf }
 0x31e   : > { %v3474_v56 = vrot.slane %v3473_v1, 1  ;;  %v3480_v40 = vmax.f32 %v3478_v9, %v3479_v60  ;;  %v3487_v50 = vmax.f32 %v3485_v13, %v3486_v48  ;;  %v3493_v57 = vrot.slane %v3492_v17, 2 }
 0x31f   : > { %v4368_v52 = vrot.slane %v4367_v35, 2  ;;  %v4374_v47 = vmax.f32 %v4372_v5, %v4373_v33  ;;  %v4381_v34 = vmax.f32 %v4379_v46, %v4380_v15  ;;  %v4387_v14 = vrot.slane %v4386_v31, 4 }
 0x320   : > { %v3481_v12 = vrot.slane %v3480_v40, 1  ;;  %v3488_v51 = vrot.slane %v3487_v50, 1  ;;  %v3494_v18 = vmax.f32 %v3492_v17, %v3493_v57  ;;  %v3475_v28 = vmax.f32 %v3473_v1, %v3474_v56 }
 0x321   : > { %v4369_v23 = vmax.f32 %v4367_v35, %v4368_v52  ;;  %v4375_v21 = vrot.slane %v4374_v47, 2  ;;  %v4382_v16 = vrot.slane %v4381_v34, 2  ;;  %v4388_v55 = vmax.f32 %v4386_v31, %v4387_v14 }
 0x322   : > { %v3482_v61 = vmax.f32 %v3480_v40, %v3481_v12  ;;  %v1184_v30 = vmax.f32 %v1120_v37, 0.0  ;;  %v3495_v54 = vrot.slane %v3494_v18, 1  ;;  %v3489_v29 = vmax.f32 %v3487_v50, %v3488_v51 }
 0x323   : > { %v4376_v20 = vmax.f32 %v4374_v47, %v4375_v21  ;;  %v4383_v0 = vmax.f32 %v4381_v34, %v4382_v16  ;;  %v4389_v3 = vrot.slane %v4388_v55, 2  ;;  %v4370_v24 = vrot.slane %v4369_v23, 1 }
 0x324   : > { %v1760_v2 = vcombine.high %v1184_v30, %v1184_v30  ;;  %v1767_v6 = vrot.slane %v1184_v30, %v13167_v44  ;;  %v4903_v38 = vsel %vm4791_vm2, %v3482_v61, %v3475_v28  ;;  %v14282_v22 = vmax.f32 %v3494_v18, %v3495_v54 }
 0x325   : > { %v4377_v58 = vrot.slane %v4376_v20, 1  ;;  %v4390_v36 = vmax.f32 %v4388_v55, %v4389_v3  ;;  %v4384_v37 = vrot.slane %v4383_v0, 1  ;;  %v1081_v43 = vmul.f32 %v14251_v25, %v14053_v7 }
 0x326   : > { %v1774_v32 = vrot.slane %v1760_v2, %v13167_v44  ;;  %v1775_v63 = vcombine.high %v1767_v6, %v1767_v6  ;;  %v3413_v10 = vsel %vm2628_vm1, %v1767_v6, -inf  ;;  %v14289_v59 = vsel %vm4793_vm3, %v3489_v29, %v4903_v38 }
 0x327   : > { %v3414_v39 = vrot.slane %v3413_v10, 4  ;;  %v4378_v53 = vmax.f32 %v4376_v20, %v4377_v58  ;;  %v4371_v45 = vmax.f32 %v4369_v23, %v4370_v24  ;;  %v4391_v41 = vrot.slane %v4390_v36, 1 }
 0x328   : > { %v1776_v8 = vcombine.high %v1774_v32, %v1774_v32  ;;  %v3420_v42 = vsel %vm2628_vm1, %v1775_v63, -inf  ;;  %v3427_v62 = vsel %vm2628_vm1, %v1774_v32, -inf  ;;  %v1152_v46 = vadd.f32 %v14207_v26, %v1081_v43 }
 0x329   : > { %v3415_v9 = vmax.f32 %v3413_v10, %v3414_v39  ;;  %v3421_v13 = vrot.slane %v3420_v42, 4  ;;  %v3428_v11 = vrot.slane %v3427_v62, 4  ;;  %v4385_v17 = vmax.f32 %v4383_v0, %v4384_v37 }
 0x32a   : > { %v3434_v5 = vsel %vm2628_vm1, %v1776_v8, -inf  ;;  %v5015_v35 = vsel %vm4791_vm2, %v4378_v53, %v4371_v45  ;;  %v1216_v33 = vmax.f32 %v1152_v46, 0.0  ;;  %v1052_v15 = vmul.f32 %v14251_v25, %v14070_v27 }
 0x32b   : > { %v3416_v1 = vrot.slane %v3415_v9, 2  ;;  %v3422_v7 = vmax.f32 %v3420_v42, %v3421_v13  ;;  %v3429_v60 = vmax.f32 %v3427_v62, %v3428_v11  ;;  %v3435_v48 = vrot.slane %v3434_v5, 4 }
 0x32c   : > { %v14296_v57 = vmax.f32 %v4390_v36, %v4391_v41  ;;  %v2304_v52 = vcombine.high %v1216_v33, %v1216_v33  ;;  %v2311_v47 = vrot.slane %v1216_v33, %v13167_v44  ;;  %v1123_v34 = vadd.f32 %v14207_v26, %v1052_v15 }
 0x32d   : > { %v3417_v31 = vmax.f32 %v3415_v9, %v3416_v1  ;;  %v3423_v56 = vrot.slane %v3422_v7, 2  ;;  %v3430_v40 = vrot.slane %v3429_v60, 2  ;;  %v3436_v50 = vmax.f32 %v3434_v5, %v3435_v48 }
 0x32e   : > { %v1084_v18 = vmul.f32 %v14251_v25, %v14095_v4  ;;  %v2318_v23 = vrot.slane %v2304_v52, %v13167_v44  ;;  %v2319_v27 = vcombine.high %v2311_v47, %v2311_v47  ;;  %v4309_v21 = vsel %vm2628_vm1, %v2311_v47, -inf }
 0x32f   : > { %v3424_v14 = vmax.f32 %v3422_v7, %v3423_v56  ;;  %v3431_v12 = vmax.f32 %v3429_v60, %v3430_v40  ;;  %v3437_v51 = vrot.slane %v3436_v50, 2  ;;  %v1187_v16 = vmax.f32 %v1123_v34, 0.0 }
 0x330   : > { %v3418_v55 = vrot.slane %v3417_v31, 1  ;;  %v2320_v54 = vcombine.high %v2318_v23, %v2318_v23  ;;  %v4310_v20 = vrot.slane %v4309_v21, 4  ;;  %v4316_v0 = vsel %vm2628_vm1, %v2319_v27, -inf }
 0x331   : > { %v3425_v28 = vrot.slane %v3424_v14, 1  ;;  %v3432_v61 = vrot.slane %v3431_v12, 1  ;;  %v3438_v30 = vmax.f32 %v3436_v50, %v3437_v51  ;;  %v4323_v3 = vsel %vm2628_vm1, %v2318_v23, -inf }
 0x332   : > { %v14307_v2 = vsel %vm4793_vm3, %v4385_v17, %v5015_v35  ;;  %v4317_v6 = vrot.slane %v4316_v0, 4  ;;  %v1155_v29 = vadd.f32 %v14207_v26, %v1084_v18  ;;  %v4311_v38 = vmax.f32 %v4309_v21, %v4310_v20 }
 0x333   : > { %v3426_v4 = vmax.f32 %v3424_v14, %v3425_v28  ;;  %v4324_v24 = vrot.slane %v4323_v3, 4  ;;  %v4330_v58 = vsel %vm2628_vm1, %v2320_v54, -inf  ;;  %v1811_v36 = vcombine.high %v1187_v16, %v1187_v16 }
 0x334   : > { %v3419_v32 = vmax.f32 %v3417_v31, %v3418_v55  ;;  %v3433_v63 = vmax.f32 %v3431_v12, %v3432_v61  ;;  %v4318_v10 = vmax.f32 %v4316_v0, %v4317_v6  ;;  %v4331_v37 = vrot.slane %v4330_v58, 4 }
 0x335   : > { %v3439_v39 = vrot.slane %v3438_v30, 1  ;;  %v4312_v43 = vrot.slane %v4311_v38, 2  ;;  %v4325_v53 = vmax.f32 %v4323_v3, %v4324_v24  ;;  %v1818_v8 = vrot.slane %v1187_v16, %v13167_v44 }
 0x336   : > { %v4896_v42 = vsel %vm4791_vm2, %v3426_v4, %v3419_v32  ;;  %v4319_v62 = vrot.slane %v4318_v10, 2  ;;  %v4332_v9 = vmax.f32 %v4330_v58, %v4331_v37  ;;  %v1825_v13 = vrot.slane %v1811_v36, %v13167_v44 }
 0x337   : > { %v4313_v11 = vmax.f32 %v4311_v38, %v4312_v43  ;;  %v4326_v45 = vrot.slane %v4325_v53, 2  ;;  %v1826_v41 = vcombine.high %v1818_v8, %v1818_v8  ;;  %v3497_v5 = vsel %vm2628_vm1, %v1818_v8, -inf }
 0x338   : > { %v4320_v46 = vmax.f32 %v4318_v10, %v4319_v62  ;;  %v4333_v1 = vrot.slane %v4332_v9, 2  ;;  %v1827_v7 = vcombine.high %v1825_v13, %v1825_v13  ;;  %v3498_v60 = vrot.slane %v3497_v5, 4 }
 0x339   : > { %v4327_v48 = vmax.f32 %v4325_v53, %v4326_v45  ;;  %v3504_v17 = vsel %vm2628_vm1, %v1826_v41, -inf  ;;  %v3511_v35 = vsel %vm2628_vm1, %v1825_v13, -inf  ;;  %v1219_v33 = vmax.f32 %v1155_v29, 0.0 }
 0x33a   : > { %v4314_v15 = vrot.slane %v4313_v11, 1  ;;  %v4321_v31 = vrot.slane %v4320_v46, 1  ;;  %v3499_v56 = vmax.f32 %v3497_v5, %v3498_v60  ;;  %v3505_v40 = vrot.slane %v3504_v17, 4 }
 0x33b   : > { %v14317_v50 = vmax.f32 %v4332_v9, %v4333_v1  ;;  %v3512_v52 = vrot.slane %v3511_v35, 4  ;;  %v3518_v47 = vsel %vm2628_vm1, %v1827_v7, -inf  ;;  %v4905_v34 = vsel %vm4795_vm4, %v14282_v22, %v14289_v59 }
 0x33c   : > { %v14323_v14 = vmax.f32 %v3438_v30, %v3439_v39  ;;  %v4328_v12 = vrot.slane %v4327_v48, 1  ;;  %v3500_v51 = vrot.slane %v3499_v56, 2  ;;  %v3506_v18 = vmax.f32 %v3504_v17, %v3505_v40 }
 0x33d   : > { %v14326_v23 = vsel %vm4793_vm3, %v3433_v63, %v4896_v42  ;;  %v3513_v27 = vmax.f32 %v3511_v35, %v3512_v52  ;;  %v3519_v21 = vrot.slane %v3518_v47, 4  ;;  %v2355_v16 = vcombine.high %v1219_v33, %v1219_v33 }
 0x33e   : > { %v4315_v55 = vmax.f32 %v4313_v11, %v4314_v15  ;;  %v4322_v28 = vmax.f32 %v4320_v46, %v4321_v31  ;;  %v3501_v61 = vmax.f32 %v3499_v56, %v3500_v51  ;;  %v3507_v54 = vrot.slane %v3506_v18, 2 }
 0x33f   : > { %v4335_v20 = vrot.slane %v14317_v50, 1  ;;  %v3514_v0 = vrot.slane %v3513_v27, 2  ;;  %v3520_v3 = vmax.f32 %v3518_v47, %v3519_v21  ;;  %v2362_v22 = vrot.slane %v1219_v33, %v13167_v44 }
 0x340   : > { %v14330_v59 = vmax.f32 %v4327_v48, %v4328_v12  ;;  %v3502_v30 = vrot.slane %v3501_v61, 1  ;;  %v3508_v4 = vmax.f32 %v3506_v18, %v3507_v54  ;;  %v2369_v6 = vrot.slane %v2355_v16, %v13167_v44 }
 0x341   : > { %v3515_v29 = vmax.f32 %v3513_v27, %v3514_v0  ;;  %v3521_v38 = vrot.slane %v3520_v3, 2  ;;  %v2370_v24 = vcombine.high %v2362_v22, %v2362_v22  ;;  %v4393_v58 = vsel %vm2628_vm1, %v2362_v22, -inf }
 0x342   : > { %v3503_v36 = vmax.f32 %v3501_v61, %v3502_v30  ;;  %v3509_v32 = vrot.slane %v3508_v4, 1  ;;  %v2371_v63 = vcombine.high %v2369_v6, %v2369_v6  ;;  %v4394_v10 = vrot.slane %v4393_v58, 4 }
 0x343   : > { %v3516_v37 = vrot.slane %v3515_v29, 1  ;;  %v3522_v39 = vmax.f32 %v3520_v3, %v3521_v38  ;;  %v4400_v43 = vsel %vm2628_vm1, %v2370_v24, -inf  ;;  %v4407_v53 = vsel %vm2628_vm1, %v2369_v6, -inf }
 0x344   : > { %v3510_v8 = vmax.f32 %v3508_v4, %v3509_v32  ;;  %v4906_v42 = vsel %vm4797_vm5, %v3503_v36, %v4905_v34  ;;  %v4395_v62 = vmax.f32 %v4393_v58, %v4394_v10  ;;  %v4401_v9 = vrot.slane %v4400_v43, 4 }
 0x345   : > { %v3517_v13 = vmax.f32 %v3515_v29, %v3516_v37  ;;  %v3523_v11 = vrot.slane %v3522_v39, 1  ;;  %v4408_v45 = vrot.slane %v4407_v53, 4  ;;  %v4414_v41 = vsel %vm2628_vm1, %v2371_v63, -inf }
 0x346   : > { %v4907_v5 = vsel %vm4799_vm6, %v3510_v8, %v4906_v42  ;;  %v4396_v46 = vrot.slane %v4395_v62, 2  ;;  %v4402_v1 = vmax.f32 %v4400_v43, %v4401_v9  ;;  %v4415_v7 = vrot.slane %v4414_v41, 4 }
 0x347   : > { %v3524_v60 = vmax.f32 %v3522_v39, %v3523_v11  ;;  %v4908_v48 = vsel %vm4801_vm7, %v3517_v13, %v4907_v5  ;;  %v4409_v17 = vmax.f32 %v4407_v53, %v4408_v45  ;;  %v1050_v35 = vmul.f32 %v14251_v25, %v14113_v19 }
 0x348   : > { %v14343_v33 = vsel %vm4791_vm2, %v4322_v28, %v4315_v55  ;;  %v4397_v15 = vmax.f32 %v4395_v62, %v4396_v46  ;;  %v4403_v31 = vrot.slane %v4402_v1, 2  ;;  %v4416_v56 = vmax.f32 %v4414_v41, %v4415_v7 }
 0x349   : > { %v4909_v40 = vsel %vm4803_vm8, %v3524_v60, %v4908_v48  ;;  %v4410_v52 = vrot.slane %v4409_v17, 2  ;;  %v1121_v47 = vadd.f32 %v14207_v26, %v1050_v35  ;;  %v1082_v34 = vmul.f32 %v14251_v25, %v14128_v49 }
 0x34a   : > { %5069 = vst [vmem:[#allocation2 + $0x1d0] sm:$0xff] %v4909_v40  ;;  %v4398_v12 = vrot.slane %v4397_v15, 1  ;;  %v14349_v51 = vmax.f32 %v4402_v1, %v4403_v31  ;;  %v4417_v18 = vrot.slane %v4416_v56, 2  ;;  %v14354_v19 = vsel %vm4795_vm4, %v14296_v57, %v14307_v2 }
 0x34b   : > { %v14356_v27 = vmax.f32 %v4409_v17, %v4410_v52  ;;  %v14358_v21 = vmax.f32 %v1121_v47, 0.0  ;;  %v14361_v16 = vadd.f32 %v14207_v26, %v1082_v34  ;;  %v14364_v55 = vmax.f32 %v14317_v50, %v4335_v20 }
 0x34c   : > { %v14366_v49 = vmax.f32 %v4397_v15, %v4398_v12  ;;  %v4405_v25 = vrot.slane %v14349_v51, 1  ;;  %v14369_v28 = vmax.f32 %v4416_v56, %v4417_v18  ;;  %v13010_v61 = vmov 0.0  }
 0x34d   : > { %4421 = vst [vmem:[#allocation2] sm:$0xff] %v13010_v61  ;;  %4422 = vst [vmem:[#allocation2 + $0x8] sm:$0xff] %v13010_v61  ;;  %v4412_v26 = vrot.slane %v14356_v27, 1  ;;  %v1777_v57 = vcombine.high %v14358_v21, %v14358_v21  ;;  %v1784_v2 = vrot.slane %v14358_v21, %v13167_v44  ;;  %v1217_v50 = vmax.f32 %v14361_v16, 0.0 }
 0x34e   : > { %4423 = vst [vmem:[#allocation2 + $0x10] sm:$0xff] %v13010_v61  ;;  %4424 = vst [vmem:[#allocation2 + $0x18] sm:$0xff] %v13010_v61  ;;  %v14492_v54 = vsel %vm4793_vm3, %v14330_v59, %v14343_v33  ;;  %v4406_v20 = vmax.f32 %v14349_v51, %v4405_v25  ;;  %v4419_v0 = vrot.slane %v14369_v28, 1  ;;  %v5018_v3 = vsel %vm4797_vm5, %v14366_v49, %v14354_v19 }
 0x34f   : > { %4425 = vst [vmem:[#allocation2 + $0x20] sm:$0xff] %v13010_v61  ;;  %4426 = vst [vmem:[#allocation2 + $0x28] sm:$0xff] %v13010_v61  ;;  %v4413_v22 = vmax.f32 %v14356_v27, %v4412_v26  ;;  %v1791_v30 = vrot.slane %v1777_v57, %v13167_v44  ;;  %v1792_v4 = vcombine.high %v1784_v2, %v1784_v2  ;;  %v3441_v6 = vsel %vm2628_vm1, %v1784_v2, -inf }
 0x350   : > { %4427 = vst [vmem:[#allocation2 + $0x30] sm:$0xff] %v13010_v61  ;;  %4428 = vst [vmem:[#allocation2 + $0x38] sm:$0xff] %v13010_v61  ;;  %v4420_v59 = vmax.f32 %v14369_v28, %v4419_v0  ;;  %v5019_v29 = vsel %vm4799_vm6, %v4406_v20, %v5018_v3  ;;  %v3442_v38 = vrot.slane %v3441_v6, 4  ;;  %v2321_v24 = vcombine.high %v1217_v50, %v1217_v50 }
 0x351   : > { %4429 = vst [vmem:[#allocation2 + $0x40] sm:$0xff] %v13010_v61  ;;  %4430 = vst [vmem:[#allocation2 + $0x48] sm:$0xff] %v13010_v61  ;;  %v5020_v58 = vsel %vm4801_vm7, %v4413_v22, %v5019_v29  ;;  %v1793_v36 = vcombine.high %v1791_v30, %v1791_v30  ;;  %v3448_v32 = vsel %vm2628_vm1, %v1792_v4, -inf  ;;  %v3455_v63 = vsel %vm2628_vm1, %v1791_v30, -inf }
 0x352   : > { %4431 = vst [vmem:[#allocation2 + $0x50] sm:$0xff] %v13010_v61  ;;  %4432 = vst [vmem:[#allocation2 + $0x58] sm:$0xff] %v13010_v61  ;;  %v5021_v10 = vsel %vm4803_vm8, %v4420_v59, %v5020_v58  ;;  %v3443_v37 = vmax.f32 %v3441_v6, %v3442_v38  ;;  %v3449_v39 = vrot.slane %v3448_v32, 4  ;;  %v3456_v43 = vrot.slane %v3455_v63, 4 }
 0x353   : > { %4433 = vst [vmem:[#allocation2 + $0x240] sm:$0xff] %v13010_v61  ;;  %4434 = vst [vmem:[#allocation2 + $0x248] sm:$0xff] %v13010_v61  ;;  %v3462_v53 = vsel %vm2628_vm1, %v1793_v36, -inf  ;;  %v4898_v8 = vsel %vm4795_vm4, %v14323_v14, %v14326_v23  ;;  %v2328_v42 = vrot.slane %v1217_v50, %v13167_v44  ;;  %v2335_v62 = vrot.slane %v2321_v24, %v13167_v44 }
 0x354   : > { %4435 = vst [vmem:[#allocation2 + $0x250] sm:$0xff] %v13010_v61  ;;  %4436 = vst [vmem:[#allocation2 + $0x258] sm:$0xff] %v13010_v61  ;;  %v3444_v9 = vrot.slane %v3443_v37, 2  ;;  %v3450_v13 = vmax.f32 %v3448_v32, %v3449_v39  ;;  %v3457_v11 = vmax.f32 %v3455_v63, %v3456_v43  ;;  %v3463_v45 = vrot.slane %v3462_v53, 4 }
 0x355   : > { %4437 = vst [vmem:[#allocation2 + $0x260] sm:$0xff] %v13010_v61  ;;  %4438 = vst [vmem:[#allocation2 + $0x268] sm:$0xff] %v13010_v61  ;;  %v2336_v41 = vcombine.high %v2328_v42, %v2328_v42  ;;  %v2337_v5 = vcombine.high %v2335_v62, %v2335_v62  ;;  %v4337_v46 = vsel %vm2628_vm1, %v2328_v42, -inf  ;;  %v4351_v1 = vsel %vm2628_vm1, %v2335_v62, -inf }
 0x356   : > { %4439 = vst [vmem:[#allocation2 + $0x270] sm:$0xff] %v13010_v61  ;;  %4440 = vst [vmem:[#allocation2 + $0x278] sm:$0xff] %v13010_v61  ;;  %v3445_v7 = vmax.f32 %v3443_v37, %v3444_v9  ;;  %v3451_v60 = vrot.slane %v3450_v13, 2  ;;  %v3458_v48 = vrot.slane %v3457_v11, 2  ;;  %v3464_v17 = vmax.f32 %v3462_v53, %v3463_v45 }
 0x357   : > { %4441 = vst [vmem:[#allocation2 + $0x280] sm:$0xff] %v13010_v61  ;;  %4442 = vst [vmem:[#allocation2 + $0x288] sm:$0xff] %v13010_v61  ;;  %v4338_v35 = vrot.slane %v4337_v46, 4  ;;  %v4344_v14 = vsel %vm2628_vm1, %v2336_v41, -inf  ;;  %v4352_v23 = vrot.slane %v4351_v1, 4  ;;  %v4358_v33 = vsel %vm2628_vm1, %v2337_v5, -inf }
 0x358   : > { %4443 = vst [vmem:[#allocation2 + $0x290] sm:$0xff] %v13010_v61  ;;  %4444 = vst [vmem:[#allocation2 + $0x298] sm:$0xff] %v13010_v61  ;;  %v3446_v15 = vrot.slane %v3445_v7, 1  ;;  %v3452_v31 = vmax.f32 %v3450_v13, %v3451_v60  ;;  %v3459_v56 = vmax.f32 %v3457_v11, %v3458_v48  ;;  %v3465_v40 = vrot.slane %v3464_v17, 2 }
 0x359   : > { %4446 = vst [vmem:[#allocation2 + $0x1e0] sm:$0xff] %v13010_v61  ;;  %4447 = vst [vmem:[#allocation2 + $0x1e8] sm:$0xff] %v13010_v61  ;;  %v4339_v52 = vmax.f32 %v4337_v46, %v4338_v35  ;;  %v4345_v47 = vrot.slane %v4344_v14, 4  ;;  %v4353_v34 = vmax.f32 %v4351_v1, %v4352_v23  ;;  %v4359_v12 = vrot.slane %v4358_v33, 4 }
 0x35a   : > { %4448 = vst [vmem:[#allocation2 + $0x1f0] sm:$0xff] %v13010_v61  ;;  %4449 = vst [vmem:[#allocation2 + $0x1f8] sm:$0xff] %v13010_v61  ;;  %v3447_v51 = vmax.f32 %v3445_v7, %v3446_v15  ;;  %v3453_v18 = vrot.slane %v3452_v31, 1  ;;  %v3460_v19 = vrot.slane %v3459_v56, 1  ;;  %v3466_v27 = vmax.f32 %v3464_v17, %v3465_v40 }
 0x35b   : > { %4450 = vst [vmem:[#allocation2 + $0x200] sm:$0xff] %v13010_v61  ;;  %4451 = vst [vmem:[#allocation2 + $0x208] sm:$0xff] %v13010_v61  ;;  %v4340_v21 = vrot.slane %v4339_v52, 2  ;;  %v4346_v16 = vmax.f32 %v4344_v14, %v4345_v47  ;;  %v4354_v49 = vrot.slane %v4353_v34, 2  ;;  %v4360_v25 = vmax.f32 %v4358_v33, %v4359_v12 }
 0x35c   : > { %4452 = vst [vmem:[#allocation2 + $0x210] sm:$0xff] %v13010_v61  ;;  %4453 = vst [vmem:[#allocation2 + $0x218] sm:$0xff] %v13010_v61  ;;  %v3454_v28 = vmax.f32 %v3452_v31, %v3453_v18  ;;  %v3467_v26 = vrot.slane %v3466_v27, 1  ;;  %v4899_v57 = vsel %vm4797_vm5, %v3447_v51, %v4898_v8  ;;  %v5010_v24 = vsel %vm4795_vm4, %v14364_v55, %v14492_v54 }
 0x35d   : > { %4454 = vst [vmem:[#allocation2 + $0x220] sm:$0xff] %v13010_v61  ;;  %4455 = vst [vmem:[#allocation2 + $0x228] sm:$0xff] %v13010_v61  ;;  %v4341_v2 = vmax.f32 %v4339_v52, %v4340_v21  ;;  %v4347_v50 = vrot.slane %v4346_v16, 2  ;;  %v4355_v20 = vmax.f32 %v4353_v34, %v4354_v49  ;;  %v4361_v0 = vrot.slane %v4360_v25, 2 }
 0x35e   : > { %4456 = vst [vmem:[#allocation2 + $0x230] sm:$0xff] %v13010_v61  ;;  %4457 = vst [vmem:[#allocation2 + $0x238] sm:$0xff] %v13010_v61  ;;  %v3468_v3 = vmax.f32 %v3466_v27, %v3467_v26  ;;  %v4900_v22 = vsel %vm4799_vm6, %v3454_v28, %v4899_v57  ;;  %v14531_v42 = vmov 0.0   ;;  %v14533_v62 = vmov 0.0  }
 0x35f   : > { %4458 = vst [vmem:[#allocation2 + $0x420] sm:$0xff] %v13010_v61  ;;  %4459 = vst [vmem:[#allocation2 + $0x428] sm:$0xff] %v13010_v61  ;;  %v4342_v4 = vrot.slane %v4341_v2, 1  ;;  %v4348_v6 = vmax.f32 %v4346_v16, %v4347_v50  ;;  %v4356_v29 = vrot.slane %v4355_v20, 1  ;;  %v4362_v38 = vmax.f32 %v4360_v25, %v4361_v0 }
 0x360   : > { %4460 = vst [vmem:[#allocation2 + $0x430] sm:$0xff] %v13010_v61  ;;  %4461 = vst [vmem:[#allocation2 + $0x438] sm:$0xff] %v13010_v61  ;;  %v14535_v55 = vmov 0.0   ;;  %v14537_v54 = vmov 0.0   ;;  %v14539_v9 = vmov 0.0   ;;  %v14541_v13 = vmov 0.0  }
 0x361   : > { %4462 = vst [vmem:[#allocation2 + $0x440] sm:$0xff] %v13010_v61  ;;  %4463 = vst [vmem:[#allocation2 + $0x448] sm:$0xff] %v13010_v61  ;;  %v4343_v58 = vmax.f32 %v4341_v2, %v4342_v4  ;;  %v4349_v36 = vrot.slane %v4348_v6, 1  ;;  %v4363_v32 = vrot.slane %v4362_v38, 1  ;;  %v4357_v37 = vmax.f32 %v4355_v20, %v4356_v29 }
 0x362   : > { %4464 = vst [vmem:[#allocation2 + $0x450] sm:$0xff] %v13010_v61  ;;  %4465 = vst [vmem:[#allocation2 + $0x458] sm:$0xff] %v13010_v61  ;;  %v14543_v11 = vmov 0.0   ;;  %v14545_v45 = vmov 0.0   ;;  %v14547_v41 = vmov 0.0   ;;  %v14549_v5 = vmov 0.0  }
 0x363   : > { %4466 = vst [vmem:[#allocation2 + $0x460] sm:$0xff] %v13010_v61  ;;  %4467 = vst [vmem:[#allocation2 + $0x468] sm:$0xff] %v13010_v61  ;;  %v4350_v63 = vmax.f32 %v4348_v6, %v4349_v36  ;;  %v4364_v39 = vmax.f32 %v4362_v38, %v4363_v32  ;;  %v14551_v46 = vmov 0.0   ;;  %v14553_v1 = vmov 0.0  }
 0x364   : > { %4468 = vst [vmem:[#allocation2 + $0x470] sm:$0xff] %v13010_v61  ;;  %4469 = vst [vmem:[#allocation2 + $0x478] sm:$0xff] %v13010_v61  ;;  %v14555_v7 = vmov 0.0   ;;  %v14557_v60 = vmov 0.0   ;;  %v14559_v48 = vmov 0.0   ;;  %v14561_v17 = vmov 0.0  }
 0x365   : > { %4471 = vst [vmem:[#allocation2 + $0x60] sm:$0xff] %v13010_v61  ;;  %4472 = vst [vmem:[#allocation2 + $0x78] sm:$0xff] %v13010_v61  ;;  %v14563_v35 = vmov 0.0   ;;  %v14565_v14 = vmov 0.0   ;;  %v14567_v23 = vmov 0.0   ;;  %v14569_v33 = vmov 0.0  }
 0x366   : > { %4473 = vst [vmem:[#allocation2 + $0x90] sm:$0xff] %v13010_v61  ;;  %4474 = vst [vmem:[#allocation2 + $0xa8] sm:$0xff] %v13010_v61  ;;  %v14571_v15 = vmov 0.0   ;;  %v14573_v31 = vmov 0.0   ;;  %v14577_v40 = vmov 0.0   ;;  %v14579_v52 = vmov 0.0  }
 0x367   : > { %4475 = vst [vmem:[#allocation2 + $0xc0] sm:$0xff] %v13010_v61  ;;  %4476 = vst [vmem:[#allocation2 + $0xd8] sm:$0xff] %v13010_v61  ;;  %v14581_v47 = vmov 0.0   ;;  %v14583_v34 = vmov 0.0   ;;  %v14585_v12 = vmov 0.0   ;;  %v14587_v51 = vmov 0.0  }
 0x368   : > { %4477 = vst [vmem:[#allocation2 + $0xf0] sm:$0xff] %v13010_v61  ;;  %4478 = vst [vmem:[#allocation2 + $0x108] sm:$0xff] %v13010_v61  ;;  %v14589_v18 = vmov 0.0   ;;  %v14593_v27 = vmov 0.0  }
 0x369   : > { %4479 = vst [vmem:[#allocation2 + $0x120] sm:$0xff] %v13010_v61  ;;  %4480 = vst [vmem:[#allocation2 + $0x138] sm:$0xff] %v13010_v61 }
 0x36a   : > { %4481 = vst [vmem:[#allocation2 + $0x150] sm:$0xff] %v13010_v61  ;;  %4482 = vst [vmem:[#allocation2 + $0x168] sm:$0xff] %v13010_v61 }
 0x36b   : > { %4483 = vst [vmem:[#allocation2 + $0x180] sm:$0xff] %v13010_v61  ;;  %4484 = vst [vmem:[#allocation2 + $0x198] sm:$0xff] %v13010_v61 }
 0x36c   : > { %4485 = vst [vmem:[#allocation2 + $0x1b0] sm:$0xff] %v13010_v61  ;;  %4486 = vst [vmem:[#allocation2 + $0x1c8] sm:$0xff] %v13010_v61 }
 0x36d   : > { %4487 = vst [vmem:[#allocation2 + $0x2a0] sm:$0xff] %v13010_v61  ;;  %4488 = vst [vmem:[#allocation2 + $0x2b8] sm:$0xff] %v13010_v61 }
 0x36e   : > { %4489 = vst [vmem:[#allocation2 + $0x2d0] sm:$0xff] %v13010_v61  ;;  %4490 = vst [vmem:[#allocation2 + $0x2e8] sm:$0xff] %v13010_v61 }
 0x36f   : > { %4491 = vst [vmem:[#allocation2 + $0x300] sm:$0xff] %v13010_v61  ;;  %4492 = vst [vmem:[#allocation2 + $0x318] sm:$0xff] %v13010_v61 }
 0x370   : > { %4493 = vst [vmem:[#allocation2 + $0x330] sm:$0xff] %v13010_v61  ;;  %4494 = vst [vmem:[#allocation2 + $0x348] sm:$0xff] %v13010_v61 }
 0x371   : > { %4495 = vst [vmem:[#allocation2 + $0x360] sm:$0xff] %v13010_v61  ;;  %4496 = vst [vmem:[#allocation2 + $0x378] sm:$0xff] %v13010_v61 }
 0x372   : > { %4497 = vst [vmem:[#allocation2 + $0x390] sm:$0xff] %v13010_v61  ;;  %4498 = vst [vmem:[#allocation2 + $0x3a8] sm:$0xff] %v13010_v61 }
 0x373   : > { %4499 = vst [vmem:[#allocation2 + $0x3c0] sm:$0xff] %v13010_v61  ;;  %4500 = vst [vmem:[#allocation2 + $0x3d8] sm:$0xff] %v13010_v61 }
 0x374   : > { %4501 = vst [vmem:[#allocation2 + $0x3f0] sm:$0xff] %v13010_v61  ;;  %4502 = vst [vmem:[#allocation2 + $0x408] sm:$0xff] %v13010_v61 }
 0x375   : > { %4503 = vst [vmem:[#allocation2 + $0x70] sm:$0xff] %v13010_v61  ;;  %4504 = vst [vmem:[#allocation2 + $0x88] sm:$0xff] %v13010_v61 }
 0x376   : > { %4505 = vst [vmem:[#allocation2 + $0xa0] sm:$0xff] %v13010_v61  ;;  %4506 = vst [vmem:[#allocation2 + $0xb8] sm:$0xff] %v13010_v61 }
 0x377   : > { %4507 = vst [vmem:[#allocation2 + $0xd0] sm:$0xff] %v13010_v61  ;;  %4508 = vst [vmem:[#allocation2 + $0xe8] sm:$0xff] %v13010_v61 }
 0x378   : > { %4509 = vst [vmem:[#allocation2 + $0x100] sm:$0xff] %v13010_v61  ;;  %4510 = vst [vmem:[#allocation2 + $0x118] sm:$0xff] %v13010_v61 }
 0x379   : > { %4511 = vst [vmem:[#allocation2 + $0x130] sm:$0xff] %v13010_v61  ;;  %4512 = vst [vmem:[#allocation2 + $0x148] sm:$0xff] %v13010_v61 }
 0x37a   : > { %4513 = vst [vmem:[#allocation2 + $0x160] sm:$0xff] %v13010_v61  ;;  %4514 = vst [vmem:[#allocation2 + $0x178] sm:$0xff] %v13010_v61 }
 0x37b   : > { %4515 = vst [vmem:[#allocation2 + $0x190] sm:$0xff] %v13010_v61  ;;  %4516 = vst [vmem:[#allocation2 + $0x1a8] sm:$0xff] %v13010_v61 }
 0x37c   : > { %4517 = vst [vmem:[#allocation2 + $0x1c0] sm:$0xff] %v13010_v61  ;;  %4518 = vst [vmem:[#allocation2 + $0x1d8] sm:$0xff] %v13010_v61 }
 0x37d   : > { %4519 = vst [vmem:[#allocation2 + $0x2b0] sm:$0xff] %v13010_v61  ;;  %4520 = vst [vmem:[#allocation2 + $0x2c8] sm:$0xff] %v13010_v61 }
 0x37e   : > { %4521 = vst [vmem:[#allocation2 + $0x2e0] sm:$0xff] %v13010_v61  ;;  %4522 = vst [vmem:[#allocation2 + $0x2f8] sm:$0xff] %v13010_v61 }
 0x37f   : > { %4523 = vst [vmem:[#allocation2 + $0x310] sm:$0xff] %v13010_v61  ;;  %4524 = vst [vmem:[#allocation2 + $0x328] sm:$0xff] %v13010_v61 }
 0x380   : > { %4525 = vst [vmem:[#allocation2 + $0x340] sm:$0xff] %v13010_v61  ;;  %4526 = vst [vmem:[#allocation2 + $0x358] sm:$0xff] %v13010_v61 }
 0x381   : > { %4527 = vst [vmem:[#allocation2 + $0x370] sm:$0xff] %v13010_v61  ;;  %4528 = vst [vmem:[#allocation2 + $0x388] sm:$0xff] %v13010_v61 }
 0x382   : > { %4529 = vst [vmem:[#allocation2 + $0x3a0] sm:$0xff] %v13010_v61  ;;  %4530 = vst [vmem:[#allocation2 + $0x3b8] sm:$0xff] %v13010_v61 }
 0x383   : > { %4531 = vst [vmem:[#allocation2 + $0x3d0] sm:$0xff] %v13010_v61  ;;  %4532 = vst [vmem:[#allocation2 + $0x3e8] sm:$0xff] %v13010_v61 }
 0x384   : > { %4533 = vst [vmem:[#allocation2 + $0x400] sm:$0xff] %v13010_v61  ;;  %4534 = vst [vmem:[#allocation2 + $0x418] sm:$0xff] %v13010_v61  ;;  %v3461_v61 = vmax.f32 %v3459_v56, %v3460_v19  ;;  %v14575_v56 = vmov 0.0   ;;  %v14591_v19 = vmov 0.0  }
 0x385   : > { %5085 = vst [vmem:[#allocation2 + $0x410] sm:$0xff] %v5021_v10  ;;  %v5011_v10 = vsel %vm4797_vm5, %v4343_v58, %v5010_v24 }
 0x386   : > { %v4901_v30 = vsel %vm4801_vm7, %v3461_v61, %v4900_v22  ;;  %v5012_v43 = vsel %vm4799_vm6, %v4350_v63, %v5011_v10 }
 0x387   : > { %v4902_v59 = vsel %vm4803_vm8, %v3468_v3, %v4901_v30  ;;  %v5013_v53 = vsel %vm4801_vm7, %v4357_v37, %v5012_v43 }
 0x388   : > { %5068 = vst [vmem:[#allocation2 + $0x1b8] sm:$0xff] %v4902_v59  ;;  %v5014_v8 = vsel %vm4803_vm8, %v4364_v39, %v5013_v53 }
 0x389   : > { %5084 = vst [vmem:[#allocation2 + $0x3f8] sm:$0xff] %v5014_v8 }
 0x38a LB: >> { %s5124_s15 = smul.u32 24, %s13007_s14  ;;  %s5091_s22 = sadd.s32 1, %s13007_s14   ;;  %s13007_s14 = sphi %s14595_s14, %s16460_s14   ;;  %v13003_v27 = vphi %v14593_v27, %v16459_v27   ;;  %v12999_v19 = vphi %v14591_v19, %v16458_v19   ;;  %v12995_v18 = vphi %v14589_v18, %v16457_v18   ;;  %v12991_v51 = vphi %v14587_v51, %v16456_v51   ;;  %v12987_v12 = vphi %v14585_v12, %v16455_v12   ;;  %v12983_v34 = vphi %v14583_v34, %v16454_v34   ;;  %v12979_v47 = vphi %v14581_v47, %v16453_v47   ;;  %v12975_v52 = vphi %v14579_v52, %v16452_v52   ;;  %v12971_v40 = vphi %v14577_v40, %v16451_v40   ;;  %v12967_v56 = vphi %v14575_v56, %v16450_v56   ;;  %v12963_v31 = vphi %v14573_v31, %v16449_v31   ;;  %v12959_v15 = vphi %v14571_v15, %v16448_v15   ;;  %v12955_v33 = vphi %v14569_v33, %v16447_v33   ;;  %v12951_v23 = vphi %v14567_v23, %v16446_v23   ;;  %v12947_v14 = vphi %v14565_v14, %v16445_v14   ;;  %v12943_v35 = vphi %v14563_v35, %v16444_v35   ;;  %v12939_v17 = vphi %v14561_v17, %v16443_v17   ;;  %v12935_v48 = vphi %v14559_v48, %v16442_v48   ;;  %v12931_v60 = vphi %v14557_v60, %v16441_v60   ;;  %v12927_v7 = vphi %v14555_v7, %v16440_v7   ;;  %v12923_v1 = vphi %v14553_v1, %v16439_v1   ;;  %v12919_v46 = vphi %v14551_v46, %v16438_v46   ;;  %v12915_v5 = vphi %v14549_v5, %v16437_v5   ;;  %v12911_v41 = vphi %v14547_v41, %v16436_v41   ;;  %v12907_v45 = vphi %v14545_v45, %v16435_v45   ;;  %v12903_v11 = vphi %v14543_v11, %v16434_v11   ;;  %v12899_v13 = vphi %v14541_v13, %v16433_v13   ;;  %v12895_v9 = vphi %v14539_v9, %v16432_v9   ;;  %v12891_v54 = vphi %v14537_v54, %v16431_v54   ;;  %v12887_v55 = vphi %v14535_v55, %v16429_v55   ;;  %v12883_v62 = vphi %v14533_v62, %v16427_v62   ;;  %v12879_v42 = vphi %v14531_v42, %v16426_v42  }
 0x38b   : >> { %s11140_s16 = smul.u32 576, %s13007_s14  ;;  %p15192_p4 = scmp.ge.s32.totalorder %s5091_s22, 9  }
 0x38c   : >> { %s14703_s21 = scalar_lea.vmem [#allocation2], %s5124_s15  ;;  %s16460_s14 = smov %s5091_s22 }
 0x38d   : >> { %s14701_s20 = scalar_lea.vmem %s16364_s4, %s11140_s16 }
 0x38e   : >> { %v12605_v49 = vld [vmem:[%s14701_s20] sm:$0xff]   ;;  %v12607_v61 = vld [vmem:[%s14701_s20 + $0x8] sm:$0xff]   ;;  %v12609_v57 = vld [vmem:[%s14701_s20 + $0x10] sm:$0xff]  }
 0x38f   : >> { %v12606_v28 = vld [vmem:[%s14701_s20 + $0x100] sm:$0xff]   ;;  %11488 = vmatprep.subr.bf16.mxu1 %v12605_v49  ;;  %v12608_v26 = vld [vmem:[%s14701_s20 + $0x108] sm:$0xff]   ;;  %v12610_v2 = vld [vmem:[%s14701_s20 + $0x110] sm:$0xff]  }
 0x390   : >> { %v5126_v21 = vld [vmem:[%s14703_s21 + $0x4] sm:$0xff]  ;;  %v5127_v16 = vld [vmem:[%s14703_s21 + $0x1c] sm:$0xff]  ;;  %11680 = vmatprep.subr.bf16.mxu0 %v12606_v28  ;;  %11489 = vmatpush3.bf16.msra.mxu1 %v12605_v49  ;;  %v12617_v29 = vld [vmem:[%s14701_s20 + $0x30] sm:$0xff]  }
 0x391   : >> { %v5158_v25 = vpack.c.bf16 %v5127_v16, %v5126_v21  ;;  %11681 = vmatpush3.bf16.msra.mxu0 %v12606_v28  ;;  %11490 = vmatprep.subr.bf16.mxu1 %v12607_v61  ;;  %v12611_v50 = vld [vmem:[%s14701_s20 + $0x18] sm:$0xff]   ;;  %v12613_v0 = vld [vmem:[%s14701_s20 + $0x20] sm:$0xff]   ;;  %v6362_v22 = vld [vmem:[%s14703_s21 + $0x8] sm:$0xff] }
 0x392   : >> { %11682 = vmatprep.subr.bf16.mxu0 %v12608_v26  ;;  %v12612_v20 = vld [vmem:[%s14701_s20 + $0x118] sm:$0xff]   ;;  %v12614_v3 = vld [vmem:[%s14701_s20 + $0x120] sm:$0xff]   ;;  %v12615_v30 = vld [vmem:[%s14701_s20 + $0x28] sm:$0xff]  }
 0x393   : >> { %11504 = vmatprep.mubr.bf16.mxu1 %v5158_v25  ;;  %v6363_v4 = vld [vmem:[%s14703_s21 + $0x20] sm:$0xff]  ;;  %v12616_v6 = vld [vmem:[%s14701_s20 + $0x128] sm:$0xff]   ;;  %v12618_v38 = vld [vmem:[%s14701_s20 + $0x130] sm:$0xff]  }
 0x394   : >> { %11491 = vmatpush3.bf16.msra.mxu1 %v12607_v61  ;;  %v6394_v59 = vpack.c.bf16 %v6363_v4, %v6362_v22  ;;  %v12619_v24 = vld [vmem:[%s14701_s20 + $0x38] sm:$0xff]   ;;  %v5129_v32 = vld [vmem:[%s14703_s21 + $0x4c] sm:$0xff]  ;;  %v12621_v63 = vld [vmem:[%s14701_s20 + $0x40] sm:$0xff]  }
 0x395   : >> { %11683 = vmatpush3.bf16.msra.mxu0 %v12608_v26  ;;  %11492 = vmatprep.subr.bf16.mxu1 %v12609_v57  ;;  %v12620_v58 = vld [vmem:[%s14701_s20 + $0x138] sm:$0xff]   ;;  %v6365_v37 = vld [vmem:[%s14703_s21 + $0x50] sm:$0xff]  ;;  %v12622_v39 = vld [vmem:[%s14701_s20 + $0x140] sm:$0xff]  }
 0x396   : >> { %11684 = vmatprep.subr.bf16.mxu0 %v12610_v2  ;;  %11696 = vmatprep.mubr.bf16.mxu0 %v6394_v59  ;;  %v5128_v36 = vld [vmem:[%s14703_s21 + $0x34] sm:$0xff]  ;;  %v5130_v43 = vld [vmem:[%s14703_s21 + $0x64] sm:$0xff]  ;;  %v5131_v53 = vld [vmem:[%s14703_s21 + $0x7c] sm:$0xff] }
 0x397   : >> { %v6364_v10 = vld [vmem:[%s14703_s21 + $0x38] sm:$0xff]  ;;  %v6366_v8 = vld [vmem:[%s14703_s21 + $0x68] sm:$0xff]  ;;  %v5159_v21 = vpack.c.bf16 %v5129_v32, %v5128_v36  ;;  %v6367_v16 = vld [vmem:[%s14703_s21 + $0x80] sm:$0xff]  ;;  %v5160_v28 = vpack.c.bf16 %v5131_v53, %v5130_v43 }
 0x398   : >> { %11493 = vmatpush3.bf16.msra.mxu1 %v12609_v57  ;;  %v6395_v49 = vpack.c.bf16 %v6365_v37, %v6364_v10  ;;  %v12623_v25 = vld [vmem:[%s14701_s20 + $0x148] sm:$0xff]   ;;  %v6396_v61 = vpack.c.bf16 %v6367_v16, %v6366_v8  ;;  %v5132_v26 = vld [vmem:[%s14703_s21 + $0x94] sm:$0xff]  ;;  %v5135_v22 = vld [vmem:[%s14703_s21 + $0xdc] sm:$0xff] }
 0x399   : >> { %11685 = vmatpush3.bf16.msra.mxu0 %v12610_v2  ;;  %11494 = vmatprep.subr.bf16.mxu1 %v12611_v50  ;;  %v5133_v57 = vld [vmem:[%s14703_s21 + $0xac] sm:$0xff]  ;;  %v5136_v36 = vld [vmem:[%s14703_s21 + $0xf4] sm:$0xff]  ;;  %v5139_v43 = vld [vmem:[%s14703_s21 + $0x13c] sm:$0xff] }
 0x39a   : >> { %11686 = vmatprep.subr.bf16.mxu0 %v12612_v20  ;;  %v12624_v2 = vld [vmem:[%s14701_s20 + $0x48] sm:$0xff]   ;;  %v5161_v59 = vpack.c.bf16 %v5133_v57, %v5132_v26  ;;  %v6372_v10 = vld [vmem:[%s14703_s21 + $0xf8] sm:$0xff]  ;;  %v6373_v37 = vld [vmem:[%s14703_s21 + $0x110] sm:$0xff] }
 0x39b   : >> { %v6370_v4 = vld [vmem:[%s14703_s21 + $0xc8] sm:$0xff]  ;;  %v12628_v53 = vld [vmem:[%s14701_s20 + $0x160] sm:$0xff]   ;;  %v5140_v57 = vld [vmem:[%s14703_s21 + $0x154] sm:$0xff] }
 0x39c   : >> { %11495 = vmatpush3.bf16.msra.mxu1 %v12611_v50  ;;  %v6368_v50 = vld [vmem:[%s14703_s21 + $0x98] sm:$0xff]  ;;  %v5137_v32 = vld [vmem:[%s14703_s21 + $0x10c] sm:$0xff] }
 0x39d   : >> { %11687 = vmatpush3.bf16.msra.mxu0 %v12612_v20  ;;  %11496 = vmatprep.subr.bf16.mxu1 %v12613_v0  ;;  %v6369_v20 = vld [vmem:[%s14703_s21 + $0xb0] sm:$0xff]  ;;  %v6374_v8 = vld [vmem:[%s14703_s21 + $0x128] sm:$0xff]  ;;  %v5163_v16 = vpack.c.bf16 %v5137_v32, %v5136_v36  ;;  %v12632_v36 = vld [vmem:[%s14701_s20 + $0x178] sm:$0xff]  }
 0x39e   : >> { %11688 = vmatprep.subr.bf16.mxu0 %v12614_v3  ;;  %v5144_v32 = vld [vmem:[%s14703_s21 + $0x274] sm:$0xff] }
 0x3a0   : >> { %11497 = vmatpush3.bf16.msra.mxu1 %v12613_v0  ;;  %v12625_v0 = vld [vmem:[%s14701_s20 + $0x150] sm:$0xff]  }
 0x3a1   : >> { %11689 = vmatpush3.bf16.msra.mxu0 %v12614_v3  ;;  %11498 = vmatprep.subr.bf16.mxu1 %v12615_v30  ;;  %v5134_v3 = vld [vmem:[%s14703_s21 + $0xc4] sm:$0xff] }
 0x3a2   : >> { %11690 = vmatprep.subr.bf16.mxu0 %v12616_v6 }
 0x3a4   : >> { %11499 = vmatpush3.bf16.msra.mxu1 %v12615_v30  ;;  %v12627_v30 = vld [vmem:[%s14701_s20 + $0x50] sm:$0xff]  }
 0x3a5   : >> { %11691 = vmatpush3.bf16.msra.mxu0 %v12616_v6  ;;  %11500 = vmatprep.subr.bf16.mxu1 %v12617_v29  ;;  %v6371_v6 = vld [vmem:[%s14703_s21 + $0xe0] sm:$0xff] }
 0x3a6   : >> { %11692 = vmatprep.subr.bf16.mxu0 %v12618_v38 }
 0x3a8   : >> { %11501 = vmatpush3.bf16.msra.mxu1 %v12617_v29  ;;  %v6397_v29 = vpack.c.bf16 %v6369_v20, %v6368_v50  ;;  %v12635_v50 = vld [vmem:[%s14701_s20 + $0x68] sm:$0xff]   ;;  %v6376_v20 = vld [vmem:[%s14703_s21 + $0x158] sm:$0xff] }
 0x3a9   : >> { %11693 = vmatpush3.bf16.msra.mxu0 %v12618_v38  ;;  %11502 = vmatprep.subr.bf16.mxu1 %v12619_v24  ;;  %v5162_v38 = vpack.c.bf16 %v5135_v22, %v5134_v3  ;;  %v12631_v3 = vld [vmem:[%s14701_s20 + $0x170] sm:$0xff]   ;;  %v5142_v22 = vld [vmem:[%s14703_s21 + $0x244] sm:$0xff] }
 0x3aa   : >> { %11694 = vmatprep.subr.bf16.mxu0 %v12620_v58 }
 0x3ac   : >> { %11503 = vmatpush3.bf16.msra.mxu1 %v12619_v24  ;;  %v6398_v24 = vpack.c.bf16 %v6371_v6, %v6370_v4  ;;  %v6671_v4 = vld [vmem:[%s14703_s21 + $0x9] sm:$0xff]  ;;  %v6672_v6 = vld [vmem:[%s14703_s21 + $0x21] sm:$0xff] }
 0x3ad   : >> { %11695 = vmatpush3.bf16.msra.mxu0 %v12620_v58  ;;  %11536 = vmatprep.subr.bf16.mxu1 %v12621_v63  ;;  %v12626_v58 = vld [vmem:[%s14701_s20 + $0x158] sm:$0xff]  }
 0x3ae   : >> { %11728 = vmatprep.subr.bf16.mxu0 %v12622_v39 }
 0x3af   : >> { %11505 = vmatmul.mubr.bf16.vlgmr.msra.gmra.mrb[0].mxu1 %v5159_v21  ;;  %v6375_v21 = vld [vmem:[%s14703_s21 + $0x140] sm:$0xff] }
 0x3b0   : >> { %11697 = vmatmul.mubr.bf16.vlgmr.msra.gmra.mrb[0].mxu0 %v6395_v49  ;;  %11537 = vmatpush3.bf16.msra.mxu1 %v12621_v63  ;;  %v12630_v63 = vld [vmem:[%s14701_s20 + $0x58] sm:$0xff]   ;;  %v12633_v49 = vld [vmem:[%s14701_s20 + $0x60] sm:$0xff]   ;;  %v6400_v26 = vpack.c.bf16 %v6375_v21, %v6374_v8  ;;  %v6675_v21 = vld [vmem:[%s14703_s21 + $0x69] sm:$0xff] }
 0x3b1   : >> { %11729 = vmatpush3.bf16.msra.mxu0 %v12622_v39  ;;  %11508 = vmatprep.mubr.bf16.mxu1 %v5160_v28  ;;  %v5138_v39 = vld [vmem:[%s14703_s21 + $0x124] sm:$0xff] }
 0x3b2   : >> { %11730 = vmatprep.subr.bf16.mxu0 %v12623_v25  ;;  %11700 = vmatprep.mubr.bf16.mxu0 %v6396_v61  ;;  %v5164_v28 = vpack.c.bf16 %v5139_v43, %v5138_v39  ;;  %v12629_v61 = vld [vmem:[%s14701_s20 + $0x168] sm:$0xff]   ;;  %v6674_v39 = vld [vmem:[%s14703_s21 + $0x51] sm:$0xff]  ;;  %v12634_v8 = vld [vmem:[%s14701_s20 + $0x180] sm:$0xff]  }
 0x3b3   : >> { %11538 = vmatprep.subr.bf16.mxu1 %v12624_v2  ;;  %v5146_v43 = vld [vmem:[%s14703_s21 + $0x2a4] sm:$0xff] }
 0x3b4   : >> { %11539 = vmatpush3.bf16.msra.mxu1 %v12624_v2  ;;  %v5141_v2 = vld [vmem:[%s14703_s21 + $0x16c] sm:$0xff] }
 0x3b5   : >> { %11731 = vmatpush3.bf16.msra.mxu0 %v12623_v25  ;;  %11540 = vmatprep.subr.bf16.mxu1 %v12627_v30  ;;  %v6399_v25 = vpack.c.bf16 %v6373_v37, %v6372_v10  ;;  %v12639_v10 = vld [vmem:[%s14701_s20 + $0x78] sm:$0xff]  }
 0x3b6   : >> { %11732 = vmatprep.subr.bf16.mxu0 %v12625_v0  ;;  %v6673_v37 = vld [vmem:[%s14703_s21 + $0x39] sm:$0xff] }
 0x3b7   : >> { %11509 = vmatmul.mubr.bf16.gmra.mrb[4].mxu1 %v5161_v59  ;;  %v5165_v59 = vpack.c.bf16 %v5141_v2, %v5140_v57  ;;  %v5148_v57 = vld [vmem:[%s14703_s21 + $0x2d4] sm:$0xff]  ;;  %v12636_v2 = vld [vmem:[%s14701_s20 + $0x188] sm:$0xff]  }
 0x3b8   : >> { %11701 = vmatmul.mubr.bf16.gmra.mrb[4].mxu0 %v6397_v29  ;;  %11512 = vmatprep.mubr.bf16.mxu1 %v5162_v38  ;;  %v12637_v29 = vld [vmem:[%s14701_s20 + $0x70] sm:$0xff]  }
 0x3b9   : >> { %11733 = vmatpush3.bf16.msra.mxu0 %v12625_v0  ;;  %11704 = vmatprep.mubr.bf16.mxu0 %v6398_v24  ;;  %v6377_v0 = vld [vmem:[%s14703_s21 + $0x170] sm:$0xff] }
 0x3ba   : >> { %11734 = vmatprep.subr.bf16.mxu0 %v12626_v58  ;;  %11541 = vmatpush3.bf16.msra.mxu1 %v12627_v30  ;;  %v5143_v30 = vld [vmem:[%s14703_s21 + $0x25c] sm:$0xff]  ;;  %v6401_v38 = vpack.c.bf16 %v6377_v0, %v6376_v20  ;;  %v6678_v0 = vld [vmem:[%s14703_s21 + $0xb1] sm:$0xff] }
 0x3bb   : >> { %11542 = vmatprep.subr.bf16.mxu1 %v12630_v63  ;;  %v5166_v24 = vpack.c.bf16 %v5143_v30, %v5142_v22  ;;  %v6677_v20 = vld [vmem:[%s14703_s21 + $0x99] sm:$0xff]  ;;  %v6679_v30 = vld [vmem:[%s14703_s21 + $0xc9] sm:$0xff] }
 0x3bc   : >> { %v5151_v22 = vld [vmem:[%s14703_s21 + $0x31c] sm:$0xff] }
 0x3bd   : >> { %11735 = vmatpush3.bf16.msra.mxu0 %v12626_v58  ;;  %v6703_v58 = vpack.c.bf16 %v6672_v6, %v6671_v4  ;;  %v6680_v4 = vld [vmem:[%s14703_s21 + $0xe1] sm:$0xff]  ;;  %v12638_v6 = vld [vmem:[%s14701_s20 + $0x190] sm:$0xff]  }
 0x3be   : >> { %11736 = vmatprep.subr.bf16.mxu0 %v12628_v53  ;;  %11543 = vmatpush3.bf16.msra.mxu1 %v12630_v63  ;;  %v5145_v63 = vld [vmem:[%s14703_s21 + $0x28c] sm:$0xff] }
 0x3bf   : >> { %11513 = vmatmul.mubr.bf16.gmra.mrb[8].mxu1 %v5163_v16  ;;  %11544 = vmatprep.subr.bf16.mxu1 %v12633_v49  ;;  %v6676_v16 = vld [vmem:[%s14703_s21 + $0x81] sm:$0xff] }
 0x3c0   : >> { %11705 = vmatmul.mubr.bf16.gmra.mrb[8].mxu0 %v6399_v25  ;;  %11516 = vmatprep.mubr.bf16.mxu1 %v5164_v28  ;;  %v14783_v25 = vld [vmem:[%s14701_s20 + $0x80] sm:$0xff]   ;;  %v6704_v28 = vpack.c.bf16 %v6674_v39, %v6673_v37 }
 0x3c1   : >> { %11737 = vmatpush3.bf16.msra.mxu0 %v12628_v53  ;;  %11708 = vmatprep.mubr.bf16.mxu0 %v6400_v26  ;;  %v5147_v53 = vld [vmem:[%s14703_s21 + $0x2bc] sm:$0xff]  ;;  %v6705_v26 = vpack.c.bf16 %v6676_v16, %v6675_v21  ;;  %v5154_v37 = vld [vmem:[%s14703_s21 + $0x364] sm:$0xff] }
 0x3c2   : >> { %11738 = vmatprep.subr.bf16.mxu0 %v12629_v61  ;;  %11545 = vmatpush3.bf16.msra.mxu1 %v12633_v49  ;;  %v5167_v49 = vpack.c.bf16 %v5145_v63, %v5144_v32  ;;  %v5153_v32 = vld [vmem:[%s14703_s21 + $0x34c] sm:$0xff]  ;;  %v6681_v63 = vld [vmem:[%s14703_s21 + $0xf9] sm:$0xff] }
 0x3c3   : >> { %11546 = vmatprep.subr.bf16.mxu1 %v12635_v50  ;;  %v5155_v39 = vld [vmem:[%s14703_s21 + $0x37c] sm:$0xff] }
 0x3c5   : >> { %11739 = vmatpush3.bf16.msra.mxu0 %v12629_v61  ;;  %v5168_v61 = vpack.c.bf16 %v5147_v53, %v5146_v43  ;;  %v6683_v43 = vld [vmem:[%s14703_s21 + $0x129] sm:$0xff]  ;;  %v6684_v53 = vld [vmem:[%s14703_s21 + $0x141] sm:$0xff] }
 0x3c6   : >> { %11740 = vmatprep.subr.bf16.mxu0 %v12631_v3  ;;  %11547 = vmatpush3.bf16.msra.mxu1 %v12635_v50  ;;  %v5149_v50 = vld [vmem:[%s14703_s21 + $0x2ec] sm:$0xff] }
 0x3c7   : >> { %11517 = vmatmul.mubr.bf16.gmra.mrb[12].mxu1 %v5165_v59  ;;  %11548 = vmatprep.subr.bf16.mxu1 %v12637_v29  ;;  %v5169_v59 = vpack.c.bf16 %v5149_v50, %v5148_v57  ;;  %v5157_v57 = vld [vmem:[%s14703_s21 + $0x3ac] sm:$0xff] }
 0x3c8   : >> { %11709 = vmatmul.mubr.bf16.gmra.mrb[12].mxu0 %v6401_v38  ;;  %11520 = vmatprep.mubr.bf16.mxu1 %v5166_v24  ;;  %v6707_v24 = vpack.c.bf16 %v6680_v4, %v6679_v30  ;;  %v6686_v50 = vld [vmem:[%s14703_s21 + $0x171] sm:$0xff] }
 0x3c9   : >> { %11741 = vmatpush3.bf16.msra.mxu0 %v12631_v3  ;;  %11744 = vmatprep.mubr.bf16.mxu0 %v6703_v58  ;;  %v5150_v3 = vld [vmem:[%s14703_s21 + $0x304] sm:$0xff]  ;;  %v5152_v58 = vld [vmem:[%s14703_s21 + $0x334] sm:$0xff] }
 0x3ca   : >> { %11742 = vmatprep.subr.bf16.mxu0 %v12632_v36  ;;  %11549 = vmatpush3.bf16.msra.mxu1 %v12637_v29  ;;  %v6706_v29 = vpack.c.bf16 %v6678_v0, %v6677_v20  ;;  %v5170_v38 = vpack.c.bf16 %v5151_v22, %v5150_v3  ;;  %v5171_v21 = vpack.c.bf16 %v5153_v32, %v5152_v58  ;;  %v5435_v20 = vld [vmem:[%s14703_s21 + $0x5] sm:$0xff]  ;;  %v5436_v0 = vld [vmem:[%s14703_s21 + $0x1d] sm:$0xff]  ;;  %v12646_v30 = vld [vmem:[%s14701_s20 + $0x1b0] sm:$0xff]  }
 0x3cb   : >> { %11550 = vmatprep.subr.bf16.mxu1 %v12639_v10  ;;  %v6687_v3 = vld [vmem:[%s14703_s21 + $0x249] sm:$0xff]  ;;  %v6688_v22 = vld [vmem:[%s14703_s21 + $0x261] sm:$0xff]  ;;  %v6690_v32 = vld [vmem:[%s14703_s21 + $0x291] sm:$0xff] }
 0x3cc   : >> { %v5438_v58 = vld [vmem:[%s14703_s21 + $0x4d] sm:$0xff] }
 0x3cd   : >> { %11743 = vmatpush3.bf16.msra.mxu0 %v12632_v36  ;;  %v12640_v36 = vld [vmem:[%s14701_s20 + $0x198] sm:$0xff]  }
 0x3ce   : >> { %11776 = vmatprep.subr.bf16.mxu0 %v12634_v8  ;;  %11551 = vmatpush3.bf16.msra.mxu1 %v12639_v10  ;;  %v6682_v10 = vld [vmem:[%s14703_s21 + $0x111] sm:$0xff] }
 0x3cf   : >> { %11521 = vmatmul.mubr.bf16.gmra.mrb[16].mxu1 %v5167_v49  ;;  %11584 = vmatprep.subr.bf16.mxu1 %v14783_v25  ;;  %v6708_v16 = vpack.c.bf16 %v6682_v10, %v6681_v63  ;;  %v5172_v49 = vpack.c.bf16 %v5155_v39, %v5154_v37  ;;  %v5439_v63 = vld [vmem:[%s14703_s21 + $0x65] sm:$0xff]  ;;  %v5440_v10 = vld [vmem:[%s14703_s21 + $0x7d] sm:$0xff] }
 0x3d0   : >> { %11745 = vmatmul.mubr.bf16.vlgmr.msra.gmra.mrb[0].mxu0 %v6704_v28  ;;  %11524 = vmatprep.mubr.bf16.mxu1 %v5168_v61  ;;  %v6709_v28 = vpack.c.bf16 %v6684_v53, %v6683_v43  ;;  %v12644_v61 = vld [vmem:[%s14701_s20 + $0x1a8] sm:$0xff]   ;;  %v14826_v43 = vld [vmem:[%s14701_s20 + $0x1c0] sm:$0xff]  }
 0x3d1   : >> { %11777 = vmatpush3.bf16.msra.mxu0 %v12634_v8  ;;  %11748 = vmatprep.mubr.bf16.mxu0 %v6705_v26  ;;  %v12642_v8 = vld [vmem:[%s14701_s20 + $0x1a0] sm:$0xff]   ;;  %v5156_v26 = vld [vmem:[%s14703_s21 + $0x394] sm:$0xff]  ;;  %v6691_v37 = vld [vmem:[%s14703_s21 + $0x2a9] sm:$0xff] }
 0x3d2   : >> { %11778 = vmatprep.subr.bf16.mxu0 %v12636_v2  ;;  %v5173_v4 = vpack.c.bf16 %v5157_v57, %v5156_v26  ;;  %v6692_v39 = vld [vmem:[%s14703_s21 + $0x2c1] sm:$0xff]  ;;  %v6693_v26 = vld [vmem:[%s14703_s21 + $0x2d9] sm:$0xff]  ;;  %v6694_v57 = vld [vmem:[%s14703_s21 + $0x2f1] sm:$0xff] }
 0x3d5   : >> { %11779 = vmatpush3.bf16.msra.mxu0 %v12636_v2  ;;  %v6685_v2 = vld [vmem:[%s14703_s21 + $0x159] sm:$0xff] }
 0x3d6   : >> { %11780 = vmatprep.subr.bf16.mxu0 %v12638_v6 }
 0x3d7   : >> { %11525 = vmatmul.mubr.bf16.gmra.mrb[20].mxu1 %v5169_v59  ;;  %v5467_v59 = vpack.c.bf16 %v5436_v0, %v5435_v20  ;;  %v12645_v20 = vld [vmem:[%s14701_s20 + $0x90] sm:$0xff]  }
 0x3d8   : >> { %11749 = vmatmul.mubr.bf16.gmra.mrb[4].mxu0 %v6706_v29  ;;  %11528 = vmatprep.mubr.bf16.mxu1 %v5170_v38  ;;  %v6711_v29 = vpack.c.bf16 %v6688_v22, %v6687_v3  ;;  %v5437_v38 = vld [vmem:[%s14703_s21 + $0x35] sm:$0xff]  ;;  %v6695_v0 = vld [vmem:[%s14703_s21 + $0x309] sm:$0xff]  ;;  %v6696_v3 = vld [vmem:[%s14703_s21 + $0x321] sm:$0xff] }
 0x3d9   : >> { %11752 = vmatprep.mubr.bf16.mxu0 %v6707_v24  ;;  %11781 = vmatpush3.bf16.msra.mxu0 %v12638_v6  ;;  %v6710_v6 = vpack.c.bf16 %v6686_v50, %v6685_v2  ;;  %v12648_v24 = vld [vmem:[%s14701_s20 + $0x1b8] sm:$0xff]   ;;  %v5468_v53 = vpack.c.bf16 %v5438_v58, %v5437_v38  ;;  %v5443_v2 = vld [vmem:[%s14703_s21 + $0xc5] sm:$0xff] }
 0x3da   : >> { %11782 = vmatprep.subr.bf16.mxu0 %v12640_v36  ;;  %v5444_v50 = vld [vmem:[%s14703_s21 + $0xdd] sm:$0xff]  ;;  %v5447_v58 = vld [vmem:[%s14703_s21 + $0x125] sm:$0xff] }
 0x3db   : >> { %v6697_v38 = vld [vmem:[%s14703_s21 + $0x339] sm:$0xff] }
 0x3dd   : >> { %11783 = vmatpush3.bf16.msra.mxu0 %v12640_v36  ;;  %v6689_v36 = vld [vmem:[%s14703_s21 + $0x279] sm:$0xff] }
 0x3de   : >> { %11784 = vmatprep.subr.bf16.mxu0 %v12642_v8 }
 0x3df   : >> { %11529 = vmatmul.mubr.bf16.gmra.mrb[24].mxu1 %v5171_v21  ;;  %v5469_v21 = vpack.c.bf16 %v5440_v10, %v5439_v63  ;;  %v6700_v63 = vld [vmem:[%s14703_s21 + $0x381] sm:$0xff] }
 0x3e0   : >> { %11753 = vmatmul.mubr.bf16.gmra.mrb[8].mxu0 %v6708_v16  ;;  %11532 = vmatprep.mubr.bf16.mxu1 %v5172_v49  ;;  %v6713_v16 = vpack.c.bf16 %v6692_v39, %v6691_v37  ;;  %v12643_v49 = vld [vmem:[%s14701_s20 + $0x88] sm:$0xff]   ;;  %v12649_v10 = vld [vmem:[%s14701_s20 + $0xa0] sm:$0xff]  }
 0x3e1   : >> { %11756 = vmatprep.mubr.bf16.mxu0 %v6709_v28  ;;  %11785 = vmatpush3.bf16.msra.mxu0 %v12642_v8  ;;  %v6712_v8 = vpack.c.bf16 %v6690_v32, %v6689_v36  ;;  %v5441_v28 = vld [vmem:[%s14703_s21 + $0x95] sm:$0xff]  ;;  %v5448_v36 = vld [vmem:[%s14703_s21 + $0x13d] sm:$0xff]  ;;  %v6699_v32 = vld [vmem:[%s14703_s21 + $0x369] sm:$0xff] }
 0x3e2   : >> { %11786 = vmatprep.subr.bf16.mxu0 %v12644_v61 }
 0x3e5   : >> { %11787 = vmatpush3.bf16.msra.mxu0 %v12644_v61  ;;  %v5442_v61 = vld [vmem:[%s14703_s21 + $0xad] sm:$0xff] }
 0x3e6   : >> { %11788 = vmatprep.subr.bf16.mxu0 %v12646_v30  ;;  %v5470_v22 = vpack.c.bf16 %v5442_v61, %v5441_v28  ;;  %v6701_v28 = vld [vmem:[%s14703_s21 + $0x399] sm:$0xff]  ;;  %v6702_v61 = vld [vmem:[%s14703_s21 + $0x3b1] sm:$0xff] }
 0x3e7   : >> { %11533 = vmatmul.mubr.bf16.gmra.mrb[28].mxu1 %v5173_v4  ;;  %v6715_v4 = vpack.c.bf16 %v6696_v3, %v6695_v0  ;;  %v6718_v3 = vpack.c.bf16 %v6702_v61, %v6701_v28  ;;  %v5459_v28 = vld [vmem:[%s14703_s21 + $0x305] sm:$0xff]  ;;  %v5460_v61 = vld [vmem:[%s14703_s21 + $0x31d] sm:$0xff] }
 0x3e8   : >> { %11757 = vmatmul.mubr.bf16.gmra.mrb[12].mxu0 %v6710_v6  ;;  %11552 = vmatprep.mubr.bf16.mxu1 %v5467_v59  ;;  %v12647_v6 = vld [vmem:[%s14701_s20 + $0x98] sm:$0xff]  }
 0x3e9   : >> { %11760 = vmatprep.mubr.bf16.mxu0 %v6711_v29  ;;  %11789 = vmatpush3.bf16.msra.mxu0 %v12646_v30  ;;  %v6714_v30 = vpack.c.bf16 %v6694_v57, %v6693_v26  ;;  %v5445_v59 = vld [vmem:[%s14703_s21 + $0xf5] sm:$0xff]  ;;  %v5446_v29 = vld [vmem:[%s14703_s21 + $0x10d] sm:$0xff]  ;;  %v5451_v26 = vld [vmem:[%s14703_s21 + $0x245] sm:$0xff] }
 0x3ea   : >> { %11790 = vmatprep.subr.bf16.mxu0 %v12648_v24  ;;  %v5472_v37 = vpack.c.bf16 %v5446_v29, %v5445_v59  ;;  %v5452_v57 = vld [vmem:[%s14703_s21 + $0x25d] sm:$0xff]  ;;  %v6983_v29 = vld [vmem:[%s14703_s21 + $0x52] sm:$0xff] }
 0x3eb   : >> { %v6982_v59 = vld [vmem:[%s14703_s21 + $0x3a] sm:$0xff] }
 0x3ed   : >> { %11791 = vmatpush3.bf16.msra.mxu0 %v12648_v24  ;;  %v6698_v24 = vld [vmem:[%s14703_s21 + $0x351] sm:$0xff] }
 0x3ee   : >> { %11824 = vmatprep.subr.bf16.mxu0 %v14826_v43  ;;  %v6716_v39 = vpack.c.bf16 %v6698_v24, %v6697_v38  ;;  %v5455_v38 = vld [vmem:[%s14703_s21 + $0x2a5] sm:$0xff]  ;;  %v5456_v24 = vld [vmem:[%s14703_s21 + $0x2bd] sm:$0xff] }
 0x3ef   : >> { %11553 = vmatmul.mubr.bf16.vlgmr.msra.gmra.mrb[0].mxu1 %v5468_v53  ;;  %v5473_v53 = vpack.c.bf16 %v5448_v36, %v5447_v58  ;;  %v6984_v58 = vld [vmem:[%s14703_s21 + $0x6a] sm:$0xff]  ;;  %v6985_v36 = vld [vmem:[%s14703_s21 + $0x82] sm:$0xff] }
 0x3f0   : >> { %11761 = vmatmul.mubr.bf16.gmra.mrb[16].mxu0 %v6712_v8  ;;  %11585 = vmatpush3.bf16.msra.mxu1 %v14783_v25  ;;  %v5471_v25 = vpack.c.bf16 %v5444_v50, %v5443_v2  ;;  %v6717_v8 = vpack.c.bf16 %v6700_v63, %v6699_v32  ;;  %v6980_v2 = vld [vmem:[%s14703_s21 + $0xa] sm:$0xff]  ;;  %v6981_v50 = vld [vmem:[%s14703_s21 + $0x22] sm:$0xff] }
 0x3f1   : >> { %11556 = vmatprep.mubr.bf16.mxu1 %v5469_v21  ;;  %11764 = vmatprep.mubr.bf16.mxu0 %v6713_v16  ;;  %v5449_v21 = vld [vmem:[%s14703_s21 + $0x155] sm:$0xff]  ;;  %v12651_v16 = vld [vmem:[%s14701_s20 + $0xa8] sm:$0xff]   ;;  %v14870_v32 = vld [vmem:[%s14701_s20 + $0xc0] sm:$0xff]  }
 0x3f2   : >> { %11586 = vmatprep.subr.bf16.mxu1 %v12643_v49 }
 0x3f4   : >> { %11587 = vmatpush3.bf16.msra.mxu1 %v12643_v49  ;;  %v5450_v49 = vld [vmem:[%s14703_s21 + $0x16d] sm:$0xff] }
 0x3f5   : >> { %11588 = vmatprep.subr.bf16.mxu1 %v12645_v20  ;;  %v5474_v0 = vpack.c.bf16 %v5450_v49, %v5449_v21  ;;  %v5458_v21 = vld [vmem:[%s14703_s21 + $0x2ed] sm:$0xff] }
 0x3f6   : >> { %v6987_v49 = vld [vmem:[%s14703_s21 + $0xb2] sm:$0xff] }
 0x3f7   : >> { %11557 = vmatmul.mubr.bf16.gmra.mrb[4].mxu1 %v5470_v22  ;;  %v5475_v22 = vpack.c.bf16 %v5452_v57, %v5451_v26  ;;  %v6988_v26 = vld [vmem:[%s14703_s21 + $0xca] sm:$0xff]  ;;  %v6989_v57 = vld [vmem:[%s14703_s21 + $0xe2] sm:$0xff] }
 0x3f8   : >> { %11765 = vmatmul.mubr.bf16.gmra.mrb[20].mxu0 %v6714_v30  ;;  %11560 = vmatprep.mubr.bf16.mxu1 %v5471_v25  ;;  %v7012_v30 = vpack.c.bf16 %v6981_v50, %v6980_v2  ;;  %v5453_v25 = vld [vmem:[%s14703_s21 + $0x275] sm:$0xff] }
 0x3f9   : >> { %11768 = vmatprep.mubr.bf16.mxu0 %v6715_v4  ;;  %11589 = vmatpush3.bf16.msra.mxu1 %v12645_v20  ;;  %v12653_v20 = vld [vmem:[%s14701_s20 + $0xb0] sm:$0xff]   ;;  %v12655_v4 = vld [vmem:[%s14701_s20 + $0xb8] sm:$0xff]  }
 0x3fa   : >> { %11590 = vmatprep.subr.bf16.mxu1 %v12647_v6  ;;  %v12654_v2 = vld [vmem:[%s14701_s20 + $0x1d0] sm:$0xff]  }
 0x3fd   : >> { %11591 = vmatpush3.bf16.msra.mxu1 %v12647_v6  ;;  %v5454_v6 = vld [vmem:[%s14703_s21 + $0x28d] sm:$0xff] }
 0x3fe   : >> { %11592 = vmatprep.subr.bf16.mxu1 %v12649_v10  ;;  %v5476_v63 = vpack.c.bf16 %v5454_v6, %v5453_v25  ;;  %v6990_v25 = vld [vmem:[%s14703_s21 + $0xfa] sm:$0xff]  ;;  %v5463_v6 = vld [vmem:[%s14703_s21 + $0x365] sm:$0xff] }
 0x3ff   : >> { %11561 = vmatmul.mubr.bf16.gmra.mrb[8].mxu1 %v5472_v37  ;;  %v5477_v37 = vpack.c.bf16 %v5456_v24, %v5455_v38  ;;  %v6993_v38 = vld [vmem:[%s14703_s21 + $0x142] sm:$0xff] }
 0x400   : >> { %11769 = vmatmul.mubr.bf16.gmra.mrb[24].mxu0 %v6716_v39  ;;  %11564 = vmatprep.mubr.bf16.mxu1 %v5473_v53  ;;  %v7014_v39 = vpack.c.bf16 %v6985_v36, %v6984_v58  ;;  %v12652_v53 = vld [vmem:[%s14701_s20 + $0x1c8] sm:$0xff]   ;;  %v12658_v24 = vld [vmem:[%s14701_s20 + $0x1e0] sm:$0xff]  }
 0x401   : >> { %11772 = vmatprep.mubr.bf16.mxu0 %v6717_v8  ;;  %11593 = vmatpush3.bf16.msra.mxu1 %v12649_v10  ;;  %v7013_v10 = vpack.c.bf16 %v6983_v29, %v6982_v59  ;;  %v5457_v8 = vld [vmem:[%s14703_s21 + $0x2d5] sm:$0xff]  ;;  %v5464_v59 = vld [vmem:[%s14703_s21 + $0x37d] sm:$0xff]  ;;  %v6992_v29 = vld [vmem:[%s14703_s21 + $0x12a] sm:$0xff] }
 0x402   : >> { %11594 = vmatprep.subr.bf16.mxu1 %v12651_v16  ;;  %v5478_v50 = vpack.c.bf16 %v5458_v21, %v5457_v8  ;;  %v6994_v8 = vld [vmem:[%s14703_s21 + $0x15a] sm:$0xff]  ;;  %v6995_v21 = vld [vmem:[%s14703_s21 + $0x172] sm:$0xff] }
 0x405   : >> { %11595 = vmatpush3.bf16.msra.mxu1 %v12651_v16  ;;  %v6986_v16 = vld [vmem:[%s14703_s21 + $0x9a] sm:$0xff] }
 0x406   : >> { %11596 = vmatprep.subr.bf16.mxu1 %v12653_v20 }
 0x407   : >> { %11565 = vmatmul.mubr.bf16.gmra.mrb[12].mxu1 %v5474_v0  ;;  %v5479_v0 = vpack.c.bf16 %v5460_v61, %v5459_v28  ;;  %v6996_v28 = vld [vmem:[%s14703_s21 + $0x24a] sm:$0xff]  ;;  %v6997_v61 = vld [vmem:[%s14703_s21 + $0x262] sm:$0xff] }
 0x408   : >> { %11773 = vmatmul.mubr.bf16.gmra.mrb[28].mxu0 %v6718_v3  ;;  %11568 = vmatprep.mubr.bf16.mxu1 %v5475_v22  ;;  %v12656_v3 = vld [vmem:[%s14701_s20 + $0x1d8] sm:$0xff]  }
 0x409   : >> { %11792 = vmatprep.mubr.bf16.mxu0 %v7012_v30  ;;  %11597 = vmatpush3.bf16.msra.mxu1 %v12653_v20  ;;  %v7015_v20 = vpack.c.bf16 %v6987_v49, %v6986_v16  ;;  %v5461_v22 = vld [vmem:[%s14703_s21 + $0x335] sm:$0xff]  ;;  %v5462_v30 = vld [vmem:[%s14703_s21 + $0x34d] sm:$0xff]  ;;  %v5745_v49 = vld [vmem:[%s14703_s21 + $0x1e] sm:$0xff] }
 0x40a   : >> { %11598 = vmatprep.subr.bf16.mxu1 %v12655_v4  ;;  %v5480_v58 = vpack.c.bf16 %v5462_v30, %v5461_v22  ;;  %v5744_v16 = vld [vmem:[%s14703_s21 + $0x6] sm:$0xff]  ;;  %v6998_v22 = vld [vmem:[%s14703_s21 + $0x27a] sm:$0xff]  ;;  %v6999_v30 = vld [vmem:[%s14703_s21 + $0x292] sm:$0xff] }
 0x40d   : >> { %11599 = vmatpush3.bf16.msra.mxu1 %v12655_v4  ;;  %v6991_v4 = vld [vmem:[%s14703_s21 + $0x112] sm:$0xff] }
 0x40e   : >> { %11632 = vmatprep.subr.bf16.mxu1 %v14870_v32  ;;  %v7017_v36 = vpack.c.bf16 %v6991_v4, %v6990_v25  ;;  %v5748_v25 = vld [vmem:[%s14703_s21 + $0x66] sm:$0xff]  ;;  %v5749_v4 = vld [vmem:[%s14703_s21 + $0x7e] sm:$0xff] }
 0x40f   : >> { %11569 = vmatmul.mubr.bf16.gmra.mrb[16].mxu1 %v5476_v63  ;;  %v5481_v63 = vpack.c.bf16 %v5464_v59, %v5463_v6  ;;  %v7000_v6 = vld [vmem:[%s14703_s21 + $0x2aa] sm:$0xff]  ;;  %v7001_v59 = vld [vmem:[%s14703_s21 + $0x2c2] sm:$0xff] }
 0x410   : >> { %11793 = vmatmul.mubr.bf16.vlgmr.msra.gmra.mrb[0].mxu0 %v7013_v10  ;;  %11572 = vmatprep.mubr.bf16.mxu1 %v5477_v37  ;;  %v7018_v10 = vpack.c.bf16 %v6993_v38, %v6992_v29  ;;  %v12660_v37 = vld [vmem:[%s14701_s20 + $0x1e8] sm:$0xff]   ;;  %v14914_v29 = vld [vmem:[%s14701_s20 + $0x200] sm:$0xff]  }
 0x411   : >> { %11825 = vmatpush3.bf16.msra.mxu0 %v14826_v43  ;;  %11796 = vmatprep.mubr.bf16.mxu0 %v7014_v39  ;;  %v7016_v43 = vpack.c.bf16 %v6989_v57, %v6988_v26  ;;  %v5465_v39 = vld [vmem:[%s14703_s21 + $0x395] sm:$0xff] }
 0x412   : >> { %11826 = vmatprep.subr.bf16.mxu0 %v12652_v53  ;;  %v12662_v26 = vld [vmem:[%s14701_s20 + $0x1f0] sm:$0xff]  }
 0x415   : >> { %11827 = vmatpush3.bf16.msra.mxu0 %v12652_v53  ;;  %v5466_v53 = vld [vmem:[%s14703_s21 + $0x3ad] sm:$0xff] }
 0x416   : >> { %11828 = vmatprep.subr.bf16.mxu0 %v12654_v2  ;;  %v5482_v57 = vpack.c.bf16 %v5466_v53, %v5465_v39  ;;  %v7002_v39 = vld [vmem:[%s14703_s21 + $0x2da] sm:$0xff]  ;;  %v7003_v53 = vld [vmem:[%s14703_s21 + $0x2f2] sm:$0xff] }
 0x417   : >> { %11573 = vmatmul.mubr.bf16.gmra.mrb[20].mxu1 %v5478_v50  ;;  %v5776_v50 = vpack.c.bf16 %v5745_v49, %v5744_v16  ;;  %v12661_v16 = vld [vmem:[%s14701_s20 + $0xd0] sm:$0xff]  }
 0x418   : >> { %11797 = vmatmul.mubr.bf16.gmra.mrb[4].mxu0 %v7015_v20  ;;  %11576 = vmatprep.mubr.bf16.mxu1 %v5479_v0  ;;  %v7020_v20 = vpack.c.bf16 %v6997_v61, %v6996_v28  ;;  %v12664_v0 = vld [vmem:[%s14701_s20 + $0x1f8] sm:$0xff]   ;;  %v7004_v49 = vld [vmem:[%s14703_s21 + $0x30a] sm:$0xff]  ;;  %v7005_v28 = vld [vmem:[%s14703_s21 + $0x322] sm:$0xff] }
 0x419   : >> { %11800 = vmatprep.mubr.bf16.mxu0 %v7016_v43  ;;  %11829 = vmatpush3.bf16.msra.mxu0 %v12654_v2  ;;  %v7019_v2 = vpack.c.bf16 %v6995_v21, %v6994_v8  ;;  %v5746_v43 = vld [vmem:[%s14703_s21 + $0x36] sm:$0xff]  ;;  %v5752_v8 = vld [vmem:[%s14703_s21 + $0xc6] sm:$0xff]  ;;  %v5753_v21 = vld [vmem:[%s14703_s21 + $0xde] sm:$0xff] }
 0x41a   : >> { %11830 = vmatprep.subr.bf16.mxu0 %v12656_v3 }
 0x41d   : >> { %11831 = vmatpush3.bf16.msra.mxu0 %v12656_v3  ;;  %v5747_v3 = vld [vmem:[%s14703_s21 + $0x4e] sm:$0xff] }
 0x41e   : >> { %11832 = vmatprep.subr.bf16.mxu0 %v12658_v24  ;;  %v5777_v38 = vpack.c.bf16 %v5747_v3, %v5746_v43  ;;  %v7007_v43 = vld [vmem:[%s14703_s21 + $0x352] sm:$0xff]  ;;  %v5756_v3 = vld [vmem:[%s14703_s21 + $0x126] sm:$0xff] }
 0x41f   : >> { %11577 = vmatmul.mubr.bf16.gmra.mrb[24].mxu1 %v5480_v58  ;;  %v5778_v58 = vpack.c.bf16 %v5749_v4, %v5748_v25  ;;  %v7009_v25 = vld [vmem:[%s14703_s21 + $0x382] sm:$0xff] }
 0x420   : >> { %11801 = vmatmul.mubr.bf16.gmra.mrb[8].mxu0 %v7017_v36  ;;  %11580 = vmatprep.mubr.bf16.mxu1 %v5481_v63  ;;  %v7022_v36 = vpack.c.bf16 %v7001_v59, %v7000_v6  ;;  %v12659_v63 = vld [vmem:[%s14701_s20 + $0xc8] sm:$0xff]   ;;  %v12665_v4 = vld [vmem:[%s14701_s20 + $0xe0] sm:$0xff]  }
 0x421   : >> { %11804 = vmatprep.mubr.bf16.mxu0 %v7018_v10  ;;  %11833 = vmatpush3.bf16.msra.mxu0 %v12658_v24  ;;  %v7021_v24 = vpack.c.bf16 %v6999_v30, %v6998_v22  ;;  %v5750_v10 = vld [vmem:[%s14703_s21 + $0x96] sm:$0xff]  ;;  %v5757_v22 = vld [vmem:[%s14703_s21 + $0x13e] sm:$0xff]  ;;  %v7008_v30 = vld [vmem:[%s14703_s21 + $0x36a] sm:$0xff] }
 0x422   : >> { %11834 = vmatprep.subr.bf16.mxu0 %v12660_v37 }
 0x425   : >> { %11835 = vmatpush3.bf16.msra.mxu0 %v12660_v37  ;;  %v5751_v37 = vld [vmem:[%s14703_s21 + $0xae] sm:$0xff] }
 0x426   : >> { %11836 = vmatprep.subr.bf16.mxu0 %v12662_v26  ;;  %v5779_v61 = vpack.c.bf16 %v5751_v37, %v5750_v10  ;;  %v7010_v10 = vld [vmem:[%s14703_s21 + $0x39a] sm:$0xff]  ;;  %v7011_v37 = vld [vmem:[%s14703_s21 + $0x3b2] sm:$0xff] }
 0x427   : >> { %11581 = vmatmul.mubr.bf16.gmra.mrb[28].mxu1 %v5482_v57  ;;  %v7024_v57 = vpack.c.bf16 %v7005_v28, %v7004_v49  ;;  %v7027_v28 = vpack.c.bf16 %v7011_v37, %v7010_v10  ;;  %v5768_v10 = vld [vmem:[%s14703_s21 + $0x306] sm:$0xff]  ;;  %v5769_v37 = vld [vmem:[%s14703_s21 + $0x31e] sm:$0xff] }
 0x428   : >> { %11805 = vmatmul.mubr.bf16.gmra.mrb[12].mxu0 %v7019_v2  ;;  %11600 = vmatprep.mubr.bf16.mxu1 %v5776_v50  ;;  %v12663_v2 = vld [vmem:[%s14701_s20 + $0xd8] sm:$0xff]  }
 0x429   : >> { %11808 = vmatprep.mubr.bf16.mxu0 %v7020_v20  ;;  %11837 = vmatpush3.bf16.msra.mxu0 %v12662_v26  ;;  %v7023_v26 = vpack.c.bf16 %v7003_v53, %v7002_v39  ;;  %v5754_v50 = vld [vmem:[%s14703_s21 + $0xf6] sm:$0xff]  ;;  %v5755_v20 = vld [vmem:[%s14703_s21 + $0x10e] sm:$0xff]  ;;  %v5760_v39 = vld [vmem:[%s14703_s21 + $0x246] sm:$0xff] }
 0x42a   : >> { %11838 = vmatprep.subr.bf16.mxu0 %v12664_v0  ;;  %v5781_v6 = vpack.c.bf16 %v5755_v20, %v5754_v50  ;;  %v5761_v53 = vld [vmem:[%s14703_s21 + $0x25e] sm:$0xff]  ;;  %v7292_v20 = vld [vmem:[%s14703_s21 + $0x53] sm:$0xff] }
 0x42b   : >> { %v7291_v50 = vld [vmem:[%s14703_s21 + $0x3b] sm:$0xff] }
 0x42d   : >> { %11839 = vmatpush3.bf16.msra.mxu0 %v12664_v0  ;;  %v7006_v0 = vld [vmem:[%s14703_s21 + $0x33a] sm:$0xff] }
 0x42e   : >> { %11872 = vmatprep.subr.bf16.mxu0 %v14914_v29  ;;  %v7025_v59 = vpack.c.bf16 %v7007_v43, %v7006_v0  ;;  %v5764_v0 = vld [vmem:[%s14703_s21 + $0x2a6] sm:$0xff]  ;;  %v5765_v43 = vld [vmem:[%s14703_s21 + $0x2be] sm:$0xff] }
 0x42f   : >> { %11601 = vmatmul.mubr.bf16.vlgmr.msra.gmra.mrb[0].mxu1 %v5777_v38  ;;  %v5782_v38 = vpack.c.bf16 %v5757_v22, %v5756_v3  ;;  %v7293_v3 = vld [vmem:[%s14703_s21 + $0x6b] sm:$0xff]  ;;  %v7294_v22 = vld [vmem:[%s14703_s21 + $0x83] sm:$0xff] }
 0x430   : >> { %11809 = vmatmul.mubr.bf16.gmra.mrb[16].mxu0 %v7021_v24  ;;  %11633 = vmatpush3.bf16.msra.mxu1 %v14870_v32  ;;  %v5780_v32 = vpack.c.bf16 %v5753_v21, %v5752_v8  ;;  %v7026_v24 = vpack.c.bf16 %v7009_v25, %v7008_v30  ;;  %v7289_v8 = vld [vmem:[%s14703_s21 + $0xb] sm:$0xff]  ;;  %v7290_v21 = vld [vmem:[%s14703_s21 + $0x23] sm:$0xff]  ;;  %v7322_v25 = vpack.c.bf16 %v7292_v20, %v7291_v50 }
 0x431   : >> { %11604 = vmatprep.mubr.bf16.mxu1 %v5778_v58  ;;  %11812 = vmatprep.mubr.bf16.mxu0 %v7022_v36  ;;  %v12667_v58 = vld [vmem:[%s14701_s20 + $0xe8] sm:$0xff]   ;;  %v5758_v36 = vld [vmem:[%s14703_s21 + $0x156] sm:$0xff]  ;;  %v5773_v50 = vld [vmem:[%s14703_s21 + $0x37e] sm:$0xff] }
 0x432   : >> { %11634 = vmatprep.subr.bf16.mxu1 %v12659_v63  ;;  %v7301_v20 = vld [vmem:[%s14703_s21 + $0x12b] sm:$0xff] }
 0x434   : >> { %11635 = vmatpush3.bf16.msra.mxu1 %v12659_v63  ;;  %v5759_v63 = vld [vmem:[%s14703_s21 + $0x16e] sm:$0xff] }
 0x435   : >> { %11636 = vmatprep.subr.bf16.mxu1 %v12661_v16  ;;  %v5783_v49 = vpack.c.bf16 %v5759_v63, %v5758_v36  ;;  %v7295_v36 = vld [vmem:[%s14703_s21 + $0x9b] sm:$0xff]  ;;  %v7296_v63 = vld [vmem:[%s14703_s21 + $0xb3] sm:$0xff] }
 0x437   : >> { %11605 = vmatmul.mubr.bf16.gmra.mrb[4].mxu1 %v5779_v61  ;;  %v5784_v61 = vpack.c.bf16 %v5761_v53, %v5760_v39  ;;  %v7297_v39 = vld [vmem:[%s14703_s21 + $0xcb] sm:$0xff]  ;;  %v7298_v53 = vld [vmem:[%s14703_s21 + $0xe3] sm:$0xff] }
 0x438   : >> { %11813 = vmatmul.mubr.bf16.gmra.mrb[20].mxu0 %v7023_v26  ;;  %11608 = vmatprep.mubr.bf16.mxu1 %v5780_v32  ;;  %v7321_v26 = vpack.c.bf16 %v7290_v21, %v7289_v8  ;;  %v12671_v32 = vld [vmem:[%s14701_s20 + $0xf8] sm:$0xff]   ;;  %v12670_v8 = vld [vmem:[%s14701_s20 + $0x210] sm:$0xff]  }
 0x439   : >> { %11816 = vmatprep.mubr.bf16.mxu0 %v7024_v57  ;;  %11637 = vmatpush3.bf16.msra.mxu1 %v12661_v16  ;;  %v12669_v16 = vld [vmem:[%s14701_s20 + $0xf0] sm:$0xff]  }
 0x43a   : >> { %11638 = vmatprep.subr.bf16.mxu1 %v12663_v2  ;;  %v5762_v57 = vld [vmem:[%s14703_s21 + $0x276] sm:$0xff] }
 0x43d   : >> { %11639 = vmatpush3.bf16.msra.mxu1 %v12663_v2  ;;  %v5763_v2 = vld [vmem:[%s14703_s21 + $0x28e] sm:$0xff] }
 0x43e   : >> { %11640 = vmatprep.subr.bf16.mxu1 %v12665_v4  ;;  %v5785_v30 = vpack.c.bf16 %v5763_v2, %v5762_v57  ;;  %v7300_v57 = vld [vmem:[%s14703_s21 + $0x113] sm:$0xff]  ;;  %v5772_v2 = vld [vmem:[%s14703_s21 + $0x366] sm:$0xff] }
 0x43f   : >> { %11609 = vmatmul.mubr.bf16.gmra.mrb[8].mxu1 %v5781_v6  ;;  %v7323_v6 = vpack.c.bf16 %v7294_v22, %v7293_v3 }
 0x440   : >> { %11817 = vmatmul.mubr.bf16.gmra.mrb[24].mxu0 %v7025_v59  ;;  %11612 = vmatprep.mubr.bf16.mxu1 %v5782_v38  ;;  %v12668_v59 = vld [vmem:[%s14701_s20 + $0x208] sm:$0xff]   ;;  %v14959_v38 = vld [vmem:[%s14701_s20 + $0x100] sm:$0xff]  }
 0x441   : >> { %11820 = vmatprep.mubr.bf16.mxu0 %v7026_v24  ;;  %11641 = vmatpush3.bf16.msra.mxu1 %v12665_v4  ;;  %v5786_v4 = vpack.c.bf16 %v5765_v43, %v5764_v0  ;;  %v5766_v24 = vld [vmem:[%s14703_s21 + $0x2d6] sm:$0xff]  ;;  %v7302_v0 = vld [vmem:[%s14703_s21 + $0x143] sm:$0xff] }
 0x442   : >> { %11642 = vmatprep.subr.bf16.mxu1 %v12667_v58  ;;  %v12673_v43 = vld [vmem:[%s14701_s20 + $0x220] sm:$0xff]  }
 0x445   : >> { %11643 = vmatpush3.bf16.msra.mxu1 %v12667_v58  ;;  %v5767_v58 = vld [vmem:[%s14703_s21 + $0x2ee] sm:$0xff] }
 0x446   : >> { %11644 = vmatprep.subr.bf16.mxu1 %v12669_v16  ;;  %v5787_v21 = vpack.c.bf16 %v5767_v58, %v5766_v24  ;;  %v7303_v24 = vld [vmem:[%s14703_s21 + $0x15b] sm:$0xff]  ;;  %v7304_v58 = vld [vmem:[%s14703_s21 + $0x173] sm:$0xff] }
 0x447   : >> { %11613 = vmatmul.mubr.bf16.gmra.mrb[12].mxu1 %v5783_v49  ;;  %v5788_v49 = vpack.c.bf16 %v5769_v37, %v5768_v10  ;;  %v7305_v10 = vld [vmem:[%s14703_s21 + $0x24b] sm:$0xff]  ;;  %v7306_v37 = vld [vmem:[%s14703_s21 + $0x263] sm:$0xff] }
 0x448   : >> { %11821 = vmatmul.mubr.bf16.gmra.mrb[28].mxu0 %v7027_v28  ;;  %11616 = vmatprep.mubr.bf16.mxu1 %v5784_v61  ;;  %v12672_v28 = vld [vmem:[%s14701_s20 + $0x218] sm:$0xff]  }
 0x449   : >> { %11840 = vmatprep.mubr.bf16.mxu0 %v7321_v26  ;;  %11645 = vmatpush3.bf16.msra.mxu1 %v12669_v16  ;;  %v7324_v16 = vpack.c.bf16 %v7296_v63, %v7295_v36  ;;  %v5770_v61 = vld [vmem:[%s14703_s21 + $0x336] sm:$0xff]  ;;  %v5771_v26 = vld [vmem:[%s14703_s21 + $0x34e] sm:$0xff]  ;;  %v6054_v63 = vld [vmem:[%s14703_s21 + $0x1f] sm:$0xff] }
 0x44a   : >> { %11646 = vmatprep.subr.bf16.mxu1 %v12671_v32  ;;  %v5789_v3 = vpack.c.bf16 %v5771_v26, %v5770_v61  ;;  %v6053_v36 = vld [vmem:[%s14703_s21 + $0x7] sm:$0xff]  ;;  %v7307_v61 = vld [vmem:[%s14703_s21 + $0x27b] sm:$0xff]  ;;  %v7308_v26 = vld [vmem:[%s14703_s21 + $0x293] sm:$0xff] }
 0x44d   : >> { %11647 = vmatpush3.bf16.msra.mxu1 %v12671_v32  ;;  %v7299_v32 = vld [vmem:[%s14703_s21 + $0xfb] sm:$0xff] }
 0x44e   : >> { %11986 = vmatprep.subr.bf16.mxu1 %v14959_v38  ;;  %v7326_v22 = vpack.c.bf16 %v7300_v57, %v7299_v32  ;;  %v6057_v32 = vld [vmem:[%s14703_s21 + $0x67] sm:$0xff]  ;;  %v6058_v57 = vld [vmem:[%s14703_s21 + $0x7f] sm:$0xff] }
 0x44f   : >> { %11617 = vmatmul.mubr.bf16.gmra.mrb[16].mxu1 %v5785_v30  ;;  %v5790_v30 = vpack.c.bf16 %v5773_v50, %v5772_v2  ;;  %v7309_v2 = vld [vmem:[%s14703_s21 + $0x2ab] sm:$0xff]  ;;  %v7310_v50 = vld [vmem:[%s14703_s21 + $0x2c3] sm:$0xff] }
 0x450   : >> { %11841 = vmatmul.mubr.bf16.vlgmr.msra.gmra.mrb[0].mxu0 %v7322_v25  ;;  %11620 = vmatprep.mubr.bf16.mxu1 %v5786_v4  ;;  %v7327_v25 = vpack.c.bf16 %v7302_v0, %v7301_v20  ;;  %v12674_v4 = vld [vmem:[%s14701_s20 + $0x228] sm:$0xff]   ;;  %v7330_v0 = vpack.c.bf16 %v7308_v26, %v7307_v61  ;;  %v12680_v26 = vld [vmem:[%s14701_s20 + $0x118] sm:$0xff]  }
 0x451   : >> { %11873 = vmatpush3.bf16.msra.mxu0 %v14914_v29  ;;  %11844 = vmatprep.mubr.bf16.mxu0 %v7323_v6  ;;  %v7325_v29 = vpack.c.bf16 %v7298_v53, %v7297_v39  ;;  %v5774_v6 = vld [vmem:[%s14703_s21 + $0x396] sm:$0xff]  ;;  %v7318_v61 = vld [vmem:[%s14703_s21 + $0x383] sm:$0xff] }
 0x452   : >> { %11874 = vmatprep.subr.bf16.mxu0 %v12668_v59  ;;  %v12675_v39 = vld [vmem:[%s14701_s20 + $0x230] sm:$0xff]  }
 0x455   : >> { %11875 = vmatpush3.bf16.msra.mxu0 %v12668_v59  ;;  %v5775_v59 = vld [vmem:[%s14703_s21 + $0x3ae] sm:$0xff] }
 0x456   : >> { %11876 = vmatprep.subr.bf16.mxu0 %v12670_v8  ;;  %v5791_v53 = vpack.c.bf16 %v5775_v59, %v5774_v6  ;;  %v6061_v6 = vld [vmem:[%s14703_s21 + $0xc7] sm:$0xff]  ;;  %v6062_v59 = vld [vmem:[%s14703_s21 + $0xdf] sm:$0xff] }
 0x457   : >> { %11621 = vmatmul.mubr.bf16.gmra.mrb[20].mxu1 %v5787_v21  ;;  %v6085_v21 = vpack.c.bf16 %v6054_v63, %v6053_v36  ;;  %v7314_v36 = vld [vmem:[%s14703_s21 + $0x323] sm:$0xff] }
 0x458   : >> { %11845 = vmatmul.mubr.bf16.gmra.mrb[4].mxu0 %v7324_v16  ;;  %11624 = vmatprep.mubr.bf16.mxu1 %v5788_v49  ;;  %v7329_v16 = vpack.c.bf16 %v7306_v37, %v7305_v10  ;;  %v12676_v49 = vld [vmem:[%s14701_s20 + $0x238] sm:$0xff]   ;;  %v6089_v10 = vpack.c.bf16 %v6062_v59, %v6061_v6  ;;  %v7599_v6 = vld [vmem:[%s14703_s21 + $0x24] sm:$0xff] }
 0x459   : >> { %11848 = vmatprep.mubr.bf16.mxu0 %v7325_v29  ;;  %11877 = vmatpush3.bf16.msra.mxu0 %v12670_v8  ;;  %v7328_v8 = vpack.c.bf16 %v7304_v58, %v7303_v24  ;;  %v6055_v29 = vld [vmem:[%s14703_s21 + $0x37] sm:$0xff]  ;;  %v12678_v24 = vld [vmem:[%s14701_s20 + $0x108] sm:$0xff]  }
 0x45a   : >> { %11878 = vmatprep.subr.bf16.mxu0 %v12672_v28  ;;  %v7313_v58 = vld [vmem:[%s14703_s21 + $0x30b] sm:$0xff] }
 0x45b   : >> { %v7333_v37 = vpack.c.bf16 %v7314_v36, %v7313_v58  ;;  %v12682_v59 = vld [vmem:[%s14701_s20 + $0x128] sm:$0xff]  }
 0x45d   : >> { %11879 = vmatpush3.bf16.msra.mxu0 %v12672_v28  ;;  %v6056_v28 = vld [vmem:[%s14703_s21 + $0x4f] sm:$0xff] }
 0x45e   : >> { %11880 = vmatprep.subr.bf16.mxu0 %v12673_v43  ;;  %v6086_v20 = vpack.c.bf16 %v6056_v28, %v6055_v29  ;;  %v6066_v29 = vld [vmem:[%s14703_s21 + $0x13f] sm:$0xff]  ;;  %v7317_v28 = vld [vmem:[%s14703_s21 + $0x36b] sm:$0xff] }
 0x45f   : >> { %11625 = vmatmul.mubr.bf16.gmra.mrb[24].mxu1 %v5789_v3  ;;  %v7331_v3 = vpack.c.bf16 %v7310_v50, %v7309_v2  ;;  %v7335_v50 = vpack.c.bf16 %v7318_v61, %v7317_v28 }
 0x460   : >> { %11849 = vmatmul.mubr.bf16.gmra.mrb[8].mxu0 %v7326_v22  ;;  %11628 = vmatprep.mubr.bf16.mxu1 %v5790_v30  ;;  %v6059_v22 = vld [vmem:[%s14703_s21 + $0x97] sm:$0xff]  ;;  %v6060_v30 = vld [vmem:[%s14703_s21 + $0xaf] sm:$0xff] }
 0x461   : >> { %11852 = vmatprep.mubr.bf16.mxu0 %v7327_v25  ;;  %11881 = vmatpush3.bf16.msra.mxu0 %v12673_v43  ;;  %v6087_v43 = vpack.c.bf16 %v6058_v57, %v6057_v32  ;;  %v7311_v25 = vld [vmem:[%s14703_s21 + $0x2db] sm:$0xff]  ;;  %v6088_v63 = vpack.c.bf16 %v6060_v30, %v6059_v22  ;;  %v7320_v22 = vld [vmem:[%s14703_s21 + $0x3b3] sm:$0xff]  ;;  %v6069_v30 = vld [vmem:[%s14703_s21 + $0x247] sm:$0xff] }
 0x462   : >> { %11882 = vmatprep.subr.bf16.mxu0 %v12674_v4 }
 0x465   : >> { %11883 = vmatpush3.bf16.msra.mxu0 %v12674_v4  ;;  %v7312_v4 = vld [vmem:[%s14703_s21 + $0x2f3] sm:$0xff] }
 0x466   : >> { %11884 = vmatprep.subr.bf16.mxu0 %v12675_v39 }
 0x467   : >> { %11629 = vmatmul.mubr.bf16.gmra.mrb[28].mxu1 %v5791_v53  ;;  %v6063_v53 = vld [vmem:[%s14703_s21 + $0xf7] sm:$0xff] }
 0x468   : >> { %11853 = vmatmul.mubr.bf16.gmra.mrb[12].mxu0 %v7328_v8  ;;  %11648 = vmatprep.mubr.bf16.mxu1 %v6085_v21  ;;  %v6064_v8 = vld [vmem:[%s14703_s21 + $0x10f] sm:$0xff]  ;;  %v7315_v21 = vld [vmem:[%s14703_s21 + $0x33b] sm:$0xff] }
 0x469   : >> { %11856 = vmatprep.mubr.bf16.mxu0 %v7329_v16  ;;  %11885 = vmatpush3.bf16.msra.mxu0 %v12675_v39  ;;  %v12679_v39 = vld [vmem:[%s14701_s20 + $0x110] sm:$0xff]   ;;  %v6090_v32 = vpack.c.bf16 %v6064_v8, %v6063_v53  ;;  %v6073_v8 = vld [vmem:[%s14703_s21 + $0x2a7] sm:$0xff] }
 0x46a   : >> { %11886 = vmatprep.subr.bf16.mxu0 %v12676_v49  ;;  %v7316_v16 = vld [vmem:[%s14703_s21 + $0x353] sm:$0xff] }
 0x46b   : >> { %v7334_v57 = vpack.c.bf16 %v7316_v16, %v7315_v21  ;;  %v7601_v53 = vld [vmem:[%s14703_s21 + $0x54] sm:$0xff]  ;;  %v6074_v21 = vld [vmem:[%s14703_s21 + $0x2bf] sm:$0xff]  ;;  %v7602_v16 = vld [vmem:[%s14703_s21 + $0x6c] sm:$0xff] }
 0x46d   : >> { %11887 = vmatpush3.bf16.msra.mxu0 %v12676_v49  ;;  %v6065_v49 = vld [vmem:[%s14703_s21 + $0x127] sm:$0xff] }
 0x46e   : >> { %v6091_v2 = vpack.c.bf16 %v6066_v29, %v6065_v49  ;;  %v7603_v49 = vld [vmem:[%s14703_s21 + $0x84] sm:$0xff]  ;;  %v12684_v29 = vld [vmem:[%s14701_s20 + $0x138] sm:$0xff]  }
 0x46f   : >> { %11649 = vmatmul.mubr.bf16.vlgmr.msra.gmra.mrb[0].mxu1 %v6086_v20  ;;  %v12681_v20 = vld [vmem:[%s14701_s20 + $0x120] sm:$0xff]  }
 0x470   : >> { %11857 = vmatmul.mubr.bf16.gmra.mrb[16].mxu0 %v7330_v0  ;;  %11994 = vmatpush3.bf16.msra.mxu1 %v14959_v38  ;;  %v7332_v38 = vpack.c.bf16 %v7312_v4, %v7311_v25  ;;  %v6067_v0 = vld [vmem:[%s14703_s21 + $0x157] sm:$0xff]  ;;  %v6070_v25 = vld [vmem:[%s14703_s21 + $0x25f] sm:$0xff]  ;;  %v7598_v4 = vld [vmem:[%s14703_s21 + $0xc] sm:$0xff] }
 0x471   : >> { %11652 = vmatprep.mubr.bf16.mxu1 %v6087_v43  ;;  %11860 = vmatprep.mubr.bf16.mxu0 %v7331_v3  ;;  %v6068_v43 = vld [vmem:[%s14703_s21 + $0x16f] sm:$0xff]  ;;  %v7319_v3 = vld [vmem:[%s14703_s21 + $0x39b] sm:$0xff]  ;;  %v6093_v36 = vpack.c.bf16 %v6070_v25, %v6069_v30 }
 0x472   : >> { %11987 = vmatprep.subr.bf16.mxu1 %v12678_v24  ;;  %v7336_v58 = vpack.c.bf16 %v7320_v22, %v7319_v3  ;;  %v7606_v3 = vld [vmem:[%s14703_s21 + $0xcc] sm:$0xff]  ;;  %v7607_v22 = vld [vmem:[%s14703_s21 + $0xe4] sm:$0xff] }
 0x474   : >> { %11995 = vmatpush3.bf16.msra.mxu1 %v12678_v24  ;;  %v6092_v24 = vpack.c.bf16 %v6068_v43, %v6067_v0  ;;  %v6077_v0 = vld [vmem:[%s14703_s21 + $0x307] sm:$0xff]  ;;  %v6078_v43 = vld [vmem:[%s14703_s21 + $0x31f] sm:$0xff] }
 0x475   : >> { %11988 = vmatprep.subr.bf16.mxu1 %v12679_v39 }
 0x477   : >> { %11653 = vmatmul.mubr.bf16.gmra.mrb[4].mxu1 %v6088_v63  ;;  %v7630_v63 = vpack.c.bf16 %v7599_v6, %v7598_v4  ;;  %v6097_v4 = vpack.c.bf16 %v6078_v43, %v6077_v0  ;;  %v7634_v6 = vpack.c.bf16 %v7607_v22, %v7606_v3  ;;  %v6380_v43 = vld [vmem:[%s14703_s21 + $0x278] sm:$0xff]  ;;  %v6381_v3 = vld [vmem:[%s14703_s21 + $0x290] sm:$0xff] }
 0x478   : >> { %11861 = vmatmul.mubr.bf16.gmra.mrb[20].mxu0 %v7332_v38  ;;  %11656 = vmatprep.mubr.bf16.mxu1 %v6089_v10  ;;  %v12683_v38 = vld [vmem:[%s14701_s20 + $0x130] sm:$0xff]   ;;  %v7616_v22 = vld [vmem:[%s14703_s21 + $0x27c] sm:$0xff] }
 0x479   : >> { %11864 = vmatprep.mubr.bf16.mxu0 %v7333_v37  ;;  %11996 = vmatpush3.bf16.msra.mxu1 %v12679_v39  ;;  %v6071_v10 = vld [vmem:[%s14703_s21 + $0x277] sm:$0xff]  ;;  %v6072_v37 = vld [vmem:[%s14703_s21 + $0x28f] sm:$0xff] }
 0x47a   : >> { %11989 = vmatprep.subr.bf16.mxu1 %v12680_v26  ;;  %v7600_v39 = vld [vmem:[%s14703_s21 + $0x3c] sm:$0xff]  ;;  %v6094_v28 = vpack.c.bf16 %v6072_v37, %v6071_v10  ;;  %v7610_v10 = vld [vmem:[%s14703_s21 + $0x12c] sm:$0xff]  ;;  %v7611_v37 = vld [vmem:[%s14703_s21 + $0x144] sm:$0xff] }
 0x47b   : >> { %v7631_v61 = vpack.c.bf16 %v7601_v53, %v7600_v39 }
 0x47d   : >> { %11997 = vmatpush3.bf16.msra.mxu1 %v12680_v26  ;;  %v6095_v26 = vpack.c.bf16 %v6074_v21, %v6073_v8  ;;  %v7636_v21 = vpack.c.bf16 %v7611_v37, %v7610_v10  ;;  %v6385_v10 = vld [vmem:[%s14703_s21 + $0x2f0] sm:$0xff]  ;;  %v7620_v37 = vld [vmem:[%s14703_s21 + $0x2dc] sm:$0xff] }
 0x47e   : >> { %11990 = vmatprep.subr.bf16.mxu1 %v12681_v20 }
 0x47f   : >> { %11657 = vmatmul.mubr.bf16.gmra.mrb[8].mxu1 %v6090_v32  ;;  %v7632_v32 = vpack.c.bf16 %v7603_v49, %v7602_v16  ;;  %v6083_v16 = vld [vmem:[%s14703_s21 + $0x397] sm:$0xff]  ;;  %v6084_v49 = vld [vmem:[%s14703_s21 + $0x3af] sm:$0xff] }
 0x480   : >> { %11865 = vmatmul.mubr.bf16.gmra.mrb[24].mxu0 %v7334_v57  ;;  %11660 = vmatprep.mubr.bf16.mxu1 %v6091_v2  ;;  %v6075_v57 = vld [vmem:[%s14703_s21 + $0x2d7] sm:$0xff]  ;;  %v6076_v2 = vld [vmem:[%s14703_s21 + $0x2ef] sm:$0xff] }
 0x481   : >> { %11868 = vmatprep.mubr.bf16.mxu0 %v7335_v50  ;;  %11998 = vmatpush3.bf16.msra.mxu1 %v12681_v20  ;;  %v7604_v50 = vld [vmem:[%s14703_s21 + $0x9c] sm:$0xff]  ;;  %v7605_v20 = vld [vmem:[%s14703_s21 + $0xb4] sm:$0xff]  ;;  %v6096_v30 = vpack.c.bf16 %v6076_v2, %v6075_v57  ;;  %v7615_v57 = vld [vmem:[%s14703_s21 + $0x264] sm:$0xff]  ;;  %v6100_v2 = vpack.c.bf16 %v6084_v49, %v6083_v16 }
 0x482   : >> { %11991 = vmatprep.subr.bf16.mxu1 %v12682_v59  ;;  %v7633_v25 = vpack.c.bf16 %v7605_v20, %v7604_v50  ;;  %v7623_v16 = vld [vmem:[%s14703_s21 + $0x324] sm:$0xff] }
 0x485   : >> { %11999 = vmatpush3.bf16.msra.mxu1 %v12682_v59  ;;  %v6079_v59 = vld [vmem:[%s14703_s21 + $0x337] sm:$0xff] }
 0x486   : >> { %11992 = vmatprep.subr.bf16.mxu1 %v12683_v38 }
 0x487   : >> { %11661 = vmatmul.mubr.bf16.gmra.mrb[12].mxu1 %v6092_v24  ;;  %v6080_v24 = vld [vmem:[%s14703_s21 + $0x34f] sm:$0xff] }
 0x488   : >> { %11869 = vmatmul.mubr.bf16.gmra.mrb[28].mxu0 %v7336_v58  ;;  %11664 = vmatprep.mubr.bf16.mxu1 %v6093_v36  ;;  %v7608_v58 = vld [vmem:[%s14703_s21 + $0xfc] sm:$0xff]  ;;  %v7609_v36 = vld [vmem:[%s14703_s21 + $0x114] sm:$0xff]  ;;  %v6098_v39 = vpack.c.bf16 %v6080_v24, %v6079_v59  ;;  %v7619_v59 = vld [vmem:[%s14703_s21 + $0x2c4] sm:$0xff]  ;;  %v6403_v24 = vpack.c.bf16 %v6381_v3, %v6380_v43 }
 0x489   : >> { %11888 = vmatprep.mubr.bf16.mxu0 %v7630_v63  ;;  %12000 = vmatpush3.bf16.msra.mxu1 %v12683_v38  ;;  %v6081_v63 = vld [vmem:[%s14703_s21 + $0x367] sm:$0xff]  ;;  %v6082_v38 = vld [vmem:[%s14703_s21 + $0x37f] sm:$0xff]  ;;  %v7635_v53 = vpack.c.bf16 %v7609_v36, %v7608_v58 }
 0x48a   : >> { %11993 = vmatprep.subr.bf16.mxu1 %v12684_v29  ;;  %v6099_v8 = vpack.c.bf16 %v6082_v38, %v6081_v63  ;;  %v6384_v38 = vld [vmem:[%s14703_s21 + $0x2d8] sm:$0xff]  ;;  %v7627_v43 = vld [vmem:[%s14703_s21 + $0x384] sm:$0xff] }
 0x48b   : >> { %v6405_v49 = vpack.c.bf16 %v6385_v10, %v6384_v38 }
 0x48d   : >> { %12001 = vmatpush3.bf16.msra.mxu1 %v12684_v29  ;;  %v7612_v29 = vld [vmem:[%s14703_s21 + $0x15c] sm:$0xff] }
 0x48f   : >> { %11665 = vmatmul.mubr.bf16.gmra.mrb[16].mxu1 %v6094_v28  ;;  %v7613_v28 = vld [vmem:[%s14703_s21 + $0x174] sm:$0xff] }
 0x490   : >> { %11889 = vmatmul.mubr.bf16.vlgmr.msra.gmra.mrb[0].mxu0 %v7631_v61  ;;  %11668 = vmatprep.mubr.bf16.mxu1 %v6095_v26  ;;  %v6378_v61 = vld [vmem:[%s14703_s21 + $0x248] sm:$0xff]  ;;  %v6379_v26 = vld [vmem:[%s14703_s21 + $0x260] sm:$0xff]  ;;  %v7637_v50 = vpack.c.bf16 %v7613_v28, %v7612_v29 }
 0x491   : >> { %11892 = vmatprep.mubr.bf16.mxu0 %v7632_v32  ;;  %v7614_v32 = vld [vmem:[%s14703_s21 + $0x24c] sm:$0xff]  ;;  %v6402_v20 = vpack.c.bf16 %v6379_v26, %v6378_v61  ;;  %v6388_v26 = vld [vmem:[%s14703_s21 + $0x338] sm:$0xff] }
 0x492   : >> { %v7638_v0 = vpack.c.bf16 %v7615_v57, %v7614_v32  ;;  %v6389_v32 = vld [vmem:[%s14703_s21 + $0x350] sm:$0xff]  ;;  %v7624_v57 = vld [vmem:[%s14703_s21 + $0x33c] sm:$0xff] }
 0x493   : >> { %v6407_v3 = vpack.c.bf16 %v6389_v32, %v6388_v26 }
 0x497   : >> { %11669 = vmatmul.mubr.bf16.gmra.mrb[20].mxu1 %v6096_v30  ;;  %v7617_v30 = vld [vmem:[%s14703_s21 + $0x294] sm:$0xff] }
 0x498   : >> { %11893 = vmatmul.mubr.bf16.gmra.mrb[4].mxu0 %v7633_v25  ;;  %11672 = vmatprep.mubr.bf16.mxu1 %v6097_v4  ;;  %v6382_v25 = vld [vmem:[%s14703_s21 + $0x2a8] sm:$0xff]  ;;  %v6383_v4 = vld [vmem:[%s14703_s21 + $0x2c0] sm:$0xff]  ;;  %v7639_v58 = vpack.c.bf16 %v7617_v30, %v7616_v22 }
 0x499   : >> { %11896 = vmatprep.mubr.bf16.mxu0 %v7634_v6  ;;  %v7618_v6 = vld [vmem:[%s14703_s21 + $0x2ac] sm:$0xff]  ;;  %v6404_v36 = vpack.c.bf16 %v6383_v4, %v6382_v25  ;;  %v6392_v4 = vld [vmem:[%s14703_s21 + $0x398] sm:$0xff] }
 0x49a   : >> { %v7640_v63 = vpack.c.bf16 %v7619_v59, %v7618_v6  ;;  %v6393_v6 = vld [vmem:[%s14703_s21 + $0x3b0] sm:$0xff]  ;;  %v7628_v59 = vld [vmem:[%s14703_s21 + $0x39c] sm:$0xff] }
 0x49f   : >> { %11673 = vmatmul.mubr.bf16.gmra.mrb[24].mxu1 %v6098_v39  ;;  %v7621_v39 = vld [vmem:[%s14703_s21 + $0x2f4] sm:$0xff] }
 0x4a0   : >> { %11897 = vmatmul.mubr.bf16.gmra.mrb[8].mxu0 %v7635_v53  ;;  %11676 = vmatprep.mubr.bf16.mxu1 %v6099_v8  ;;  %v6386_v53 = vld [vmem:[%s14703_s21 + $0x308] sm:$0xff]  ;;  %v6387_v8 = vld [vmem:[%s14703_s21 + $0x320] sm:$0xff]  ;;  %v7641_v29 = vpack.c.bf16 %v7621_v39, %v7620_v37 }
 0x4a1   : >> { %11900 = vmatprep.mubr.bf16.mxu0 %v7636_v21  ;;  %v7622_v21 = vld [vmem:[%s14703_s21 + $0x30c] sm:$0xff]  ;;  %v6406_v28 = vpack.c.bf16 %v6387_v8, %v6386_v53 }
 0x4a2   : >> { %v7642_v61 = vpack.c.bf16 %v7623_v16, %v7622_v21 }
 0x4a7   : >> { %11677 = vmatmul.mubr.bf16.gmra.mrb[28].mxu1 %v6100_v2  ;;  %v7625_v2 = vld [vmem:[%s14703_s21 + $0x354] sm:$0xff] }
 0x4a8   : >> { %11901 = vmatmul.mubr.bf16.gmra.mrb[12].mxu0 %v7637_v50  ;;  %11712 = vmatprep.mubr.bf16.mxu1 %v6402_v20  ;;  %v6390_v50 = vld [vmem:[%s14703_s21 + $0x368] sm:$0xff]  ;;  %v6391_v20 = vld [vmem:[%s14703_s21 + $0x380] sm:$0xff]  ;;  %v7643_v22 = vpack.c.bf16 %v7625_v2, %v7624_v57 }
 0x4a9   : >> { %11904 = vmatprep.mubr.bf16.mxu0 %v7638_v0  ;;  %v7626_v0 = vld [vmem:[%s14703_s21 + $0x36c] sm:$0xff]  ;;  %v6408_v30 = vpack.c.bf16 %v6391_v20, %v6390_v50 }
 0x4aa   : >> { %v7644_v25 = vpack.c.bf16 %v7627_v43, %v7626_v0 }
 0x4af   : >> { %11713 = vmatmul.mubr.bf16.vlgmr.msra.gmra.mrb[16].mxu1 %v6403_v24  ;;  %v7629_v24 = vld [vmem:[%s14703_s21 + $0x3b4] sm:$0xff] }
 0x4b0   : >> { %11905 = vmatmul.mubr.bf16.gmra.mrb[16].mxu0 %v7639_v58  ;;  %11716 = vmatprep.mubr.bf16.mxu1 %v6404_v36  ;;  %v6409_v58 = vpack.c.bf16 %v6393_v6, %v6392_v4  ;;  %v7645_v36 = vpack.c.bf16 %v7629_v24, %v7628_v59 }
 0x4b1   : >> { %11908 = vmatprep.mubr.bf16.mxu0 %v7640_v63 }
 0x4b7   : >> { %11717 = vmatmul.mubr.bf16.gmra.mrb[20].mxu1 %v6405_v49 }
 0x4b8   : >> { %11909 = vmatmul.mubr.bf16.gmra.mrb[20].mxu0 %v7641_v29  ;;  %11720 = vmatprep.mubr.bf16.mxu1 %v6406_v28 }
 0x4b9   : >> { %11912 = vmatprep.mubr.bf16.mxu0 %v7642_v61 }
 0x4bf   : >> { %11721 = vmatmul.mubr.bf16.gmra.mrb[24].mxu1 %v6407_v3 }
 0x4c0   : >> { %11913 = vmatmul.mubr.bf16.gmra.mrb[24].mxu0 %v7643_v22  ;;  %11724 = vmatprep.mubr.bf16.mxu1 %v6408_v30 }
 0x4c1   : >> { %11916 = vmatprep.mubr.bf16.mxu0 %v7644_v25 }
 0x4c7   : >> { %11725 = vmatmul.mubr.bf16.gmra.mrb[28].mxu1 %v6409_v58 }
 0x4c8   : >> { %11917 = vmatmul.mubr.bf16.gmra.mrb[28].mxu0 %v7645_v36 }
 0x542   : >> { %v11650_v63 = vpop.f32.mrb[0].mxu1 }
 0x543   : >> { %v6203_v38 = vpop.f32.mrb[1].mxu1  ;;  %v12002_v2 = vadd.f32 %v12995_v18, %v11650_v63 }
 0x544   : >> { %v11651_v10 = vpop.f32.mrb[2].mxu1  ;;  %v12004_v50 = vadd.f32 %v13003_v27, %v6203_v38 }
 0x545   : >> { %v6206_v37 = vpop.f32.mrb[3].mxu1  ;;  %v12006_v0 = vadd.f32 %v12991_v51, %v11651_v10 }
 0x546   : >> { %v12008_v22 = vadd.f32 %v12999_v19, %v6206_v37 }
 0x54a   : >> { %v11654_v39 = vpop.f32.mrb[4].mxu1 }
 0x54b   : >> { %v6219_v53 = vpop.f32.mrb[5].mxu1  ;;  %v12010_v24 = vadd.f32 %v12979_v47, %v11654_v39 }
 0x54c   : >> { %v11655_v8 = vpop.f32.mrb[6].mxu1  ;;  %v12012_v58 = vadd.f32 %v12987_v12, %v6219_v53 }
 0x54d   : >> { %v6222_v21 = vpop.f32.mrb[7].mxu1  ;;  %v12014_v63 = vadd.f32 %v12975_v52, %v11655_v8 }
 0x54e   : >> { %v12016_v10 = vadd.f32 %v12983_v34, %v6222_v21 }
 0x552   : >> { %v11658_v16 = vpop.f32.mrb[8].mxu1 }
 0x553   : >> { %v6235_v49 = vpop.f32.mrb[9].mxu1 }
 0x554   : >> { %v11659_v29 = vpop.f32.mrb[10].mxu1  ;;  %v12020_v39 = vadd.f32 %v12971_v40, %v6235_v49 }
 0x555   : >> { %v6238_v28 = vpop.f32.mrb[11].mxu1  ;;  %v12022_v8 = vadd.f32 %v12959_v15, %v11659_v29 }
 0x556   : >> { %v12024_v21 = vadd.f32 %v12967_v56, %v6238_v28 }
 0x55a   : >> { %v11662_v61 = vpop.f32.mrb[12].mxu1 }
 0x55b   : >> { %v6251_v26 = vpop.f32.mrb[13].mxu1 }
 0x55c   : >> { %v11663_v32 = vpop.f32.mrb[14].mxu1 }
 0x55d   : >> { %v6254_v57 = vpop.f32.mrb[15].mxu1  ;;  %v12030_v29 = vadd.f32 %v12943_v35, %v11663_v32 }
 0x55e   : >> { %v12032_v28 = vadd.f32 %v12951_v23, %v6254_v57 }
 0x563   : >> { %v11890_v20 = vpop.f32.mrb[0].mxu0 }
 0x564   : >> { %v15096_v18 = vadd.f32 %v12002_v2, %v11890_v20   ;;  %v7748_v3 = vpop.f32.mrb[1].mxu0 }
 0x565   : >> { %v15099_v27 = vadd.f32 %v12004_v50, %v7748_v3   ;;  %v11891_v25 = vpop.f32.mrb[2].mxu0 }
 0x566   : >> { %v16384_v43 = vmov %v15096_v18  ;;  %v15101_v51 = vadd.f32 %v12006_v0, %v11891_v25   ;;  %v7751_v6 = vpop.f32.mrb[3].mxu0 }
 0x567   : >> { %v16385_v30 = vmov %v15099_v27  ;;  %v15103_v19 = vadd.f32 %v12008_v22, %v7751_v6  }
 0x568   : >> { %v16386_v4 = vmov %v15101_v51 }
 0x569   : >> { %v16387_v59 = vmov %v15103_v19  ;;  %v12018_v19 = vadd.f32 %v12963_v31, %v11658_v16  ;;  %v12028_v16 = vadd.f32 %v12955_v33, %v6251_v26 }
 0x56b   : >> { %v11894_v36 = vpop.f32.mrb[4].mxu0 }
 0x56c   : >> { %v15108_v47 = vadd.f32 %v12010_v24, %v11894_v36   ;;  %v7764_v18 = vpop.f32.mrb[5].mxu0 }
 0x56d   : >> { %v15111_v12 = vadd.f32 %v12012_v58, %v7764_v18   ;;  %v11895_v27 = vpop.f32.mrb[6].mxu0 }
 0x56e   : >> { %v16388_v38 = vmov %v15108_v47  ;;  %v15113_v52 = vadd.f32 %v12014_v63, %v11895_v27   ;;  %v7767_v51 = vpop.f32.mrb[7].mxu0 }
 0x56f   : >> { %v16389_v37 = vmov %v15111_v12  ;;  %v15115_v34 = vadd.f32 %v12016_v10, %v7767_v51  }
 0x570   : >> { %v16390_v2 = vmov %v15113_v52 }
 0x571   : >> { %v16391_v50 = vmov %v15115_v34  ;;  %v12026_v34 = vadd.f32 %v12947_v14, %v11662_v61 }
 0x573   : >> { %v11898_v53 = vpop.f32.mrb[8].mxu0 }
 0x574   : >> { %v15120_v31 = vadd.f32 %v12018_v19, %v11898_v53   ;;  %v7780_v47 = vpop.f32.mrb[9].mxu0 }
 0x575   : >> { %v15123_v40 = vadd.f32 %v12020_v39, %v7780_v47   ;;  %v11899_v12 = vpop.f32.mrb[10].mxu0 }
 0x576   : >> { %v16392_v20 = vmov %v15120_v31  ;;  %v15125_v15 = vadd.f32 %v12022_v8, %v11899_v12   ;;  %v7783_v52 = vpop.f32.mrb[11].mxu0 }
 0x577   : >> { %v16393_v0 = vmov %v15123_v40  ;;  %v15127_v56 = vadd.f32 %v12024_v21, %v7783_v52  }
 0x578   : >> { %v16394_v3 = vmov %v15125_v15 }
 0x579   : >> { %v16395_v22 = vmov %v15127_v56 }
 0x57b   : >> { %v11902_v49 = vpop.f32.mrb[12].mxu0 }
 0x57c   : >> { %v15132_v14 = vadd.f32 %v12026_v34, %v11902_v49   ;;  %v7796_v31 = vpop.f32.mrb[13].mxu0 }
 0x57d   : >> { %v15135_v33 = vadd.f32 %v12028_v16, %v7796_v31   ;;  %v11903_v40 = vpop.f32.mrb[14].mxu0 }
 0x57e   : >> { %v16396_v25 = vmov %v15132_v14  ;;  %v15137_v35 = vadd.f32 %v12030_v29, %v11903_v40   ;;  %v7799_v15 = vpop.f32.mrb[15].mxu0 }
 0x57f   : >> { %v16397_v6 = vmov %v15135_v33  ;;  %v15139_v23 = vadd.f32 %v12032_v28, %v7799_v15  }
 0x580   : >> { %v16398_v24 = vmov %v15137_v35 }
 0x581   : >> { %v16399_v58 = vmov %v15139_v23 }
 0x582   : >> { %v11714_v56 = vpop.f32.mrb[16].mxu1 }
 0x583   : >> { %v12034_v61 = vadd.f32 %v12931_v60, %v11714_v56  ;;  %v11906_v26 = vpop.f32.mrb[16].mxu0  ;;  %v6576_v36 = vpop.f32.mrb[17].mxu1 }
 0x584   : >> { %v12036_v32 = vadd.f32 %v12939_v17, %v6576_v36  ;;  %v7812_v63 = vpop.f32.mrb[17].mxu0  ;;  %v11715_v14 = vpop.f32.mrb[18].mxu1 }
 0x585   : >> { %v15143_v60 = vadd.f32 %v12034_v61, %v11906_v26   ;;  %v12038_v57 = vadd.f32 %v12927_v7, %v11715_v14  ;;  %v11907_v33 = vpop.f32.mrb[18].mxu0  ;;  %v6579_v18 = vpop.f32.mrb[19].mxu1 }
 0x586   : >> { %v15146_v17 = vadd.f32 %v12036_v32, %v7812_v63   ;;  %v12040_v35 = vadd.f32 %v12935_v48, %v6579_v18  ;;  %v7815_v23 = vpop.f32.mrb[19].mxu0 }
 0x587   : >> { %v16400_v10 = vmov %v15143_v60  ;;  %v15149_v7 = vadd.f32 %v12038_v57, %v11907_v33  }
 0x588   : >> { %v16401_v39 = vmov %v15146_v17  ;;  %v15151_v48 = vadd.f32 %v12040_v35, %v7815_v23  }
 0x589   : >> { %v16402_v53 = vmov %v15149_v7 }
 0x58a   : >> { %v16403_v8 = vmov %v15151_v48  ;;  %v11718_v27 = vpop.f32.mrb[20].mxu1 }
 0x58b   : >> { %v12042_v51 = vadd.f32 %v12915_v5, %v11718_v27  ;;  %v11910_v19 = vpop.f32.mrb[20].mxu0  ;;  %v6592_v47 = vpop.f32.mrb[21].mxu1 }
 0x58c   : >> { %v12044_v60 = vadd.f32 %v12923_v1, %v6592_v47  ;;  %v7828_v21 = vpop.f32.mrb[21].mxu0  ;;  %v11719_v12 = vpop.f32.mrb[22].mxu1  ;;  %v16453_v47 = vmov %v16388_v38 }
 0x58d   : >> { %v15155_v5 = vadd.f32 %v12042_v51, %v11910_v19   ;;  %v12046_v17 = vadd.f32 %v12911_v41, %v11719_v12  ;;  %v11911_v52 = vpop.f32.mrb[22].mxu0  ;;  %v6595_v34 = vpop.f32.mrb[23].mxu1  ;;  %v16455_v12 = vmov %v16389_v37 }
 0x58e   : >> { %v15158_v1 = vadd.f32 %v12044_v60, %v7828_v21   ;;  %v12048_v7 = vadd.f32 %v12919_v46, %v6595_v34  ;;  %v7831_v48 = vpop.f32.mrb[23].mxu0  ;;  %v16441_v60 = vmov %v16400_v10  ;;  %v16454_v34 = vmov %v16391_v50  ;;  %v12689_v12 = vld [vmem:[%s16367_s7 + $0x20] sm:$0xff] (%p15192_p4)  }
 0x58f   : >> { %v16404_v16 = vmov %v15155_v5  ;;  %v15161_v41 = vadd.f32 %v12046_v17, %v11911_v52   ;;  %v16443_v17 = vmov %v16401_v39  ;;  %v16452_v52 = vmov %v16390_v2 }
 0x590   : >> { %v16405_v49 = vmov %v15158_v1  ;;  %v15163_v46 = vadd.f32 %v12048_v7, %v7831_v48   ;;  %v16440_v7 = vmov %v16402_v53  ;;  %v16442_v48 = vmov %v16403_v8 }
 0x591   : >> { %16406 = vst [vmem:[#allocation4_spill] sm:$0xff] %v15161_v41  ;;  %v16407_v29 = vmov %v15161_v41 }
 0x592   : >> { %v16408_v28 = vmov %v15163_v46  ;;  %v11722_v31 = vpop.f32.mrb[24].mxu1 }
 0x593   : >> { %v12050_v40 = vadd.f32 %v12899_v13, %v11722_v31  ;;  %v11914_v15 = vpop.f32.mrb[24].mxu0  ;;  %v6608_v56 = vpop.f32.mrb[25].mxu1  ;;  %v16449_v31 = vmov %v16392_v20 }
 0x594   : >> { %v12052_v5 = vadd.f32 %v12907_v45, %v6608_v56  ;;  %v7844_v61 = vpop.f32.mrb[25].mxu0  ;;  %v11723_v26 = vpop.f32.mrb[26].mxu1  ;;  %v16450_v56 = vmov %v16395_v22 }
 0x595   : >> { %v15167_v13 = vadd.f32 %v12050_v40, %v11914_v15   ;;  %v12054_v1 = vadd.f32 %v12895_v9, %v11723_v26  ;;  %v11915_v32 = vpop.f32.mrb[26].mxu0  ;;  %v6611_v63 = vpop.f32.mrb[27].mxu1  ;;  %v16448_v15 = vmov %v16394_v3  ;;  %v16451_v40 = vmov %v16393_v0 }
 0x596   : >> { %v15170_v45 = vadd.f32 %v12052_v5, %v7844_v61   ;;  %v12056_v41 = vadd.f32 %v12903_v11, %v6611_v63  ;;  %v7847_v46 = vpop.f32.mrb[27].mxu0  ;;  %v16437_v5 = vmov %v16404_v16 }
 0x597   : >> { %16409 = vst [vmem:[#allocation5_spill] sm:$0xff] %v15167_v13  ;;  %v16410_v36 = vmov %v15167_v13  ;;  %v15173_v9 = vadd.f32 %v12054_v1, %v11915_v32   ;;  %v16439_v1 = vmov %v16405_v49 }
 0x598   : >> { %16411 = vst [vmem:[#allocation6_spill] sm:$0xff] %v15170_v45  ;;  %v16412_v57 = vmov %v15170_v45  ;;  %v15175_v11 = vadd.f32 %v12056_v41, %v7847_v46   ;;  %v16436_v41 = vmov %v16407_v29  ;;  %v16438_v46 = vmov %v16408_v28 }
 0x599   : >> { %16413 = vst [vmem:[#allocation7_spill] sm:$0xff] %v15173_v9  ;;  %v16414_v21 = vmov %v15173_v9 }
 0x59a   : >> { %16415 = vst [vmem:[#allocation8_spill] sm:$0xff] %v15175_v11  ;;  %v16416_v44 = vmov %v15175_v11  ;;  %v11726_v14 = vpop.f32.mrb[28].mxu1 }
 0x59b   : >> { %v12058_v33 = vadd.f32 %v12883_v62, %v11726_v14  ;;  %v11918_v18 = vpop.f32.mrb[28].mxu0  ;;  %v6624_v35 = vpop.f32.mrb[29].mxu1  ;;  %v16445_v14 = vmov %v16396_v25 }
 0x59c   : >> { %v12060_v13 = vadd.f32 %v12891_v54, %v6624_v35  ;;  %v7860_v23 = vpop.f32.mrb[29].mxu0  ;;  %v11727_v27 = vpop.f32.mrb[30].mxu1  ;;  %v16444_v35 = vmov %v16398_v24  ;;  %v16461_v14 = vld [vmem:[#allocation3_spill] sm:$0xff] (%p15192_p4) }
 0x59d   : >> { %v15179_v62 = vadd.f32 %v12058_v33, %v11918_v18   ;;  %v12062_v45 = vadd.f32 %v12879_v42, %v11727_v27  ;;  %v11919_v51 = vpop.f32.mrb[30].mxu0  ;;  %v6627_v19 = vpop.f32.mrb[31].mxu1  ;;  %v16447_v33 = vmov %v16397_v6  ;;  %v16457_v18 = vmov %v16384_v43  ;;  %5090 = sbr.rel (!%p15192_p4) target bundleno = 906 (0x38a), region = 113 }
 0x59e   : >> { %v15182_v54 = vadd.f32 %v12060_v13, %v7860_v23   ;;  %v12064_v9 = vadd.f32 %v12887_v55, %v6627_v19  ;;  %v7863_v11 = vpop.f32.mrb[31].mxu0  ;;  %v16433_v13 = vmov %v16410_v36  ;;  %v16446_v23 = vmov %v16399_v58 }
 0x59f   : >> { %16417 = vst [vmem:[#allocation9_spill] sm:$0xff] %v15179_v62  ;;  %v16418_v26 = vmov %v15179_v62  ;;  %v15185_v42 = vadd.f32 %v12062_v45, %v11919_v51   ;;  %v16435_v45 = vmov %v16412_v57  ;;  %v16456_v51 = vmov %v16386_v4  ;;  %v12690_v13 = vld [vmem:[%s16367_s7 + $0x28] sm:$0xff] (%p15192_p4)  }
 0x5a0   : >> { %16419 = vst [vmem:[#allocation10_spill] sm:$0xff] %v15182_v54  ;;  %v15187_v55 = vadd.f32 %v12064_v9, %v7863_v11   ;;  %v16427_v62 = vmov %v16418_v26  ;;  %v16430_v61 = vmov %v15182_v54  ;;  %v16432_v9 = vmov %v16414_v21  ;;  %v12687_v26 = vld [vmem:[%s16367_s7 + $0x10] sm:$0xff] (%p15192_p4)  }
 0x5a1   : >> { %16421 = vst [vmem:[#allocation11_spill] sm:$0xff] %v15185_v42  ;;  %v16422_v32 = vmov %v15185_v42  ;;  %v16431_v54 = vmov %v16430_v61  ;;  %v16434_v11 = vmov %v16416_v44  ;;  %v16458_v19 = vmov %v16387_v59  ;;  %v15318_v62 = vld [vmem:[%s16366_s6] ss:$0 sm:$0xff] (%p15192_p4) }
 0x5a2   : >> { %16423 = vst [vmem:[#allocation12_spill] sm:$0xff] %v15187_v55  ;;  %v16426_v42 = vmov %v16422_v32  ;;  %v16428_v63 = vmov %v15187_v55  ;;  %v16459_v27 = vmov %v16385_v30  ;;  %v12686_v32 = vld [vmem:[%s16367_s7 + $0x8] sm:$0xff] (%p15192_p4)  }
 0x5a3   : >> { %v16429_v55 = vmov %v16428_v63  ;;  %v12685_v27 = vld [vmem:[%s16367_s7] sm:$0xff] (%p15192_p4)   ;;  %v12688_v63 = vld [vmem:[%s16367_s7 + $0x18] sm:$0xff] (%p15192_p4)  }
 0x5a4   : > { %11920 = vmatprep.subr.bf16.mxu0 %v12685_v27  ;;  %v15313_v42 = vld [vmem:[%s16365_s5] ss:$0 sm:$0xff] }
 0x5a5   : > { %11921 = vmatpush3.bf16.msra.mxu0 %v12685_v27  ;;  %v7914_v55 = vmul.f32 %v16385_v30, %v15313_v42  ;;  %v7915_v54 = vmul.f32 %v16387_v59, %v15313_v42  ;;  %v7916_v47 = vmul.f32 %v16384_v43, %v15313_v42  ;;  %v7917_v60 = vmul.f32 %v16386_v4, %v15313_v42 }
 0x5a6   : > { %11922 = vmatprep.subr.bf16.mxu0 %v12686_v32  ;;  %v7918_v17 = vmul.f32 %v16389_v37, %v15313_v42  ;;  %v7919_v52 = vmul.f32 %v16391_v50, %v15313_v42  ;;  %v7920_v30 = vmul.f32 %v16388_v38, %v15313_v42  ;;  %v7921_v59 = vmul.f32 %v16390_v2, %v15313_v42 }
 0x5a7   : > { %v7953_v43 = vadd.f32 %v15318_v62, %v7914_v55  ;;  %v7954_v4 = vadd.f32 %v15318_v62, %v7915_v54  ;;  %v7955_v34 = vadd.f32 %v15318_v62, %v7916_v47  ;;  %v7956_v7 = vadd.f32 %v15318_v62, %v7917_v60 }
 0x5a8   : > { %v7957_v37 = vadd.f32 %v15318_v62, %v7918_v17  ;;  %v7958_v50 = vadd.f32 %v15318_v62, %v7919_v52  ;;  %v7959_v48 = vadd.f32 %v15318_v62, %v7920_v30  ;;  %v7960_v38 = vadd.f32 %v15318_v62, %v7921_v59  ;;  %v12691_v30 = vld [vmem:[%s16367_s7 + $0x30] sm:$0xff]  }
 0x5a9   : > { %11923 = vmatpush3.bf16.msra.mxu0 %v12686_v32  ;;  %v7985_v31 = vmax.f32 %v7953_v43, 0.0  ;;  %v7986_v2 = vmax.f32 %v7954_v4, 0.0  ;;  %v7987_v40 = vmax.f32 %v7955_v34, 0.0  ;;  %v7988_v15 = vmax.f32 %v7956_v7, 0.0 }
 0x5aa   : > { %11924 = vmatprep.subr.bf16.mxu0 %v12687_v26  ;;  %v15347_v56 = vmax.f32 %v7957_v37, 0.0  ;;  %v15349_v5 = vmax.f32 %v7958_v50, 0.0  ;;  %v15351_v1 = vmax.f32 %v7959_v48, 0.0  ;;  %v15353_v41 = vmax.f32 %v7960_v38, 0.0 }
 0x5ab   : > { %v8049_v46 = vcombine.high %v7985_v31, %v7985_v31  ;;  %v8056_v33 = vrot.slane %v7985_v31, %v16461_v14  ;;  %v8066_v18 = vcombine.high %v7986_v2, %v7986_v2  ;;  %v8073_v35 = vrot.slane %v7986_v2, %v16461_v14 }
 0x5ac   : > { %v8083_v23 = vcombine.high %v7987_v40, %v7987_v40  ;;  %v8100_v45 = vcombine.high %v7988_v15, %v7988_v15  ;;  %v15364_v51 = vrot.slane %v7988_v15, %v16461_v14 }
 0x5ad   : > { %11925 = vmatpush3.bf16.msra.mxu0 %v12687_v26  ;;  %v15361_v26 = vrot.slane %v7987_v40, %v16461_v14  ;;  %v8063_v19 = vrot.slane %v8049_v46, %v16461_v14  ;;  %v8064_v9 = vcombine.high %v8056_v33, %v8056_v33  ;;  %v8080_v11 = vrot.slane %v8066_v18, %v16461_v14  ;;  %v12692_v18 = vld [vmem:[%s16367_s7 + $0x38] sm:$0xff]  }
 0x5ae   : > { %11926 = vmatprep.subr.bf16.mxu0 %v12688_v63  ;;  %v8081_v32 = vcombine.high %v8073_v35, %v8073_v35  ;;  %v15374_v55 = vrot.slane %v8100_v45, %v16461_v14  ;;  %v8721_v17 = vsel %vm2628_vm1, %v8056_v33, -inf  ;;  %v8749_v37 = vsel %vm2628_vm1, %v8073_v35, -inf }
 0x5af   : > { %v8065_v47 = vcombine.high %v8063_v19, %v8063_v19  ;;  %v8082_v60 = vcombine.high %v8080_v11, %v8080_v11  ;;  %v8728_v52 = vsel %vm2628_vm1, %v8064_v9, -inf  ;;  %v8722_v4 = vrot.slane %v8721_v17, 4 }
 0x5b0   : > { %v8729_v34 = vrot.slane %v8728_v52, 4  ;;  %v8756_v50 = vsel %vm2628_vm1, %v8081_v32, -inf  ;;  %v8750_v40 = vrot.slane %v8749_v37, 4  ;;  %v8763_v46 = vsel %vm2628_vm1, %v8080_v11, -inf }
 0x5b1   : > { %11927 = vmatpush3.bf16.msra.mxu0 %v12688_v63  ;;  %v15369_v63 = vrot.slane %v8083_v23, %v16461_v14  ;;  %v8742_v7 = vsel %vm2628_vm1, %v8065_v47, -inf  ;;  %v8723_v48 = vmax.f32 %v8721_v17, %v8722_v4  ;;  %v8757_v15 = vrot.slane %v8756_v50, 4 }
 0x5b2   : > { %11928 = vmatprep.subr.bf16.mxu0 %v12689_v12  ;;  %v8730_v38 = vmax.f32 %v8728_v52, %v8729_v34  ;;  %v8743_v2 = vrot.slane %v8742_v7, 4  ;;  %v8770_v33 = vsel %vm2628_vm1, %v8082_v60, -inf  ;;  %v8751_v9 = vmax.f32 %v8749_v37, %v8750_v40 }
 0x5b3   : > { %v8724_v23 = vrot.slane %v8723_v48, 2  ;;  %v8758_v32 = vmax.f32 %v8756_v50, %v8757_v15  ;;  %v8764_v47 = vrot.slane %v8763_v46, 4  ;;  %v8771_v17 = vrot.slane %v8770_v33, 4 }
 0x5b4   : > { %v8731_v35 = vrot.slane %v8730_v38, 2  ;;  %v8752_v11 = vrot.slane %v8751_v9, 2 }
 0x5b5   : > { %11929 = vmatpush3.bf16.msra.mxu0 %v12689_v12  ;;  %v8735_v12 = vsel %vm2628_vm1, %v8063_v19, -inf  ;;  %v8744_v19 = vmax.f32 %v8742_v7, %v8743_v2  ;;  %v8759_v60 = vrot.slane %v8758_v32, 2  ;;  %v8765_v43 = vmax.f32 %v8763_v46, %v8764_v47 }
 0x5b6   : > { %11930 = vmatprep.subr.bf16.mxu0 %v12690_v13  ;;  %v8736_v31 = vrot.slane %v8735_v12, 4  ;;  %v8732_v52 = vmax.f32 %v8730_v38, %v8731_v35  ;;  %v8772_v54 = vmax.f32 %v8770_v33, %v8771_v17  ;;  %v8777_v35 = vsel %vm2628_vm1, %v15361_v26, -inf }
 0x5b7   : > { %v8745_v34 = vrot.slane %v8744_v19, 2  ;;  %v8760_v7 = vmax.f32 %v8758_v32, %v8759_v60  ;;  %v8766_v37 = vrot.slane %v8765_v43, 2 }
 0x5b8   : > { %v8737_v45 = vmax.f32 %v8735_v12, %v8736_v31  ;;  %v8733_v27 = vrot.slane %v8732_v52, 1  ;;  %v8753_v12 = vmax.f32 %v8751_v9, %v8752_v11  ;;  %v8773_v50 = vrot.slane %v8772_v54, 2 }
 0x5b9   : > { %11931 = vmatpush3.bf16.msra.mxu0 %v12690_v13  ;;  %v8725_v13 = vmax.f32 %v8723_v48, %v8724_v23  ;;  %v8746_v21 = vmax.f32 %v8744_v19, %v8745_v34  ;;  %v8761_v40 = vrot.slane %v8760_v7, 1  ;;  %v8767_v15 = vmax.f32 %v8765_v43, %v8766_v37 }
 0x5ba   : > { %11932 = vmatprep.subr.bf16.mxu0 %v12691_v30  ;;  %v8738_v4 = vrot.slane %v8737_v45, 2  ;;  %v15398_v48 = vmax.f32 %v8732_v52, %v8733_v27  ;;  %v8774_v46 = vmax.f32 %v8772_v54, %v8773_v50  ;;  %v8778_v43 = vrot.slane %v8777_v35, 4 }
 0x5bb   : > { %v8726_v59 = vrot.slane %v8725_v13, 1  ;;  %v8747_v2 = vrot.slane %v8746_v21, 1  ;;  %v15412_v19 = vmax.f32 %v8760_v7, %v8761_v40  ;;  %v8805_v34 = vsel %vm2628_vm1, %v15364_v51, -inf }
 0x5bc   : > { %v8739_v61 = vmax.f32 %v8737_v45, %v8738_v4  ;;  %v8775_v9 = vrot.slane %v8774_v46, 1  ;;  %v8779_v52 = vmax.f32 %v8777_v35, %v8778_v43  ;;  %v16464_v11 = vcombine.high %v15364_v51, %v15364_v51 }
 0x5bd   : > { %11933 = vmatpush3.bf16.msra.mxu0 %v12691_v30  ;;  %v15396_v31 = vmax.f32 %v8725_v13, %v8726_v59  ;;  %v8754_v30 = vrot.slane %v8753_v12, 1  ;;  %v15402_v23 = vmax.f32 %v8746_v21, %v8747_v2  ;;  %v16462_v59 = vcombine.high %v15361_v26, %v15361_v26 }
 0x5be   : > { %11934 = vmatprep.subr.bf16.mxu0 %v12692_v18  ;;  %v8740_v38 = vrot.slane %v8739_v61, 1  ;;  %v8791_v21 = vsel %vm2628_vm1, %v15369_v63, -inf  ;;  %v15422_v26 = vmax.f32 %v8774_v46, %v8775_v9  ;;  %v8812_v60 = vsel %vm2628_vm1, %v16464_v11, -inf }
 0x5bf   : > { %v8784_v27 = vsel %vm2628_vm1, %v16462_v59, -inf  ;;  %v15410_v45 = vmax.f32 %v8753_v12, %v8754_v30  ;;  %v8792_v17 = vrot.slane %v8791_v21, 4  ;;  %v8806_v7 = vrot.slane %v8805_v34, 4 }
 0x5c0   : > { %v15400_v33 = vmax.f32 %v8739_v61, %v8740_v38  ;;  %v8785_v54 = vrot.slane %v8784_v27, 4  ;;  %v16463_v61 = vcombine.high %v15369_v63, %v15369_v63  ;;  %v8813_v37 = vrot.slane %v8812_v60, 4 }
 0x5c1   : > { %11935 = vmatpush3.bf16.msra.mxu0 %v12692_v18  ;;  %v8768_v18 = vrot.slane %v8767_v15, 1  ;;  %v8793_v12 = vmax.f32 %v8791_v21, %v8792_v17  ;;  %v8780_v50 = vrot.slane %v8779_v52, 2  ;;  %v8819_v2 = vsel %vm2628_vm1, %v15374_v55, -inf }
 0x5c2   : > { %v8798_v32 = vsel %vm2628_vm1, %v16463_v61, -inf  ;;  %v8786_v4 = vmax.f32 %v8784_v27, %v8785_v54  ;;  %v16465_v30 = vcombine.high %v15374_v55, %v15374_v55  ;;  %v8807_v35 = vmax.f32 %v8805_v34, %v8806_v7 }
 0x5c3   : > { %v15420_v47 = vmax.f32 %v8767_v15, %v8768_v18  ;;  %v8799_v13 = vrot.slane %v8798_v32, 4  ;;  %v8794_v15 = vrot.slane %v8793_v12, 2  ;;  %v8814_v51 = vmax.f32 %v8812_v60, %v8813_v37 }
 0x5c4   : > { %v8787_v38 = vrot.slane %v8786_v4, 2  ;;  %v8826_v40 = vsel %vm2628_vm1, %v16465_v30, -inf  ;;  %v8781_v59 = vmax.f32 %v8779_v52, %v8780_v50  ;;  %v8820_v18 = vrot.slane %v8819_v2, 4 }
 0x5c5   : > { %v8800_v63 = vmax.f32 %v8798_v32, %v8799_v13  ;;  %v8827_v9 = vrot.slane %v8826_v40, 4  ;;  %v8795_v43 = vmax.f32 %v8793_v12, %v8794_v15  ;;  %v8808_v21 = vrot.slane %v8807_v35, 2 }
 0x5c6   : > { %v8788_v27 = vmax.f32 %v8786_v4, %v8787_v38  ;;  %v8815_v61 = vrot.slane %v8814_v51, 2  ;;  %v8782_v32 = vrot.slane %v8781_v59, 1  ;;  %v8821_v13 = vmax.f32 %v8819_v2, %v8820_v18 }
 0x5c7   : > { %v8801_v46 = vrot.slane %v8800_v63, 2  ;;  %v8828_v11 = vmax.f32 %v8826_v40, %v8827_v9  ;;  %v8796_v36 = vrot.slane %v8795_v43, 1  ;;  %v8809_v44 = vmax.f32 %v8807_v35, %v8808_v21 }
 0x5c8   : > { %v8789_v17 = vrot.slane %v8788_v27, 1  ;;  %v8816_v30 = vmax.f32 %v8814_v51, %v8815_v61  ;;  %v8783_v57 = vmax.f32 %v8781_v59, %v8782_v32  ;;  %v8822_v34 = vrot.slane %v8821_v13, 2 }
 0x5c9   : > { %v8802_v54 = vmax.f32 %v8800_v63, %v8801_v46  ;;  %v8829_v60 = vrot.slane %v8828_v11, 2  ;;  %v8797_v52 = vmax.f32 %v8795_v43, %v8796_v36  ;;  %v8810_v7 = vrot.slane %v8809_v44, 1 }
 0x5ca   : > { %v8790_v29 = vmax.f32 %v8788_v27, %v8789_v17  ;;  %v8817_v37 = vrot.slane %v8816_v30, 1  ;;  %v8823_v12 = vmax.f32 %v8821_v13, %v8822_v34  ;;  %v9617_v50 = vpack.c.bf16 %v15396_v31, %v15396_v31 }
 0x5cb   : > { %v8803_v55 = vrot.slane %v8802_v54, 1  ;;  %v8830_v63 = vmax.f32 %v8828_v11, %v8829_v60  ;;  %v9618_v38 = vpack.c.bf16 %v15398_v48, %v15398_v48  ;;  %v8811_v2 = vmax.f32 %v8809_v44, %v8810_v7 }
 0x5cc   : > { %v8818_v40 = vmax.f32 %v8816_v30, %v8817_v37  ;;  %v9619_v15 = vpack.c.bf16 %v15400_v33, %v15400_v33  ;;  %v9620_v46 = vpack.c.bf16 %v15402_v23, %v15402_v23  ;;  %v8824_v36 = vrot.slane %v8823_v12, 1 }
 0x5cd   : > { %v8804_v4 = vmax.f32 %v8802_v54, %v8803_v55  ;;  %v8831_v35 = vrot.slane %v8830_v63, 1  ;;  %v9621_v51 = vpack.c.bf16 %v15410_v45, %v15410_v45  ;;  %v9622_v59 = vpack.c.bf16 %v15412_v19, %v15412_v19 }
 0x5ce   : > { %v9623_v31 = vpack.c.bf16 %v15420_v47, %v15420_v47  ;;  %v9624_v44 = vpack.c.bf16 %v15422_v26, %v15422_v26  ;;  %v9625_v48 = vpack.c.bf16 %v8783_v57, %v8783_v57  ;;  %v9626_v27 = vpack.c.bf16 %v8790_v29, %v8790_v29 }
 0x5cf   : > { %v8825_v33 = vmax.f32 %v8823_v12, %v8824_v36  ;;  %v8832_v18 = vmax.f32 %v8830_v63, %v8831_v35  ;;  %v9627_v9 = vpack.c.bf16 %v8797_v52, %v8797_v52  ;;  %v9628_v23 = vpack.c.bf16 %v8804_v4, %v8804_v4 }
 0x5d0   : > { %v9629_v43 = vpack.c.bf16 %v8811_v2, %v8811_v2  ;;  %v9630_v54 = vpack.c.bf16 %v8818_v40, %v8818_v40  ;;  %v9896_v21 = vunpack.c.l.b16 %v9617_v50  ;;  %v9897_v61 = vunpack.c.l.b16 %v9618_v38 }
 0x5d1   : > { %v9631_v45 = vpack.c.bf16 %v8825_v33, %v8825_v33  ;;  %v9632_v32 = vpack.c.bf16 %v8832_v18, %v8832_v18  ;;  %v9898_v17 = vunpack.c.l.b16 %v9619_v15  ;;  %v9899_v19 = vunpack.c.l.b16 %v9620_v46 }
 0x5d2   : > { %v9900_v13 = vunpack.c.l.b16 %v9621_v51  ;;  %v9901_v11 = vunpack.c.l.b16 %v9622_v59  ;;  %v9902_v47 = vunpack.c.l.b16 %v9623_v31  ;;  %v9903_v55 = vunpack.c.l.b16 %v9624_v44 }
 0x5d3   : > { %v9904_v30 = vunpack.c.l.b16 %v9625_v48  ;;  %v9905_v26 = vunpack.c.l.b16 %v9626_v27  ;;  %v9906_v57 = vunpack.c.l.b16 %v9627_v9  ;;  %v9907_v29 = vunpack.c.l.b16 %v9628_v23 }
 0x5d4   : > { %v9908_v34 = vunpack.c.l.b16 %v9629_v43  ;;  %v9909_v60 = vunpack.c.l.b16 %v9630_v54  ;;  %v9910_v52 = vunpack.c.l.b16 %v9631_v45  ;;  %v9911_v4 = vunpack.c.l.b16 %v9632_v32 }
 0x5d5   : > { %v10024_v7 = vsel %vm4791_vm2, %v9897_v61, %v9896_v21  ;;  %v10031_v37 = vsel %vm4791_vm2, %v9905_v26, %v9904_v30  ;;  %v8117_v12 = vcombine.high %v15347_v56, %v15347_v56  ;;  %v8124_v63 = vrot.slane %v15347_v56, %v16461_v14 }
 0x5d6   : > { %v10025_v50 = vsel %vm4793_vm3, %v9898_v17, %v10024_v7  ;;  %v10032_v38 = vsel %vm4793_vm3, %v9906_v57, %v10031_v37  ;;  %v8134_v2 = vcombine.high %v15349_v5, %v15349_v5  ;;  %v8141_v40 = vrot.slane %v15349_v5, %v16461_v14 }
 0x5d7   : > { %v10026_v15 = vsel %vm4795_vm4, %v9899_v19, %v10025_v50  ;;  %v10033_v46 = vsel %vm4795_vm4, %v9907_v29, %v10032_v38  ;;  %v8131_v36 = vrot.slane %v8117_v12, %v16461_v14  ;;  %v8132_v35 = vcombine.high %v8124_v63, %v8124_v63 }
 0x5d8   : > { %v10027_v51 = vsel %vm4797_vm5, %v9900_v13, %v10026_v15  ;;  %v10034_v56 = vsel %vm4797_vm5, %v9908_v34, %v10033_v46  ;;  %v8148_v59 = vrot.slane %v8134_v2, %v16461_v14  ;;  %v8149_v31 = vcombine.high %v8141_v40, %v8141_v40 }
 0x5d9   : > { %v10028_v44 = vsel %vm4799_vm6, %v9901_v11, %v10027_v51  ;;  %v10035_v48 = vsel %vm4799_vm6, %v9909_v60, %v10034_v56  ;;  %v8133_v27 = vcombine.high %v8131_v36, %v8131_v36  ;;  %v8151_v5 = vcombine.high %v15351_v1, %v15351_v1 }
 0x5da   : > { %v10029_v33 = vsel %vm4801_vm7, %v9902_v47, %v10028_v44  ;;  %v10036_v18 = vsel %vm4801_vm7, %v9910_v52, %v10035_v48  ;;  %v8150_v9 = vcombine.high %v8148_v59, %v8148_v59  ;;  %v15478_v23 = vrot.slane %v15351_v1, %v16461_v14 }
 0x5db   : > { %v10030_v43 = vsel %vm4803_vm8, %v9903_v55, %v10029_v33  ;;  %v10037_v54 = vsel %vm4803_vm8, %v9911_v4, %v10036_v18  ;;  %v15483_v21 = vrot.slane %v8151_v5, %v16461_v14  ;;  %v8168_v61 = vcombine.high %v15353_v41, %v15353_v41 }
 0x5dc   : > { %v10136_v45 = vpack.c.b16 %v10037_v54, %v10030_v43  ;;  %v8166_v32 = vcombine.high %v15478_v23, %v15478_v23  ;;  %v15491_v17 = vrot.slane %v15353_v41, %v16461_v14  ;;  %v8833_v1 = vsel %vm2628_vm1, %v8124_v63, -inf }
 0x5dd   : > { %v8167_v19 = vcombine.high %v15483_v21, %v15483_v21  ;;  %v15497_v13 = vrot.slane %v8168_v61, %v16461_v14  ;;  %v8834_v11 = vrot.slane %v8833_v1, 4  ;;  %v8840_v47 = vsel %vm2628_vm1, %v8132_v35, -inf }
 0x5de   : > { %11936 = vmatprep.mubr.bf16.mxu0 %v10136_v45  ;;  %v8183_v55 = vcombine.high %v15491_v17, %v15491_v17  ;;  %v8841_v30 = vrot.slane %v8840_v47, 4  ;;  %v8847_v26 = vsel %vm2628_vm1, %v8131_v36, -inf  ;;  %v8854_v41 = vsel %vm2628_vm1, %v8133_v27, -inf }
 0x5df   : > { %v8184_v57 = vcombine.high %v15497_v13, %v15497_v13  ;;  %v8835_v29 = vmax.f32 %v8833_v1, %v8834_v11  ;;  %v8848_v34 = vrot.slane %v8847_v26, 4  ;;  %v8855_v60 = vrot.slane %v8854_v41, 4 }
 0x5e0   : > { %v8842_v52 = vmax.f32 %v8840_v47, %v8841_v30  ;;  %v8861_v4 = vsel %vm2628_vm1, %v8141_v40, -inf  ;;  %v8868_v7 = vsel %vm2628_vm1, %v8149_v31, -inf  ;;  %v8875_v37 = vsel %vm2628_vm1, %v8148_v59, -inf }
 0x5e1   : > { %v8836_v12 = vrot.slane %v8835_v29, 2  ;;  %v8849_v63 = vmax.f32 %v8847_v26, %v8848_v34  ;;  %v8856_v50 = vmax.f32 %v8854_v41, %v8855_v60  ;;  %v8862_v38 = vrot.slane %v8861_v4, 4 }
 0x5e2   : > { %v8843_v2 = vrot.slane %v8842_v52, 2  ;;  %v8869_v15 = vrot.slane %v8868_v7, 4  ;;  %v8876_v46 = vrot.slane %v8875_v37, 4  ;;  %v8882_v36 = vsel %vm2628_vm1, %v8150_v9, -inf }
 0x5e3   : > { %v8837_v35 = vmax.f32 %v8835_v29, %v8836_v12  ;;  %v8850_v51 = vrot.slane %v8849_v63, 2  ;;  %v8857_v56 = vrot.slane %v8856_v50, 2  ;;  %v8863_v44 = vmax.f32 %v8861_v4, %v8862_v38 }
 0x5e4   : > { %v8844_v48 = vmax.f32 %v8842_v52, %v8843_v2  ;;  %v8870_v27 = vmax.f32 %v8868_v7, %v8869_v15  ;;  %v8877_v40 = vmax.f32 %v8875_v37, %v8876_v46  ;;  %v8883_v5 = vrot.slane %v8882_v36, 4 }
 0x5e5   : > { %v8838_v31 = vrot.slane %v8837_v35, 1  ;;  %v8851_v33 = vmax.f32 %v8849_v63, %v8850_v51  ;;  %v8858_v59 = vmax.f32 %v8856_v50, %v8857_v56  ;;  %v8864_v18 = vrot.slane %v8863_v44, 2 }
 0x5e6   : > { %v8845_v43 = vrot.slane %v8844_v48, 1  ;;  %v8871_v54 = vrot.slane %v8870_v27, 2  ;;  %v8878_v61 = vrot.slane %v8877_v40, 2  ;;  %v8884_v45 = vmax.f32 %v8882_v36, %v8883_v5 }
 0x5e7   : > { %v15510_v1 = vmax.f32 %v8837_v35, %v8838_v31  ;;  %v8852_v11 = vrot.slane %v8851_v33, 1  ;;  %v8859_v9 = vrot.slane %v8858_v59, 1  ;;  %v8865_v47 = vmax.f32 %v8863_v44, %v8864_v18 }
 0x5e8   : > { %v15512_v30 = vmax.f32 %v8844_v48, %v8845_v43  ;;  %v8872_v26 = vmax.f32 %v8870_v27, %v8871_v54  ;;  %v8879_v41 = vmax.f32 %v8877_v40, %v8878_v61  ;;  %v8885_v29 = vrot.slane %v8884_v45, 2 }
 0x5e9   : > { %v15514_v34 = vmax.f32 %v8851_v33, %v8852_v11  ;;  %v15516_v60 = vmax.f32 %v8858_v59, %v8859_v9  ;;  %v8866_v52 = vrot.slane %v8865_v47, 1  ;;  %v8889_v4 = vsel %vm2628_vm1, %v15478_v23, -inf }
 0x5ea   : > { %v8873_v7 = vrot.slane %v8872_v26, 1  ;;  %v8880_v37 = vrot.slane %v8879_v41, 1  ;;  %v8886_v12 = vmax.f32 %v8884_v45, %v8885_v29  ;;  %v8890_v63 = vrot.slane %v8889_v4, 4 }
 0x5eb   : > { %v15520_v50 = vmax.f32 %v8865_v47, %v8866_v52  ;;  %v8896_v38 = vsel %vm2628_vm1, %v8166_v32, -inf  ;;  %v8903_v2 = vsel %vm2628_vm1, %v15483_v21, -inf  ;;  %v8910_v15 = vsel %vm2628_vm1, %v8167_v19, -inf }
 0x5ec   : > { %v15526_v46 = vmax.f32 %v8872_v26, %v8873_v7  ;;  %v15528_v36 = vmax.f32 %v8879_v41, %v8880_v37  ;;  %v8887_v35 = vrot.slane %v8886_v12, 1  ;;  %v8891_v51 = vmax.f32 %v8889_v4, %v8890_v63 }
 0x5ed   : > { %v8897_v23 = vrot.slane %v8896_v38, 4  ;;  %v8904_v56 = vrot.slane %v8903_v2, 4  ;;  %v8911_v44 = vrot.slane %v8910_v15, 4  ;;  %v8917_v48 = vsel %vm2628_vm1, %v15491_v17, -inf }
 0x5ee   : > { %v15532_v27 = vmax.f32 %v8886_v12, %v8887_v35  ;;  %v8892_v32 = vrot.slane %v8891_v51, 2  ;;  %v8918_v40 = vrot.slane %v8917_v48, 4  ;;  %v8924_v21 = vsel %vm2628_vm1, %v8183_v55, -inf }
 0x5ef   : > { %v8898_v19 = vmax.f32 %v8896_v38, %v8897_v23  ;;  %v8905_v5 = vmax.f32 %v8903_v2, %v8904_v56  ;;  %v8912_v31 = vmax.f32 %v8910_v15, %v8911_v44  ;;  %v8925_v33 = vrot.slane %v8924_v21, 4 }
 0x5f0   : > { %v8893_v59 = vmax.f32 %v8891_v51, %v8892_v32  ;;  %v8919_v18 = vmax.f32 %v8917_v48, %v8918_v40  ;;  %v8931_v43 = vsel %vm2628_vm1, %v15497_v13, -inf  ;;  %v8938_v54 = vsel %vm2628_vm1, %v8184_v57, -inf }
 0x5f1   : > { %v8899_v61 = vrot.slane %v8898_v19, 2  ;;  %v8906_v45 = vrot.slane %v8905_v5, 2  ;;  %v8913_v11 = vrot.slane %v8912_v31, 2  ;;  %v8926_v17 = vmax.f32 %v8924_v21, %v8925_v33 }
 0x5f2   : > { %v8894_v9 = vrot.slane %v8893_v59, 1  ;;  %v8920_v55 = vrot.slane %v8919_v18, 2  ;;  %v8932_v47 = vrot.slane %v8931_v43, 4  ;;  %v8939_v26 = vrot.slane %v8938_v54, 4 }
 0x5f3   : > { %v8900_v41 = vmax.f32 %v8898_v19, %v8899_v61  ;;  %v8907_v29 = vmax.f32 %v8905_v5, %v8906_v45  ;;  %v8914_v52 = vmax.f32 %v8912_v31, %v8913_v11  ;;  %v8927_v4 = vrot.slane %v8926_v17, 2 }
 0x5f4   : > { %v8895_v7 = vmax.f32 %v8893_v59, %v8894_v9  ;;  %v8921_v37 = vmax.f32 %v8919_v18, %v8920_v55  ;;  %v8933_v12 = vmax.f32 %v8931_v43, %v8932_v47  ;;  %v8940_v63 = vmax.f32 %v8938_v54, %v8939_v26 }
 0x5f5   : > { %v8901_v38 = vrot.slane %v8900_v41, 1  ;;  %v8908_v13 = vrot.slane %v8907_v29, 1  ;;  %v8915_v2 = vrot.slane %v8914_v52, 1  ;;  %v8928_v57 = vmax.f32 %v8926_v17, %v8927_v4 }
 0x5f6   : > { %v8922_v15 = vrot.slane %v8921_v37, 1  ;;  %v8934_v35 = vrot.slane %v8933_v12, 2  ;;  %v8941_v51 = vrot.slane %v8940_v63, 2  ;;  %v9633_v23 = vpack.c.bf16 %v15510_v1, %v15510_v1 }
 0x5f7   : > { %v8902_v56 = vmax.f32 %v8900_v41, %v8901_v38  ;;  %v8909_v44 = vmax.f32 %v8907_v29, %v8908_v13  ;;  %v8916_v48 = vmax.f32 %v8914_v52, %v8915_v2  ;;  %v8929_v32 = vrot.slane %v8928_v57, 1 }
 0x5f8   : > { %v8923_v40 = vmax.f32 %v8921_v37, %v8922_v15  ;;  %v8935_v21 = vmax.f32 %v8933_v12, %v8934_v35  ;;  %v8942_v19 = vmax.f32 %v8940_v63, %v8941_v51  ;;  %v9634_v5 = vpack.c.bf16 %v15512_v30, %v15512_v30 }
 0x5f9   : > { %v8930_v31 = vmax.f32 %v8928_v57, %v8929_v32  ;;  %v9635_v33 = vpack.c.bf16 %v15514_v34, %v15514_v34  ;;  %v9636_v59 = vpack.c.bf16 %v15516_v60, %v15516_v60  ;;  %v9637_v1 = vpack.c.bf16 %v15520_v50, %v15520_v50 }
 0x5fa   : > { %v8936_v18 = vrot.slane %v8935_v21, 1  ;;  %v8943_v43 = vrot.slane %v8942_v19, 1  ;;  %v9638_v54 = vpack.c.bf16 %v15526_v46, %v15526_v46  ;;  %v9639_v61 = vpack.c.bf16 %v15528_v36, %v15528_v36 }
 0x5fb   : > { %v9640_v30 = vpack.c.bf16 %v15532_v27, %v15532_v27  ;;  %v9641_v45 = vpack.c.bf16 %v8895_v7, %v8895_v7  ;;  %v9642_v11 = vpack.c.bf16 %v8902_v56, %v8902_v56  ;;  %v9643_v34 = vpack.c.bf16 %v8909_v44, %v8909_v44 }
 0x5fc   : > { %v8937_v17 = vmax.f32 %v8935_v21, %v8936_v18  ;;  %v8944_v9 = vmax.f32 %v8942_v19, %v8943_v43  ;;  %v9644_v60 = vpack.c.bf16 %v8916_v48, %v8916_v48  ;;  %v9645_v55 = vpack.c.bf16 %v8923_v40, %v8923_v40 }
 0x5fd   : > { %v9646_v47 = vpack.c.bf16 %v8930_v31, %v8930_v31  ;;  %v9912_v50 = vunpack.c.l.b16 %v9633_v23  ;;  %v9913_v26 = vunpack.c.l.b16 %v9634_v5  ;;  %v9914_v41 = vunpack.c.l.b16 %v9635_v33 }
 0x5fe   : > { %v9647_v29 = vpack.c.bf16 %v8937_v17, %v8937_v17  ;;  %v9648_v52 = vpack.c.bf16 %v8944_v9, %v8944_v9  ;;  %v9915_v46 = vunpack.c.l.b16 %v9636_v59  ;;  %v9916_v4 = vunpack.c.l.b16 %v9637_v1 }
 0x5ff   : > { %v9917_v37 = vunpack.c.l.b16 %v9638_v54  ;;  %v9918_v36 = vunpack.c.l.b16 %v9639_v61  ;;  %v9919_v12 = vunpack.c.l.b16 %v9640_v30  ;;  %v9920_v63 = vunpack.c.l.b16 %v9641_v45 }
 0x600   : > { %v9921_v27 = vunpack.c.l.b16 %v9642_v11  ;;  %v9922_v7 = vunpack.c.l.b16 %v9643_v34  ;;  %v9923_v38 = vunpack.c.l.b16 %v9644_v60  ;;  %v9924_v13 = vunpack.c.l.b16 %v9645_v55 }
 0x601   : > { %v9925_v2 = vunpack.c.l.b16 %v9646_v47  ;;  %v9926_v57 = vunpack.c.l.b16 %v9647_v29  ;;  %v9927_v15 = vunpack.c.l.b16 %v9648_v52  ;;  %v10038_v35 = vsel %vm4791_vm2, %v9913_v26, %v9912_v50 }
 0x602   : > { %v10039_v51 = vsel %vm4793_vm3, %v9914_v41, %v10038_v35  ;;  %v10045_v23 = vsel %vm4791_vm2, %v9921_v27, %v9920_v63  ;;  %v7922_v56 = vmul.f32 %v16393_v0, %v15313_v42  ;;  %v7923_v44 = vmul.f32 %v16395_v22, %v15313_v42 }
 0x603   : > { %v10040_v48 = vsel %vm4795_vm4, %v9915_v46, %v10039_v51  ;;  %v10046_v32 = vsel %vm4793_vm3, %v9922_v7, %v10045_v23  ;;  %v7924_v40 = vmul.f32 %v16392_v20, %v15313_v42  ;;  %v7925_v21 = vmul.f32 %v16394_v3, %v15313_v42 }
 0x604   : > { %v10041_v19 = vsel %vm4797_vm5, %v9916_v4, %v10040_v48  ;;  %v10047_v5 = vsel %vm4795_vm4, %v9923_v38, %v10046_v32  ;;  %v7961_v31 = vadd.f32 %v15318_v62, %v7922_v56  ;;  %v7962_v0 = vadd.f32 %v15318_v62, %v7923_v44 }
 0x605   : > { %v10042_v22 = vsel %vm4799_vm6, %v9917_v37, %v10041_v19  ;;  %v10048_v33 = vsel %vm4797_vm5, %v9924_v13, %v10047_v5  ;;  %v7963_v59 = vadd.f32 %v15318_v62, %v7924_v40  ;;  %v7964_v1 = vadd.f32 %v15318_v62, %v7925_v21 }
 0x606   : > { %v10043_v20 = vsel %vm4801_vm7, %v9918_v36, %v10042_v22  ;;  %v10049_v3 = vsel %vm4799_vm6, %v9925_v2, %v10048_v33  ;;  %v7993_v42 = vmax.f32 %v7961_v31, 0.0  ;;  %v7994_v18 = vmax.f32 %v7962_v0, 0.0 }
 0x607   : > { %v10044_v43 = vsel %vm4803_vm8, %v9919_v12, %v10043_v20  ;;  %v10050_v54 = vsel %vm4801_vm7, %v9926_v57, %v10049_v3  ;;  %v7995_v61 = vmax.f32 %v7963_v59, 0.0  ;;  %v7996_v30 = vmax.f32 %v7964_v1, 0.0 }
 0x608   : > { %v10051_v45 = vsel %vm4803_vm8, %v9927_v15, %v10050_v54  ;;  %v8185_v11 = vcombine.high %v7993_v42, %v7993_v42  ;;  %v8192_v34 = vrot.slane %v7993_v42, %v16461_v14  ;;  %v8202_v17 = vcombine.high %v7994_v18, %v7994_v18 }
 0x609   : > { %v10137_v9 = vpack.c.b16 %v10051_v45, %v10044_v43  ;;  %v8209_v62 = vrot.slane %v7994_v18, %v16461_v14  ;;  %v8219_v60 = vcombine.high %v7995_v61, %v7995_v61  ;;  %v15589_v55 = vrot.slane %v7995_v61, %v16461_v14 }
 0x60a   : > { %v8199_v47 = vrot.slane %v8185_v11, %v16461_v14  ;;  %v8200_v50 = vcombine.high %v8192_v34, %v8192_v34  ;;  %v8216_v26 = vrot.slane %v8202_v17, %v16461_v14  ;;  %v8236_v41 = vcombine.high %v7996_v30, %v7996_v30 }
 0x60b   : > { %11937 = vmatmul.mubr.bf16.vlgmr.msra.gmra.mrb[0].mxu0 %v10137_v9  ;;  %v8217_v29 = vcombine.high %v8209_v62, %v8209_v62  ;;  %v15594_v52 = vrot.slane %v8219_v60, %v16461_v14  ;;  %v8234_v46 = vcombine.high %v15589_v55, %v15589_v55  ;;  %v15599_v4 = vrot.slane %v7996_v30, %v16461_v14 }
 0x60c   : > { %v8201_v37 = vcombine.high %v8199_v47, %v8199_v47  ;;  %v8218_v36 = vcombine.high %v8216_v26, %v8216_v26  ;;  %v15602_v12 = vrot.slane %v8236_v41, %v16461_v14  ;;  %v8945_v63 = vsel %vm2628_vm1, %v8192_v34, -inf }
 0x60d   : > { %v8235_v27 = vcombine.high %v15594_v52, %v15594_v52  ;;  %v8251_v7 = vcombine.high %v15599_v4, %v15599_v4  ;;  %v8946_v38 = vrot.slane %v8945_v63, 4  ;;  %v8952_v13 = vsel %vm2628_vm1, %v8200_v50, -inf }
 0x60e   : > { %v8252_v2 = vcombine.high %v15602_v12, %v15602_v12  ;;  %v8953_v57 = vrot.slane %v8952_v13, 4  ;;  %v8959_v15 = vsel %vm2628_vm1, %v8199_v47, -inf  ;;  %v8966_v35 = vsel %vm2628_vm1, %v8201_v37, -inf }
 0x60f   : > { %v8947_v51 = vmax.f32 %v8945_v63, %v8946_v38  ;;  %v8960_v23 = vrot.slane %v8959_v15, 4  ;;  %v8967_v56 = vrot.slane %v8966_v35, 4  ;;  %v8973_v44 = vsel %vm2628_vm1, %v8209_v62, -inf }
 0x610   : > { %v8954_v48 = vmax.f32 %v8952_v13, %v8953_v57  ;;  %v8974_v32 = vrot.slane %v8973_v44, 4  ;;  %v8980_v40 = vsel %vm2628_vm1, %v8217_v29, -inf  ;;  %v8987_v21 = vsel %vm2628_vm1, %v8216_v26, -inf }
 0x611   : > { %v8948_v19 = vrot.slane %v8947_v51, 2  ;;  %v8961_v5 = vmax.f32 %v8959_v15, %v8960_v23  ;;  %v8968_v31 = vmax.f32 %v8966_v35, %v8967_v56  ;;  %v8981_v0 = vrot.slane %v8980_v40, 4 }
 0x612   : > { %v8955_v22 = vrot.slane %v8954_v48, 2  ;;  %v8975_v33 = vmax.f32 %v8973_v44, %v8974_v32  ;;  %v8988_v59 = vrot.slane %v8987_v21, 4  ;;  %v8994_v1 = vsel %vm2628_vm1, %v8218_v36, -inf }
 0x613   : > { %v8949_v20 = vmax.f32 %v8947_v51, %v8948_v19  ;;  %v8962_v3 = vrot.slane %v8961_v5, 2  ;;  %v8969_v42 = vrot.slane %v8968_v31, 2  ;;  %v8982_v18 = vmax.f32 %v8980_v40, %v8981_v0 }
 0x614   : > { %v8956_v43 = vmax.f32 %v8954_v48, %v8955_v22  ;;  %v8976_v54 = vrot.slane %v8975_v33, 2  ;;  %v8989_v61 = vmax.f32 %v8987_v21, %v8988_v59  ;;  %v8995_v30 = vrot.slane %v8994_v1, 4 }
 0x615   : > { %v8950_v45 = vrot.slane %v8949_v20, 1  ;;  %v8963_v11 = vmax.f32 %v8961_v5, %v8962_v3  ;;  %v8970_v34 = vmax.f32 %v8968_v31, %v8969_v42  ;;  %v8983_v17 = vrot.slane %v8982_v18, 2 }
 0x616   : > { %v8957_v9 = vrot.slane %v8956_v43, 1  ;;  %v8977_v62 = vmax.f32 %v8975_v33, %v8976_v54  ;;  %v8990_v60 = vrot.slane %v8989_v61, 2  ;;  %v8996_v47 = vmax.f32 %v8994_v1, %v8995_v30 }
 0x617   : > { %v15618_v50 = vmax.f32 %v8949_v20, %v8950_v45  ;;  %v8964_v26 = vrot.slane %v8963_v11, 1  ;;  %v8971_v41 = vrot.slane %v8970_v34, 1  ;;  %v8984_v29 = vmax.f32 %v8982_v18, %v8983_v17 }
 0x618   : > { %v15620_v37 = vmax.f32 %v8956_v43, %v8957_v9  ;;  %v8978_v36 = vrot.slane %v8977_v62, 1  ;;  %v8991_v63 = vmax.f32 %v8989_v61, %v8990_v60  ;;  %v8997_v38 = vrot.slane %v8996_v47, 2 }
 0x619   : > { %v15622_v13 = vmax.f32 %v8963_v11, %v8964_v26  ;;  %v15624_v57 = vmax.f32 %v8970_v34, %v8971_v41  ;;  %v8985_v15 = vrot.slane %v8984_v29, 1  ;;  %v9001_v35 = vsel %vm2628_vm1, %v15589_v55, -inf }
 0x61a   : > { %v15628_v51 = vmax.f32 %v8977_v62, %v8978_v36  ;;  %v8992_v23 = vrot.slane %v8991_v63, 1  ;;  %v8998_v56 = vmax.f32 %v8996_v47, %v8997_v38  ;;  %v9002_v44 = vrot.slane %v9001_v35, 4 }
 0x61b   : > { %v15630_v48 = vmax.f32 %v8984_v29, %v8985_v15  ;;  %v9008_v32 = vsel %vm2628_vm1, %v8234_v46, -inf  ;;  %v9015_v40 = vsel %vm2628_vm1, %v15594_v52, -inf  ;;  %v9022_v21 = vsel %vm2628_vm1, %v8235_v27, -inf }
 0x61c   : > { %v15639_v19 = vmax.f32 %v8991_v63, %v8992_v23  ;;  %v8999_v5 = vrot.slane %v8998_v56, 1  ;;  %v9003_v31 = vmax.f32 %v9001_v35, %v9002_v44  ;;  %v9009_v0 = vrot.slane %v9008_v32, 4 }
 0x61d   : > { %v9016_v22 = vrot.slane %v9015_v40, 4  ;;  %v9023_v33 = vrot.slane %v9022_v21, 4  ;;  %v9029_v59 = vsel %vm2628_vm1, %v15599_v4, -inf  ;;  %v9036_v55 = vsel %vm2628_vm1, %v8251_v7, -inf }
 0x61e   : > { %v15647_v46 = vmax.f32 %v8998_v56, %v8999_v5  ;;  %v9004_v52 = vrot.slane %v9003_v31, 2  ;;  %v9010_v1 = vmax.f32 %v9008_v32, %v9009_v0  ;;  %v9030_v27 = vrot.slane %v9029_v59, 4 }
 0x61f   : > { %v9017_v20 = vmax.f32 %v9015_v40, %v9016_v22  ;;  %v9024_v3 = vmax.f32 %v9022_v21, %v9023_v33  ;;  %v9037_v42 = vrot.slane %v9036_v55, 4  ;;  %v9043_v18 = vsel %vm2628_vm1, %v15602_v12, -inf }
 0x620   : > { %v9005_v43 = vmax.f32 %v9003_v31, %v9004_v52  ;;  %v9011_v54 = vrot.slane %v9010_v1, 2  ;;  %v9031_v61 = vmax.f32 %v9029_v59, %v9030_v27  ;;  %v9044_v30 = vrot.slane %v9043_v18, 4 }
 0x621   : > { %v9018_v45 = vrot.slane %v9017_v20, 2  ;;  %v9025_v11 = vrot.slane %v9024_v3, 2  ;;  %v9038_v4 = vmax.f32 %v9036_v55, %v9037_v42  ;;  %v9050_v7 = vsel %vm2628_vm1, %v8252_v2, -inf }
 0x622   : > { %v9006_v34 = vrot.slane %v9005_v43, 1  ;;  %v9012_v17 = vmax.f32 %v9010_v1, %v9011_v54  ;;  %v9032_v9 = vrot.slane %v9031_v61, 2  ;;  %v9045_v62 = vmax.f32 %v9043_v18, %v9044_v30 }
 0x623   : > { %v9019_v60 = vmax.f32 %v9017_v20, %v9018_v45  ;;  %v9026_v47 = vmax.f32 %v9024_v3, %v9025_v11  ;;  %v9039_v26 = vrot.slane %v9038_v4, 2  ;;  %v9051_v41 = vrot.slane %v9050_v7, 4 }
 0x624   : > { %v9007_v29 = vmax.f32 %v9005_v43, %v9006_v34  ;;  %v9013_v36 = vrot.slane %v9012_v17, 1  ;;  %v9033_v63 = vmax.f32 %v9031_v61, %v9032_v9  ;;  %v9046_v38 = vrot.slane %v9045_v62, 2 }
 0x625   : > { %v9020_v15 = vrot.slane %v9019_v60, 1  ;;  %v9027_v35 = vrot.slane %v9026_v47, 1  ;;  %v9040_v23 = vmax.f32 %v9038_v4, %v9039_v26  ;;  %v9052_v56 = vmax.f32 %v9050_v7, %v9051_v41 }
 0x626   : > { %v9014_v44 = vmax.f32 %v9012_v17, %v9013_v36  ;;  %v9034_v12 = vrot.slane %v9033_v63, 1  ;;  %v9047_v32 = vmax.f32 %v9045_v62, %v9046_v38  ;;  %v9649_v2 = vpack.c.bf16 %v15618_v50, %v15618_v50 }
 0x627   : > { %v9021_v40 = vmax.f32 %v9019_v60, %v9020_v15  ;;  %v9028_v21 = vmax.f32 %v9026_v47, %v9027_v35  ;;  %v9041_v5 = vrot.slane %v9040_v23, 1  ;;  %v9053_v31 = vrot.slane %v9052_v56, 2 }
 0x628   : > { %v9035_v0 = vmax.f32 %v9033_v63, %v9034_v12  ;;  %v9048_v22 = vrot.slane %v9047_v32, 1  ;;  %v9650_v33 = vpack.c.bf16 %v15620_v37, %v15620_v37  ;;  %v9651_v59 = vpack.c.bf16 %v15622_v13, %v15622_v13 }
 0x629   : > { %v9042_v55 = vmax.f32 %v9040_v23, %v9041_v5  ;;  %v9054_v52 = vmax.f32 %v9052_v56, %v9053_v31  ;;  %v9652_v1 = vpack.c.bf16 %v15624_v57, %v15624_v57  ;;  %v9653_v50 = vpack.c.bf16 %v15628_v51, %v15628_v51  ;;  %v15678_v23 = vld [vmem:[%s16365_s5] ss:$0 sm:$0xff] }
 0x62a   : > { %v9049_v27 = vmax.f32 %v9047_v32, %v9048_v22  ;;  %v9654_v20 = vpack.c.bf16 %v15630_v48, %v15630_v48  ;;  %v9655_v3 = vpack.c.bf16 %v15639_v19, %v15639_v19  ;;  %v9656_v37 = vpack.c.bf16 %v15647_v46, %v15647_v46 }
 0x62b   : > { %v9055_v42 = vrot.slane %v9054_v52, 1  ;;  %v9657_v13 = vpack.c.bf16 %v9007_v29, %v9007_v29  ;;  %v9658_v18 = vpack.c.bf16 %v9014_v44, %v9014_v44  ;;  %v9659_v43 = vpack.c.bf16 %v9021_v40, %v9021_v40 }
 0x62c   : > { %v9660_v54 = vpack.c.bf16 %v9028_v21, %v9028_v21  ;;  %v9661_v61 = vpack.c.bf16 %v9035_v0, %v9035_v0  ;;  %v9662_v57 = vpack.c.bf16 %v9042_v55, %v9042_v55  ;;  %v9663_v30 = vpack.c.bf16 %v9049_v27, %v9049_v27 }
 0x62d   : > { %v9056_v45 = vmax.f32 %v9054_v52, %v9055_v42  ;;  %v9928_v51 = vunpack.c.l.b16 %v9649_v2  ;;  %v9929_v11 = vunpack.c.l.b16 %v9650_v33  ;;  %v9930_v4 = vunpack.c.l.b16 %v9651_v59 }
 0x62e   : > { %v9931_v7 = vunpack.c.l.b16 %v9652_v1  ;;  %v9932_v48 = vunpack.c.l.b16 %v9653_v50  ;;  %v9933_v34 = vunpack.c.l.b16 %v9654_v20  ;;  %v9934_v17 = vunpack.c.l.b16 %v9655_v3 }
 0x62f   : > { %v9664_v19 = vpack.c.bf16 %v9056_v45, %v9056_v45  ;;  %v9935_v9 = vunpack.c.l.b16 %v9656_v37  ;;  %v9936_v62 = vunpack.c.l.b16 %v9657_v13  ;;  %v9937_v46 = vunpack.c.l.b16 %v9658_v18 }
 0x630   : > { %v9938_v60 = vunpack.c.l.b16 %v9659_v43  ;;  %v9939_v47 = vunpack.c.l.b16 %v9660_v54  ;;  %v9940_v26 = vunpack.c.l.b16 %v9661_v61  ;;  %v9941_v41 = vunpack.c.l.b16 %v9662_v57 }
 0x631   : > { %v9942_v29 = vunpack.c.l.b16 %v9663_v30  ;;  %v9943_v36 = vunpack.c.l.b16 %v9664_v19  ;;  %v10052_v63 = vsel %vm4791_vm2, %v9929_v11, %v9928_v51  ;;  %v10059_v38 = vsel %vm4791_vm2, %v9937_v46, %v9936_v62 }
 0x632   : > { %v10053_v15 = vsel %vm4793_vm3, %v9930_v4, %v10052_v63  ;;  %v10060_v35 = vsel %vm4793_vm3, %v9938_v60, %v10059_v38  ;;  %v7926_v56 = vmul.f32 %v15678_v23, %v16397_v6  ;;  %v7927_v44 = vmul.f32 %v15678_v23, %v16399_v58  ;;  %v15695_v6 = vld [vmem:[%s16366_s6] ss:$0 sm:$0xff] }
 0x633   : > { %v10054_v12 = vsel %vm4795_vm4, %v9931_v7, %v10053_v15  ;;  %v10061_v32 = vsel %vm4795_vm4, %v9939_v47, %v10060_v35  ;;  %v7928_v2 = vmul.f32 %v15678_v23, %v16396_v25  ;;  %v7929_v40 = vmul.f32 %v15678_v23, %v16398_v24 }
 0x634   : > { %v10055_v21 = vsel %vm4797_vm5, %v9932_v48, %v10054_v12  ;;  %v10062_v5 = vsel %vm4797_vm5, %v9940_v26, %v10061_v32  ;;  %v7965_v58 = vadd.f32 %v15695_v6, %v7926_v56  ;;  %v7966_v31 = vadd.f32 %v15695_v6, %v7927_v44 }
 0x635   : > { %v10056_v0 = vsel %vm4799_vm6, %v9933_v34, %v10055_v21  ;;  %v10063_v25 = vsel %vm4799_vm6, %v9941_v41, %v10062_v5  ;;  %v7967_v22 = vadd.f32 %v15695_v6, %v7928_v2  ;;  %v7968_v24 = vadd.f32 %v15695_v6, %v7929_v40 }
 0x636   : > { %v10057_v33 = vsel %vm4801_vm7, %v9934_v17, %v10056_v0  ;;  %v10064_v59 = vsel %vm4801_vm7, %v9942_v29, %v10063_v25  ;;  %v7997_v55 = vmax.f32 %v7965_v58, 0.0  ;;  %v7998_v52 = vmax.f32 %v7966_v31, 0.0 }
 0x637   : > { %v10058_v1 = vsel %vm4803_vm8, %v9935_v9, %v10057_v33  ;;  %v10065_v50 = vsel %vm4803_vm8, %v9943_v36, %v10064_v59  ;;  %v7999_v27 = vmax.f32 %v7967_v22, 0.0  ;;  %v8000_v20 = vmax.f32 %v7968_v24, 0.0 }
 0x638   : > { %v10138_v3 = vpack.c.b16 %v10065_v50, %v10058_v1  ;;  %v8253_v37 = vcombine.high %v7997_v55, %v7997_v55  ;;  %v8260_v42 = vrot.slane %v7997_v55, %v16461_v14  ;;  %v8270_v13 = vcombine.high %v7998_v52, %v7998_v52 }
 0x639   : > { %v8277_v18 = vrot.slane %v7998_v52, %v16461_v14  ;;  %v8287_v43 = vcombine.high %v7999_v27, %v7999_v27  ;;  %v15710_v54 = vrot.slane %v7999_v27, %v16461_v14  ;;  %v8304_v61 = vcombine.high %v8000_v20, %v8000_v20 }
 0x63a   : > { %11940 = vmatprep.mubr.bf16.mxu0 %v10138_v3  ;;  %v8267_v57 = vrot.slane %v8253_v37, %v16461_v14  ;;  %v8268_v30 = vcombine.high %v8260_v42, %v8260_v42  ;;  %v8284_v45 = vrot.slane %v8270_v13, %v16461_v14  ;;  %v15715_v51 = vrot.slane %v8000_v20, %v16461_v14 }
 0x63b   : > { %v8285_v11 = vcombine.high %v8277_v18, %v8277_v18  ;;  %v15718_v4 = vrot.slane %v8287_v43, %v16461_v14  ;;  %v8302_v7 = vcombine.high %v15710_v54, %v15710_v54  ;;  %v15723_v48 = vrot.slane %v8304_v61, %v16461_v14 }
 0x63c   : > { %v8269_v34 = vcombine.high %v8267_v57, %v8267_v57  ;;  %v8286_v17 = vcombine.high %v8284_v45, %v8284_v45  ;;  %v8319_v19 = vcombine.high %v15715_v51, %v15715_v51  ;;  %v9057_v9 = vsel %vm2628_vm1, %v8260_v42, -inf }
 0x63d   : > { %v8303_v62 = vcombine.high %v15718_v4, %v15718_v4  ;;  %v8320_v46 = vcombine.high %v15723_v48, %v15723_v48  ;;  %v9058_v60 = vrot.slane %v9057_v9, 4  ;;  %v9064_v47 = vsel %vm2628_vm1, %v8268_v30, -inf }
 0x63e   : > { %v9065_v26 = vrot.slane %v9064_v47, 4  ;;  %v9071_v41 = vsel %vm2628_vm1, %v8267_v57, -inf  ;;  %v9078_v29 = vsel %vm2628_vm1, %v8269_v34, -inf  ;;  %v9085_v36 = vsel %vm2628_vm1, %v8277_v18, -inf }
 0x63f   : > { %v9059_v63 = vmax.f32 %v9057_v9, %v9058_v60  ;;  %v9072_v38 = vrot.slane %v9071_v41, 4  ;;  %v9079_v15 = vrot.slane %v9078_v29, 4  ;;  %v9086_v35 = vrot.slane %v9085_v36, 4 }
 0x640   : > { %v9066_v56 = vmax.f32 %v9064_v47, %v9065_v26  ;;  %v9092_v44 = vsel %vm2628_vm1, %v8285_v11, -inf  ;;  %v9099_v12 = vsel %vm2628_vm1, %v8284_v45, -inf  ;;  %v9106_v32 = vsel %vm2628_vm1, %v8286_v17, -inf }
 0x641   : > { %v9060_v2 = vrot.slane %v9059_v63, 2  ;;  %v9073_v40 = vmax.f32 %v9071_v41, %v9072_v38  ;;  %v9080_v21 = vmax.f32 %v9078_v29, %v9079_v15  ;;  %v9087_v5 = vmax.f32 %v9085_v36, %v9086_v35 }
 0x642   : > { %v9067_v58 = vrot.slane %v9066_v56, 2  ;;  %v9093_v31 = vrot.slane %v9092_v44, 4  ;;  %v9100_v0 = vrot.slane %v9099_v12, 4  ;;  %v9107_v25 = vrot.slane %v9106_v32, 4 }
 0x643   : > { %v9061_v22 = vmax.f32 %v9059_v63, %v9060_v2  ;;  %v9074_v24 = vrot.slane %v9073_v40, 2  ;;  %v9081_v33 = vrot.slane %v9080_v21, 2  ;;  %v9088_v59 = vrot.slane %v9087_v5, 2 }
 0x644   : > { %v9068_v55 = vmax.f32 %v9066_v56, %v9067_v58  ;;  %v9094_v52 = vmax.f32 %v9092_v44, %v9093_v31  ;;  %v9101_v1 = vmax.f32 %v9099_v12, %v9100_v0  ;;  %v9108_v50 = vmax.f32 %v9106_v32, %v9107_v25 }
 0x645   : > { %v9062_v27 = vrot.slane %v9061_v22, 1  ;;  %v9075_v20 = vmax.f32 %v9073_v40, %v9074_v24  ;;  %v9082_v3 = vmax.f32 %v9080_v21, %v9081_v33  ;;  %v9089_v37 = vmax.f32 %v9087_v5, %v9088_v59 }
 0x646   : > { %v9069_v42 = vrot.slane %v9068_v55, 1  ;;  %v9095_v13 = vrot.slane %v9094_v52, 2  ;;  %v9102_v18 = vrot.slane %v9101_v1, 2  ;;  %v9109_v43 = vrot.slane %v9108_v50, 2 }
 0x647   : > { %v15739_v61 = vmax.f32 %v9061_v22, %v9062_v27  ;;  %v9076_v57 = vrot.slane %v9075_v20, 1  ;;  %v9083_v30 = vrot.slane %v9082_v3, 1  ;;  %v9090_v45 = vrot.slane %v9089_v37, 1 }
 0x648   : > { %v15741_v11 = vmax.f32 %v9068_v55, %v9069_v42  ;;  %v9096_v34 = vmax.f32 %v9094_v52, %v9095_v13  ;;  %v9103_v17 = vmax.f32 %v9101_v1, %v9102_v18  ;;  %v9110_v9 = vmax.f32 %v9108_v50, %v9109_v43 }
 0x649   : > { %v15743_v60 = vmax.f32 %v9075_v20, %v9076_v57  ;;  %v15745_v47 = vmax.f32 %v9082_v3, %v9083_v30  ;;  %v15747_v26 = vmax.f32 %v9089_v37, %v9090_v45  ;;  %v9113_v41 = vsel %vm2628_vm1, %v15710_v54, -inf }
 0x64a   : > { %v9097_v29 = vrot.slane %v9096_v34, 1  ;;  %v9104_v36 = vrot.slane %v9103_v17, 1  ;;  %v9111_v63 = vrot.slane %v9110_v9, 1  ;;  %v9114_v38 = vrot.slane %v9113_v41, 4 }
 0x64b   : > { %v9120_v15 = vsel %vm2628_vm1, %v8302_v7, -inf  ;;  %v9127_v35 = vsel %vm2628_vm1, %v15718_v4, -inf  ;;  %v9134_v56 = vsel %vm2628_vm1, %v8303_v62, -inf  ;;  %v9141_v44 = vsel %vm2628_vm1, %v15715_v51, -inf }
 0x64c   : > { %v15757_v12 = vmax.f32 %v9096_v34, %v9097_v29  ;;  %v15759_v32 = vmax.f32 %v9103_v17, %v9104_v36  ;;  %v15761_v2 = vmax.f32 %v9110_v9, %v9111_v63  ;;  %v9115_v54 = vmax.f32 %v9113_v41, %v9114_v38 }
 0x64d   : > { %v9121_v40 = vrot.slane %v9120_v15, 4  ;;  %v9128_v21 = vrot.slane %v9127_v35, 4  ;;  %v9135_v5 = vrot.slane %v9134_v56, 4  ;;  %v9142_v58 = vrot.slane %v9141_v44, 4 }
 0x64e   : > { %v9116_v7 = vrot.slane %v9115_v54, 2  ;;  %v9148_v4 = vsel %vm2628_vm1, %v8319_v19, -inf  ;;  %v9155_v62 = vsel %vm2628_vm1, %v15723_v48, -inf  ;;  %v9162_v31 = vsel %vm2628_vm1, %v8320_v46, -inf }
 0x64f   : > { %v9122_v0 = vmax.f32 %v9120_v15, %v9121_v40  ;;  %v9129_v25 = vmax.f32 %v9127_v35, %v9128_v21  ;;  %v9136_v22 = vmax.f32 %v9134_v56, %v9135_v5  ;;  %v9143_v24 = vmax.f32 %v9141_v44, %v9142_v58 }
 0x650   : > { %v9117_v33 = vmax.f32 %v9115_v54, %v9116_v7  ;;  %v9149_v59 = vrot.slane %v9148_v4, 4  ;;  %v9156_v55 = vrot.slane %v9155_v62, 4  ;;  %v9163_v52 = vrot.slane %v9162_v31, 4 }
 0x651   : > { %v9123_v1 = vrot.slane %v9122_v0, 2  ;;  %v9130_v51 = vrot.slane %v9129_v25, 2  ;;  %v9137_v50 = vrot.slane %v9136_v22, 2  ;;  %v9144_v19 = vrot.slane %v9143_v24, 2 }
 0x652   : > { %v9118_v27 = vrot.slane %v9117_v33, 1  ;;  %v9150_v20 = vmax.f32 %v9148_v4, %v9149_v59  ;;  %v9157_v3 = vmax.f32 %v9155_v62, %v9156_v55  ;;  %v9164_v37 = vmax.f32 %v9162_v31, %v9163_v52 }
 0x653   : > { %v9124_v42 = vmax.f32 %v9122_v0, %v9123_v1  ;;  %v9131_v48 = vmax.f32 %v9129_v25, %v9130_v51  ;;  %v9138_v13 = vmax.f32 %v9136_v22, %v9137_v50  ;;  %v9145_v46 = vmax.f32 %v9143_v24, %v9144_v19 }
 0x654   : > { %v9119_v18 = vmax.f32 %v9117_v33, %v9118_v27  ;;  %v9151_v43 = vrot.slane %v9150_v20, 2  ;;  %v9158_v57 = vrot.slane %v9157_v3, 2  ;;  %v9165_v30 = vrot.slane %v9164_v37, 2 }
 0x655   : > { %v9125_v45 = vrot.slane %v9124_v42, 1  ;;  %v9132_v34 = vrot.slane %v9131_v48, 1  ;;  %v9139_v17 = vrot.slane %v9138_v13, 1  ;;  %v9146_v9 = vrot.slane %v9145_v46, 1 }
 0x656   : > { %v9152_v41 = vmax.f32 %v9150_v20, %v9151_v43  ;;  %v9159_v29 = vmax.f32 %v9157_v3, %v9158_v57  ;;  %v9166_v36 = vmax.f32 %v9164_v37, %v9165_v30  ;;  %v9665_v63 = vpack.c.bf16 %v15739_v61, %v15739_v61 }
 0x657   : > { %v9126_v38 = vmax.f32 %v9124_v42, %v9125_v45  ;;  %v9133_v15 = vmax.f32 %v9131_v48, %v9132_v34  ;;  %v9140_v35 = vmax.f32 %v9138_v13, %v9139_v17  ;;  %v9147_v56 = vmax.f32 %v9145_v46, %v9146_v9 }
 0x658   : > { %v9153_v44 = vrot.slane %v9152_v41, 1  ;;  %v9160_v54 = vrot.slane %v9159_v29, 1  ;;  %v9167_v40 = vrot.slane %v9166_v36, 1  ;;  %v9666_v21 = vpack.c.bf16 %v15741_v11, %v15741_v11 }
 0x659   : > { %v9667_v5 = vpack.c.bf16 %v15743_v60, %v15743_v60  ;;  %v9668_v58 = vpack.c.bf16 %v15745_v47, %v15745_v47  ;;  %v9669_v7 = vpack.c.bf16 %v15747_v26, %v15747_v26  ;;  %v9670_v61 = vpack.c.bf16 %v15757_v12, %v15757_v12 }
 0x65a   : > { %v9154_v4 = vmax.f32 %v9152_v41, %v9153_v44  ;;  %v9161_v62 = vmax.f32 %v9159_v29, %v9160_v54  ;;  %v9168_v31 = vmax.f32 %v9166_v36, %v9167_v40  ;;  %v9671_v0 = vpack.c.bf16 %v15759_v32, %v15759_v32 }
 0x65b   : > { %v9672_v11 = vpack.c.bf16 %v15761_v2, %v15761_v2  ;;  %v9673_v25 = vpack.c.bf16 %v9119_v18, %v9119_v18  ;;  %v9674_v60 = vpack.c.bf16 %v9126_v38, %v9126_v38  ;;  %v9675_v22 = vpack.c.bf16 %v9133_v15, %v9133_v15 }
 0x65c   : > { %v9676_v24 = vpack.c.bf16 %v9140_v35, %v9140_v35  ;;  %v9677_v47 = vpack.c.bf16 %v9147_v56, %v9147_v56  ;;  %v9678_v33 = vpack.c.bf16 %v9154_v4, %v9154_v4  ;;  %v9679_v59 = vpack.c.bf16 %v9161_v62, %v9161_v62 }
 0x65d   : > { %v9680_v26 = vpack.c.bf16 %v9168_v31, %v9168_v31  ;;  %v9944_v55 = vunpack.c.l.b16 %v9665_v63  ;;  %v9945_v52 = vunpack.c.l.b16 %v9666_v21  ;;  %v9946_v12 = vunpack.c.l.b16 %v9667_v5 }
 0x65e   : > { %v9947_v1 = vunpack.c.l.b16 %v9668_v58  ;;  %v9948_v51 = vunpack.c.l.b16 %v9669_v7  ;;  %v9949_v50 = vunpack.c.l.b16 %v9670_v61  ;;  %v9950_v19 = vunpack.c.l.b16 %v9671_v0 }
 0x65f   : > { %v9951_v27 = vunpack.c.l.b16 %v9672_v11  ;;  %v9952_v32 = vunpack.c.l.b16 %v9673_v25  ;;  %v9953_v20 = vunpack.c.l.b16 %v9674_v60  ;;  %v9954_v3 = vunpack.c.l.b16 %v9675_v22 }
 0x660   : > { %v9955_v2 = vunpack.c.l.b16 %v9676_v24  ;;  %v9956_v37 = vunpack.c.l.b16 %v9677_v47  ;;  %v9957_v42 = vunpack.c.l.b16 %v9678_v33  ;;  %v9958_v48 = vunpack.c.l.b16 %v9679_v59 }
 0x661   : > { %v9959_v13 = vunpack.c.l.b16 %v9680_v26  ;;  %v10066_v46 = vsel %vm4791_vm2, %v9945_v52, %v9944_v55  ;;  %v10073_v18 = vsel %vm4791_vm2, %v9953_v20, %v9952_v32  ;;  %v7930_v43 = vmul.f32 %v15678_v23, %v16401_v39 }
 0x662   : > { %v10067_v57 = vsel %vm4793_vm3, %v9946_v12, %v10066_v46  ;;  %v10074_v30 = vsel %vm4793_vm3, %v9954_v3, %v10073_v18  ;;  %v7931_v45 = vmul.f32 %v15678_v23, %v16403_v8  ;;  %v7932_v34 = vmul.f32 %v15678_v23, %v16400_v10 }
 0x663   : > { %v10068_v17 = vsel %vm4795_vm4, %v9947_v1, %v10067_v57  ;;  %v10075_v9 = vsel %vm4795_vm4, %v9955_v2, %v10074_v30  ;;  %v7933_v41 = vmul.f32 %v15678_v23, %v16402_v53  ;;  %v7969_v29 = vadd.f32 %v15695_v6, %v7930_v43 }
 0x664   : > { %v10069_v39 = vsel %vm4797_vm5, %v9948_v51, %v10068_v17  ;;  %v10076_v36 = vsel %vm4797_vm5, %v9956_v37, %v10075_v9  ;;  %v7970_v63 = vadd.f32 %v15695_v6, %v7931_v45  ;;  %v7971_v8 = vadd.f32 %v15695_v6, %v7932_v34 }
 0x665   : > { %v10070_v38 = vsel %vm4799_vm6, %v9949_v50, %v10069_v39  ;;  %v10077_v10 = vsel %vm4799_vm6, %v9957_v42, %v10076_v36  ;;  %v7972_v15 = vadd.f32 %v15695_v6, %v7933_v41  ;;  %v8001_v35 = vmax.f32 %v7969_v29, 0.0 }
 0x666   : > { %v10071_v56 = vsel %vm4801_vm7, %v9950_v19, %v10070_v38  ;;  %v10078_v53 = vsel %vm4801_vm7, %v9958_v48, %v10077_v10  ;;  %v8002_v44 = vmax.f32 %v7970_v63, 0.0  ;;  %v8003_v54 = vmax.f32 %v7971_v8, 0.0 }
 0x667   : > { %v10072_v40 = vsel %vm4803_vm8, %v9951_v27, %v10071_v56  ;;  %v10079_v21 = vsel %vm4803_vm8, %v9959_v13, %v10078_v53  ;;  %v8004_v5 = vmax.f32 %v7972_v15, 0.0  ;;  %v8321_v58 = vcombine.high %v8001_v35, %v8001_v35 }
 0x668   : > { %v10139_v7 = vpack.c.b16 %v10079_v21, %v10072_v40  ;;  %v8328_v61 = vrot.slane %v8001_v35, %v16461_v14  ;;  %v8338_v4 = vcombine.high %v8002_v44, %v8002_v44  ;;  %v8345_v62 = vrot.slane %v8002_v44, %v16461_v14 }
 0x669   : > { %v8335_v31 = vrot.slane %v8321_v58, %v16461_v14  ;;  %v8355_v0 = vcombine.high %v8003_v54, %v8003_v54  ;;  %v15819_v11 = vrot.slane %v8003_v54, %v16461_v14  ;;  %v8372_v25 = vcombine.high %v8004_v5, %v8004_v5 }
 0x66a   : > { %11941 = vmatmul.mubr.bf16.gmra.mrb[4].mxu0 %v10139_v7  ;;  %v8336_v60 = vcombine.high %v8328_v61, %v8328_v61  ;;  %v8352_v22 = vrot.slane %v8338_v4, %v16461_v14  ;;  %v8353_v24 = vcombine.high %v8345_v62, %v8345_v62  ;;  %v15823_v47 = vrot.slane %v8004_v5, %v16461_v14 }
 0x66b   : > { %v8337_v33 = vcombine.high %v8335_v31, %v8335_v31  ;;  %v15826_v59 = vrot.slane %v8355_v0, %v16461_v14  ;;  %v8370_v26 = vcombine.high %v15819_v11, %v15819_v11  ;;  %v15831_v55 = vrot.slane %v8372_v25, %v16461_v14 }
 0x66c   : > { %v8354_v52 = vcombine.high %v8352_v22, %v8352_v22  ;;  %v8387_v12 = vcombine.high %v15823_v47, %v15823_v47  ;;  %v9169_v1 = vsel %vm2628_vm1, %v8328_v61, -inf  ;;  %v9176_v51 = vsel %vm2628_vm1, %v8336_v60, -inf }
 0x66d   : > { %v8371_v50 = vcombine.high %v15826_v59, %v15826_v59  ;;  %v8388_v19 = vcombine.high %v15831_v55, %v15831_v55  ;;  %v9170_v27 = vrot.slane %v9169_v1, 4  ;;  %v9177_v32 = vrot.slane %v9176_v51, 4 }
 0x66e   : > { %v9183_v20 = vsel %vm2628_vm1, %v8335_v31, -inf  ;;  %v9190_v3 = vsel %vm2628_vm1, %v8337_v33, -inf  ;;  %v9197_v2 = vsel %vm2628_vm1, %v8345_v62, -inf  ;;  %v9204_v37 = vsel %vm2628_vm1, %v8353_v24, -inf }
 0x66f   : > { %v9171_v42 = vmax.f32 %v9169_v1, %v9170_v27  ;;  %v9178_v48 = vmax.f32 %v9176_v51, %v9177_v32  ;;  %v9184_v13 = vrot.slane %v9183_v20, 4  ;;  %v9191_v46 = vrot.slane %v9190_v3, 4 }
 0x670   : > { %v9198_v18 = vrot.slane %v9197_v2, 4  ;;  %v9205_v43 = vrot.slane %v9204_v37, 4  ;;  %v9211_v57 = vsel %vm2628_vm1, %v8352_v22, -inf  ;;  %v9218_v30 = vsel %vm2628_vm1, %v8354_v52, -inf }
 0x671   : > { %v9172_v45 = vrot.slane %v9171_v42, 2  ;;  %v9179_v34 = vrot.slane %v9178_v48, 2  ;;  %v9185_v17 = vmax.f32 %v9183_v20, %v9184_v13  ;;  %v9192_v9 = vmax.f32 %v9190_v3, %v9191_v46 }
 0x672   : > { %v9199_v41 = vmax.f32 %v9197_v2, %v9198_v18  ;;  %v9206_v29 = vmax.f32 %v9204_v37, %v9205_v43  ;;  %v9212_v39 = vrot.slane %v9211_v57, 4  ;;  %v9219_v36 = vrot.slane %v9218_v30, 4 }
 0x673   : > { %v9173_v63 = vmax.f32 %v9171_v42, %v9172_v45  ;;  %v9180_v8 = vmax.f32 %v9178_v48, %v9179_v34  ;;  %v9186_v38 = vrot.slane %v9185_v17, 2  ;;  %v9193_v10 = vrot.slane %v9192_v9, 2 }
 0x674   : > { %v9200_v15 = vrot.slane %v9199_v41, 2  ;;  %v9207_v35 = vrot.slane %v9206_v29, 2  ;;  %v9213_v56 = vmax.f32 %v9211_v57, %v9212_v39  ;;  %v9220_v53 = vmax.f32 %v9218_v30, %v9219_v36 }
 0x675   : > { %v9174_v44 = vrot.slane %v9173_v63, 1  ;;  %v9181_v54 = vrot.slane %v9180_v8, 1  ;;  %v9187_v40 = vmax.f32 %v9185_v17, %v9186_v38  ;;  %v9194_v21 = vmax.f32 %v9192_v9, %v9193_v10 }
 0x676   : > { %v9201_v5 = vmax.f32 %v9199_v41, %v9200_v15  ;;  %v9208_v58 = vmax.f32 %v9206_v29, %v9207_v35  ;;  %v9214_v7 = vrot.slane %v9213_v56, 2  ;;  %v9221_v61 = vrot.slane %v9220_v53, 2 }
 0x677   : > { %v15847_v4 = vmax.f32 %v9173_v63, %v9174_v44  ;;  %v15849_v62 = vmax.f32 %v9180_v8, %v9181_v54  ;;  %v9188_v31 = vrot.slane %v9187_v40, 1  ;;  %v9195_v0 = vrot.slane %v9194_v21, 1 }
 0x678   : > { %v9202_v25 = vrot.slane %v9201_v5, 1  ;;  %v9209_v60 = vrot.slane %v9208_v58, 1  ;;  %v9215_v22 = vmax.f32 %v9213_v56, %v9214_v7  ;;  %v9222_v24 = vmax.f32 %v9220_v53, %v9221_v61 }
 0x679   : > { %v15851_v33 = vmax.f32 %v9187_v40, %v9188_v31  ;;  %v15853_v52 = vmax.f32 %v9194_v21, %v9195_v0  ;;  %v9225_v1 = vsel %vm2628_vm1, %v15819_v11, -inf  ;;  %v9232_v51 = vsel %vm2628_vm1, %v8370_v26, -inf }
 0x67a   : > { %v15858_v27 = vmax.f32 %v9201_v5, %v9202_v25  ;;  %v15860_v32 = vmax.f32 %v9208_v58, %v9209_v60  ;;  %v9216_v20 = vrot.slane %v9215_v22, 1  ;;  %v9223_v3 = vrot.slane %v9222_v24, 1 }
 0x67b   : > { %v9226_v2 = vrot.slane %v9225_v1, 4  ;;  %v9233_v37 = vrot.slane %v9232_v51, 4  ;;  %v9239_v42 = vsel %vm2628_vm1, %v15826_v59, -inf  ;;  %v9246_v48 = vsel %vm2628_vm1, %v8371_v50, -inf }
 0x67c   : > { %v15865_v13 = vmax.f32 %v9215_v22, %v9216_v20  ;;  %v15867_v46 = vmax.f32 %v9222_v24, %v9223_v3  ;;  %v9240_v11 = vrot.slane %v9239_v42, 4  ;;  %v9247_v18 = vrot.slane %v9246_v48, 4 }
 0x67d   : > { %v9227_v26 = vmax.f32 %v9225_v1, %v9226_v2  ;;  %v9234_v43 = vmax.f32 %v9232_v51, %v9233_v37  ;;  %v9253_v57 = vsel %vm2628_vm1, %v15823_v47, -inf  ;;  %v9260_v30 = vsel %vm2628_vm1, %v8387_v12, -inf }
 0x67e   : > { %v9241_v45 = vmax.f32 %v9239_v42, %v9240_v11  ;;  %v9248_v59 = vmax.f32 %v9246_v48, %v9247_v18  ;;  %v9254_v34 = vrot.slane %v9253_v57, 4  ;;  %v9261_v50 = vrot.slane %v9260_v30, 4 }
 0x67f   : > { %v9228_v17 = vrot.slane %v9227_v26, 2  ;;  %v9235_v9 = vrot.slane %v9234_v43, 2  ;;  %v9267_v41 = vsel %vm2628_vm1, %v15831_v55, -inf  ;;  %v9274_v29 = vsel %vm2628_vm1, %v8388_v19, -inf }
 0x680   : > { %v9242_v39 = vrot.slane %v9241_v45, 2  ;;  %v9249_v36 = vrot.slane %v9248_v59, 2  ;;  %v9255_v63 = vmax.f32 %v9253_v57, %v9254_v34  ;;  %v9262_v47 = vmax.f32 %v9260_v30, %v9261_v50 }
 0x681   : > { %v9229_v8 = vmax.f32 %v9227_v26, %v9228_v17  ;;  %v9236_v12 = vmax.f32 %v9234_v43, %v9235_v9  ;;  %v9268_v38 = vrot.slane %v9267_v41, 4  ;;  %v9275_v10 = vrot.slane %v9274_v29, 4 }
 0x682   : > { %v9243_v15 = vmax.f32 %v9241_v45, %v9242_v39  ;;  %v9250_v35 = vmax.f32 %v9248_v59, %v9249_v36  ;;  %v9256_v56 = vrot.slane %v9255_v63, 2  ;;  %v9263_v53 = vrot.slane %v9262_v47, 2 }
 0x683   : > { %v9230_v44 = vrot.slane %v9229_v8, 1  ;;  %v9237_v54 = vrot.slane %v9236_v12, 1  ;;  %v9269_v40 = vmax.f32 %v9267_v41, %v9268_v38  ;;  %v9276_v21 = vmax.f32 %v9274_v29, %v9275_v10 }
 0x684   : > { %v9244_v5 = vrot.slane %v9243_v15, 1  ;;  %v9251_v55 = vrot.slane %v9250_v35, 1  ;;  %v9257_v58 = vmax.f32 %v9255_v63, %v9256_v56  ;;  %v9264_v19 = vmax.f32 %v9262_v47, %v9263_v53 }
 0x685   : > { %v9231_v7 = vmax.f32 %v9229_v8, %v9230_v44  ;;  %v9238_v61 = vmax.f32 %v9236_v12, %v9237_v54  ;;  %v9270_v31 = vrot.slane %v9269_v40, 2  ;;  %v9277_v0 = vrot.slane %v9276_v21, 2 }
 0x686   : > { %v9245_v25 = vmax.f32 %v9243_v15, %v9244_v5  ;;  %v9252_v60 = vmax.f32 %v9250_v35, %v9251_v55  ;;  %v9258_v22 = vrot.slane %v9257_v58, 1  ;;  %v9265_v24 = vrot.slane %v9264_v19, 1  ;;  %v16466_v55 = vld [vmem:[#allocation4_spill] sm:$0xff] }
 0x687   : > { %v9271_v1 = vmax.f32 %v9269_v40, %v9270_v31  ;;  %v9278_v51 = vmax.f32 %v9276_v21, %v9277_v0  ;;  %v9681_v20 = vpack.c.bf16 %v15847_v4, %v15847_v4  ;;  %v9682_v3 = vpack.c.bf16 %v15849_v62, %v15849_v62 }
 0x688   : > { %v9259_v2 = vmax.f32 %v9257_v58, %v9258_v22  ;;  %v9266_v37 = vmax.f32 %v9264_v19, %v9265_v24  ;;  %v9683_v42 = vpack.c.bf16 %v15851_v33, %v15851_v33  ;;  %v9684_v48 = vpack.c.bf16 %v15853_v52, %v15853_v52 }
 0x689   : > { %v9272_v11 = vrot.slane %v9271_v1, 1  ;;  %v9279_v18 = vrot.slane %v9278_v51, 1  ;;  %v9685_v26 = vpack.c.bf16 %v15858_v27, %v15858_v27  ;;  %v9686_v43 = vpack.c.bf16 %v15860_v32, %v15860_v32 }
 0x68a   : > { %v9687_v4 = vpack.c.bf16 %v15865_v13, %v15865_v13  ;;  %v9688_v62 = vpack.c.bf16 %v15867_v46, %v15867_v46  ;;  %v9689_v57 = vpack.c.bf16 %v9231_v7, %v9231_v7  ;;  %v9690_v30 = vpack.c.bf16 %v9238_v61, %v9238_v61 }
 0x68b   : > { %v9273_v33 = vmax.f32 %v9271_v1, %v9272_v11  ;;  %v9280_v45 = vmax.f32 %v9278_v51, %v9279_v18  ;;  %v9691_v59 = vpack.c.bf16 %v9245_v25, %v9245_v25  ;;  %v9692_v52 = vpack.c.bf16 %v9252_v60, %v9252_v60 }
 0x68c   : > { %v9693_v34 = vpack.c.bf16 %v9259_v2, %v9259_v2  ;;  %v9694_v50 = vpack.c.bf16 %v9266_v37, %v9266_v37  ;;  %v9960_v17 = vunpack.c.l.b16 %v9681_v20  ;;  %v9961_v9 = vunpack.c.l.b16 %v9682_v3 }
 0x68d   : > { %v9695_v27 = vpack.c.bf16 %v9273_v33, %v9273_v33  ;;  %v9696_v41 = vpack.c.bf16 %v9280_v45, %v9280_v45  ;;  %v9962_v29 = vunpack.c.l.b16 %v9683_v42  ;;  %v9963_v32 = vunpack.c.l.b16 %v9684_v48 }
 0x68e   : > { %v9964_v39 = vunpack.c.l.b16 %v9685_v26  ;;  %v9965_v36 = vunpack.c.l.b16 %v9686_v43  ;;  %v9966_v13 = vunpack.c.l.b16 %v9687_v4  ;;  %v9967_v63 = vunpack.c.l.b16 %v9688_v62 }
 0x68f   : > { %v9968_v47 = vunpack.c.l.b16 %v9689_v57  ;;  %v9969_v46 = vunpack.c.l.b16 %v9690_v30  ;;  %v9970_v8 = vunpack.c.l.b16 %v9691_v59  ;;  %v9971_v12 = vunpack.c.l.b16 %v9692_v52 }
 0x690   : > { %v9972_v38 = vunpack.c.l.b16 %v9693_v34  ;;  %v9973_v10 = vunpack.c.l.b16 %v9694_v50  ;;  %v9974_v15 = vunpack.c.l.b16 %v9695_v27  ;;  %v9975_v35 = vunpack.c.l.b16 %v9696_v41 }
 0x691   : > { %v10080_v56 = vsel %vm4791_vm2, %v9961_v9, %v9960_v17  ;;  %v10087_v53 = vsel %vm4791_vm2, %v9969_v46, %v9968_v47  ;;  %v7934_v44 = vmul.f32 %v15678_v23, %v16405_v49  ;;  %v7935_v54 = vmul.f32 %v15678_v23, %v16408_v28 }
 0x692   : > { %v10081_v40 = vsel %vm4793_vm3, %v9962_v29, %v10080_v56  ;;  %v10088_v21 = vsel %vm4793_vm3, %v9970_v8, %v10087_v53  ;;  %v7936_v5 = vmul.f32 %v15678_v23, %v16404_v16  ;;  %v7937_v58 = vmul.f32 %v15678_v23, %v16466_v55 }
 0x693   : > { %v10082_v19 = vsel %vm4795_vm4, %v9963_v32, %v10081_v40  ;;  %v10089_v7 = vsel %vm4795_vm4, %v9971_v12, %v10088_v21  ;;  %v7973_v61 = vadd.f32 %v15695_v6, %v7934_v44  ;;  %v7974_v49 = vadd.f32 %v15695_v6, %v7935_v54 }
 0x694   : > { %v10083_v28 = vsel %vm4797_vm5, %v9964_v39, %v10082_v19  ;;  %v10090_v31 = vsel %vm4797_vm5, %v9972_v38, %v10089_v7  ;;  %v7975_v0 = vadd.f32 %v15695_v6, %v7936_v5  ;;  %v7976_v25 = vadd.f32 %v15695_v6, %v7937_v58 }
 0x695   : > { %v10084_v16 = vsel %vm4799_vm6, %v9965_v36, %v10083_v28  ;;  %v10091_v23 = vsel %vm4799_vm6, %v9973_v10, %v10090_v31  ;;  %v8005_v60 = vmax.f32 %v7973_v61, 0.0  ;;  %v8006_v22 = vmax.f32 %v7974_v49, 0.0 }
 0x696   : > { %v10085_v24 = vsel %vm4801_vm7, %v9966_v13, %v10084_v16  ;;  %v10092_v1 = vsel %vm4801_vm7, %v9974_v15, %v10091_v23  ;;  %v8007_v51 = vmax.f32 %v7975_v0, 0.0  ;;  %v8008_v20 = vmax.f32 %v7976_v25, 0.0 }
 0x697   : > { %v10086_v3 = vsel %vm4803_vm8, %v9967_v63, %v10085_v24  ;;  %v10093_v2 = vsel %vm4803_vm8, %v9975_v35, %v10092_v1  ;;  %v8389_v37 = vcombine.high %v8005_v60, %v8005_v60  ;;  %v8396_v42 = vrot.slane %v8005_v60, %v16461_v14 }
 0x698   : > { %v10140_v6 = vpack.c.b16 %v10093_v2, %v10086_v3  ;;  %v8406_v48 = vcombine.high %v8006_v22, %v8006_v22  ;;  %v8413_v11 = vrot.slane %v8006_v22, %v16461_v14  ;;  %v8423_v18 = vcombine.high %v8007_v51, %v8007_v51 }
 0x699   : > { %v8403_v26 = vrot.slane %v8389_v37, %v16461_v14  ;;  %v8404_v43 = vcombine.high %v8396_v42, %v8396_v42  ;;  %v15927_v4 = vrot.slane %v8007_v51, %v16461_v14  ;;  %v8440_v62 = vcombine.high %v8008_v20, %v8008_v20 }
 0x69a   : > { %11944 = vmatprep.mubr.bf16.mxu0 %v10140_v6  ;;  %v8420_v57 = vrot.slane %v8406_v48, %v16461_v14  ;;  %v8421_v30 = vcombine.high %v8413_v11, %v8413_v11  ;;  %v15931_v33 = vrot.slane %v8423_v18, %v16461_v14  ;;  %v15934_v45 = vrot.slane %v8008_v20, %v16461_v14 }
 0x69b   : > { %v8405_v59 = vcombine.high %v8403_v26, %v8403_v26  ;;  %v8438_v52 = vcombine.high %v15927_v4, %v15927_v4  ;;  %v15939_v34 = vrot.slane %v8440_v62, %v16461_v14  ;;  %v9281_v50 = vsel %vm2628_vm1, %v8396_v42, -inf }
 0x69c   : > { %v8422_v17 = vcombine.high %v8420_v57, %v8420_v57  ;;  %v8439_v9 = vcombine.high %v15931_v33, %v15931_v33  ;;  %v8455_v27 = vcombine.high %v15934_v45, %v15934_v45  ;;  %v9282_v41 = vrot.slane %v9281_v50, 4 }
 0x69d   : > { %v8456_v29 = vcombine.high %v15939_v34, %v15939_v34  ;;  %v9288_v32 = vsel %vm2628_vm1, %v8404_v43, -inf  ;;  %v9295_v39 = vsel %vm2628_vm1, %v8403_v26, -inf  ;;  %v9302_v36 = vsel %vm2628_vm1, %v8405_v59, -inf }
 0x69e   : > { %v9283_v13 = vmax.f32 %v9281_v50, %v9282_v41  ;;  %v9289_v63 = vrot.slane %v9288_v32, 4  ;;  %v9296_v47 = vrot.slane %v9295_v39, 4  ;;  %v9303_v46 = vrot.slane %v9302_v36, 4 }
 0x69f   : > { %v9309_v8 = vsel %vm2628_vm1, %v8413_v11, -inf  ;;  %v9316_v12 = vsel %vm2628_vm1, %v8421_v30, -inf  ;;  %v9323_v38 = vsel %vm2628_vm1, %v8420_v57, -inf  ;;  %v9330_v10 = vsel %vm2628_vm1, %v8422_v17, -inf }
 0x6a0   : > { %v9284_v15 = vrot.slane %v9283_v13, 2  ;;  %v9290_v35 = vmax.f32 %v9288_v32, %v9289_v63  ;;  %v9297_v56 = vmax.f32 %v9295_v39, %v9296_v47  ;;  %v9304_v53 = vmax.f32 %v9302_v36, %v9303_v46 }
 0x6a1   : > { %v9310_v44 = vrot.slane %v9309_v8, 4  ;;  %v9317_v54 = vrot.slane %v9316_v12, 4  ;;  %v9324_v40 = vrot.slane %v9323_v38, 4  ;;  %v9331_v21 = vrot.slane %v9330_v10, 4 }
 0x6a2   : > { %v9285_v5 = vmax.f32 %v9283_v13, %v9284_v15  ;;  %v9291_v55 = vrot.slane %v9290_v35, 2  ;;  %v9298_v58 = vrot.slane %v9297_v56, 2  ;;  %v9305_v19 = vrot.slane %v9304_v53, 2 }
 0x6a3   : > { %v9311_v7 = vmax.f32 %v9309_v8, %v9310_v44  ;;  %v9318_v61 = vmax.f32 %v9316_v12, %v9317_v54  ;;  %v9325_v49 = vmax.f32 %v9323_v38, %v9324_v40  ;;  %v9332_v28 = vmax.f32 %v9330_v10, %v9331_v21  ;;  %v12693_v12 = vld [vmem:[%s16369_s9] sm:$0xff]   ;;  %v12694_v38 = vld [vmem:[%s16369_s9 + $0x8] sm:$0xff]  }
 0x6a4   : > { %v9286_v31 = vrot.slane %v9285_v5, 1  ;;  %v9292_v0 = vmax.f32 %v9290_v35, %v9291_v55  ;;  %v9299_v25 = vmax.f32 %v9297_v56, %v9298_v58  ;;  %v9306_v16 = vmax.f32 %v9304_v53, %v9305_v19  ;;  %11952 = vmatprep.subr.bf16.mxu1 %v12693_v12 }
 0x6a5   : > { %v9312_v23 = vrot.slane %v9311_v7, 2  ;;  %v9319_v60 = vrot.slane %v9318_v61, 2  ;;  %v9326_v22 = vrot.slane %v9325_v49, 2  ;;  %v9333_v24 = vrot.slane %v9332_v28, 2  ;;  %11953 = vmatpush3.bf16.msra.mxu1 %v12693_v12 }
 0x6a6   : > { %v15955_v1 = vmax.f32 %v9285_v5, %v9286_v31  ;;  %v9293_v51 = vrot.slane %v9292_v0, 1  ;;  %v9300_v20 = vrot.slane %v9299_v25, 1  ;;  %v9307_v3 = vrot.slane %v9306_v16, 1  ;;  %11954 = vmatprep.subr.bf16.mxu1 %v12694_v38 }
 0x6a7   : > { %v9313_v2 = vmax.f32 %v9311_v7, %v9312_v23  ;;  %v9320_v37 = vmax.f32 %v9318_v61, %v9319_v60  ;;  %v9327_v42 = vmax.f32 %v9325_v49, %v9326_v22  ;;  %v9334_v6 = vmax.f32 %v9332_v28, %v9333_v24 }
 0x6a8   : > { %v15957_v48 = vmax.f32 %v9292_v0, %v9293_v51  ;;  %v15959_v11 = vmax.f32 %v9299_v25, %v9300_v20  ;;  %v15961_v18 = vmax.f32 %v9306_v16, %v9307_v3  ;;  %v9337_v26 = vsel %vm2628_vm1, %v15927_v4, -inf }
 0x6a9   : > { %v9314_v43 = vrot.slane %v9313_v2, 1  ;;  %v9321_v62 = vrot.slane %v9320_v37, 1  ;;  %v9328_v57 = vrot.slane %v9327_v42, 1  ;;  %v9335_v30 = vrot.slane %v9334_v6, 1  ;;  %11955 = vmatpush3.bf16.msra.mxu1 %v12694_v38 }
 0x6aa   : > { %v9338_v59 = vrot.slane %v9337_v26, 4  ;;  %v9344_v50 = vsel %vm2628_vm1, %v8438_v52, -inf  ;;  %v9351_v17 = vsel %vm2628_vm1, %v15931_v33, -inf  ;;  %v9358_v41 = vsel %vm2628_vm1, %v8439_v9, -inf }
 0x6ab   : > { %v15969_v32 = vmax.f32 %v9313_v2, %v9314_v43  ;;  %v15971_v39 = vmax.f32 %v9320_v37, %v9321_v62  ;;  %v15973_v36 = vmax.f32 %v9327_v42, %v9328_v57  ;;  %v15975_v13 = vmax.f32 %v9334_v6, %v9335_v30 }
 0x6ac   : > { %v9339_v4 = vmax.f32 %v9337_v26, %v9338_v59  ;;  %v9345_v63 = vrot.slane %v9344_v50, 4  ;;  %v9352_v47 = vrot.slane %v9351_v17, 4  ;;  %v9359_v46 = vrot.slane %v9358_v41, 4 }
 0x6ad   : > { %v9365_v52 = vsel %vm2628_vm1, %v15934_v45, -inf  ;;  %v9372_v33 = vsel %vm2628_vm1, %v8455_v27, -inf  ;;  %v9379_v9 = vsel %vm2628_vm1, %v15939_v34, -inf  ;;  %v9386_v8 = vsel %vm2628_vm1, %v8456_v29, -inf }
 0x6ae   : > { %v9340_v10 = vrot.slane %v9339_v4, 2  ;;  %v9346_v45 = vmax.f32 %v9344_v50, %v9345_v63  ;;  %v9353_v15 = vmax.f32 %v9351_v17, %v9352_v47  ;;  %v9360_v27 = vmax.f32 %v9358_v41, %v9359_v46 }
 0x6af   : > { %v9366_v35 = vrot.slane %v9365_v52, 4  ;;  %v9373_v56 = vrot.slane %v9372_v33, 4  ;;  %v9380_v53 = vrot.slane %v9379_v9, 4  ;;  %v9387_v44 = vrot.slane %v9386_v8, 4 }
 0x6b0   : > { %v9341_v34 = vmax.f32 %v9339_v4, %v9340_v10  ;;  %v9347_v54 = vrot.slane %v9346_v45, 2  ;;  %v9354_v29 = vrot.slane %v9353_v15, 2  ;;  %v9361_v40 = vrot.slane %v9360_v27, 2 }
 0x6b1   : > { %v9367_v21 = vmax.f32 %v9365_v52, %v9366_v35  ;;  %v9374_v5 = vmax.f32 %v9372_v33, %v9373_v56  ;;  %v9381_v55 = vmax.f32 %v9379_v9, %v9380_v53  ;;  %v9388_v58 = vmax.f32 %v9386_v8, %v9387_v44 }
 0x6b2   : > { %v9342_v19 = vrot.slane %v9341_v34, 1  ;;  %v9348_v7 = vmax.f32 %v9346_v45, %v9347_v54  ;;  %v9355_v61 = vmax.f32 %v9353_v15, %v9354_v29  ;;  %v9362_v49 = vmax.f32 %v9360_v27, %v9361_v40 }
 0x6b3   : > { %v9368_v28 = vrot.slane %v9367_v21, 2  ;;  %v9375_v31 = vrot.slane %v9374_v5, 2  ;;  %v9382_v0 = vrot.slane %v9381_v55, 2  ;;  %v9389_v25 = vrot.slane %v9388_v58, 2 }
 0x6b4   : > { %v9343_v16 = vmax.f32 %v9341_v34, %v9342_v19  ;;  %v9349_v23 = vrot.slane %v9348_v7, 1  ;;  %v9356_v60 = vrot.slane %v9355_v61, 1  ;;  %v9363_v22 = vrot.slane %v9362_v49, 1  ;;  %v16467_v19 = vld [vmem:[#allocation6_spill] sm:$0xff] }
 0x6b5   : > { %v9369_v24 = vmax.f32 %v9367_v21, %v9368_v28  ;;  %v9376_v51 = vmax.f32 %v9374_v5, %v9375_v31  ;;  %v9383_v20 = vmax.f32 %v9381_v55, %v9382_v0  ;;  %v9390_v3 = vmax.f32 %v9388_v58, %v9389_v25  ;;  %v16017_v58 = vld [vmem:[%s16365_s5] ss:$0 sm:$0xff]  ;;  %v16469_v0 = vld [vmem:[#allocation5_spill] sm:$0xff] }
 0x6b6   : > { %v9350_v2 = vmax.f32 %v9348_v7, %v9349_v23  ;;  %v9357_v37 = vmax.f32 %v9355_v61, %v9356_v60  ;;  %v9364_v42 = vmax.f32 %v9362_v49, %v9363_v22  ;;  %v9697_v6 = vpack.c.bf16 %v15955_v1, %v15955_v1  ;;  %v16468_v61 = vld [vmem:[#allocation8_spill] sm:$0xff] }
 0x6b7   : > { %v9370_v26 = vrot.slane %v9369_v24, 1  ;;  %v9377_v43 = vrot.slane %v9376_v51, 1  ;;  %v9384_v62 = vrot.slane %v9383_v20, 1  ;;  %v9391_v57 = vrot.slane %v9390_v3, 1 }
 0x6b8   : > { %v9698_v30 = vpack.c.bf16 %v15957_v48, %v15957_v48  ;;  %v9699_v59 = vpack.c.bf16 %v15959_v11, %v15959_v11  ;;  %v9700_v50 = vpack.c.bf16 %v15961_v18, %v15961_v18  ;;  %v9701_v17 = vpack.c.bf16 %v15969_v32, %v15969_v32 }
 0x6b9   : > { %v9371_v41 = vmax.f32 %v9369_v24, %v9370_v26  ;;  %v9378_v4 = vmax.f32 %v9376_v51, %v9377_v43  ;;  %v9385_v63 = vmax.f32 %v9383_v20, %v9384_v62  ;;  %v9392_v1 = vmax.f32 %v9390_v3, %v9391_v57  ;;  %v16034_v24 = vld [vmem:[%s16366_s6] ss:$0 sm:$0xff] }
 0x6ba   : > { %v9702_v47 = vpack.c.bf16 %v15971_v39, %v15971_v39  ;;  %v9703_v46 = vpack.c.bf16 %v15973_v36, %v15973_v36  ;;  %v9704_v48 = vpack.c.bf16 %v15975_v13, %v15975_v13  ;;  %v9705_v11 = vpack.c.bf16 %v9343_v16, %v9343_v16  ;;  %v16470_v16 = vld [vmem:[#allocation7_spill] sm:$0xff] }
 0x6bb   : > { %v9706_v52 = vpack.c.bf16 %v9350_v2, %v9350_v2  ;;  %v9707_v33 = vpack.c.bf16 %v9357_v37, %v9357_v37  ;;  %v9708_v18 = vpack.c.bf16 %v9364_v42, %v9364_v42  ;;  %v9709_v9 = vpack.c.bf16 %v9371_v41, %v9371_v41 }
 0x6bc   : > { %v9710_v8 = vpack.c.bf16 %v9378_v4, %v9378_v4  ;;  %v9711_v32 = vpack.c.bf16 %v9385_v63, %v9385_v63  ;;  %v9712_v12 = vpack.c.bf16 %v9392_v1, %v9392_v1  ;;  %v9976_v38 = vunpack.c.l.b16 %v9697_v6 }
 0x6bd   : > { %v9977_v10 = vunpack.c.l.b16 %v9698_v30  ;;  %v9978_v45 = vunpack.c.l.b16 %v9699_v59  ;;  %v9979_v15 = vunpack.c.l.b16 %v9700_v50  ;;  %v9980_v27 = vunpack.c.l.b16 %v9701_v17 }
 0x6be   : > { %v9981_v39 = vunpack.c.l.b16 %v9702_v47  ;;  %v9982_v35 = vunpack.c.l.b16 %v9703_v46  ;;  %v9983_v56 = vunpack.c.l.b16 %v9704_v48  ;;  %v9984_v36 = vunpack.c.l.b16 %v9705_v11 }
 0x6bf   : > { %v9985_v53 = vunpack.c.l.b16 %v9706_v52  ;;  %v9986_v44 = vunpack.c.l.b16 %v9707_v33  ;;  %v9987_v13 = vunpack.c.l.b16 %v9708_v18  ;;  %v9988_v34 = vunpack.c.l.b16 %v9709_v9 }
 0x6c0   : > { %v9989_v54 = vunpack.c.l.b16 %v9710_v8  ;;  %v9990_v29 = vunpack.c.l.b16 %v9711_v32  ;;  %v9991_v40 = vunpack.c.l.b16 %v9712_v12  ;;  %v10094_v21 = vsel %vm4791_vm2, %v9977_v10, %v9976_v38 }
 0x6c1   : > { %v10095_v5 = vsel %vm4793_vm3, %v9978_v45, %v10094_v21  ;;  %v10101_v55 = vsel %vm4791_vm2, %v9985_v53, %v9984_v36  ;;  %v7938_v7 = vmul.f32 %v16017_v58, %v16467_v19  ;;  %v7939_v49 = vmul.f32 %v16017_v58, %v16468_v61  ;;  %v12695_v36 = vld [vmem:[%s16369_s9 + $0x10] sm:$0xff]  }
 0x6c2   : > { %v10096_v28 = vsel %vm4795_vm4, %v9979_v15, %v10095_v5  ;;  %v10102_v31 = vsel %vm4793_vm3, %v9986_v44, %v10101_v55  ;;  %v7940_v25 = vmul.f32 %v16017_v58, %v16469_v0  ;;  %v7941_v23 = vmul.f32 %v16017_v58, %v16470_v16  ;;  %11956 = vmatprep.subr.bf16.mxu1 %v12695_v36 }
 0x6c3   : > { %v10097_v60 = vsel %vm4797_vm5, %v9980_v27, %v10096_v28  ;;  %v10103_v22 = vsel %vm4795_vm4, %v9987_v13, %v10102_v31  ;;  %v7977_v51 = vadd.f32 %v16034_v24, %v7938_v7  ;;  %v7978_v20 = vadd.f32 %v16034_v24, %v7939_v49  ;;  %11957 = vmatpush3.bf16.msra.mxu1 %v12695_v36 }
 0x6c4   : > { %v10098_v3 = vsel %vm4799_vm6, %v9981_v39, %v10097_v60  ;;  %v10104_v2 = vsel %vm4797_vm5, %v9988_v34, %v10103_v22  ;;  %v7979_v37 = vadd.f32 %v16034_v24, %v7940_v25  ;;  %v7980_v42 = vadd.f32 %v16034_v24, %v7941_v23 }
 0x6c5   : > { %v10099_v6 = vsel %vm4801_vm7, %v9982_v35, %v10098_v3  ;;  %v10105_v26 = vsel %vm4799_vm6, %v9989_v54, %v10104_v2  ;;  %v8009_v43 = vmax.f32 %v7977_v51, 0.0  ;;  %v8010_v62 = vmax.f32 %v7978_v20, 0.0  ;;  %v12696_v54 = vld [vmem:[%s16369_s9 + $0x18] sm:$0xff]  }
 0x6c6   : > { %v10100_v57 = vsel %vm4803_vm8, %v9983_v56, %v10099_v6  ;;  %v10106_v30 = vsel %vm4801_vm7, %v9990_v29, %v10105_v26  ;;  %v8011_v59 = vmax.f32 %v7979_v37, 0.0  ;;  %v8012_v50 = vmax.f32 %v7980_v42, 0.0  ;;  %11958 = vmatprep.subr.bf16.mxu1 %v12696_v54 }
 0x6c7   : > { %v10107_v17 = vsel %vm4803_vm8, %v9991_v40, %v10106_v30  ;;  %v8457_v41 = vcombine.high %v8009_v43, %v8009_v43  ;;  %v8464_v4 = vrot.slane %v8009_v43, %v16461_v14  ;;  %v8474_v63 = vcombine.high %v8010_v62, %v8010_v62  ;;  %11959 = vmatpush3.bf16.msra.mxu1 %v12696_v54 }
 0x6c8   : > { %v10141_v1 = vpack.c.b16 %v10107_v17, %v10100_v57  ;;  %v8481_v47 = vrot.slane %v8010_v62, %v16461_v14  ;;  %v8491_v46 = vcombine.high %v8011_v59, %v8011_v59  ;;  %v16050_v48 = vrot.slane %v8011_v59, %v16461_v14 }
 0x6c9   : > { %v8471_v11 = vrot.slane %v8457_v41, %v16461_v14  ;;  %v8472_v52 = vcombine.high %v8464_v4, %v8464_v4  ;;  %v8488_v33 = vrot.slane %v8474_v63, %v16461_v14  ;;  %v8508_v18 = vcombine.high %v8012_v50, %v8012_v50 }
 0x6ca   : > { %11945 = vmatmul.mubr.bf16.gmra.mrb[8].mxu0 %v10141_v1  ;;  %v8489_v9 = vcombine.high %v8481_v47, %v8481_v47  ;;  %v16055_v8 = vrot.slane %v8491_v46, %v16461_v14  ;;  %v8506_v32 = vcombine.high %v16050_v48, %v16050_v48  ;;  %v16060_v12 = vrot.slane %v8012_v50, %v16461_v14 }
 0x6cb   : > { %v8473_v38 = vcombine.high %v8471_v11, %v8471_v11  ;;  %v8490_v10 = vcombine.high %v8488_v33, %v8488_v33  ;;  %v16063_v45 = vrot.slane %v8508_v18, %v16461_v14  ;;  %v9393_v15 = vsel %vm2628_vm1, %v8464_v4, -inf }
 0x6cc   : > { %v8507_v27 = vcombine.high %v16055_v8, %v16055_v8  ;;  %v8523_v39 = vcombine.high %v16060_v12, %v16060_v12  ;;  %v9394_v35 = vrot.slane %v9393_v15, 4  ;;  %v9400_v56 = vsel %vm2628_vm1, %v8472_v52, -inf }
 0x6cd   : > { %v8524_v53 = vcombine.high %v16063_v45, %v16063_v45  ;;  %v9401_v44 = vrot.slane %v9400_v56, 4  ;;  %v9407_v13 = vsel %vm2628_vm1, %v8471_v11, -inf  ;;  %v9414_v34 = vsel %vm2628_vm1, %v8473_v38, -inf }
 0x6ce   : > { %v9395_v29 = vmax.f32 %v9393_v15, %v9394_v35  ;;  %v9408_v40 = vrot.slane %v9407_v13, 4  ;;  %v9415_v21 = vrot.slane %v9414_v34, 4  ;;  %v9421_v5 = vsel %vm2628_vm1, %v8481_v47, -inf }
 0x6cf   : > { %v9402_v55 = vmax.f32 %v9400_v56, %v9401_v44  ;;  %v9422_v19 = vrot.slane %v9421_v5, 4  ;;  %v9428_v7 = vsel %vm2628_vm1, %v8489_v9, -inf  ;;  %v9435_v61 = vsel %vm2628_vm1, %v8488_v33, -inf }
 0x6d0   : > { %v9396_v49 = vrot.slane %v9395_v29, 2  ;;  %v9409_v28 = vmax.f32 %v9407_v13, %v9408_v40  ;;  %v9416_v31 = vmax.f32 %v9414_v34, %v9415_v21  ;;  %v9429_v0 = vrot.slane %v9428_v7, 4 }
 0x6d1   : > { %v9403_v25 = vrot.slane %v9402_v55, 2  ;;  %v9423_v16 = vmax.f32 %v9421_v5, %v9422_v19  ;;  %v9436_v23 = vrot.slane %v9435_v61, 4  ;;  %v9442_v60 = vsel %vm2628_vm1, %v8490_v10, -inf }
 0x6d2   : > { %v9397_v22 = vmax.f32 %v9395_v29, %v9396_v49  ;;  %v9410_v51 = vrot.slane %v9409_v28, 2  ;;  %v9417_v20 = vrot.slane %v9416_v31, 2  ;;  %v9430_v3 = vmax.f32 %v9428_v7, %v9429_v0 }
 0x6d3   : > { %v9404_v2 = vmax.f32 %v9402_v55, %v9403_v25  ;;  %v9424_v37 = vrot.slane %v9423_v16, 2  ;;  %v9437_v42 = vmax.f32 %v9435_v61, %v9436_v23  ;;  %v9443_v6 = vrot.slane %v9442_v60, 4 }
 0x6d4   : > { %v9398_v26 = vrot.slane %v9397_v22, 1  ;;  %v9411_v43 = vmax.f32 %v9409_v28, %v9410_v51  ;;  %v9418_v62 = vmax.f32 %v9416_v31, %v9417_v20  ;;  %v9431_v57 = vrot.slane %v9430_v3, 2 }
 0x6d5   : > { %v9405_v30 = vrot.slane %v9404_v2, 1  ;;  %v9425_v59 = vmax.f32 %v9423_v16, %v9424_v37  ;;  %v9438_v50 = vrot.slane %v9437_v42, 2  ;;  %v9444_v17 = vmax.f32 %v9442_v60, %v9443_v6 }
 0x6d6   : > { %v16085_v41 = vmax.f32 %v9397_v22, %v9398_v26  ;;  %v9412_v4 = vrot.slane %v9411_v43, 1  ;;  %v9419_v63 = vrot.slane %v9418_v62, 1  ;;  %v9432_v1 = vmax.f32 %v9430_v3, %v9431_v57 }
 0x6d7   : > { %v16087_v47 = vmax.f32 %v9404_v2, %v9405_v30  ;;  %v9426_v46 = vrot.slane %v9425_v59, 1  ;;  %v9439_v11 = vmax.f32 %v9437_v42, %v9438_v50  ;;  %v9445_v52 = vrot.slane %v9444_v17, 2 }
 0x6d8   : > { %v16089_v33 = vmax.f32 %v9411_v43, %v9412_v4  ;;  %v16091_v18 = vmax.f32 %v9418_v62, %v9419_v63  ;;  %v9433_v9 = vrot.slane %v9432_v1, 1  ;;  %v9449_v38 = vsel %vm2628_vm1, %v16050_v48, -inf }
 0x6d9   : > { %v16095_v10 = vmax.f32 %v9425_v59, %v9426_v46  ;;  %v9440_v15 = vrot.slane %v9439_v11, 1  ;;  %v9446_v35 = vmax.f32 %v9444_v17, %v9445_v52  ;;  %v9450_v56 = vrot.slane %v9449_v38, 4 }
 0x6da   : > { %v16097_v36 = vmax.f32 %v9432_v1, %v9433_v9  ;;  %v9456_v44 = vsel %vm2628_vm1, %v8506_v32, -inf  ;;  %v9463_v13 = vsel %vm2628_vm1, %v16055_v8, -inf  ;;  %v9470_v34 = vsel %vm2628_vm1, %v8507_v27, -inf }
 0x6db   : > { %v16109_v54 = vmax.f32 %v9439_v11, %v9440_v15  ;;  %v9447_v29 = vrot.slane %v9446_v35, 1  ;;  %v9451_v40 = vmax.f32 %v9449_v38, %v9450_v56  ;;  %v9457_v21 = vrot.slane %v9456_v44, 4 }
 0x6dc   : > { %v9464_v5 = vrot.slane %v9463_v13, 4  ;;  %v9471_v55 = vrot.slane %v9470_v34, 4  ;;  %v9477_v48 = vsel %vm2628_vm1, %v16060_v12, -inf  ;;  %v9484_v32 = vsel %vm2628_vm1, %v8523_v39, -inf }
 0x6dd   : > { %v16117_v19 = vmax.f32 %v9446_v35, %v9447_v29  ;;  %v9452_v8 = vrot.slane %v9451_v40, 2  ;;  %v9458_v7 = vmax.f32 %v9456_v44, %v9457_v21  ;;  %v9478_v27 = vrot.slane %v9477_v48, 4 }
 0x6de   : > { %v9465_v61 = vmax.f32 %v9463_v13, %v9464_v5  ;;  %v9472_v49 = vmax.f32 %v9470_v34, %v9471_v55  ;;  %v9485_v28 = vrot.slane %v9484_v32, 4  ;;  %v9491_v31 = vsel %vm2628_vm1, %v16063_v45, -inf  ;;  %v16121_v0 = vpop.f32.mrb[0].mxu0 }
 0x6df   : > { %v9453_v25 = vmax.f32 %v9451_v40, %v9452_v8  ;;  %v9459_v16 = vrot.slane %v9458_v7, 2  ;;  %v9479_v23 = vmax.f32 %v9477_v48, %v9478_v27  ;;  %v9492_v60 = vrot.slane %v9491_v31, 4  ;;  %v16123_v12 = vpop.f32.mrb[1].mxu0 }
 0x6e0   : > { %v9466_v39 = vrot.slane %v9465_v61, 2  ;;  %v9473_v22 = vrot.slane %v9472_v49, 2  ;;  %v9486_v51 = vmax.f32 %v9484_v32, %v9485_v28  ;;  %v9498_v20 = vsel %vm2628_vm1, %v8524_v53, -inf  ;;  %v16129_v3 = vpop.f32.mrb[2].mxu0 }
 0x6e1   : > { %v9454_v2 = vrot.slane %v9453_v25, 1  ;;  %v9460_v37 = vmax.f32 %v9458_v7, %v9459_v16  ;;  %v9480_v42 = vrot.slane %v9479_v23, 2  ;;  %v9493_v6 = vmax.f32 %v9491_v31, %v9492_v60  ;;  %v16131_v26 = vpop.f32.mrb[3].mxu0 }
 0x6e2   : > { %v9467_v43 = vmax.f32 %v9465_v61, %v9466_v39  ;;  %v9474_v62 = vmax.f32 %v9472_v49, %v9473_v22  ;;  %v9487_v57 = vrot.slane %v9486_v51, 2  ;;  %v9499_v30 = vrot.slane %v9498_v20, 4 }
 0x6e3   : > { %v9455_v59 = vmax.f32 %v9453_v25, %v9454_v2  ;;  %v9461_v50 = vrot.slane %v9460_v37, 1  ;;  %v9481_v17 = vmax.f32 %v9479_v23, %v9480_v42  ;;  %v9494_v4 = vrot.slane %v9493_v6, 2 }
 0x6e4   : > { %v9468_v63 = vrot.slane %v9467_v43, 1  ;;  %v9475_v45 = vrot.slane %v9474_v62, 1  ;;  %v9488_v1 = vmax.f32 %v9486_v51, %v9487_v57  ;;  %v9500_v53 = vmax.f32 %v9498_v20, %v9499_v30 }
 0x6e5   : > { %v9462_v46 = vmax.f32 %v9460_v37, %v9461_v50  ;;  %v9482_v11 = vrot.slane %v9481_v17, 1  ;;  %v9495_v52 = vmax.f32 %v9493_v6, %v9494_v4  ;;  %v9713_v9 = vpack.c.bf16 %v16085_v41, %v16085_v41  ;;  %v16471_v50 = vld [vmem:[#allocation10_spill] sm:$0xff]  ;;  %v16472_v4 = vld [vmem:[#allocation12_spill] sm:$0xff] }
 0x6e6   : > { %v9469_v38 = vmax.f32 %v9467_v43, %v9468_v63  ;;  %v9476_v15 = vmax.f32 %v9474_v62, %v9475_v45  ;;  %v9489_v35 = vrot.slane %v9488_v1, 1  ;;  %v9501_v56 = vrot.slane %v9500_v53, 2 }
 0x6e7   : > { %v9483_v44 = vmax.f32 %v9481_v17, %v9482_v11  ;;  %v9496_v13 = vrot.slane %v9495_v52, 1  ;;  %v9714_v34 = vpack.c.bf16 %v16087_v47, %v16087_v47  ;;  %v9715_v29 = vpack.c.bf16 %v16089_v33, %v16089_v33  ;;  %v16474_v11 = vld [vmem:[#allocation11_spill] sm:$0xff] }
 0x6e8   : > { %v9490_v40 = vmax.f32 %v9488_v1, %v9489_v35  ;;  %v9502_v21 = vmax.f32 %v9500_v53, %v9501_v56  ;;  %v9716_v5 = vpack.c.bf16 %v16091_v18, %v16091_v18  ;;  %v9717_v41 = vpack.c.bf16 %v16095_v10, %v16095_v10  ;;  %v16473_v53 = vld [vmem:[#allocation9_spill] sm:$0xff] }
 0x6e9   : > { %v9497_v55 = vmax.f32 %v9495_v52, %v9496_v13  ;;  %v9718_v48 = vpack.c.bf16 %v16097_v36, %v16097_v36  ;;  %v9719_v32 = vpack.c.bf16 %v16109_v54, %v16109_v54  ;;  %v9720_v47 = vpack.c.bf16 %v16117_v19, %v16117_v19 }
 0x6ea   : > { %v9503_v8 = vrot.slane %v9502_v21, 1  ;;  %v9721_v33 = vpack.c.bf16 %v9455_v59, %v9455_v59  ;;  %v9722_v7 = vpack.c.bf16 %v9462_v46, %v9462_v46  ;;  %v9723_v27 = vpack.c.bf16 %v9469_v38, %v9469_v38 }
 0x6eb   : > { %v9724_v61 = vpack.c.bf16 %v9476_v15, %v9476_v15  ;;  %v9725_v49 = vpack.c.bf16 %v9483_v44, %v9483_v44  ;;  %v9726_v18 = vpack.c.bf16 %v9490_v40, %v9490_v40  ;;  %v9727_v28 = vpack.c.bf16 %v9497_v55, %v9497_v55 }
 0x6ec   : > { %v9504_v31 = vmax.f32 %v9502_v21, %v9503_v8  ;;  %v9992_v10 = vunpack.c.l.b16 %v9713_v9  ;;  %v9993_v25 = vunpack.c.l.b16 %v9714_v34  ;;  %v9994_v16 = vunpack.c.l.b16 %v9715_v29 }
 0x6ed   : > { %v9995_v23 = vunpack.c.l.b16 %v9716_v5  ;;  %v9996_v36 = vunpack.c.l.b16 %v9717_v41  ;;  %v9997_v60 = vunpack.c.l.b16 %v9718_v48  ;;  %v9998_v39 = vunpack.c.l.b16 %v9719_v32 }
 0x6ee   : > { %v9728_v54 = vpack.c.bf16 %v9504_v31, %v9504_v31  ;;  %v9999_v22 = vunpack.c.l.b16 %v9720_v47  ;;  %v10000_v51 = vunpack.c.l.b16 %v9721_v33  ;;  %v10001_v19 = vunpack.c.l.b16 %v9722_v7 }
 0x6ef   : > { %v10002_v20 = vunpack.c.l.b16 %v9723_v27  ;;  %v10003_v2 = vunpack.c.l.b16 %v9724_v61  ;;  %v10004_v37 = vunpack.c.l.b16 %v9725_v49  ;;  %v10005_v42 = vunpack.c.l.b16 %v9726_v18 }
 0x6f0   : > { %v10006_v6 = vunpack.c.l.b16 %v9727_v28  ;;  %v10007_v43 = vunpack.c.l.b16 %v9728_v54  ;;  %v10108_v62 = vsel %vm4791_vm2, %v9993_v25, %v9992_v10  ;;  %v10115_v57 = vsel %vm4791_vm2, %v10001_v19, %v10000_v51 }
 0x6f1   : > { %v10109_v30 = vsel %vm4793_vm3, %v9994_v16, %v10108_v62  ;;  %v10116_v59 = vsel %vm4793_vm3, %v10002_v20, %v10115_v57  ;;  %v7942_v17 = vmul.f32 %v16017_v58, %v16471_v50  ;;  %v7943_v63 = vmul.f32 %v16017_v58, %v16472_v4 }
 0x6f2   : > { %v10110_v45 = vsel %vm4795_vm4, %v9995_v23, %v10109_v30  ;;  %v10117_v1 = vsel %vm4795_vm4, %v10003_v2, %v10116_v59  ;;  %v7944_v46 = vmul.f32 %v16017_v58, %v16473_v53  ;;  %v7945_v52 = vmul.f32 %v16017_v58, %v16474_v11 }
 0x6f3   : > { %v10111_v9 = vsel %vm4797_vm5, %v9996_v36, %v10110_v45  ;;  %v10118_v38 = vsel %vm4797_vm5, %v10004_v37, %v10117_v1  ;;  %v7981_v15 = vadd.f32 %v16034_v24, %v7942_v17  ;;  %v7982_v35 = vadd.f32 %v16034_v24, %v7943_v63 }
 0x6f4   : > { %v10112_v56 = vsel %vm4799_vm6, %v9997_v60, %v10111_v9  ;;  %v10119_v44 = vsel %vm4799_vm6, %v10005_v42, %v10118_v38  ;;  %v7983_v13 = vadd.f32 %v16034_v24, %v7944_v46  ;;  %v7984_v34 = vadd.f32 %v16034_v24, %v7945_v52 }
 0x6f5   : > { %v10113_v29 = vsel %vm4801_vm7, %v9998_v39, %v10112_v56  ;;  %v10120_v58 = vsel %vm4801_vm7, %v10006_v6, %v10119_v44  ;;  %v8013_v40 = vmax.f32 %v7981_v15, 0.0  ;;  %v8014_v21 = vmax.f32 %v7982_v35, 0.0 }
 0x6f6   : > { %v10114_v5 = vsel %vm4803_vm8, %v9999_v22, %v10113_v29  ;;  %v10121_v41 = vsel %vm4803_vm8, %v10007_v43, %v10120_v58  ;;  %v8015_v55 = vmax.f32 %v7983_v13, 0.0  ;;  %v8016_v48 = vmax.f32 %v7984_v34, 0.0 }
 0x6f7   : > { %v10142_v32 = vpack.c.b16 %v10121_v41, %v10114_v5  ;;  %v8525_v47 = vcombine.high %v8013_v40, %v8013_v40  ;;  %v8532_v8 = vrot.slane %v8013_v40, %v16461_v14  ;;  %v8542_v33 = vcombine.high %v8014_v21, %v8014_v21 }
 0x6f8   : > { %v8549_v7 = vrot.slane %v8014_v21, %v16461_v14  ;;  %v8559_v24 = vcombine.high %v8015_v55, %v8015_v55  ;;  %v8576_v27 = vcombine.high %v8016_v48, %v8016_v48  ;;  %v16180_v28 = vrot.slane %v8015_v55, %v16461_v14 }
 0x6f9   : > { %11948 = vmatprep.mubr.bf16.mxu0 %v10142_v32  ;;  %v8539_v61 = vrot.slane %v8525_v47, %v16461_v14  ;;  %v8540_v49 = vcombine.high %v8532_v8, %v8532_v8  ;;  %v8556_v18 = vrot.slane %v8542_v33, %v16461_v14  ;;  %v16183_v31 = vrot.slane %v8016_v48, %v16461_v14 }
 0x6fa   : > { %v8557_v25 = vcombine.high %v8549_v7, %v8549_v7  ;;  %v9505_v23 = vsel %vm2628_vm1, %v8532_v8, -inf  ;;  %v8573_v36 = vrot.slane %v8559_v24, %v16461_v14  ;;  %v16188_v60 = vrot.slane %v8576_v27, %v16461_v14 }
 0x6fb   : > { %v8541_v10 = vcombine.high %v8539_v61, %v8539_v61  ;;  %v8558_v16 = vcombine.high %v8556_v18, %v8556_v18  ;;  %v9506_v39 = vrot.slane %v9505_v23, 4  ;;  %v9512_v54 = vsel %vm2628_vm1, %v8540_v49, -inf }
 0x6fc   : > { %v9513_v22 = vrot.slane %v9512_v54, 4  ;;  %v9519_v51 = vsel %vm2628_vm1, %v8539_v61, -inf  ;;  %v9533_v20 = vsel %vm2628_vm1, %v8549_v7, -inf  ;;  %v9540_v62 = vsel %vm2628_vm1, %v8557_v25, -inf }
 0x6fd   : > { %v9526_v19 = vsel %vm2628_vm1, %v8541_v10, -inf  ;;  %v9507_v2 = vmax.f32 %v9505_v23, %v9506_v39  ;;  %v9520_v37 = vrot.slane %v9519_v51, 4  ;;  %v9534_v6 = vrot.slane %v9533_v20, 4 }
 0x6fe   : > { %v9527_v42 = vrot.slane %v9526_v19, 4  ;;  %v9514_v43 = vmax.f32 %v9512_v54, %v9513_v22  ;;  %v9547_v14 = vsel %vm2628_vm1, %v8556_v18, -inf  ;;  %v9554_v57 = vsel %vm2628_vm1, %v8558_v16, -inf }
 0x6ff   : > { %v9508_v30 = vrot.slane %v9507_v2, 2  ;;  %v9521_v59 = vmax.f32 %v9519_v51, %v9520_v37  ;;  %v9535_v17 = vmax.f32 %v9533_v20, %v9534_v6  ;;  %v9541_v63 = vrot.slane %v9540_v62, 4 }
 0x700   : > { %v9528_v50 = vmax.f32 %v9526_v19, %v9527_v42  ;;  %v9515_v4 = vrot.slane %v9514_v43, 2  ;;  %v9548_v45 = vrot.slane %v9547_v14, 4  ;;  %v9555_v1 = vrot.slane %v9554_v57, 4 }
 0x701   : > { %v9509_v53 = vmax.f32 %v9507_v2, %v9508_v30  ;;  %v9522_v46 = vrot.slane %v9521_v59, 2  ;;  %v9536_v52 = vrot.slane %v9535_v17, 2  ;;  %v9542_v38 = vmax.f32 %v9540_v62, %v9541_v63 }
 0x702   : > { %v9529_v11 = vrot.slane %v9528_v50, 2  ;;  %v9516_v9 = vmax.f32 %v9514_v43, %v9515_v4  ;;  %v9549_v15 = vmax.f32 %v9547_v14, %v9548_v45  ;;  %v9556_v35 = vmax.f32 %v9554_v57, %v9555_v1 }
 0x703   : > { %v9510_v56 = vrot.slane %v9509_v53, 1  ;;  %v9523_v44 = vmax.f32 %v9521_v59, %v9522_v46  ;;  %v9537_v34 = vmax.f32 %v9535_v17, %v9536_v52  ;;  %v9543_v58 = vrot.slane %v9542_v38, 2 }
 0x704   : > { %v9530_v13 = vmax.f32 %v9528_v50, %v9529_v11  ;;  %v9517_v29 = vrot.slane %v9516_v9, 1  ;;  %v9550_v40 = vrot.slane %v9549_v15, 2  ;;  %v9557_v21 = vrot.slane %v9556_v35, 2 }
 0x705   : > { %v8574_v5 = vcombine.high %v16180_v28, %v16180_v28  ;;  %v8575_v41 = vcombine.high %v8573_v36, %v8573_v36  ;;  %v9524_v55 = vrot.slane %v9523_v44, 1  ;;  %v8591_v32 = vcombine.high %v16183_v31, %v16183_v31 }
 0x706   : > { %v9531_v48 = vrot.slane %v9530_v13, 1  ;;  %v9538_v47 = vrot.slane %v9537_v34, 1  ;;  %v9544_v8 = vmax.f32 %v9542_v38, %v9543_v58  ;;  %v16201_v33 = vmax.f32 %v9549_v15, %v9550_v40 }
 0x707   : > { %v8592_v7 = vcombine.high %v16188_v60, %v16188_v60  ;;  %v16205_v24 = vmax.f32 %v9509_v53, %v9510_v56  ;;  %v16207_v27 = vmax.f32 %v9516_v9, %v9517_v29  ;;  %v9561_v61 = vsel %vm2628_vm1, %v16180_v28, -inf }
 0x708   : > { %v16211_v49 = vmax.f32 %v9523_v44, %v9524_v55  ;;  %v16213_v18 = vmax.f32 %v9530_v13, %v9531_v48  ;;  %v9558_v10 = vmax.f32 %v9556_v35, %v9557_v21  ;;  %v9562_v25 = vrot.slane %v9561_v61, 4 }
 0x709   : > { %v9568_v16 = vsel %vm2628_vm1, %v8574_v5, -inf  ;;  %v9575_v23 = vsel %vm2628_vm1, %v8573_v36, -inf  ;;  %v9582_v39 = vsel %vm2628_vm1, %v8575_v41, -inf  ;;  %v9589_v54 = vsel %vm2628_vm1, %v16183_v31, -inf }
 0x70a   : > { %v16220_v22 = vmax.f32 %v9537_v34, %v9538_v47  ;;  %v9545_v51 = vrot.slane %v9544_v8, 1  ;;  %v9552_v28 = vrot.slane %v16201_v33, 1  ;;  %v9563_v19 = vmax.f32 %v9561_v61, %v9562_v25 }
 0x70b   : > { %v9569_v20 = vrot.slane %v9568_v16, 4  ;;  %v9576_v2 = vrot.slane %v9575_v23, 4  ;;  %v9583_v37 = vrot.slane %v9582_v39, 4  ;;  %v9590_v42 = vrot.slane %v9589_v54, 4 }
 0x70c   : > { %v9564_v6 = vrot.slane %v9563_v19, 2  ;;  %v9596_v43 = vsel %vm2628_vm1, %v8591_v32, -inf  ;;  %v9603_v36 = vsel %vm2628_vm1, %v16188_v60, -inf  ;;  %v9610_v62 = vsel %vm2628_vm1, %v8592_v7, -inf }
 0x70d   : > { %v9570_v14 = vmax.f32 %v9568_v16, %v9569_v20  ;;  %v9577_v31 = vmax.f32 %v9575_v23, %v9576_v2  ;;  %v9584_v57 = vmax.f32 %v9582_v39, %v9583_v37  ;;  %v9591_v30 = vmax.f32 %v9589_v54, %v9590_v42 }
 0x70e   : > { %v9565_v59 = vmax.f32 %v9563_v19, %v9564_v6  ;;  %v9597_v50 = vrot.slane %v9596_v43, 4  ;;  %v9604_v17 = vrot.slane %v9603_v36, 4  ;;  %v9611_v4 = vrot.slane %v9610_v62, 4 }
 0x70f   : > { %v9571_v63 = vrot.slane %v9570_v14, 2  ;;  %v9578_v45 = vrot.slane %v9577_v31, 2  ;;  %v9585_v1 = vrot.slane %v9584_v57, 2  ;;  %v9592_v53 = vrot.slane %v9591_v30, 2 }
 0x710   : > { %v9566_v46 = vrot.slane %v9565_v59, 1  ;;  %v9598_v11 = vmax.f32 %v9596_v43, %v9597_v50  ;;  %v9605_v52 = vmax.f32 %v9603_v36, %v9604_v17  ;;  %v9612_v9 = vmax.f32 %v9610_v62, %v9611_v4 }
 0x711   : > { %v9572_v38 = vmax.f32 %v9570_v14, %v9571_v63  ;;  %v9579_v60 = vmax.f32 %v9577_v31, %v9578_v45  ;;  %v9586_v15 = vmax.f32 %v9584_v57, %v9585_v1  ;;  %v9593_v35 = vmax.f32 %v9591_v30, %v9592_v53 }
 0x712   : > { %v9559_v56 = vrot.slane %v9558_v10, 1  ;;  %v9599_v44 = vrot.slane %v9598_v11, 2  ;;  %v9606_v13 = vrot.slane %v9605_v52, 2  ;;  %v9613_v34 = vrot.slane %v9612_v9, 2 }
 0x713   : > { %v9573_v29 = vrot.slane %v9572_v38, 1  ;;  %v9580_v58 = vrot.slane %v9579_v60, 1  ;;  %v9587_v40 = vrot.slane %v9586_v15, 1  ;;  %v9594_v21 = vrot.slane %v9593_v35, 1 }
 0x714   : > { %v9546_v5 = vmax.f32 %v9544_v8, %v9545_v51  ;;  %v9600_v41 = vmax.f32 %v9598_v11, %v9599_v44  ;;  %v9607_v55 = vmax.f32 %v9605_v52, %v9606_v13  ;;  %v9614_v48 = vmax.f32 %v9612_v9, %v9613_v34 }
 0x715   : > { %v9567_v32 = vmax.f32 %v9565_v59, %v9566_v46  ;;  %v9574_v47 = vmax.f32 %v9572_v38, %v9573_v29  ;;  %v9581_v7 = vmax.f32 %v9579_v60, %v9580_v58  ;;  %v9588_v61 = vmax.f32 %v9586_v15, %v9587_v40 }
 0x716   : > { %v9595_v25 = vmax.f32 %v9593_v35, %v9594_v21  ;;  %v9601_v16 = vrot.slane %v9600_v41, 1  ;;  %v9608_v23 = vrot.slane %v9607_v55, 1  ;;  %v9615_v39 = vrot.slane %v9614_v48, 1 }
 0x717   : > { %v9553_v54 = vmax.f32 %v16201_v33, %v9552_v28  ;;  %v9560_v19 = vmax.f32 %v9558_v10, %v9559_v56  ;;  %v9729_v20 = vpack.c.bf16 %v16205_v24, %v16205_v24  ;;  %v9730_v8 = vpack.c.bf16 %v16207_v27, %v16207_v27 }
 0x718   : > { %v9602_v51 = vmax.f32 %v9600_v41, %v9601_v16  ;;  %v9609_v2 = vmax.f32 %v9607_v55, %v9608_v23  ;;  %v9616_v37 = vmax.f32 %v9614_v48, %v9615_v39  ;;  %v9731_v42 = vpack.c.bf16 %v16211_v49, %v16211_v49  ;;  %v16261_v23 = vld [vmem:[%s16368_s8] ss:$0 sm:$0xff] }
 0x719   : > { %v9732_v6 = vpack.c.bf16 %v16213_v18, %v16213_v18  ;;  %v9737_v43 = vpack.c.bf16 %v9567_v32, %v9567_v32  ;;  %v9738_v36 = vpack.c.bf16 %v9574_v47, %v9574_v47  ;;  %v9739_v62 = vpack.c.bf16 %v9581_v7, %v9581_v7  ;;  %v12697_v32 = vld [vmem:[%s16369_s9 + $0x20] sm:$0xff]   ;;  %v12698_v47 = vld [vmem:[%s16369_s9 + $0x28] sm:$0xff]  }
 0x71a   : > { %v9733_v33 = vpack.c.bf16 %v16220_v22, %v16220_v22  ;;  %v9734_v10 = vpack.c.bf16 %v9546_v5, %v9546_v5  ;;  %v9740_v24 = vpack.c.bf16 %v9588_v61, %v9588_v61  ;;  %v9741_v28 = vpack.c.bf16 %v9595_v25, %v9595_v25  ;;  %11960 = vmatprep.subr.bf16.mxu1 %v12697_v32 }
 0x71b   : > { %v9735_v14 = vpack.c.bf16 %v9553_v54, %v9553_v54  ;;  %v9742_v27 = vpack.c.bf16 %v9602_v51, %v9602_v51  ;;  %v10008_v31 = vunpack.c.l.b16 %v9729_v20  ;;  %v10009_v57 = vunpack.c.l.b16 %v9730_v8  ;;  %11961 = vmatpush3.bf16.msra.mxu1 %v12697_v32 }
 0x71c   : > { %v9736_v30 = vpack.c.bf16 %v9560_v19, %v9560_v19  ;;  %v9743_v59 = vpack.c.bf16 %v9609_v2, %v9609_v2  ;;  %v9744_v50 = vpack.c.bf16 %v9616_v37, %v9616_v37  ;;  %v10010_v49 = vunpack.c.l.b16 %v9731_v42  ;;  %11962 = vmatprep.subr.bf16.mxu1 %v12698_v47 }
 0x71d   : > { %v10011_v17 = vunpack.c.l.b16 %v9732_v6  ;;  %v10016_v4 = vunpack.c.l.b16 %v9737_v43  ;;  %v10017_v18 = vunpack.c.l.b16 %v9738_v36  ;;  %v10018_v63 = vunpack.c.l.b16 %v9739_v62 }
 0x71e   : > { %v10012_v45 = vunpack.c.l.b16 %v9733_v33  ;;  %v10019_v1 = vunpack.c.l.b16 %v9740_v24  ;;  %v10020_v53 = vunpack.c.l.b16 %v9741_v28  ;;  %v10013_v46 = vunpack.c.l.b16 %v9734_v10 }
 0x71f   : > { %v10021_v22 = vunpack.c.l.b16 %v9742_v27  ;;  %v10122_v11 = vsel %vm4791_vm2, %v10009_v57, %v10008_v31  ;;  %v10129_v52 = vsel %vm4791_vm2, %v10017_v18, %v10016_v4  ;;  %v10014_v9 = vunpack.c.l.b16 %v9735_v14  ;;  %11963 = vmatpush3.bf16.msra.mxu1 %v12698_v47 }
 0x720   : > { %v10022_v38 = vunpack.c.l.b16 %v9743_v59  ;;  %v10123_v60 = vsel %vm4793_vm3, %v10010_v49, %v10122_v11  ;;  %v10130_v15 = vsel %vm4793_vm3, %v10018_v63, %v10129_v52  ;;  %v10015_v35 = vunpack.c.l.b16 %v9736_v30 }
 0x721   : > { %v10023_v56 = vunpack.c.l.b16 %v9744_v50  ;;  %v10124_v44 = vsel %vm4795_vm4, %v10011_v17, %v10123_v60  ;;  %v10131_v13 = vsel %vm4795_vm4, %v10019_v1, %v10130_v15  ;;  %v16265_v39 = vadd.f32 %v16121_v0, %v16261_v23 }
 0x722   : > { %v10125_v34 = vsel %vm4797_vm5, %v10012_v45, %v10124_v44  ;;  %v10132_v29 = vsel %vm4797_vm5, %v10020_v53, %v10131_v13  ;;  %v16269_v54 = vadd.f32 %v16129_v3, %v16261_v23  ;;  %v16277_v8 = vadd.f32 %v16261_v23, %v16123_v12 }
 0x723   : > { %v10126_v58 = vsel %vm4799_vm6, %v10013_v46, %v10125_v34  ;;  %v10133_v40 = vsel %vm4799_vm6, %v10021_v22, %v10132_v29  ;;  %v10315_v19 = vmul.f32 %v16265_v39, %v16265_v39  ;;  %v10238_v0 = vadd.f32 %v16261_v23, %v16131_v26 }
 0x724   : > { %v10127_v21 = vsel %vm4801_vm7, %v10014_v9, %v10126_v58  ;;  %v10134_v5 = vsel %vm4801_vm7, %v10022_v38, %v10133_v40  ;;  %v10316_v20 = vmul.f32 %v16269_v54, %v16269_v54  ;;  %v10313_v12 = vmul.f32 %v16277_v8, %v16277_v8  ;;  %v12699_v40 = vld [vmem:[%s16369_s9 + $0x30] sm:$0xff]  }
 0x725   : > { %v10128_v41 = vsel %vm4803_vm8, %v10015_v35, %v10127_v21  ;;  %v10135_v55 = vsel %vm4803_vm8, %v10023_v56, %v10134_v5  ;;  %v10331_v51 = vmul.f32 %v10315_v19, %v16265_v39  ;;  %v10314_v62 = vmul.f32 %v10238_v0, %v10238_v0  ;;  %11964 = vmatprep.subr.bf16.mxu1 %v12699_v40 }
 0x726   : > { %v10143_v48 = vpack.c.b16 %v10135_v55, %v10128_v41  ;;  %v10332_v37 = vmul.f32 %v10316_v20, %v16269_v54  ;;  %v10329_v24 = vmul.f32 %v10313_v12, %v16277_v8  ;;  %v10299_v55 = vmul.f32 0.5, %v16265_v39  ;;  %11965 = vmatpush3.bf16.msra.mxu1 %v12699_v40 }
 0x727   : > { %v10347_v43 = vmul.f32 0.044715, %v10331_v51  ;;  %v10330_v31 = vmul.f32 %v10314_v62, %v10238_v0  ;;  %v10297_v47 = vmul.f32 0.5, %v16277_v8 }
 0x728   : > { %11949 = vmatmul.mubr.bf16.gmra.mrb[12].mxu0 %v10143_v48  ;;  %v10348_v33 = vmul.f32 0.044715, %v10332_v37  ;;  %v10345_v50 = vmul.f32 0.044715, %v10329_v24  ;;  %v10300_v48 = vmul.f32 0.5, %v16269_v54 }
 0x729   : > { %v10363_v14 = vadd.f32 %v10347_v43, %v16265_v39  ;;  %v10346_v18 = vmul.f32 0.044715, %v10330_v31 }
 0x72a   : > { %v10364_v30 = vadd.f32 %v10348_v33, %v16269_v54  ;;  %v10361_v46 = vadd.f32 %v10345_v50, %v16277_v8 }
 0x72b   : > { %v10379_v17 = vmul.f32 0.7978846, %v10363_v14  ;;  %v10362_v52 = vadd.f32 %v10346_v18, %v10238_v0 }
 0x72c   : > { %v10380_v45 = vmul.f32 0.7978846, %v10364_v30  ;;  %v10377_v9 = vmul.f32 0.7978846, %v10361_v46 }
 0x72d   : > { %12701 = vtanh.f32 %v10379_v17  ;;  %v10378_v15 = vmul.f32 0.7978846, %v10362_v52 }
 0x72e   : > { %12703 = vtanh.f32 %v10380_v45 }
 0x72f   : > { %12705 = vtanh.f32 %v10377_v9 }
 0x730   : > { %12707 = vtanh.f32 %v10378_v15 }
 0x737   : > { %v12702_v34 = vpop.eup %12701 }
 0x738   : > { %v12704_v29 = vpop.eup %12703  ;;  %v10411_v21 = vadd.f32 1.0, %v12702_v34 }
 0x739   : > { %v12706_v58 = vpop.eup %12705  ;;  %v10412_v32 = vadd.f32 1.0, %v12704_v29 }
 0x73a   : > { %v10409_v5 = vadd.f32 1.0, %v12706_v58  ;;  %v12708_v41 = vpop.eup %12707 }
 0x73b   : > { %v10428_v19 = vmul.f32 %v10412_v32, %v10300_v48 }
 0x73c   : > { %v10425_v51 = vmul.f32 %v10409_v5, %v10297_v47 }
 0x73d   : > { %v11942_v7 = vpop.f32.mrb[4].mxu0 }
 0x73e   : > { %v10250_v61 = vpop.f32.mrb[5].mxu0  ;;  %v16281_v2 = vadd.f32 %v11942_v7, %v16261_v23  ;;  %v10298_v7 = vmul.f32 0.5, %v10238_v0 }
 0x73f   : > { %v11943_v25 = vpop.f32.mrb[6].mxu0  ;;  %v16286_v3 = vadd.f32 %v16261_v23, %v10250_v61  ;;  %v10410_v61 = vadd.f32 1.0, %v12708_v41 }
 0x740   : > { %v10253_v16 = vpop.f32.mrb[7].mxu0  ;;  %v16290_v42 = vadd.f32 %v11943_v25, %v16261_v23  ;;  %v10319_v36 = vmul.f32 %v16281_v2, %v16281_v2  ;;  %v12700_v25 = vld [vmem:[%s16369_s9 + $0x38] sm:$0xff]   ;;  %v10303_v0 = vmul.f32 0.5, %v16281_v2 }
 0x741   : > { %v16295_v6 = vadd.f32 %v16261_v23, %v10253_v16  ;;  %v10317_v26 = vmul.f32 %v16286_v3, %v16286_v3  ;;  %v10427_v16 = vmul.f32 %v10411_v21, %v10299_v55  ;;  %v10426_v37 = vmul.f32 %v10410_v61, %v10298_v7  ;;  %11966 = vmatprep.subr.bf16.mxu1 %v12700_v25 }
 0x742   : > { %v10320_v10 = vmul.f32 %v16290_v42, %v16290_v42  ;;  %v10335_v27 = vmul.f32 %v10319_v36, %v16281_v2  ;;  %11967 = vmatpush3.bf16.msra.mxu1 %v12700_v25 }
 0x743   : > { %v10318_v28 = vmul.f32 %v16295_v6, %v16295_v6  ;;  %v10333_v57 = vmul.f32 %v10317_v26, %v16286_v3  ;;  %v10442_v39 = vpack.c.bf16 %v10428_v19, %v10427_v16  ;;  %v10441_v54 = vpack.c.bf16 %v10426_v37, %v10425_v51 }
 0x744   : > { %v10336_v59 = vmul.f32 %v10320_v10, %v16290_v42  ;;  %v10351_v4 = vmul.f32 0.044715, %v10335_v27  ;;  %v10304_v26 = vmul.f32 0.5, %v16290_v42  ;;  %v10301_v10 = vmul.f32 0.5, %v16286_v3 }
 0x745   : > { %v10334_v49 = vmul.f32 %v10318_v28, %v16295_v6  ;;  %v10349_v63 = vmul.f32 0.044715, %v10333_v57  ;;  %11968 = vmatprep.mubr.bf16.mxu1 %v10441_v54  ;;  %v10302_v24 = vmul.f32 0.5, %v16295_v6 }
 0x746   : > { %v10352_v1 = vmul.f32 0.044715, %v10336_v59  ;;  %v10367_v22 = vadd.f32 %v10351_v4, %v16281_v2  ;;  %11969 = vmatmul.mubr.bf16.vlgmr.msra.gmra.mrb[0].mxu1 %v10442_v39 }
 0x747   : > { %v10350_v53 = vmul.f32 0.044715, %v10334_v49  ;;  %v10365_v11 = vadd.f32 %v10349_v63, %v16286_v3 }
 0x748   : > { %v10368_v38 = vadd.f32 %v10352_v1, %v16290_v42  ;;  %v10383_v35 = vmul.f32 0.7978846, %v10367_v22 }
 0x749   : > { %v10366_v60 = vadd.f32 %v10350_v53, %v16295_v6  ;;  %v10381_v56 = vmul.f32 0.7978846, %v10365_v11 }
 0x74a   : > { %v10384_v44 = vmul.f32 0.7978846, %v10368_v38  ;;  %12709 = vtanh.f32 %v10383_v35 }
 0x74b   : > { %v10382_v13 = vmul.f32 0.7978846, %v10366_v60  ;;  %12711 = vtanh.f32 %v10381_v56 }
 0x74c   : > { %12713 = vtanh.f32 %v10384_v44 }
 0x74d   : > { %12715 = vtanh.f32 %v10382_v13 }
 0x754   : > { %v12710_v20 = vpop.eup %12709 }
 0x755   : > { %v12712_v12 = vpop.eup %12711  ;;  %v10415_v62 = vadd.f32 1.0, %v12710_v20 }
 0x756   : > { %v12714_v43 = vpop.eup %12713  ;;  %v10413_v8 = vadd.f32 1.0, %v12712_v12 }
 0x757   : > { %v12716_v36 = vpop.eup %12715  ;;  %v10416_v33 = vadd.f32 1.0, %v12714_v43  ;;  %v10431_v14 = vmul.f32 %v10415_v62, %v10303_v0 }
 0x758   : > { %v10414_v28 = vadd.f32 1.0, %v12716_v36  ;;  %v10429_v31 = vmul.f32 %v10413_v8, %v10301_v10 }
 0x759   : > { %v10432_v27 = vmul.f32 %v10416_v33, %v10304_v26 }
 0x75a   : > { %v10430_v57 = vmul.f32 %v10414_v28, %v10302_v24 }
 0x75b   : > { %v10444_v30 = vpack.c.bf16 %v10432_v27, %v10431_v14 }
 0x75c   : > { %v10443_v59 = vpack.c.bf16 %v10430_v57, %v10429_v31 }
 0x75e   : > { %11972 = vmatprep.mubr.bf16.mxu1 %v10443_v59 }
 0x75f   : > { %11973 = vmatmul.mubr.bf16.gmra.mrb[4].mxu1 %v10444_v30 }
 0x79d   : > { %v11946_v50 = vpop.f32.mrb[8].mxu0 }
 0x79e   : > { %v10275_v49 = vadd.f32 %v11946_v50, %v16261_v23  ;;  %v10266_v2 = vpop.f32.mrb[9].mxu0 }
 0x79f   : > { %v10267_v42 = vadd.f32 %v16261_v23, %v10266_v2  ;;  %v11947_v17 = vpop.f32.mrb[10].mxu0 }
 0x7a0   : > { %v10323_v4 = vmul.f32 %v10275_v49, %v10275_v49  ;;  %v10278_v3 = vadd.f32 %v11947_v17, %v16261_v23  ;;  %v10269_v6 = vpop.f32.mrb[11].mxu0  ;;  %v10307_v32 = vmul.f32 0.5, %v10275_v49 }
 0x7a1   : > { %v10321_v18 = vmul.f32 %v10267_v42, %v10267_v42  ;;  %v10270_v63 = vadd.f32 %v16261_v23, %v10269_v6  ;;  %v10305_v61 = vmul.f32 0.5, %v10267_v42 }
 0x7a2   : > { %v10339_v45 = vmul.f32 %v10323_v4, %v10275_v49  ;;  %v10324_v1 = vmul.f32 %v10278_v3, %v10278_v3  ;;  %v10308_v47 = vmul.f32 0.5, %v10278_v3 }
 0x7a3   : > { %v10337_v53 = vmul.f32 %v10321_v18, %v10267_v42  ;;  %v10322_v46 = vmul.f32 %v10270_v63, %v10270_v63  ;;  %v10306_v25 = vmul.f32 0.5, %v10270_v63 }
 0x7a4   : > { %v10355_v22 = vmul.f32 0.044715, %v10339_v45  ;;  %v10340_v11 = vmul.f32 %v10324_v1, %v10278_v3 }
 0x7a5   : > { %v10353_v52 = vmul.f32 0.044715, %v10337_v53  ;;  %v10338_v9 = vmul.f32 %v10322_v46, %v10270_v63 }
 0x7a6   : > { %v10371_v38 = vadd.f32 %v10355_v22, %v10275_v49  ;;  %v10356_v60 = vmul.f32 0.044715, %v10340_v11 }
 0x7a7   : > { %v10369_v15 = vadd.f32 %v10353_v52, %v10267_v42  ;;  %v10354_v35 = vmul.f32 0.044715, %v10338_v9 }
 0x7a8   : > { %v10387_v56 = vmul.f32 0.7978846, %v10371_v38  ;;  %v10372_v44 = vadd.f32 %v10356_v60, %v10278_v3 }
 0x7a9   : > { %v10385_v13 = vmul.f32 0.7978846, %v10369_v15  ;;  %v10370_v34 = vadd.f32 %v10354_v35, %v10270_v63 }
 0x7aa   : > { %12717 = vtanh.f32 %v10387_v56  ;;  %v10388_v29 = vmul.f32 0.7978846, %v10372_v44 }
 0x7ab   : > { %12719 = vtanh.f32 %v10385_v13  ;;  %v10386_v58 = vmul.f32 0.7978846, %v10370_v34 }
 0x7ac   : > { %12721 = vtanh.f32 %v10388_v29 }
 0x7ad   : > { %12723 = vtanh.f32 %v10386_v58 }
 0x7b4   : > { %v12718_v40 = vpop.eup %12717 }
 0x7b5   : > { %v12720_v21 = vpop.eup %12719  ;;  %v10419_v5 = vadd.f32 1.0, %v12718_v40  ;;  %v11127_v40 = vld [vmem:[%s16370_s10] ss:$0 sm:$0xff] }
 0x7b6   : > { %v12722_v41 = vpop.eup %12721  ;;  %v10417_v55 = vadd.f32 1.0, %v12720_v21 }
 0x7b7   : > { %v12724_v48 = vpop.eup %12723  ;;  %v10420_v7 = vadd.f32 1.0, %v12722_v41  ;;  %v10435_v19 = vmul.f32 %v10419_v5, %v10307_v32 }
 0x7b8   : > { %v10418_v16 = vadd.f32 1.0, %v12724_v48  ;;  %v10433_v51 = vmul.f32 %v10417_v55, %v10305_v61 }
 0x7b9   : > { %v10436_v20 = vmul.f32 %v10420_v7, %v10308_v47 }
 0x7ba   : > { %v10434_v37 = vmul.f32 %v10418_v16, %v10306_v25 }
 0x7bb   : > { %v10446_v12 = vpack.c.bf16 %v10436_v20, %v10435_v19 }
 0x7bc   : > { %v10445_v39 = vpack.c.bf16 %v10434_v37, %v10433_v51 }
 0x7be   : > { %11976 = vmatprep.mubr.bf16.mxu1 %v10445_v39 }
 0x7bf   : > { %11977 = vmatmul.mubr.bf16.gmra.mrb[8].mxu1 %v10446_v12 }
 0x7fb   : > { %v11950_v43 = vpop.f32.mrb[12].mxu0 }
 0x7fc   : > { %v10291_v54 = vadd.f32 %v11950_v43, %v16261_v23  ;;  %v10282_v36 = vpop.f32.mrb[13].mxu0 }
 0x7fd   : > { %v10283_v62 = vadd.f32 %v16261_v23, %v10282_v36  ;;  %v11951_v8 = vpop.f32.mrb[14].mxu0 }
 0x7fe   : > { %v10327_v0 = vmul.f32 %v10291_v54, %v10291_v54  ;;  %v10294_v26 = vadd.f32 %v11951_v8, %v16261_v23  ;;  %v10285_v33 = vpop.f32.mrb[15].mxu0  ;;  %v10311_v52 = vmul.f32 0.5, %v10291_v54 }
 0x7ff   : > { %v10325_v10 = vmul.f32 %v10283_v62, %v10283_v62  ;;  %v10286_v24 = vadd.f32 %v16261_v23, %v10285_v33  ;;  %v10309_v60 = vmul.f32 0.5, %v10283_v62 }
 0x800   : > { %v10343_v28 = vmul.f32 %v10327_v0, %v10291_v54  ;;  %v10328_v14 = vmul.f32 %v10294_v26, %v10294_v26  ;;  %v10312_v9 = vmul.f32 0.5, %v10294_v26 }
 0x801   : > { %v10341_v27 = vmul.f32 %v10325_v10, %v10283_v62  ;;  %v10326_v31 = vmul.f32 %v10286_v24, %v10286_v24  ;;  %v10310_v15 = vmul.f32 0.5, %v10286_v24 }
 0x802   : > { %v10359_v57 = vmul.f32 0.044715, %v10343_v28  ;;  %v10344_v30 = vmul.f32 %v10328_v14, %v10294_v26 }
 0x803   : > { %v10357_v59 = vmul.f32 0.044715, %v10341_v27  ;;  %v10342_v50 = vmul.f32 %v10326_v31, %v10286_v24 }
 0x804   : > { %v10375_v49 = vadd.f32 %v10359_v57, %v10291_v54  ;;  %v10360_v2 = vmul.f32 0.044715, %v10344_v30 }
 0x805   : > { %v10373_v42 = vadd.f32 %v10357_v59, %v10283_v62  ;;  %v10358_v17 = vmul.f32 0.044715, %v10342_v50 }
 0x806   : > { %v10391_v4 = vmul.f32 0.7978846, %v10375_v49  ;;  %v10376_v3 = vadd.f32 %v10360_v2, %v10294_v26 }
 0x807   : > { %v10389_v6 = vmul.f32 0.7978846, %v10373_v42  ;;  %v10374_v18 = vadd.f32 %v10358_v17, %v10286_v24 }
 0x808   : > { %12725 = vtanh.f32 %v10391_v4  ;;  %v10392_v63 = vmul.f32 0.7978846, %v10376_v3 }
 0x809   : > { %12727 = vtanh.f32 %v10389_v6  ;;  %v10390_v23 = vmul.f32 0.7978846, %v10374_v18 }
 0x80a   : > { %12729 = vtanh.f32 %v10392_v63 }
 0x80b   : > { %12731 = vtanh.f32 %v10390_v23 }
 0x812   : > { %v12726_v45 = vpop.eup %12725 }
 0x813   : > { %v12728_v1 = vpop.eup %12727  ;;  %v10423_v53 = vadd.f32 1.0, %v12726_v45 }
 0x814   : > { %v12730_v46 = vpop.eup %12729  ;;  %v10421_v22 = vadd.f32 1.0, %v12728_v1 }
 0x815   : > { %v12732_v11 = vpop.eup %12731  ;;  %v10424_v38 = vadd.f32 1.0, %v12730_v46  ;;  %v10439_v56 = vmul.f32 %v10423_v53, %v10311_v52 }
 0x816   : > { %v10422_v35 = vadd.f32 1.0, %v12732_v11  ;;  %v10437_v13 = vmul.f32 %v10421_v22, %v10309_v60 }
 0x817   : > { %v10440_v44 = vmul.f32 %v10424_v38, %v10312_v9 }
 0x818   : > { %v10438_v34 = vmul.f32 %v10422_v35, %v10310_v15 }
 0x819   : > { %v10448_v29 = vpack.c.bf16 %v10440_v44, %v10439_v56  ;;  %v11970_v21 = vpop.f32.mrb[0].mxu1 }
 0x81a   : > { %v10447_v58 = vpack.c.bf16 %v10438_v34, %v10437_v13  ;;  %v10563_v5 = vadd.f32 %v11970_v21, %v11127_v40  ;;  %v10554_v41 = vpop.f32.mrb[1].mxu1 }
 0x81b   : > { %v10555_v55 = vadd.f32 %v11127_v40, %v10554_v41  ;;  %v11971_v48 = vpop.f32.mrb[2].mxu1 }
 0x81c   : > { %11980 = vmatprep.mubr.bf16.mxu1 %v10447_v58  ;;  %10619 = vst [vmem:[%s13090_s29 + $0x10] sm:$0xff] %v10563_v5  ;;  %v10566_v32 = vadd.f32 %v11971_v48, %v11127_v40  ;;  %v10557_v47 = vpop.f32.mrb[3].mxu1 }
 0x81d   : > { %11981 = vmatmul.mubr.bf16.gmra.mrb[12].mxu1 %v10448_v29  ;;  %10617 = vst [vmem:[%s13090_s29] sm:$0xff] %v10555_v55  ;;  %v10558_v7 = vadd.f32 %v11127_v40, %v10557_v47 }
 0x81e   : > { %10620 = vst [vmem:[%s13090_s29 + $0x18] sm:$0xff] %v10566_v32 }
 0x81f   : > { %10618 = vst [vmem:[%s13090_s29 + $0x8] sm:$0xff] %v10558_v7 }
 0x832   : > { %v11974_v61 = vpop.f32.mrb[4].mxu1 }
 0x833   : > { %v10579_v25 = vadd.f32 %v11974_v61, %v11127_v40  ;;  %v10570_v16 = vpop.f32.mrb[5].mxu1 }
 0x834   : > { %v10571_v19 = vadd.f32 %v11127_v40, %v10570_v16  ;;  %v11975_v20 = vpop.f32.mrb[6].mxu1 }
 0x835   : > { %10623 = vst [vmem:[%s13090_s29 + $0x30] sm:$0xff] %v10579_v25  ;;  %v10582_v51 = vadd.f32 %v11975_v20, %v11127_v40  ;;  %v10573_v37 = vpop.f32.mrb[7].mxu1 }
 0x836   : > { %10621 = vst [vmem:[%s13090_s29 + $0x20] sm:$0xff] %v10571_v19  ;;  %v10574_v12 = vadd.f32 %v11127_v40, %v10573_v37 }
 0x837   : > { %10624 = vst [vmem:[%s13090_s29 + $0x38] sm:$0xff] %v10582_v51 }
 0x838   : > { %10622 = vst [vmem:[%s13090_s29 + $0x28] sm:$0xff] %v10574_v12 }
 0x892   : > { %v11978_v39 = vpop.f32.mrb[8].mxu1 }
 0x893   : > { %v10595_v43 = vadd.f32 %v11978_v39, %v11127_v40  ;;  %v10586_v54 = vpop.f32.mrb[9].mxu1 }
 0x894   : > { %v10587_v36 = vadd.f32 %v11127_v40, %v10586_v54  ;;  %v11979_v62 = vpop.f32.mrb[10].mxu1 }
 0x895   : > { %10627 = vst [vmem:[%s13090_s29 + $0x50] sm:$0xff] %v10595_v43  ;;  %v10598_v8 = vadd.f32 %v11979_v62, %v11127_v40  ;;  %v10589_v0 = vpop.f32.mrb[11].mxu1 }
 0x896   : > { %10625 = vst [vmem:[%s13090_s29 + $0x40] sm:$0xff] %v10587_v36  ;;  %v10590_v26 = vadd.f32 %v11127_v40, %v10589_v0 }
 0x897   : > { %10628 = vst [vmem:[%s13090_s29 + $0x58] sm:$0xff] %v10598_v8 }
 0x898   : > { %10626 = vst [vmem:[%s13090_s29 + $0x48] sm:$0xff] %v10590_v26 }
 0x8f0   : > { %v11982_v33 = vpop.f32.mrb[12].mxu1 }
 0x8f1   : > { %v10611_v10 = vadd.f32 %v11982_v33, %v11127_v40  ;;  %v10602_v24 = vpop.f32.mrb[13].mxu1 }
 0x8f2   : > { %v10603_v28 = vadd.f32 %v11127_v40, %v10602_v24  ;;  %v11983_v14 = vpop.f32.mrb[14].mxu1 }
 0x8f3   : > { %10631 = vst [vmem:[%s13090_s29 + $0x70] sm:$0xff] %v10611_v10  ;;  %v10614_v27 = vadd.f32 %v11983_v14, %v11127_v40  ;;  %v10605_v31 = vpop.f32.mrb[15].mxu1 }
 0x8f4   : > { %10629 = vst [vmem:[%s13090_s29 + $0x60] sm:$0xff] %v10603_v28  ;;  %v10606_v57 = vadd.f32 %v11127_v40, %v10605_v31 }
 0x8f5   : > { %10632 = vst [vmem:[%s13090_s29 + $0x78] sm:$0xff] %v10614_v27 }
 0x8f6   : > { %10630 = vst [vmem:[%s13090_s29 + $0x68] sm:$0xff] %v10606_v57 }
 0x8f7 PF: > { %s21_s17 = sadd.s32 1, %s12875_s17  }
 0x8f8   : > { %p18_p5 = scmp.ge.s32.totalorder %s21_s17, 4  }
 0x8fa   :  { %20 = sbr.rel (!%p18_p5) target bundleno = 1 (0x1), region = 124 }

</bundles_post_ra>
